<compile_context>
chip_gen: v5e
topology: v5e:2x2
jax: 0.10.0
libtpu: 0.0.40
codegen_flags: <defaults>
</compile_context>

<pallas_src>
import functools

import numpy as np
import jax
import jax.numpy as jnp
from jax import lax
from jax.experimental import pallas as pl
from jax.experimental.pallas import tpu as pltpu

LEAKY_SLOPE = 0.01
BN_EPS = 1e-5
LANE = 128          # lane-dense channel padding target
N_BLOCKS = 4


def _round_up(x, m):
    return ((x + m - 1) // m) * m


# ---------------------------------------------------------------------------
# One ConvNet block: conv3x3+bias -> LeakyReLU -> maxpool 2x2/2 -> BN affine
# ---------------------------------------------------------------------------

def _conv_pool_bn(make_operand, w_ref, cb_ref, s_ref, b_ref, hp_ref, *, h, w_eff, wo):
    """make_operand(di) -> (h*w_eff, K) bf16 operand with the 3 dj taps stacked on K.

    Returns the pooled + BN-affine block output, shape (h//2, wo, cout) fp32.
    """
    cout = w_ref.shape[-1]
    ho = h // 2

    # 3 deep-K MXU matmuls (one per kernel row), fp32 accumulation (2 add passes).
    acc = jnp.dot(make_operand(0), w_ref[0], preferred_element_type=jnp.float32)
    acc = acc + jnp.dot(make_operand(1), w_ref[1], preferred_element_type=jnp.float32)
    acc = acc + jnp.dot(make_operand(2), w_ref[2], preferred_element_type=jnp.float32)
    acc = acc + cb_ref[0]                                   # conv bias
    act = jnp.where(acc >= 0.0, acc, LEAKY_SLOPE * acc)     # LeakyReLU(0.01)

    # Row pool via an (8,128)-tile-aligned reshape (2*w_eff % 8 == 0).
    act = act.reshape(ho, 2 * w_eff, cout)
    hmax = jnp.maximum(act[:, :w_eff, :], act[:, w_eff:, :])        # (ho, w_eff, cout)
    hp_ref[0:ho, 0:w_eff, :] = hmax
    # Column pool via stride-2 VMEM reads (reads never touch columns >= 2*wo).
    pooled = jnp.maximum(hp_ref[0:ho, pl.ds(0, wo, stride=2), :],
                         hp_ref[0:ho, pl.ds(1, wo, stride=2), :])   # (ho, wo, cout)

    # frozen eval-mode BatchNorm folded to a per-channel affine
    return pooled * s_ref[0] + b_ref[0]


# ---------------------------------------------------------------------------
# Fused 4-block encoder kernel (one batch element per grid step)
# ---------------------------------------------------------------------------

def _encoder_kernel(*refs, H, W):
    assert len(refs) == 1 + 4 * N_BLOCKS + 1 + 2
    x_ref = refs[0]
    blk_refs = [refs[1 + 4 * i: 1 + 4 * (i + 1)] for i in range(N_BLOCKS)]
    o_ref = refs[1 + 4 * N_BLOCKS]
    pad_ref = refs[2 + 4 * N_BLOCKS]   # fp32 padded inter-stage activation scratch
    hp_ref = refs[3 + 4 * N_BLOCKS]    # fp32 row-pooled scratch (column-pool staging)
    cp = pad_ref.shape[-1]

    # ---- block 0: bf16 input with dj taps pre-stacked on channels (wrapper) ----
    h, w = H, W
    k0 = x_ref.shape[-1]

    def op0(di):
        return x_ref[di:di + H, 0:W, :].reshape(H * W, k0)

    pooled = _conv_pool_bn(op0, *blk_refs[0], hp_ref=hp_ref, h=h, w_eff=W, wo=w // 2)

    # ---- blocks 1..3 ----
    for i in range(1, N_BLOCKS):
        h, w = h // 2, w // 2
        w_eff = _round_up(w, 8)

        # Zero only the 1-px border ring plus the stale dj-read-window columns
        # [w+1, w_eff+2); the interior is fully overwritten right below.
        zrow = jnp.zeros((1, w_eff + 2, cp), jnp.float32)
        pad_ref[0:1, 0:w_eff + 2, :] = zrow
        pad_ref[h + 1:h + 2, 0:w_eff + 2, :] = zrow
        pad_ref[1:h + 1, 0:1, :] = jnp.zeros((h, 1, cp), jnp.float32)
        pad_ref[1:h + 1, w + 1:w_eff + 2, :] = jnp.zeros((h, w_eff + 1 - w, cp),
                                                         jnp.float32)
        pad_ref[1:h + 1, 1:w + 1, :] = pooled

        w_ref, cb_ref, s_ref, b_ref = blk_refs[i]

        def make_op(di, _h=h, _w_eff=w_eff):
            # dj-stacked operand: concat of 3 column-shifted bf16 slices -> K = 3*128.
            pieces = [pad_ref[di:di + _h, dj:dj + _w_eff, :].astype(jnp.bfloat16)
                      for dj in range(3)]
            return jnp.concatenate(pieces, axis=-1).reshape(_h * _w_eff, 3 * cp)

        pooled = _conv_pool_bn(make_op, w_ref, cb_ref, s_ref, b_ref,
                               hp_ref=hp_ref, h=h, w_eff=w_eff, wo=w // 2)

    o_ref[...] = pooled.astype(o_ref.dtype)


# ---------------------------------------------------------------------------
# Wrapper
# ---------------------------------------------------------------------------

def clevr_encode(image_nchw, kparams, *, hidden):
    """ImageClevrEncoder.forward: NCHW image -> (B, H/16 * W/16, hidden)."""
    B, C, H, W = image_nchw.shape
    assert H % 16 == 0 and W % 16 == 0, "spatial dims must be divisible by 16 (4 pools)"

    k0 = kparams[0]["w"].shape[1]          # 3 * cin_p0 (block-0 dj-stacked K)
    cin_p0 = k0 // 3
    cp = kparams[0]["w"].shape[-1]         # lane-padded hidden channels (128)
    Hf, Wf = H // 16, W // 16

    # NCHW -> NHWC, bf16, 1-px zero border, channel pad, dj-stack the 3 column taps.
    x = jnp.transpose(image_nchw, (0, 2, 3, 1)).astype(jnp.bfloat16)
    x = jnp.pad(x, ((0, 0), (1, 1), (1, 1), (0, cin_p0 - C)))
    x = jnp.concatenate([x[:, :, 0:W, :], x[:, :, 1:W + 1, :], x[:, :, 2:W + 2, :]],
                        axis=-1)                              # (B, H+2, W, 3*cin_p0)

    args = [x]
    in_specs = [pl.BlockSpec((None, H + 2, W, k0), lambda b: (b, 0, 0, 0))]
    flops = 0
    bytes_accessed = x.size * 2 + B * Hf * Wf * cp * 4
    hh, ww = H, W
    for blk in kparams:
        args += [blk["w"], blk["cb"], blk["scale"], blk["bias"]]
        in_specs += [
            pl.BlockSpec(blk["w"].shape, lambda b: (0, 0, 0)),
            pl.BlockSpec((1, cp), lambda b: (0, 0)),
            pl.BlockSpec((1, cp), lambda b: (0, 0)),
            pl.BlockSpec((1, cp), lambda b: (0, 0)),
        ]
        flops += 2 * B * hh * ww * 3 * blk["w"].shape[1] * cp
        bytes_accessed += blk["w"].size * 2 + 3 * cp * 4
        hh, ww = hh // 2, ww // 2

    out = pl.pallas_call(
        functools.partial(_encoder_kernel, H=H, W=W),
        out_shape=jax.ShapeDtypeStruct((B, Hf, Wf, cp), jnp.float32),
        grid_spec=pltpu.PrefetchScalarGridSpec(
            num_scalar_prefetch=0,
            grid=(B,),
            in_specs=in_specs,
            out_specs=pl.BlockSpec((None, Hf, Wf, cp), lambda b: (b, 0, 0, 0)),
            scratch_shapes=[
                pltpu.VMEM((H // 2 + 2, _round_up(W // 2, 8) + 2, cp), jnp.float32),
                pltpu.VMEM((H // 2, _round_up(W, 8), cp), jnp.float32),
            ],
        ),
        compiler_params=pltpu.CompilerParams(
            dimension_semantics=("parallel",),
            vmem_limit_bytes=32 * 1024 * 1024,
        ),
        cost_estimate=pl.CostEstimate(flops=int(flops), transcendentals=0,
                                      bytes_accessed=int(bytes_accessed)),
    )(*args)

    # torch.flatten(out, 2).transpose(1, 2) == NHWC reshape; drop channel padding.
    return out[:, :, :, :hidden].reshape(B, Hf * Wf, hidden)


# ---------------------------------------------------------------------------
# Parameters (deterministic synthetic) and kernel-side packing
# ---------------------------------------------------------------------------

def init_params(key, in_channels, hidden):
    """PyTorch-equivalent fp32 parameters for the 4 ConvNet blocks."""
    params = []
    cin = in_channels
    for _ in range(N_BLOCKS):
        key, kw, kb, kg, kbe, km, kv = jax.random.split(key, 7)
        fan_in = 3 * 3 * cin
        params.append(dict(
            w=jax.random.normal(kw, (3, 3, cin, hidden), jnp.float32) / np.sqrt(fan_in),
            b=0.05 * jax.random.normal(kb, (hidden,), jnp.float32),
            gamma=jax.random.uniform(kg, (hidden,), jnp.float32, minval=0.7, maxval=1.3),
            beta=0.1 * jax.random.normal(kbe, (hidden,), jnp.float32),
            mean=0.1 * jax.random.normal(km, (hidden,), jnp.float32),
            var=jax.random.uniform(kv, (hidden,), jnp.float32, minval=0.5, maxval=1.5),
        ))
        cin = hidden
    return params


def prepare_params(params):
    """Zero-pad channels, dj-stack the weight taps along K, fold BN, cast w to bf16."""
    prepped = []
    for i, p in enumerate(params):
        kh, kw, cin, cout = p["w"].shape                 # HWIO, kh = di, kw = dj
        cin_p = _round_up(cin, 8) if i == 0 else _round_up(cin, LANE)
        cout_p = _round_up(cout, LANE)
        w = jnp.zeros((kh, kw, cin_p, cout_p), jnp.float32)
        w = w.at[:, :, :cin, :cout].set(p["w"])
        w = w.reshape(kh, kw * cin_p, cout_p)            # (3, 3*cin_p, cout_p): K = dj*cin_p + c
        cb = jnp.zeros((1, cout_p), jnp.float32).at[0, :cout].set(p["b"])
        scale = p["gamma"] * lax.rsqrt(p["var"] + BN_EPS)
        bias = p["beta"] - p["mean"] * scale
        # scale/bias padded with zeros so padded channels stay exactly 0 through the net
        s = jnp.zeros((1, cout_p), jnp.float32).at[0, :cout].set(scale)
        bb = jnp.zeros((1, cout_p), jnp.float32).at[0, :cout].set(bias)
        prepped.append(dict(w=w.astype(jnp.bfloat16), cb=cb, scale=s, bias=bb))
    return prepped


# ---------------------------------------------------------------------------
# Pure-JAX reference (correctness check only)
# ---------------------------------------------------------------------------

def _ref_convnet_block(x, p):
    out = lax.conv_general_dilated(
        x, p["w"], window_strides=(1, 1), padding=[(1, 1), (1, 1)],
        dimension_numbers=("NHWC", "HWIO", "NHWC"))
    out = out + p["b"]
    out = jnp.where(out >= 0.0, out, LEAKY_SLOPE * out)
    out = lax.reduce_window(out, -jnp.inf, lax.max,
                            window_dimensions=(1, 2, 2, 1),
                            window_strides=(1, 2, 2, 1),
                            padding=((0, 0), (0, 0), (0, 0), (0, 0)))
    scale = p["gamma"] * lax.rsqrt(p["var"] + BN_EPS)
    return out * scale + (p["beta"] - p["mean"] * scale)


def ref_encode(image_nchw, params, *, hidden):
    x = jnp.transpose(image_nchw, (0, 2, 3, 1)).astype(jnp.float32)
    for p in params:
        x = _ref_convnet_block(x, p)
    B, H, W, C = x.shape
    return x.reshape(B, H * W, C)


# ---------------------------------------------------------------------------
# Main
# ---------------------------------------------------------------------------

if __name__ == "__main__":
    HIDDEN = 32
    B, C, S = 2, 3, 32                                   # NCHW image, CLEVR-style RGB

    key = jax.random.PRNGKey(0)
    k_param, k_x = jax.random.split(key)
    params = init_params(k_param, C, HIDDEN)
    kparams = prepare_params(params)
    x = jax.random.normal(k_x, (B, C, S, S), jnp.float32)

    fwd = jax.jit(functools.partial(clevr_encode, hidden=HIDDEN))
    ref_fwd = jax.jit(functools.partial(ref_encode, hidden=HIDDEN))

    out = jax.block_until_ready(fwd(x, kparams))
    ref = jax.block_until_ready(ref_fwd(x, params))

    assert out.shape == (B, (S // 16) * (S // 16), HIDDEN), out.shape
    rel_err = float(jnp.max(jnp.abs(out - ref)) / (jnp.max(jnp.abs(ref)) + 1e-6))
    assert np.isfinite(rel_err) and rel_err < 5e-2, f"mismatch rel_err={rel_err}"
    print("KERNEL_OK")
</pallas_src>

<mosaic_0001>
module attributes {stable_mosaic.version = 11 : i64} {
  func.func @_encoder_kernel(%arg0: i32, %arg1: memref<1x34x32x24xbf16, #tpu.memory_space<vmem>>, %arg2: memref<3x24x128xbf16, #tpu.memory_space<vmem>>, %arg3: memref<1x128xf32, #tpu.memory_space<vmem>>, %arg4: memref<1x128xf32, #tpu.memory_space<vmem>>, %arg5: memref<1x128xf32, #tpu.memory_space<vmem>>, %arg6: memref<3x384x128xbf16, #tpu.memory_space<vmem>>, %arg7: memref<1x128xf32, #tpu.memory_space<vmem>>, %arg8: memref<1x128xf32, #tpu.memory_space<vmem>>, %arg9: memref<1x128xf32, #tpu.memory_space<vmem>>, %arg10: memref<3x384x128xbf16, #tpu.memory_space<vmem>>, %arg11: memref<1x128xf32, #tpu.memory_space<vmem>>, %arg12: memref<1x128xf32, #tpu.memory_space<vmem>>, %arg13: memref<1x128xf32, #tpu.memory_space<vmem>>, %arg14: memref<3x384x128xbf16, #tpu.memory_space<vmem>>, %arg15: memref<1x128xf32, #tpu.memory_space<vmem>>, %arg16: memref<1x128xf32, #tpu.memory_space<vmem>>, %arg17: memref<1x128xf32, #tpu.memory_space<vmem>>, %arg18: memref<1x2x2x128xf32, #tpu.memory_space<vmem>>, %arg19: memref<18x18x128xf32, #tpu.memory_space<vmem>>, %arg20: memref<16x32x128xf32, #tpu.memory_space<vmem>>) attributes {dimension_semantics = [#tpu.dimension_semantics<parallel>], iteration_bounds = array<i64: 2>, scalar_prefetch = 0 : i64, scratch_operands = 2 : i64, tpu.core_type = #tpu.core_type<tc>, window_params = [{transform_indices = @transform_0, window_bounds = array<i64: 1, 34, 32, 24>}, {pipeline_mode = #tpu.pipeline_mode<synchronous>, transform_indices = @transform_1, window_bounds = array<i64: 3, 24, 128>}, {pipeline_mode = #tpu.pipeline_mode<synchronous>, transform_indices = @transform_2, window_bounds = array<i64: 1, 128>}, {pipeline_mode = #tpu.pipeline_mode<synchronous>, transform_indices = @transform_3, window_bounds = array<i64: 1, 128>}, {pipeline_mode = #tpu.pipeline_mode<synchronous>, transform_indices = @transform_4, window_bounds = array<i64: 1, 128>}, {pipeline_mode = #tpu.pipeline_mode<synchronous>, transform_indices = @transform_5, window_bounds = array<i64: 3, 384, 128>}, {pipeline_mode = #tpu.pipeline_mode<synchronous>, transform_indices = @transform_6, window_bounds = array<i64: 1, 128>}, {pipeline_mode = #tpu.pipeline_mode<synchronous>, transform_indices = @transform_7, window_bounds = array<i64: 1, 128>}, {pipeline_mode = #tpu.pipeline_mode<synchronous>, transform_indices = @transform_8, window_bounds = array<i64: 1, 128>}, {pipeline_mode = #tpu.pipeline_mode<synchronous>, transform_indices = @transform_9, window_bounds = array<i64: 3, 384, 128>}, {pipeline_mode = #tpu.pipeline_mode<synchronous>, transform_indices = @transform_10, window_bounds = array<i64: 1, 128>}, {pipeline_mode = #tpu.pipeline_mode<synchronous>, transform_indices = @transform_11, window_bounds = array<i64: 1, 128>}, {pipeline_mode = #tpu.pipeline_mode<synchronous>, transform_indices = @transform_12, window_bounds = array<i64: 1, 128>}, {pipeline_mode = #tpu.pipeline_mode<synchronous>, transform_indices = @transform_13, window_bounds = array<i64: 3, 384, 128>}, {pipeline_mode = #tpu.pipeline_mode<synchronous>, transform_indices = @transform_14, window_bounds = array<i64: 1, 128>}, {pipeline_mode = #tpu.pipeline_mode<synchronous>, transform_indices = @transform_15, window_bounds = array<i64: 1, 128>}, {pipeline_mode = #tpu.pipeline_mode<synchronous>, transform_indices = @transform_16, window_bounds = array<i64: 1, 128>}, {transform_indices = @transform_17, window_bounds = array<i64: 1, 2, 2, 128>}]} {
    %c0 = arith.constant 0 : index
    %c0_0 = arith.constant 0 : index
    %c0_1 = arith.constant 0 : index
    %c0_2 = arith.constant 0 : index
    %0 = vector.load %arg1[%c0, %c0_0, %c0_1, %c0_2] : memref<1x34x32x24xbf16, #tpu.memory_space<vmem>>, vector<1x32x32x24xbf16>
    %1 = vector.shape_cast %0 : vector<1x32x32x24xbf16> to vector<32x32x24xbf16>
    %2 = vector.shape_cast %1 : vector<32x32x24xbf16> to vector<1024x24xbf16>
    %c0_3 = arith.constant 0 : index
    %c0_4 = arith.constant 0 : index
    %c0_5 = arith.constant 0 : index
    %3 = vector.load %arg2[%c0_3, %c0_4, %c0_5] : memref<3x24x128xbf16, #tpu.memory_space<vmem>>, vector<1x24x128xbf16>
    %4 = vector.shape_cast %3 : vector<1x24x128xbf16> to vector<24x128xbf16>
    %cst = arith.constant dense<0.000000e+00> : vector<1024x128xf32>
    %5 = tpu.matmul %2, %4, %cst {dimension_numbers = #tpu.dot_dimension_numbers<[1], [0], [0], [1], [0, 0, 1, 1], [], []>} : vector<1024x24xbf16>, vector<24x128xbf16>, vector<1024x128xf32> -> vector<1024x128xf32>
    %c0_6 = arith.constant 0 : index
    %c1 = arith.constant 1 : index
    %c0_7 = arith.constant 0 : index
    %c0_8 = arith.constant 0 : index
    %6 = vector.load %arg1[%c0_6, %c1, %c0_7, %c0_8] : memref<1x34x32x24xbf16, #tpu.memory_space<vmem>>, vector<1x32x32x24xbf16>
    %7 = vector.shape_cast %6 : vector<1x32x32x24xbf16> to vector<32x32x24xbf16>
    %8 = vector.shape_cast %7 : vector<32x32x24xbf16> to vector<1024x24xbf16>
    %c1_9 = arith.constant 1 : index
    %c0_10 = arith.constant 0 : index
    %c0_11 = arith.constant 0 : index
    %9 = vector.load %arg2[%c1_9, %c0_10, %c0_11] : memref<3x24x128xbf16, #tpu.memory_space<vmem>>, vector<1x24x128xbf16>
    %10 = vector.shape_cast %9 : vector<1x24x128xbf16> to vector<24x128xbf16>
    %cst_12 = arith.constant dense<0.000000e+00> : vector<1024x128xf32>
    %11 = tpu.matmul %8, %10, %cst_12 {dimension_numbers = #tpu.dot_dimension_numbers<[1], [0], [0], [1], [0, 0, 1, 1], [], []>} : vector<1024x24xbf16>, vector<24x128xbf16>, vector<1024x128xf32> -> vector<1024x128xf32>
    %12 = arith.addf %5, %11 : vector<1024x128xf32>
    %c0_13 = arith.constant 0 : index
    %c2 = arith.constant 2 : index
    %c0_14 = arith.constant 0 : index
    %c0_15 = arith.constant 0 : index
    %13 = vector.load %arg1[%c0_13, %c2, %c0_14, %c0_15] : memref<1x34x32x24xbf16, #tpu.memory_space<vmem>>, vector<1x32x32x24xbf16>
    %14 = vector.shape_cast %13 : vector<1x32x32x24xbf16> to vector<32x32x24xbf16>
    %15 = vector.shape_cast %14 : vector<32x32x24xbf16> to vector<1024x24xbf16>
    %c2_16 = arith.constant 2 : index
    %c0_17 = arith.constant 0 : index
    %c0_18 = arith.constant 0 : index
    %16 = vector.load %arg2[%c2_16, %c0_17, %c0_18] : memref<3x24x128xbf16, #tpu.memory_space<vmem>>, vector<1x24x128xbf16>
    %17 = vector.shape_cast %16 : vector<1x24x128xbf16> to vector<24x128xbf16>
    %cst_19 = arith.constant dense<0.000000e+00> : vector<1024x128xf32>
    %18 = tpu.matmul %15, %17, %cst_19 {dimension_numbers = #tpu.dot_dimension_numbers<[1], [0], [0], [1], [0, 0, 1, 1], [], []>} : vector<1024x24xbf16>, vector<24x128xbf16>, vector<1024x128xf32> -> vector<1024x128xf32>
    %19 = arith.addf %12, %18 : vector<1024x128xf32>
    %c0_20 = arith.constant 0 : index
    %c0_21 = arith.constant 0 : index
    %20 = vector.load %arg3[%c0_20, %c0_21] : memref<1x128xf32, #tpu.memory_space<vmem>>, vector<1x128xf32>
    %21 = vector.shape_cast %20 : vector<1x128xf32> to vector<128xf32>
    %22 = vector.shape_cast %21 : vector<128xf32> to vector<1x128xf32>
    %23 = vector.broadcast %22 : vector<1x128xf32> to vector<1024x128xf32>
    %24 = arith.addf %19, %23 : vector<1024x128xf32>
    %cst_22 = arith.constant 0.000000e+00 : f32
    %25 = vector.broadcast %cst_22 : f32 to vector<1024x128xf32>
    %26 = arith.cmpf oge, %24, %25 : vector<1024x128xf32>
    %cst_23 = arith.constant 0.00999999977 : f32
    %27 = vector.broadcast %cst_23 : f32 to vector<1024x128xf32>
    %28 = arith.mulf %27, %24 : vector<1024x128xf32>
    %29 = arith.select %26, %24, %28 : vector<1024x128xi1>, vector<1024x128xf32>
    %30 = vector.shape_cast %29 : vector<1024x128xf32> to vector<16x64x128xf32>
    %31 = vector.extract_strided_slice %30 {offsets = [0, 0, 0], sizes = [16, 32, 128], strides = [1, 1, 1]} : vector<16x64x128xf32> to vector<16x32x128xf32>
    %32 = vector.extract_strided_slice %30 {offsets = [0, 32, 0], sizes = [16, 32, 128], strides = [1, 1, 1]} : vector<16x64x128xf32> to vector<16x32x128xf32>
    %33 = arith.maximumf %31, %32 : vector<16x32x128xf32>
    %c0_24 = arith.constant 0 : index
    %c0_25 = arith.constant 0 : index
    %c0_26 = arith.constant 0 : index
    %34 = vector.load %arg20[%c0_24, %c0_25, %c0_26] : memref<16x32x128xf32, #tpu.memory_space<vmem>>, vector<16x32x128xf32>
    tpu.vector_store %arg20[%c0_24, %c0_25, %c0_26], %33 {strides = array<i32>} : memref<16x32x128xf32, #tpu.memory_space<vmem>>, vector<16x32x128xf32>,
    %c0_27 = arith.constant 0 : index
    %c0_28 = arith.constant 0 : index
    %c0_29 = arith.constant 0 : index
    %35 = tpu.strided_load %arg20[%c0_27, %c0_28, %c0_29] {strides = array<i32: 1, 2, 1>} : memref<16x32x128xf32, #tpu.memory_space<vmem>>, vector<16x16x128xf32>
    %c0_30 = arith.constant 0 : index
    %c1_31 = arith.constant 1 : index
    %c0_32 = arith.constant 0 : index
    %36 = tpu.strided_load %arg20[%c0_30, %c1_31, %c0_32] {strides = array<i32: 1, 2, 1>} : memref<16x32x128xf32, #tpu.memory_space<vmem>>, vector<16x16x128xf32>
    %37 = arith.maximumf %35, %36 : vector<16x16x128xf32>
    %c0_33 = arith.constant 0 : index
    %c0_34 = arith.constant 0 : index
    %38 = vector.load %arg4[%c0_33, %c0_34] : memref<1x128xf32, #tpu.memory_space<vmem>>, vector<1x128xf32>
    %39 = vector.shape_cast %38 : vector<1x128xf32> to vector<128xf32>
    %40 = vector.shape_cast %39 : vector<128xf32> to vector<1x1x128xf32>
    %41 = vector.broadcast %40 : vector<1x1x128xf32> to vector<16x16x128xf32>
    %42 = arith.mulf %37, %41 : vector<16x16x128xf32>
    %c0_35 = arith.constant 0 : index
    %c0_36 = arith.constant 0 : index
    %43 = vector.load %arg5[%c0_35, %c0_36] : memref<1x128xf32, #tpu.memory_space<vmem>>, vector<1x128xf32>
    %44 = vector.shape_cast %43 : vector<1x128xf32> to vector<128xf32>
    %45 = vector.shape_cast %44 : vector<128xf32> to vector<1x1x128xf32>
    %46 = vector.broadcast %45 : vector<1x1x128xf32> to vector<16x16x128xf32>
    %47 = arith.addf %42, %46 : vector<16x16x128xf32>
    %cst_37 = arith.constant 0.000000e+00 : f32
    %48 = vector.broadcast %cst_37 : f32 to vector<1x18x128xf32>
    %c0_38 = arith.constant 0 : index
    %c0_39 = arith.constant 0 : index
    %c0_40 = arith.constant 0 : index
    %49 = vector.load %arg19[%c0_38, %c0_39, %c0_40] : memref<18x18x128xf32, #tpu.memory_space<vmem>>, vector<1x18x128xf32>
    tpu.vector_store %arg19[%c0_38, %c0_39, %c0_40], %48 {strides = array<i32>} : memref<18x18x128xf32, #tpu.memory_space<vmem>>, vector<1x18x128xf32>,
    %c17 = arith.constant 17 : index
    %c0_41 = arith.constant 0 : index
    %c0_42 = arith.constant 0 : index
    %50 = vector.load %arg19[%c17, %c0_41, %c0_42] : memref<18x18x128xf32, #tpu.memory_space<vmem>>, vector<1x18x128xf32>
    tpu.vector_store %arg19[%c17, %c0_41, %c0_42], %48 {strides = array<i32>} : memref<18x18x128xf32, #tpu.memory_space<vmem>>, vector<1x18x128xf32>,
    %cst_43 = arith.constant 0.000000e+00 : f32
    %51 = vector.broadcast %cst_43 : f32 to vector<16x1x128xf32>
    %c1_44 = arith.constant 1 : index
    %c0_45 = arith.constant 0 : index
    %c0_46 = arith.constant 0 : index
    %52 = vector.load %arg19[%c1_44, %c0_45, %c0_46] : memref<18x18x128xf32, #tpu.memory_space<vmem>>, vector<16x1x128xf32>
    tpu.vector_store %arg19[%c1_44, %c0_45, %c0_46], %51 {strides = array<i32>} : memref<18x18x128xf32, #tpu.memory_space<vmem>>, vector<16x1x128xf32>,
    %cst_47 = arith.constant 0.000000e+00 : f32
    %53 = vector.broadcast %cst_47 : f32 to vector<16x1x128xf32>
    %c1_48 = arith.constant 1 : index
    %c17_49 = arith.constant 17 : index
    %c0_50 = arith.constant 0 : index
    %54 = vector.load %arg19[%c1_48, %c17_49, %c0_50] : memref<18x18x128xf32, #tpu.memory_space<vmem>>, vector<16x1x128xf32>
    tpu.vector_store %arg19[%c1_48, %c17_49, %c0_50], %53 {strides = array<i32>} : memref<18x18x128xf32, #tpu.memory_space<vmem>>, vector<16x1x128xf32>,
    %c1_51 = arith.constant 1 : index
    %c1_52 = arith.constant 1 : index
    %c0_53 = arith.constant 0 : index
    %55 = vector.load %arg19[%c1_51, %c1_52, %c0_53] : memref<18x18x128xf32, #tpu.memory_space<vmem>>, vector<16x16x128xf32>
    tpu.vector_store %arg19[%c1_51, %c1_52, %c0_53], %47 {strides = array<i32>} : memref<18x18x128xf32, #tpu.memory_space<vmem>>, vector<16x16x128xf32>,
    %c0_54 = arith.constant 0 : index
    %c0_55 = arith.constant 0 : index
    %c0_56 = arith.constant 0 : index
    %56 = vector.load %arg19[%c0_54, %c0_55, %c0_56] : memref<18x18x128xf32, #tpu.memory_space<vmem>>, vector<16x16x128xf32>
    %57 = arith.truncf %56 : vector<16x16x128xf32> to vector<16x16x128xbf16>
    %c0_57 = arith.constant 0 : index
    %c1_58 = arith.constant 1 : index
    %c0_59 = arith.constant 0 : index
    %58 = vector.load %arg19[%c0_57, %c1_58, %c0_59] : memref<18x18x128xf32, #tpu.memory_space<vmem>>, vector<16x16x128xf32>
    %59 = arith.truncf %58 : vector<16x16x128xf32> to vector<16x16x128xbf16>
    %c0_60 = arith.constant 0 : index
    %c2_61 = arith.constant 2 : index
    %c0_62 = arith.constant 0 : index
    %60 = vector.load %arg19[%c0_60, %c2_61, %c0_62] : memref<18x18x128xf32, #tpu.memory_space<vmem>>, vector<16x16x128xf32>
    %61 = arith.truncf %60 : vector<16x16x128xf32> to vector<16x16x128xbf16>
    %62 = tpu.concatenate %57, %59, %61 in 2 : vector<16x16x128xbf16>, vector<16x16x128xbf16>, vector<16x16x128xbf16> -> vector<16x16x384xbf16>
    %63 = vector.shape_cast %62 : vector<16x16x384xbf16> to vector<256x384xbf16>
    %c0_63 = arith.constant 0 : index
    %c0_64 = arith.constant 0 : index
    %c0_65 = arith.constant 0 : index
    %64 = vector.load %arg6[%c0_63, %c0_64, %c0_65] : memref<3x384x128xbf16, #tpu.memory_space<vmem>>, vector<1x384x128xbf16>
    %65 = vector.shape_cast %64 : vector<1x384x128xbf16> to vector<384x128xbf16>
    %cst_66 = arith.constant dense<0.000000e+00> : vector<256x128xf32>
    %66 = tpu.matmul %63, %65, %cst_66 {dimension_numbers = #tpu.dot_dimension_numbers<[1], [0], [0], [1], [0, 0, 1, 1], [], []>} : vector<256x384xbf16>, vector<384x128xbf16>, vector<256x128xf32> -> vector<256x128xf32>
    %c1_67 = arith.constant 1 : index
    %c0_68 = arith.constant 0 : index
    %c0_69 = arith.constant 0 : index
    %67 = vector.load %arg19[%c1_67, %c0_68, %c0_69] : memref<18x18x128xf32, #tpu.memory_space<vmem>>, vector<16x16x128xf32>
    %68 = arith.truncf %67 : vector<16x16x128xf32> to vector<16x16x128xbf16>
    %c1_70 = arith.constant 1 : index
    %c1_71 = arith.constant 1 : index
    %c0_72 = arith.constant 0 : index
    %69 = vector.load %arg19[%c1_70, %c1_71, %c0_72] : memref<18x18x128xf32, #tpu.memory_space<vmem>>, vector<16x16x128xf32>
    %70 = arith.truncf %69 : vector<16x16x128xf32> to vector<16x16x128xbf16>
    %c1_73 = arith.constant 1 : index
    %c2_74 = arith.constant 2 : index
    %c0_75 = arith.constant 0 : index
    %71 = vector.load %arg19[%c1_73, %c2_74, %c0_75] : memref<18x18x128xf32, #tpu.memory_space<vmem>>, vector<16x16x128xf32>
    %72 = arith.truncf %71 : vector<16x16x128xf32> to vector<16x16x128xbf16>
    %73 = tpu.concatenate %68, %70, %72 in 2 : vector<16x16x128xbf16>, vector<16x16x128xbf16>, vector<16x16x128xbf16> -> vector<16x16x384xbf16>
    %74 = vector.shape_cast %73 : vector<16x16x384xbf16> to vector<256x384xbf16>
    %c1_76 = arith.constant 1 : index
    %c0_77 = arith.constant 0 : index
    %c0_78 = arith.constant 0 : index
    %75 = vector.load %arg6[%c1_76, %c0_77, %c0_78] : memref<3x384x128xbf16, #tpu.memory_space<vmem>>, vector<1x384x128xbf16>
    %76 = vector.shape_cast %75 : vector<1x384x128xbf16> to vector<384x128xbf16>
    %cst_79 = arith.constant dense<0.000000e+00> : vector<256x128xf32>
    %77 = tpu.matmul %74, %76, %cst_79 {dimension_numbers = #tpu.dot_dimension_numbers<[1], [0], [0], [1], [0, 0, 1, 1], [], []>} : vector<256x384xbf16>, vector<384x128xbf16>, vector<256x128xf32> -> vector<256x128xf32>
    %78 = arith.addf %66, %77 : vector<256x128xf32>
    %c2_80 = arith.constant 2 : index
    %c0_81 = arith.constant 0 : index
    %c0_82 = arith.constant 0 : index
    %79 = vector.load %arg19[%c2_80, %c0_81, %c0_82] : memref<18x18x128xf32, #tpu.memory_space<vmem>>, vector<16x16x128xf32>
    %80 = arith.truncf %79 : vector<16x16x128xf32> to vector<16x16x128xbf16>
    %c2_83 = arith.constant 2 : index
    %c1_84 = arith.constant 1 : index
    %c0_85 = arith.constant 0 : index
    %81 = vector.load %arg19[%c2_83, %c1_84, %c0_85] : memref<18x18x128xf32, #tpu.memory_space<vmem>>, vector<16x16x128xf32>
    %82 = arith.truncf %81 : vector<16x16x128xf32> to vector<16x16x128xbf16>
    %c2_86 = arith.constant 2 : index
    %c2_87 = arith.constant 2 : index
    %c0_88 = arith.constant 0 : index
    %83 = vector.load %arg19[%c2_86, %c2_87, %c0_88] : memref<18x18x128xf32, #tpu.memory_space<vmem>>, vector<16x16x128xf32>
    %84 = arith.truncf %83 : vector<16x16x128xf32> to vector<16x16x128xbf16>
    %85 = tpu.concatenate %80, %82, %84 in 2 : vector<16x16x128xbf16>, vector<16x16x128xbf16>, vector<16x16x128xbf16> -> vector<16x16x384xbf16>
    %86 = vector.shape_cast %85 : vector<16x16x384xbf16> to vector<256x384xbf16>
    %c2_89 = arith.constant 2 : index
    %c0_90 = arith.constant 0 : index
    %c0_91 = arith.constant 0 : index
    %87 = vector.load %arg6[%c2_89, %c0_90, %c0_91] : memref<3x384x128xbf16, #tpu.memory_space<vmem>>, vector<1x384x128xbf16>
    %88 = vector.shape_cast %87 : vector<1x384x128xbf16> to vector<384x128xbf16>
    %cst_92 = arith.constant dense<0.000000e+00> : vector<256x128xf32>
    %89 = tpu.matmul %86, %88, %cst_92 {dimension_numbers = #tpu.dot_dimension_numbers<[1], [0], [0], [1], [0, 0, 1, 1], [], []>} : vector<256x384xbf16>, vector<384x128xbf16>, vector<256x128xf32> -> vector<256x128xf32>
    %90 = arith.addf %78, %89 : vector<256x128xf32>
    %c0_93 = arith.constant 0 : index
    %c0_94 = arith.constant 0 : index
    %91 = vector.load %arg7[%c0_93, %c0_94] : memref<1x128xf32, #tpu.memory_space<vmem>>, vector<1x128xf32>
    %92 = vector.shape_cast %91 : vector<1x128xf32> to vector<128xf32>
    %93 = vector.shape_cast %92 : vector<128xf32> to vector<1x128xf32>
    %94 = vector.broadcast %93 : vector<1x128xf32> to vector<256x128xf32>
    %95 = arith.addf %90, %94 : vector<256x128xf32>
    %cst_95 = arith.constant 0.000000e+00 : f32
    %96 = vector.broadcast %cst_95 : f32 to vector<256x128xf32>
    %97 = arith.cmpf oge, %95, %96 : vector<256x128xf32>
    %cst_96 = arith.constant 0.00999999977 : f32
    %98 = vector.broadcast %cst_96 : f32 to vector<256x128xf32>
    %99 = arith.mulf %98, %95 : vector<256x128xf32>
    %100 = arith.select %97, %95, %99 : vector<256x128xi1>, vector<256x128xf32>
    %101 = vector.shape_cast %100 : vector<256x128xf32> to vector<8x32x128xf32>
    %102 = vector.extract_strided_slice %101 {offsets = [0, 0, 0], sizes = [8, 16, 128], strides = [1, 1, 1]} : vector<8x32x128xf32> to vector<8x16x128xf32>
    %103 = vector.extract_strided_slice %101 {offsets = [0, 16, 0], sizes = [8, 16, 128], strides = [1, 1, 1]} : vector<8x32x128xf32> to vector<8x16x128xf32>
    %104 = arith.maximumf %102, %103 : vector<8x16x128xf32>
    %c0_97 = arith.constant 0 : index
    %c0_98 = arith.constant 0 : index
    %c0_99 = arith.constant 0 : index
    %105 = vector.load %arg20[%c0_97, %c0_98, %c0_99] : memref<16x32x128xf32, #tpu.memory_space<vmem>>, vector<8x16x128xf32>
    tpu.vector_store %arg20[%c0_97, %c0_98, %c0_99], %104 {strides = array<i32>} : memref<16x32x128xf32, #tpu.memory_space<vmem>>, vector<8x16x128xf32>,
    %c0_100 = arith.constant 0 : index
    %c0_101 = arith.constant 0 : index
    %c0_102 = arith.constant 0 : index
    %106 = tpu.strided_load %arg20[%c0_100, %c0_101, %c0_102] {strides = array<i32: 1, 2, 1>} : memref<16x32x128xf32, #tpu.memory_space<vmem>>, vector<8x8x128xf32>
    %c0_103 = arith.constant 0 : index
    %c1_104 = arith.constant 1 : index
    %c0_105 = arith.constant 0 : index
    %107 = tpu.strided_load %arg20[%c0_103, %c1_104, %c0_105] {strides = array<i32: 1, 2, 1>} : memref<16x32x128xf32, #tpu.memory_space<vmem>>, vector<8x8x128xf32>
    %108 = arith.maximumf %106, %107 : vector<8x8x128xf32>
    %c0_106 = arith.constant 0 : index
    %c0_107 = arith.constant 0 : index
    %109 = vector.load %arg8[%c0_106, %c0_107] : memref<1x128xf32, #tpu.memory_space<vmem>>, vector<1x128xf32>
    %110 = vector.shape_cast %109 : vector<1x128xf32> to vector<128xf32>
    %111 = vector.shape_cast %110 : vector<128xf32> to vector<1x1x128xf32>
    %112 = vector.broadcast %111 : vector<1x1x128xf32> to vector<8x8x128xf32>
    %113 = arith.mulf %108, %112 : vector<8x8x128xf32>
    %c0_108 = arith.constant 0 : index
    %c0_109 = arith.constant 0 : index
    %114 = vector.load %arg9[%c0_108, %c0_109] : memref<1x128xf32, #tpu.memory_space<vmem>>, vector<1x128xf32>
    %115 = vector.shape_cast %114 : vector<1x128xf32> to vector<128xf32>
    %116 = vector.shape_cast %115 : vector<128xf32> to vector<1x1x128xf32>
    %117 = vector.broadcast %116 : vector<1x1x128xf32> to vector<8x8x128xf32>
    %118 = arith.addf %113, %117 : vector<8x8x128xf32>
    %cst_110 = arith.constant 0.000000e+00 : f32
    %119 = vector.broadcast %cst_110 : f32 to vector<1x10x128xf32>
    %c0_111 = arith.constant 0 : index
    %c0_112 = arith.constant 0 : index
    %c0_113 = arith.constant 0 : index
    %120 = vector.load %arg19[%c0_111, %c0_112, %c0_113] : memref<18x18x128xf32, #tpu.memory_space<vmem>>, vector<1x10x128xf32>
    tpu.vector_store %arg19[%c0_111, %c0_112, %c0_113], %119 {strides = array<i32>} : memref<18x18x128xf32, #tpu.memory_space<vmem>>, vector<1x10x128xf32>,
    %c9 = arith.constant 9 : index
    %c0_114 = arith.constant 0 : index
    %c0_115 = arith.constant 0 : index
    %121 = vector.load %arg19[%c9, %c0_114, %c0_115] : memref<18x18x128xf32, #tpu.memory_space<vmem>>, vector<1x10x128xf32>
    tpu.vector_store %arg19[%c9, %c0_114, %c0_115], %119 {strides = array<i32>} : memref<18x18x128xf32, #tpu.memory_space<vmem>>, vector<1x10x128xf32>,
    %cst_116 = arith.constant 0.000000e+00 : f32
    %122 = vector.broadcast %cst_116 : f32 to vector<8x1x128xf32>
    %c1_117 = arith.constant 1 : index
    %c0_118 = arith.constant 0 : index
    %c0_119 = arith.constant 0 : index
    %123 = vector.load %arg19[%c1_117, %c0_118, %c0_119] : memref<18x18x128xf32, #tpu.memory_space<vmem>>, vector<8x1x128xf32>
    tpu.vector_store %arg19[%c1_117, %c0_118, %c0_119], %122 {strides = array<i32>} : memref<18x18x128xf32, #tpu.memory_space<vmem>>, vector<8x1x128xf32>,
    %cst_120 = arith.constant 0.000000e+00 : f32
    %124 = vector.broadcast %cst_120 : f32 to vector<8x1x128xf32>
    %c1_121 = arith.constant 1 : index
    %c9_122 = arith.constant 9 : index
    %c0_123 = arith.constant 0 : index
    %125 = vector.load %arg19[%c1_121, %c9_122, %c0_123] : memref<18x18x128xf32, #tpu.memory_space<vmem>>, vector<8x1x128xf32>
    tpu.vector_store %arg19[%c1_121, %c9_122, %c0_123], %124 {strides = array<i32>} : memref<18x18x128xf32, #tpu.memory_space<vmem>>, vector<8x1x128xf32>,
    %c1_124 = arith.constant 1 : index
    %c1_125 = arith.constant 1 : index
    %c0_126 = arith.constant 0 : index
    %126 = vector.load %arg19[%c1_124, %c1_125, %c0_126] : memref<18x18x128xf32, #tpu.memory_space<vmem>>, vector<8x8x128xf32>
    tpu.vector_store %arg19[%c1_124, %c1_125, %c0_126], %118 {strides = array<i32>} : memref<18x18x128xf32, #tpu.memory_space<vmem>>, vector<8x8x128xf32>,
    %c0_127 = arith.constant 0 : index
    %c0_128 = arith.constant 0 : index
    %c0_129 = arith.constant 0 : index
    %127 = vector.load %arg19[%c0_127, %c0_128, %c0_129] : memref<18x18x128xf32, #tpu.memory_space<vmem>>, vector<8x8x128xf32>
    %128 = arith.truncf %127 : vector<8x8x128xf32> to vector<8x8x128xbf16>
    %c0_130 = arith.constant 0 : index
    %c1_131 = arith.constant 1 : index
    %c0_132 = arith.constant 0 : index
    %129 = vector.load %arg19[%c0_130, %c1_131, %c0_132] : memref<18x18x128xf32, #tpu.memory_space<vmem>>, vector<8x8x128xf32>
    %130 = arith.truncf %129 : vector<8x8x128xf32> to vector<8x8x128xbf16>
    %c0_133 = arith.constant 0 : index
    %c2_134 = arith.constant 2 : index
    %c0_135 = arith.constant 0 : index
    %131 = vector.load %arg19[%c0_133, %c2_134, %c0_135] : memref<18x18x128xf32, #tpu.memory_space<vmem>>, vector<8x8x128xf32>
    %132 = arith.truncf %131 : vector<8x8x128xf32> to vector<8x8x128xbf16>
    %133 = tpu.concatenate %128, %130, %132 in 2 : vector<8x8x128xbf16>, vector<8x8x128xbf16>, vector<8x8x128xbf16> -> vector<8x8x384xbf16>
    %134 = vector.shape_cast %133 : vector<8x8x384xbf16> to vector<64x384xbf16>
    %c0_136 = arith.constant 0 : index
    %c0_137 = arith.constant 0 : index
    %c0_138 = arith.constant 0 : index
    %135 = vector.load %arg10[%c0_136, %c0_137, %c0_138] : memref<3x384x128xbf16, #tpu.memory_space<vmem>>, vector<1x384x128xbf16>
    %136 = vector.shape_cast %135 : vector<1x384x128xbf16> to vector<384x128xbf16>
    %cst_139 = arith.constant dense<0.000000e+00> : vector<64x128xf32>
    %137 = tpu.matmul %134, %136, %cst_139 {dimension_numbers = #tpu.dot_dimension_numbers<[1], [0], [0], [1], [0, 0, 1, 1], [], []>} : vector<64x384xbf16>, vector<384x128xbf16>, vector<64x128xf32> -> vector<64x128xf32>
    %c1_140 = arith.constant 1 : index
    %c0_141 = arith.constant 0 : index
    %c0_142 = arith.constant 0 : index
    %138 = vector.load %arg19[%c1_140, %c0_141, %c0_142] : memref<18x18x128xf32, #tpu.memory_space<vmem>>, vector<8x8x128xf32>
    %139 = arith.truncf %138 : vector<8x8x128xf32> to vector<8x8x128xbf16>
    %c1_143 = arith.constant 1 : index
    %c1_144 = arith.constant 1 : index
    %c0_145 = arith.constant 0 : index
    %140 = vector.load %arg19[%c1_143, %c1_144, %c0_145] : memref<18x18x128xf32, #tpu.memory_space<vmem>>, vector<8x8x128xf32>
    %141 = arith.truncf %140 : vector<8x8x128xf32> to vector<8x8x128xbf16>
    %c1_146 = arith.constant 1 : index
    %c2_147 = arith.constant 2 : index
    %c0_148 = arith.constant 0 : index
    %142 = vector.load %arg19[%c1_146, %c2_147, %c0_148] : memref<18x18x128xf32, #tpu.memory_space<vmem>>, vector<8x8x128xf32>
    %143 = arith.truncf %142 : vector<8x8x128xf32> to vector<8x8x128xbf16>
    %144 = tpu.concatenate %139, %141, %143 in 2 : vector<8x8x128xbf16>, vector<8x8x128xbf16>, vector<8x8x128xbf16> -> vector<8x8x384xbf16>
    %145 = vector.shape_cast %144 : vector<8x8x384xbf16> to vector<64x384xbf16>
    %c1_149 = arith.constant 1 : index
    %c0_150 = arith.constant 0 : index
    %c0_151 = arith.constant 0 : index
    %146 = vector.load %arg10[%c1_149, %c0_150, %c0_151] : memref<3x384x128xbf16, #tpu.memory_space<vmem>>, vector<1x384x128xbf16>
    %147 = vector.shape_cast %146 : vector<1x384x128xbf16> to vector<384x128xbf16>
    %cst_152 = arith.constant dense<0.000000e+00> : vector<64x128xf32>
    %148 = tpu.matmul %145, %147, %cst_152 {dimension_numbers = #tpu.dot_dimension_numbers<[1], [0], [0], [1], [0, 0, 1, 1], [], []>} : vector<64x384xbf16>, vector<384x128xbf16>, vector<64x128xf32> -> vector<64x128xf32>
    %149 = arith.addf %137, %148 : vector<64x128xf32>
    %c2_153 = arith.constant 2 : index
    %c0_154 = arith.constant 0 : index
    %c0_155 = arith.constant 0 : index
    %150 = vector.load %arg19[%c2_153, %c0_154, %c0_155] : memref<18x18x128xf32, #tpu.memory_space<vmem>>, vector<8x8x128xf32>
    %151 = arith.truncf %150 : vector<8x8x128xf32> to vector<8x8x128xbf16>
    %c2_156 = arith.constant 2 : index
    %c1_157 = arith.constant 1 : index
    %c0_158 = arith.constant 0 : index
    %152 = vector.load %arg19[%c2_156, %c1_157, %c0_158] : memref<18x18x128xf32, #tpu.memory_space<vmem>>, vector<8x8x128xf32>
    %153 = arith.truncf %152 : vector<8x8x128xf32> to vector<8x8x128xbf16>
    %c2_159 = arith.constant 2 : index
    %c2_160 = arith.constant 2 : index
    %c0_161 = arith.constant 0 : index
    %154 = vector.load %arg19[%c2_159, %c2_160, %c0_161] : memref<18x18x128xf32, #tpu.memory_space<vmem>>, vector<8x8x128xf32>
    %155 = arith.truncf %154 : vector<8x8x128xf32> to vector<8x8x128xbf16>
    %156 = tpu.concatenate %151, %153, %155 in 2 : vector<8x8x128xbf16>, vector<8x8x128xbf16>, vector<8x8x128xbf16> -> vector<8x8x384xbf16>
    %157 = vector.shape_cast %156 : vector<8x8x384xbf16> to vector<64x384xbf16>
    %c2_162 = arith.constant 2 : index
    %c0_163 = arith.constant 0 : index
    %c0_164 = arith.constant 0 : index
    %158 = vector.load %arg10[%c2_162, %c0_163, %c0_164] : memref<3x384x128xbf16, #tpu.memory_space<vmem>>, vector<1x384x128xbf16>
    %159 = vector.shape_cast %158 : vector<1x384x128xbf16> to vector<384x128xbf16>
    %cst_165 = arith.constant dense<0.000000e+00> : vector<64x128xf32>
    %160 = tpu.matmul %157, %159, %cst_165 {dimension_numbers = #tpu.dot_dimension_numbers<[1], [0], [0], [1], [0, 0, 1, 1], [], []>} : vector<64x384xbf16>, vector<384x128xbf16>, vector<64x128xf32> -> vector<64x128xf32>
    %161 = arith.addf %149, %160 : vector<64x128xf32>
    %c0_166 = arith.constant 0 : index
    %c0_167 = arith.constant 0 : index
    %162 = vector.load %arg11[%c0_166, %c0_167] : memref<1x128xf32, #tpu.memory_space<vmem>>, vector<1x128xf32>
    %163 = vector.shape_cast %162 : vector<1x128xf32> to vector<128xf32>
    %164 = vector.shape_cast %163 : vector<128xf32> to vector<1x128xf32>
    %165 = vector.broadcast %164 : vector<1x128xf32> to vector<64x128xf32>
    %166 = arith.addf %161, %165 : vector<64x128xf32>
    %cst_168 = arith.constant 0.000000e+00 : f32
    %167 = vector.broadcast %cst_168 : f32 to vector<64x128xf32>
    %168 = arith.cmpf oge, %166, %167 : vector<64x128xf32>
    %cst_169 = arith.constant 0.00999999977 : f32
    %169 = vector.broadcast %cst_169 : f32 to vector<64x128xf32>
    %170 = arith.mulf %169, %166 : vector<64x128xf32>
    %171 = arith.select %168, %166, %170 : vector<64x128xi1>, vector<64x128xf32>
    %172 = vector.shape_cast %171 : vector<64x128xf32> to vector<4x16x128xf32>
    %173 = vector.extract_strided_slice %172 {offsets = [0, 0, 0], sizes = [4, 8, 128], strides = [1, 1, 1]} : vector<4x16x128xf32> to vector<4x8x128xf32>
    %174 = vector.extract_strided_slice %172 {offsets = [0, 8, 0], sizes = [4, 8, 128], strides = [1, 1, 1]} : vector<4x16x128xf32> to vector<4x8x128xf32>
    %175 = arith.maximumf %173, %174 : vector<4x8x128xf32>
    %c0_170 = arith.constant 0 : index
    %c0_171 = arith.constant 0 : index
    %c0_172 = arith.constant 0 : index
    %176 = vector.load %arg20[%c0_170, %c0_171, %c0_172] : memref<16x32x128xf32, #tpu.memory_space<vmem>>, vector<4x8x128xf32>
    tpu.vector_store %arg20[%c0_170, %c0_171, %c0_172], %175 {strides = array<i32>} : memref<16x32x128xf32, #tpu.memory_space<vmem>>, vector<4x8x128xf32>,
    %c0_173 = arith.constant 0 : index
    %c0_174 = arith.constant 0 : index
    %c0_175 = arith.constant 0 : index
    %177 = tpu.strided_load %arg20[%c0_173, %c0_174, %c0_175] {strides = array<i32: 1, 2, 1>} : memref<16x32x128xf32, #tpu.memory_space<vmem>>, vector<4x4x128xf32>
    %c0_176 = arith.constant 0 : index
    %c1_177 = arith.constant 1 : index
    %c0_178 = arith.constant 0 : index
    %178 = tpu.strided_load %arg20[%c0_176, %c1_177, %c0_178] {strides = array<i32: 1, 2, 1>} : memref<16x32x128xf32, #tpu.memory_space<vmem>>, vector<4x4x128xf32>
    %179 = arith.maximumf %177, %178 : vector<4x4x128xf32>
    %c0_179 = arith.constant 0 : index
    %c0_180 = arith.constant 0 : index
    %180 = vector.load %arg12[%c0_179, %c0_180] : memref<1x128xf32, #tpu.memory_space<vmem>>, vector<1x128xf32>
    %181 = vector.shape_cast %180 : vector<1x128xf32> to vector<128xf32>
    %182 = vector.shape_cast %181 : vector<128xf32> to vector<1x1x128xf32>
    %183 = vector.broadcast %182 : vector<1x1x128xf32> to vector<4x4x128xf32>
    %184 = arith.mulf %179, %183 : vector<4x4x128xf32>
    %c0_181 = arith.constant 0 : index
    %c0_182 = arith.constant 0 : index
    %185 = vector.load %arg13[%c0_181, %c0_182] : memref<1x128xf32, #tpu.memory_space<vmem>>, vector<1x128xf32>
    %186 = vector.shape_cast %185 : vector<1x128xf32> to vector<128xf32>
    %187 = vector.shape_cast %186 : vector<128xf32> to vector<1x1x128xf32>
    %188 = vector.broadcast %187 : vector<1x1x128xf32> to vector<4x4x128xf32>
    %189 = arith.addf %184, %188 : vector<4x4x128xf32>
    %cst_183 = arith.constant 0.000000e+00 : f32
    %190 = vector.broadcast %cst_183 : f32 to vector<1x10x128xf32>
    %c0_184 = arith.constant 0 : index
    %c0_185 = arith.constant 0 : index
    %c0_186 = arith.constant 0 : index
    %191 = vector.load %arg19[%c0_184, %c0_185, %c0_186] : memref<18x18x128xf32, #tpu.memory_space<vmem>>, vector<1x10x128xf32>
    tpu.vector_store %arg19[%c0_184, %c0_185, %c0_186], %190 {strides = array<i32>} : memref<18x18x128xf32, #tpu.memory_space<vmem>>, vector<1x10x128xf32>,
    %c5 = arith.constant 5 : index
    %c0_187 = arith.constant 0 : index
    %c0_188 = arith.constant 0 : index
    %192 = vector.load %arg19[%c5, %c0_187, %c0_188] : memref<18x18x128xf32, #tpu.memory_space<vmem>>, vector<1x10x128xf32>
    tpu.vector_store %arg19[%c5, %c0_187, %c0_188], %190 {strides = array<i32>} : memref<18x18x128xf32, #tpu.memory_space<vmem>>, vector<1x10x128xf32>,
    %cst_189 = arith.constant 0.000000e+00 : f32
    %193 = vector.broadcast %cst_189 : f32 to vector<4x1x128xf32>
    %c1_190 = arith.constant 1 : index
    %c0_191 = arith.constant 0 : index
    %c0_192 = arith.constant 0 : index
    %194 = vector.load %arg19[%c1_190, %c0_191, %c0_192] : memref<18x18x128xf32, #tpu.memory_space<vmem>>, vector<4x1x128xf32>
    tpu.vector_store %arg19[%c1_190, %c0_191, %c0_192], %193 {strides = array<i32>} : memref<18x18x128xf32, #tpu.memory_space<vmem>>, vector<4x1x128xf32>,
    %cst_193 = arith.constant 0.000000e+00 : f32
    %195 = vector.broadcast %cst_193 : f32 to vector<4x5x128xf32>
    %c1_194 = arith.constant 1 : index
    %c5_195 = arith.constant 5 : index
    %c0_196 = arith.constant 0 : index
    %196 = vector.load %arg19[%c1_194, %c5_195, %c0_196] : memref<18x18x128xf32, #tpu.memory_space<vmem>>, vector<4x5x128xf32>
    tpu.vector_store %arg19[%c1_194, %c5_195, %c0_196], %195 {strides = array<i32>} : memref<18x18x128xf32, #tpu.memory_space<vmem>>, vector<4x5x128xf32>,
    %c1_197 = arith.constant 1 : index
    %c1_198 = arith.constant 1 : index
    %c0_199 = arith.constant 0 : index
    %197 = vector.load %arg19[%c1_197, %c1_198, %c0_199] : memref<18x18x128xf32, #tpu.memory_space<vmem>>, vector<4x4x128xf32>
    tpu.vector_store %arg19[%c1_197, %c1_198, %c0_199], %189 {strides = array<i32>} : memref<18x18x128xf32, #tpu.memory_space<vmem>>, vector<4x4x128xf32>,
    %c0_200 = arith.constant 0 : index
    %c0_201 = arith.constant 0 : index
    %c0_202 = arith.constant 0 : index
    %198 = vector.load %arg19[%c0_200, %c0_201, %c0_202] : memref<18x18x128xf32, #tpu.memory_space<vmem>>, vector<4x8x128xf32>
    %199 = arith.truncf %198 : vector<4x8x128xf32> to vector<4x8x128xbf16>
    %c0_203 = arith.constant 0 : index
    %c1_204 = arith.constant 1 : index
    %c0_205 = arith.constant 0 : index
    %200 = vector.load %arg19[%c0_203, %c1_204, %c0_205] : memref<18x18x128xf32, #tpu.memory_space<vmem>>, vector<4x8x128xf32>
    %201 = arith.truncf %200 : vector<4x8x128xf32> to vector<4x8x128xbf16>
    %c0_206 = arith.constant 0 : index
    %c2_207 = arith.constant 2 : index
    %c0_208 = arith.constant 0 : index
    %202 = vector.load %arg19[%c0_206, %c2_207, %c0_208] : memref<18x18x128xf32, #tpu.memory_space<vmem>>, vector<4x8x128xf32>
    %203 = arith.truncf %202 : vector<4x8x128xf32> to vector<4x8x128xbf16>
    %204 = tpu.concatenate %199, %201, %203 in 2 : vector<4x8x128xbf16>, vector<4x8x128xbf16>, vector<4x8x128xbf16> -> vector<4x8x384xbf16>
    %205 = vector.shape_cast %204 : vector<4x8x384xbf16> to vector<32x384xbf16>
    %c0_209 = arith.constant 0 : index
    %c0_210 = arith.constant 0 : index
    %c0_211 = arith.constant 0 : index
    %206 = vector.load %arg14[%c0_209, %c0_210, %c0_211] : memref<3x384x128xbf16, #tpu.memory_space<vmem>>, vector<1x384x128xbf16>
    %207 = vector.shape_cast %206 : vector<1x384x128xbf16> to vector<384x128xbf16>
    %cst_212 = arith.constant dense<0.000000e+00> : vector<32x128xf32>
    %208 = tpu.matmul %205, %207, %cst_212 {dimension_numbers = #tpu.dot_dimension_numbers<[1], [0], [0], [1], [0, 0, 1, 1], [], []>} : vector<32x384xbf16>, vector<384x128xbf16>, vector<32x128xf32> -> vector<32x128xf32>
    %c1_213 = arith.constant 1 : index
    %c0_214 = arith.constant 0 : index
    %c0_215 = arith.constant 0 : index
    %209 = vector.load %arg19[%c1_213, %c0_214, %c0_215] : memref<18x18x128xf32, #tpu.memory_space<vmem>>, vector<4x8x128xf32>
    %210 = arith.truncf %209 : vector<4x8x128xf32> to vector<4x8x128xbf16>
    %c1_216 = arith.constant 1 : index
    %c1_217 = arith.constant 1 : index
    %c0_218 = arith.constant 0 : index
    %211 = vector.load %arg19[%c1_216, %c1_217, %c0_218] : memref<18x18x128xf32, #tpu.memory_space<vmem>>, vector<4x8x128xf32>
    %212 = arith.truncf %211 : vector<4x8x128xf32> to vector<4x8x128xbf16>
    %c1_219 = arith.constant 1 : index
    %c2_220 = arith.constant 2 : index
    %c0_221 = arith.constant 0 : index
    %213 = vector.load %arg19[%c1_219, %c2_220, %c0_221] : memref<18x18x128xf32, #tpu.memory_space<vmem>>, vector<4x8x128xf32>
    %214 = arith.truncf %213 : vector<4x8x128xf32> to vector<4x8x128xbf16>
    %215 = tpu.concatenate %210, %212, %214 in 2 : vector<4x8x128xbf16>, vector<4x8x128xbf16>, vector<4x8x128xbf16> -> vector<4x8x384xbf16>
    %216 = vector.shape_cast %215 : vector<4x8x384xbf16> to vector<32x384xbf16>
    %c1_222 = arith.constant 1 : index
    %c0_223 = arith.constant 0 : index
    %c0_224 = arith.constant 0 : index
    %217 = vector.load %arg14[%c1_222, %c0_223, %c0_224] : memref<3x384x128xbf16, #tpu.memory_space<vmem>>, vector<1x384x128xbf16>
    %218 = vector.shape_cast %217 : vector<1x384x128xbf16> to vector<384x128xbf16>
    %cst_225 = arith.constant dense<0.000000e+00> : vector<32x128xf32>
    %219 = tpu.matmul %216, %218, %cst_225 {dimension_numbers = #tpu.dot_dimension_numbers<[1], [0], [0], [1], [0, 0, 1, 1], [], []>} : vector<32x384xbf16>, vector<384x128xbf16>, vector<32x128xf32> -> vector<32x128xf32>
    %220 = arith.addf %208, %219 : vector<32x128xf32>
    %c2_226 = arith.constant 2 : index
    %c0_227 = arith.constant 0 : index
    %c0_228 = arith.constant 0 : index
    %221 = vector.load %arg19[%c2_226, %c0_227, %c0_228] : memref<18x18x128xf32, #tpu.memory_space<vmem>>, vector<4x8x128xf32>
    %222 = arith.truncf %221 : vector<4x8x128xf32> to vector<4x8x128xbf16>
    %c2_229 = arith.constant 2 : index
    %c1_230 = arith.constant 1 : index
    %c0_231 = arith.constant 0 : index
    %223 = vector.load %arg19[%c2_229, %c1_230, %c0_231] : memref<18x18x128xf32, #tpu.memory_space<vmem>>, vector<4x8x128xf32>
    %224 = arith.truncf %223 : vector<4x8x128xf32> to vector<4x8x128xbf16>
    %c2_232 = arith.constant 2 : index
    %c2_233 = arith.constant 2 : index
    %c0_234 = arith.constant 0 : index
    %225 = vector.load %arg19[%c2_232, %c2_233, %c0_234] : memref<18x18x128xf32, #tpu.memory_space<vmem>>, vector<4x8x128xf32>
    %226 = arith.truncf %225 : vector<4x8x128xf32> to vector<4x8x128xbf16>
    %227 = tpu.concatenate %222, %224, %226 in 2 : vector<4x8x128xbf16>, vector<4x8x128xbf16>, vector<4x8x128xbf16> -> vector<4x8x384xbf16>
    %228 = vector.shape_cast %227 : vector<4x8x384xbf16> to vector<32x384xbf16>
    %c2_235 = arith.constant 2 : index
    %c0_236 = arith.constant 0 : index
    %c0_237 = arith.constant 0 : index
    %229 = vector.load %arg14[%c2_235, %c0_236, %c0_237] : memref<3x384x128xbf16, #tpu.memory_space<vmem>>, vector<1x384x128xbf16>
    %230 = vector.shape_cast %229 : vector<1x384x128xbf16> to vector<384x128xbf16>
    %cst_238 = arith.constant dense<0.000000e+00> : vector<32x128xf32>
    %231 = tpu.matmul %228, %230, %cst_238 {dimension_numbers = #tpu.dot_dimension_numbers<[1], [0], [0], [1], [0, 0, 1, 1], [], []>} : vector<32x384xbf16>, vector<384x128xbf16>, vector<32x128xf32> -> vector<32x128xf32>
    %232 = arith.addf %220, %231 : vector<32x128xf32>
    %c0_239 = arith.constant 0 : index
    %c0_240 = arith.constant 0 : index
    %233 = vector.load %arg15[%c0_239, %c0_240] : memref<1x128xf32, #tpu.memory_space<vmem>>, vector<1x128xf32>
    %234 = vector.shape_cast %233 : vector<1x128xf32> to vector<128xf32>
    %235 = vector.shape_cast %234 : vector<128xf32> to vector<1x128xf32>
    %236 = vector.broadcast %235 : vector<1x128xf32> to vector<32x128xf32>
    %237 = arith.addf %232, %236 : vector<32x128xf32>
    %cst_241 = arith.constant 0.000000e+00 : f32
    %238 = vector.broadcast %cst_241 : f32 to vector<32x128xf32>
    %239 = arith.cmpf oge, %237, %238 : vector<32x128xf32>
    %cst_242 = arith.constant 0.00999999977 : f32
    %240 = vector.broadcast %cst_242 : f32 to vector<32x128xf32>
    %241 = arith.mulf %240, %237 : vector<32x128xf32>
    %242 = arith.select %239, %237, %241 : vector<32x128xi1>, vector<32x128xf32>
    %243 = vector.shape_cast %242 : vector<32x128xf32> to vector<2x16x128xf32>
    %244 = vector.extract_strided_slice %243 {offsets = [0, 0, 0], sizes = [2, 8, 128], strides = [1, 1, 1]} : vector<2x16x128xf32> to vector<2x8x128xf32>
    %245 = vector.extract_strided_slice %243 {offsets = [0, 8, 0], sizes = [2, 8, 128], strides = [1, 1, 1]} : vector<2x16x128xf32> to vector<2x8x128xf32>
    %246 = arith.maximumf %244, %245 : vector<2x8x128xf32>
    %c0_243 = arith.constant 0 : index
    %c0_244 = arith.constant 0 : index
    %c0_245 = arith.constant 0 : index
    %247 = vector.load %arg20[%c0_243, %c0_244, %c0_245] : memref<16x32x128xf32, #tpu.memory_space<vmem>>, vector<2x8x128xf32>
    tpu.vector_store %arg20[%c0_243, %c0_244, %c0_245], %246 {strides = array<i32>} : memref<16x32x128xf32, #tpu.memory_space<vmem>>, vector<2x8x128xf32>,
    %c0_246 = arith.constant 0 : index
    %c0_247 = arith.constant 0 : index
    %c0_248 = arith.constant 0 : index
    %248 = tpu.strided_load %arg20[%c0_246, %c0_247, %c0_248] {strides = array<i32: 1, 2, 1>} : memref<16x32x128xf32, #tpu.memory_space<vmem>>, vector<2x2x128xf32>
    %c0_249 = arith.constant 0 : index
    %c1_250 = arith.constant 1 : index
    %c0_251 = arith.constant 0 : index
    %249 = tpu.strided_load %arg20[%c0_249, %c1_250, %c0_251] {strides = array<i32: 1, 2, 1>} : memref<16x32x128xf32, #tpu.memory_space<vmem>>, vector<2x2x128xf32>
    %250 = arith.maximumf %248, %249 : vector<2x2x128xf32>
    %c0_252 = arith.constant 0 : index
    %c0_253 = arith.constant 0 : index
    %251 = vector.load %arg16[%c0_252, %c0_253] : memref<1x128xf32, #tpu.memory_space<vmem>>, vector<1x128xf32>
    %252 = vector.shape_cast %251 : vector<1x128xf32> to vector<128xf32>
    %253 = vector.shape_cast %252 : vector<128xf32> to vector<1x1x128xf32>
    %254 = vector.broadcast %253 : vector<1x1x128xf32> to vector<2x2x128xf32>
    %255 = arith.mulf %250, %254 : vector<2x2x128xf32>
    %c0_254 = arith.constant 0 : index
    %c0_255 = arith.constant 0 : index
    %256 = vector.load %arg17[%c0_254, %c0_255] : memref<1x128xf32, #tpu.memory_space<vmem>>, vector<1x128xf32>
    %257 = vector.shape_cast %256 : vector<1x128xf32> to vector<128xf32>
    %258 = vector.shape_cast %257 : vector<128xf32> to vector<1x1x128xf32>
    %259 = vector.broadcast %258 : vector<1x1x128xf32> to vector<2x2x128xf32>
    %260 = arith.addf %255, %259 : vector<2x2x128xf32>
    %c0_256 = arith.constant 0 : index
    %c0_257 = arith.constant 0 : index
    %c0_258 = arith.constant 0 : index
    %c0_259 = arith.constant 0 : index
    %261 = vector.load %arg18[%c0_256, %c0_257, %c0_258, %c0_259] : memref<1x2x2x128xf32, #tpu.memory_space<vmem>>, vector<1x2x2x128xf32>
    %262 = vector.shape_cast %261 : vector<1x2x2x128xf32> to vector<2x2x128xf32>
    %263 = vector.shape_cast %260 : vector<2x2x128xf32> to vector<1x2x2x128xf32>
    tpu.vector_store %arg18[%c0_256, %c0_257, %c0_258, %c0_259], %263 {strides = array<i32>} : memref<1x2x2x128xf32, #tpu.memory_space<vmem>>, vector<1x2x2x128xf32>,
    return
  }
  func.func @transform_0(%arg0: i32) -> (i32, i32, i32, i32) {
    %c0_i32 = arith.constant 0 : i32
    %c0_i32_0 = arith.constant 0 : i32
    %c0_i32_1 = arith.constant 0 : i32
    %c0_i32_2 = arith.constant 0 : i32
    return %arg0, %c0_i32, %c0_i32_0, %c0_i32_1 : i32, i32, i32, i32
  }
  func.func @transform_1(%arg0: i32) -> (i32, i32, i32) {
    %c0_i32 = arith.constant 0 : i32
    %c0_i32_0 = arith.constant 0 : i32
    %c0_i32_1 = arith.constant 0 : i32
    %c0_i32_2 = arith.constant 0 : i32
    return %c0_i32, %c0_i32_0, %c0_i32_1 : i32, i32, i32
  }
  func.func @transform_2(%arg0: i32) -> (i32, i32) {
    %c0_i32 = arith.constant 0 : i32
    %c0_i32_0 = arith.constant 0 : i32
    %c0_i32_1 = arith.constant 0 : i32
    return %c0_i32, %c0_i32_0 : i32, i32
  }
  func.func @transform_3(%arg0: i32) -> (i32, i32) {
    %c0_i32 = arith.constant 0 : i32
    %c0_i32_0 = arith.constant 0 : i32
    %c0_i32_1 = arith.constant 0 : i32
    return %c0_i32, %c0_i32_0 : i32, i32
  }
  func.func @transform_4(%arg0: i32) -> (i32, i32) {
    %c0_i32 = arith.constant 0 : i32
    %c0_i32_0 = arith.constant 0 : i32
    %c0_i32_1 = arith.constant 0 : i32
    return %c0_i32, %c0_i32_0 : i32, i32
  }
  func.func @transform_5(%arg0: i32) -> (i32, i32, i32) {
    %c0_i32 = arith.constant 0 : i32
    %c0_i32_0 = arith.constant 0 : i32
    %c0_i32_1 = arith.constant 0 : i32
    %c0_i32_2 = arith.constant 0 : i32
    return %c0_i32, %c0_i32_0, %c0_i32_1 : i32, i32, i32
  }
  func.func @transform_6(%arg0: i32) -> (i32, i32) {
    %c0_i32 = arith.constant 0 : i32
    %c0_i32_0 = arith.constant 0 : i32
    %c0_i32_1 = arith.constant 0 : i32
    return %c0_i32, %c0_i32_0 : i32, i32
  }
  func.func @transform_7(%arg0: i32) -> (i32, i32) {
    %c0_i32 = arith.constant 0 : i32
    %c0_i32_0 = arith.constant 0 : i32
    %c0_i32_1 = arith.constant 0 : i32
    return %c0_i32, %c0_i32_0 : i32, i32
  }
  func.func @transform_8(%arg0: i32) -> (i32, i32) {
    %c0_i32 = arith.constant 0 : i32
    %c0_i32_0 = arith.constant 0 : i32
    %c0_i32_1 = arith.constant 0 : i32
    return %c0_i32, %c0_i32_0 : i32, i32
  }
  func.func @transform_9(%arg0: i32) -> (i32, i32, i32) {
    %c0_i32 = arith.constant 0 : i32
    %c0_i32_0 = arith.constant 0 : i32
    %c0_i32_1 = arith.constant 0 : i32
    %c0_i32_2 = arith.constant 0 : i32
    return %c0_i32, %c0_i32_0, %c0_i32_1 : i32, i32, i32
  }
  func.func @transform_10(%arg0: i32) -> (i32, i32) {
    %c0_i32 = arith.constant 0 : i32
    %c0_i32_0 = arith.constant 0 : i32
    %c0_i32_1 = arith.constant 0 : i32
    return %c0_i32, %c0_i32_0 : i32, i32
  }
  func.func @transform_11(%arg0: i32) -> (i32, i32) {
    %c0_i32 = arith.constant 0 : i32
    %c0_i32_0 = arith.constant 0 : i32
    %c0_i32_1 = arith.constant 0 : i32
    return %c0_i32, %c0_i32_0 : i32, i32
  }
  func.func @transform_12(%arg0: i32) -> (i32, i32) {
    %c0_i32 = arith.constant 0 : i32
    %c0_i32_0 = arith.constant 0 : i32
    %c0_i32_1 = arith.constant 0 : i32
    return %c0_i32, %c0_i32_0 : i32, i32
  }
  func.func @transform_13(%arg0: i32) -> (i32, i32, i32) {
    %c0_i32 = arith.constant 0 : i32
    %c0_i32_0 = arith.constant 0 : i32
    %c0_i32_1 = arith.constant 0 : i32
    %c0_i32_2 = arith.constant 0 : i32
    return %c0_i32, %c0_i32_0, %c0_i32_1 : i32, i32, i32
  }
  func.func @transform_14(%arg0: i32) -> (i32, i32) {
    %c0_i32 = arith.constant 0 : i32
    %c0_i32_0 = arith.constant 0 : i32
    %c0_i32_1 = arith.constant 0 : i32
    return %c0_i32, %c0_i32_0 : i32, i32
  }
  func.func @transform_15(%arg0: i32) -> (i32, i32) {
    %c0_i32 = arith.constant 0 : i32
    %c0_i32_0 = arith.constant 0 : i32
    %c0_i32_1 = arith.constant 0 : i32
    return %c0_i32, %c0_i32_0 : i32, i32
  }
  func.func @transform_16(%arg0: i32) -> (i32, i32) {
    %c0_i32 = arith.constant 0 : i32
    %c0_i32_0 = arith.constant 0 : i32
    %c0_i32_1 = arith.constant 0 : i32
    return %c0_i32, %c0_i32_0 : i32, i32
  }
  func.func @transform_17(%arg0: i32) -> (i32, i32, i32, i32) {
    %c0_i32 = arith.constant 0 : i32
    %c0_i32_0 = arith.constant 0 : i32
    %c0_i32_1 = arith.constant 0 : i32
    %c0_i32_2 = arith.constant 0 : i32
    return %arg0, %c0_i32, %c0_i32_0, %c0_i32_1 : i32, i32, i32, i32
  }
}

</mosaic_0001>

<bundles_post_ra>
// kernel: clevr_encode.1
= control target key start
LH: loop header
LB: loop body
LE: loop exit
PB: predicated region body
PF: predicated region fallthrough
CT: control target
= control target key end

     0   :  { %s16347_s0 = inlined_call_operand.vmem [shape: bf16[2,34,32,24], index: 0, kind: input, shape index: {}]   ;;  %s16348_s1 = inlined_call_operand.vmem [shape: bf16[3,24,128], index: 1, kind: input, shape index: {}]   ;;  %s16349_s2 = inlined_call_operand.vmem [shape: f32[1,128], index: 2, kind: input, shape index: {}]   ;;  %s16350_s3 = inlined_call_operand.vmem [shape: f32[1,128], index: 3, kind: input, shape index: {}]   ;;  %s16351_s4 = inlined_call_operand.vmem [shape: f32[1,128], index: 4, kind: input, shape index: {}]   ;;  %s16352_s5 = inlined_call_operand.vmem [shape: bf16[3,384,128], index: 5, kind: input, shape index: {}]   ;;  %s16353_s6 = inlined_call_operand.vmem [shape: f32[1,128], index: 6, kind: input, shape index: {}]   ;;  %s16354_s7 = inlined_call_operand.vmem [shape: f32[1,128], index: 7, kind: input, shape index: {}]   ;;  %s16355_s8 = inlined_call_operand.vmem [shape: f32[1,128], index: 8, kind: input, shape index: {}]   ;;  %s16356_s9 = inlined_call_operand.vmem [shape: bf16[3,384,128], index: 9, kind: input, shape index: {}]   ;;  %s16357_s10 = inlined_call_operand.vmem [shape: f32[1,128], index: 10, kind: input, shape index: {}]   ;;  %s16358_s11 = inlined_call_operand.vmem [shape: f32[1,128], index: 11, kind: input, shape index: {}]   ;;  %s16359_s12 = inlined_call_operand.vmem [shape: f32[1,128], index: 12, kind: input, shape index: {}]   ;;  %s16360_s13 = inlined_call_operand.vmem [shape: bf16[3,384,128], index: 13, kind: input, shape index: {}]   ;;  %s16361_s14 = inlined_call_operand.vmem [shape: f32[1,128], index: 14, kind: input, shape index: {}]   ;;  %s16362_s15 = inlined_call_operand.vmem [shape: f32[1,128], index: 15, kind: input, shape index: {}]   ;;  %s16363_s16 = inlined_call_operand.vmem [shape: f32[1,128], index: 16, kind: input, shape index: {}]   ;;  %s16364_s17 = inlined_call_operand.hbm [shape: f32[2,2,2,128], index: 17, kind: output, shape index: {}]  }
   0x1   :  { %16379 = sst [smem:[#allocation110_spill]] %s16347_s0 }
   0x2   :  { %16380 = sst [smem:[#allocation111_spill]] %s16348_s1 }
   0x3   :  { %16381 = sst [smem:[#allocation112_spill]] %s16349_s2 }
   0x4   :  { %16382 = sst [smem:[#allocation113_spill]] %s16350_s3 }
   0x5   :  { %16383 = sst [smem:[#allocation114_spill]] %s16351_s4 }
   0x6   :  { %22 = vsyncpa [#allocation5], 0 }
   0x7   :  { %24 = vsyncpa [#allocation5 + $0x1], 0  ;;  %s13074_s24 = smov 0   ;;  %s13076_s25 = smov 0  }
   0x8   :  { %s13078_s26 = smov 0   ;;  %s13080_s27 = smov 0  }
   0x9 LB: > { %16384 = sst [smem:[#allocation7_spill]] %s12967_s24  ;;  %s13095_s28 = sadd.s32 4294967295, %s12979_s27   ;;  %s12979_s27 = sphi %s13080_s27, %s16655_s27   ;;  %s12975_s26 = sphi %s13078_s26, %s16657_s26   ;;  %s12971_s25 = sphi %s13076_s25, %s16659_s25   ;;  %s12967_s24 = sphi %s13074_s24, %s16658_s24  }
   0xa   : > { %16385 = sst [smem:[#allocation8_spill]] %s12975_s26  ;;  %s10032_s29 = sadd.s32 4294967294, %s12979_s27  }
   0xb   : > { %16386 = sst [smem:[#allocation9_spill]] %s12979_s27  ;;  %s13099_s0 = sadd.s32 1, %s12979_s27  }
   0xc   : > { %16387 = sst [smem:[#allocation10_spill]] %s13099_s0  ;;  %s399_s30 = sadd.s32 1, %s12975_s26 }
   0xd   : > { %s396_s18 = ssub.s32 %s12979_s27, %s13099_s0  ;;  %p409_p0 = scmp.ne.s32.totalorder %s12975_s26, %s12971_s25 }
   0xe   : > { %p397_p1 = scmp.eq.s32.totalorder %s396_s18, 0  ;;  %p410_p2 = scmp.eq.s32.totalorder %s13095_s28, 1 }
   0xf   : > { %p415_p3 = scmp.ne.s32.totalorder %s12971_s25, %s12967_s24  ;;  %p416_p4 = scmp.eq.s32.totalorder %s10032_s29, 1 }
  0x10   : > { %s13110_s19 = scalar_select %p397_p1, %s12975_s26, %s399_s30  }
  0x11   : > { %p13112_p5 = por %p410_p2, %p409_p0  ;;  %p13116_p6 = por %p416_p4, %p415_p3 }
  0x12   : > { %16388 = sst [smem:[#allocation11_spill]] %s13110_s19  ;;  %p10035_p7 = scmp.ge.s32.totalorder %s12979_s27, 1 }
  0x13   : > { %s16389_s1 = scalar_select %p13112_p5, 1, 0 }
  0x14   : > { %s16391_s20 = scalar_select %p13116_p6, 1, 0 }
  0x15   : > { %16390 = sst [smem:[#allocation12_spill]] %s16389_s1  ;;  %p490_p8 = scmp.lt.s32.totalorder %s12979_s27, 3 }
  0x16   : > { %16392 = sst [smem:[#allocation13_spill]] %s16391_s20 }
  0x17   : > { %p491_p9 = pnand %p10035_p7, %p490_p8 }
  0x19   : > { %494 = sbr.rel (%p491_p9) target bundleno = 2983 (0xba7), region = 88 }
  0x1e   : > { %s16393_s23 = sld [smem:[#allocation111_spill]]  ;;  %vm1334_vm0 = vcmask 1043456   ;;  %p542_p10 = scmp.lt.s32.totalorder %s13095_s28, 1  ;;  %vm1141_vm1 = vcmask 195584  }
  0x1f   : > { %s16394_s27 = sld [smem:[#allocation110_spill]]  ;;  %s539_s19 = sand.u32 1, %s12971_s25  }
  0x20   : > { %s543_s26 = scalar_select %p542_p10, %s13095_s28, 1 }
  0x21   : > { %s16395_s2 = sld [smem:[#allocation112_spill]]  ;;  %s12840_s21 = sshll.u32 %s13095_s28, 2 }
  0x22   : > { %s12841_s29 = smul.u32 544, %s543_s26  ;;  %s16396_s3 = sld [smem:[#allocation113_spill]] }
  0x23   : > { %s16397_s4 = sld [smem:[#allocation114_spill]]  ;;  %s10036_s26 = sshll.u32 %s539_s19, 2 }
  0x24   : > { %v10168_v0 = vld [vmem:[%s16393_s23 + $0x14] sm:$0xf]  ;;  %v678_v1 = vld [vmem:[%s16393_s23 + $0x8] sm:$0xf]  ;;  %v10947_v4 = vld [vmem:[%s16393_s23 + $0x20] sm:$0xf] }
  0x25   : > { %v1137_v2 = vunpack.c.l.b16 %v10168_v0  ;;  %v1992_v3 = vunpack.c.l.b16 %v678_v1  ;;  %v2978_v5 = vunpack.c.l.b16 %v10947_v4  ;;  %v12558_v11 = vld [vmem:[%s16393_s23 + $0xc] sm:$0xff]  ;;  %v12493_v13 = vld [vmem:[%s16393_s23] sm:$0xff]  ;;  %v12623_v14 = vld [vmem:[%s16393_s23 + $0x18] sm:$0xff]  ;;  %s13145_s1 = scalar_lea.vmem %s16394_s27, %s12841_s29  ;;  %s541_s20 = scalar_lea.vmem [#allocation4], %s10036_s26 }
  0x26   : > { %v12494_v15 = vld [vmem:[%s13145_s1 + $0x10] sm:$0xff]  ;;  %v12429_v16 = vld [vmem:[%s13145_s1] sm:$0xff]  ;;  %v12495_v18 = vld [vmem:[%s13145_s1 + $0x18] sm:$0xff]  ;;  %s9966_s29 = scalar_lea.hbm %s16364_s17, %s12840_s21  ;;  %s9967_s18 = sshll.u32 %s541_s20, 4  ;;  %s9968_s18 = int_to_ptr.vmem [resolvable:$true] %s9967_s18 }
  0x27   : > { %v1139_v6 = vpack.c.b16 %v1137_v2, %v1137_v2  ;;  %v1994_v7 = vpack.c.b16 %v1992_v3, %v1992_v3  ;;  %v2980_v8 = vpack.c.b16 %v2978_v5, %v2978_v5  ;;  %v12559_v17 = vld [vmem:[%s13145_s1 + $0x20] sm:$0xff]  ;;  %v12430_v19 = vld [vmem:[%s13145_s1 + $0x8] sm:$0xff]  ;;  %v12431_v22 = vld [vmem:[%s13145_s1 + $0x10] sm:$0xff]  ;;  %v12981_v5 = vmov 0.0   ;;  %s9969_s24 = sshll.u32 %s9966_s29, 4  ;;  %s9955_s26 = scalar_lea.sflag [#allocation5], %s539_s19  ;;  %s9970_s24 = int_to_ptr.hbm [resolvable:$true] %s9969_s24 }
  0x28   : > { %v12560_v20 = vld [vmem:[%s13145_s1 + $0x28] sm:$0xff]  ;;  %v12496_v21 = vld [vmem:[%s13145_s1 + $0x20] sm:$0xff]  ;;  %v12561_v23 = vld [vmem:[%s13145_s1 + $0x30] sm:$0xff]  ;;  %4517 = vst [vmem:[#allocation2 + $0x18] sm:$0x1] %v12981_v5  ;;  %s12931_s27 = sshra.s32 %s9970_s24, 4  ;;  %s12932_s27 = int_to_ptr.hbm [resolvable:$true] %s12931_s27 }
  0x29   : > { %v1336_v9 = vsel %vm1334_vm0, %v1139_v6, 0  ;;  %v2189_v10 = vsel %vm1334_vm0, %v1994_v7, 0  ;;  %v3175_v12 = vsel %vm1334_vm0, %v2980_v8, 0  ;;  %v12497_v24 = vld [vmem:[%s13145_s1 + $0x28] sm:$0xff]  ;;  %v12432_v25 = vld [vmem:[%s13145_s1 + $0x18] sm:$0xff]  ;;  %v12498_v27 = vld [vmem:[%s13145_s1 + $0x30] sm:$0xff]  ;;  %p12938_p0 = scmp.lt.s32.totalorder %s12932_s27, %s16364_s17 }
  0x2a   : > { %1344 = vmatpush.bf16.msra.mxu0 %v1336_v9  ;;  %2197 = vmatpush.bf16.msra.mxu1 %v2189_v10  ;;  %v12562_v26 = vld [vmem:[%s13145_s1 + $0x38] sm:$0xff]  ;;  %v12433_v28 = vld [vmem:[%s13145_s1 + $0x20] sm:$0xff]  ;;  %v12434_v31 = vld [vmem:[%s13145_s1 + $0x28] sm:$0xff]  ;;  %4509 = vst [vmem:[#allocation2] sm:$0xff] %v12981_v5  ;;  %s12933_s28 = scalar_lea.hbm %s12932_s27, 4 }
  0x2b   : > { %3183 = vmatpush.bf16.msra.mxu2 %v3175_v12  ;;  %v12563_v29 = vld [vmem:[%s13145_s1 + $0x40] sm:$0xff]  ;;  %v12499_v30 = vld [vmem:[%s13145_s1 + $0x38] sm:$0xff]  ;;  %v12564_v32 = vld [vmem:[%s13145_s1 + $0x48] sm:$0xff]  ;;  %4510 = vst [vmem:[#allocation2 + $0x8] sm:$0xff] %v12981_v5  ;;  %p12934_p11 = scmp.ne.s32.totalorder %s12932_s27, %s12933_s28 }
  0x2c   : > { %v12500_v33 = vld [vmem:[%s13145_s1 + $0x40] sm:$0xff]  ;;  %v12435_v34 = vld [vmem:[%s13145_s1 + $0x30] sm:$0xff]  ;;  %v12501_v36 = vld [vmem:[%s13145_s1 + $0x48] sm:$0xff]  ;;  %4511 = vst [vmem:[#allocation2 + $0x10] sm:$0x3] %v12981_v5 }
  0x2d   : > { %v12565_v35 = vld [vmem:[%s13145_s1 + $0x50] sm:$0xff]  ;;  %v12436_v37 = vld [vmem:[%s13145_s1 + $0x38] sm:$0xff]  ;;  %v12437_v40 = vld [vmem:[%s13145_s1 + $0x40] sm:$0xff]  ;;  %4513 = vst [vmem:[#allocation2 + $0x198] sm:$0xff] %v12981_v5  ;;  %p12935_p12 = pnand %p12934_p11, %p13112_p5 }
  0x2e   : > { %1345 = vmatpush.bf16.msra.mxu0 %v12558_v11  ;;  %2198 = vmatpush.bf16.msra.mxu1 %v12493_v13  ;;  %v12566_v38 = vld [vmem:[%s13145_s1 + $0x58] sm:$0xff]  ;;  %v12502_v39 = vld [vmem:[%s13145_s1 + $0x50] sm:$0xff]  ;;  %v12567_v43 = vld [vmem:[%s13145_s1 + $0x60] sm:$0xff]  ;;  %4514 = vst [vmem:[#allocation2 + $0x1a0] sm:$0xff] %v12981_v5 }
  0x2f   : > { %3184 = vmatpush.bf16.msra.mxu2 %v12623_v14  ;;  %v12503_v48 = vld [vmem:[%s13145_s1 + $0x58] sm:$0xff]  ;;  %v12438_v49 = vld [vmem:[%s13145_s1 + $0x48] sm:$0xff]  ;;  %v12504_v58 = vld [vmem:[%s13145_s1 + $0x60] sm:$0xff]  ;;  %4515 = vst [vmem:[#allocation2 + $0x1a8] sm:$0x3] %v12981_v5  ;;  %p12936_p13 = pneg %p12935_p12 }
  0x30   : > { %v12568_v52 = vld [vmem:[%s13145_s1 + $0x68] sm:$0xff]  ;;  %v12439_v59 = vld [vmem:[%s13145_s1 + $0x50] sm:$0xff]  ;;  %v13219_v0 = vld [vmem:[%s16395_s2] ss:$0 sm:$0xff]  ;;  %4518 = vst [vmem:[#allocation2 + $0x30] sm:$0x1] %v12981_v5 }
  0x31   : > { %10429 = vmatmul.msk.bf16.vlgmr.msra.gmra.mxu0 %vm1141_vm1, %v12494_v15  ;;  %10753 = vmatmul.msk.bf16.vlgmr.msra.gmra.mxu1 %vm1141_vm1, %v12429_v16  ;;  %v12569_v62 = vld [vmem:[%s13145_s1 + $0x70] sm:$0xff]  ;;  %v12655_v2 = vld [vmem:[%s16352_s5 + $0xf8] sm:$0xff]  ;;  %v12653_v15 = vld [vmem:[%s16352_s5 + $0xe8] sm:$0xff]  ;;  %4519 = vst [vmem:[#allocation2 + $0x48] sm:$0x1] %v12981_v5 }
  0x32   : > { %11208 = vmatmul.msk.bf16.vlgmr.msra.gmra.mxu2 %vm1141_vm1, %v12559_v17  ;;  %5782 = vmatpush.bf16.msra.mxu3 %v12655_v2  ;;  %v12654_v10 = vld [vmem:[%s16352_s5 + $0xf0] sm:$0xff]  ;;  %4520 = vst [vmem:[#allocation2 + $0x60] sm:$0x1] %v12981_v5 }
  0x33   : > { %4521 = vst [vmem:[#allocation2 + $0x78] sm:$0x1] %v12981_v5 }
  0x34   : > { %4522 = vst [vmem:[#allocation2 + $0x90] sm:$0x1] %v12981_v5 }
  0x35   : > { %4523 = vst [vmem:[#allocation2 + $0xa8] sm:$0x1] %v12981_v5 }
  0x36   : > { %5783 = vmatpush.bf16.msra.mxu3 %v12654_v10  ;;  %4524 = vst [vmem:[#allocation2 + $0xc0] sm:$0x1] %v12981_v5 }
  0x37   : > { %4525 = vst [vmem:[#allocation2 + $0xd8] sm:$0x1] %v12981_v5 }
  0x38   : > { %4526 = vst [vmem:[#allocation2 + $0xf0] sm:$0x1] %v12981_v5 }
  0x39   : > { %4527 = vst [vmem:[#allocation2 + $0x108] sm:$0x1] %v12981_v5 }
  0x3a   : > { %5784 = vmatpush.bf16.msra.mxu3 %v12653_v15  ;;  %4528 = vst [vmem:[#allocation2 + $0x120] sm:$0x1] %v12981_v5 }
  0x3b   : > { %4529 = vst [vmem:[#allocation2 + $0x138] sm:$0x1] %v12981_v5 }
  0x3c   : > { %4530 = vst [vmem:[#allocation2 + $0x150] sm:$0x1] %v12981_v5 }
  0x3d   : > { %4531 = vst [vmem:[#allocation2 + $0x168] sm:$0x1] %v12981_v5 }
  0x3e   : > { %4532 = vst [vmem:[#allocation2 + $0x180] sm:$0x1] %v12981_v5 }
  0x3f   : > { %4533 = vst [vmem:[#allocation2 + $0x29] sm:$0x1] %v12981_v5 }
  0x40   : > { %4534 = vst [vmem:[#allocation2 + $0x41] sm:$0x1] %v12981_v5 }
  0x41   : > { %10430 = vmatmul.msk.bf16.gmra.mxu0 %vm1141_vm1, %v12495_v18  ;;  %10754 = vmatmul.msk.bf16.gmra.mxu1 %vm1141_vm1, %v12430_v19  ;;  %4535 = vst [vmem:[#allocation2 + $0x59] sm:$0x1] %v12981_v5 }
  0x42   : > { %11209 = vmatmul.msk.bf16.gmra.mxu2 %vm1141_vm1, %v12560_v20  ;;  %4536 = vst [vmem:[#allocation2 + $0x71] sm:$0x1] %v12981_v5 }
  0x43   : > { %4537 = vst [vmem:[#allocation2 + $0x89] sm:$0x1] %v12981_v5 }
  0x44   : > { %4538 = vst [vmem:[#allocation2 + $0xa1] sm:$0x1] %v12981_v5 }
  0x45   : > { %4539 = vst [vmem:[#allocation2 + $0xb9] sm:$0x1] %v12981_v5 }
  0x46   : > { %4540 = vst [vmem:[#allocation2 + $0xd1] sm:$0x1] %v12981_v5 }
  0x47   : > { %4541 = vst [vmem:[#allocation2 + $0xe9] sm:$0x1] %v12981_v5 }
  0x48   : > { %4542 = vst [vmem:[#allocation2 + $0x101] sm:$0x1] %v12981_v5 }
  0x49   : > { %4543 = vst [vmem:[#allocation2 + $0x119] sm:$0x1] %v12981_v5 }
  0x4a   : > { %4544 = vst [vmem:[#allocation2 + $0x131] sm:$0x1] %v12981_v5 }
  0x4b   : > { %4545 = vst [vmem:[#allocation2 + $0x149] sm:$0x1] %v12981_v5 }
  0x4c   : > { %4546 = vst [vmem:[#allocation2 + $0x161] sm:$0x1] %v12981_v5 }
  0x4d   : > { %4547 = vst [vmem:[#allocation2 + $0x179] sm:$0x1] %v12981_v5 }
  0x4e   : > { %4548 = vst [vmem:[#allocation2 + $0x191] sm:$0x1] %v12981_v5 }
  0x51   : > { %10431 = vmatmul.msk.bf16.gmra.mxu0 %vm1141_vm1, %v12496_v21  ;;  %10755 = vmatmul.msk.bf16.gmra.mxu1 %vm1141_vm1, %v12431_v22 }
  0x52   : > { %11210 = vmatmul.msk.bf16.gmra.mxu2 %vm1141_vm1, %v12561_v23  ;;  %v12505_v23 = vld [vmem:[%s13145_s1 + $0x68] sm:$0xff] }
  0x61   : > { %10432 = vmatmul.msk.bf16.gmra.mxu0 %vm1141_vm1, %v12497_v24  ;;  %10756 = vmatmul.msk.bf16.gmra.mxu1 %vm1141_vm1, %v12432_v25  ;;  %v12440_v24 = vld [vmem:[%s13145_s1 + $0x58] sm:$0xff] }
  0x62   : > { %11211 = vmatmul.msk.bf16.gmra.mxu2 %vm1141_vm1, %v12562_v26 }
  0x71   : > { %10433 = vmatmul.msk.bf16.gmra.mxu0 %vm1141_vm1, %v12498_v27  ;;  %10757 = vmatmul.msk.bf16.gmra.mxu1 %vm1141_vm1, %v12433_v28  ;;  %v12570_v28 = vld [vmem:[%s13145_s1 + $0x78] sm:$0xff] }
  0x72   : > { %11212 = vmatmul.msk.bf16.gmra.mxu2 %vm1141_vm1, %v12563_v29  ;;  %v12652_v29 = vld [vmem:[%s16352_s5 + $0xe0] sm:$0xff] }
  0x73   : > { %5785 = vmatpush.bf16.msra.mxu3 %v12652_v29 }
  0x81   : > { %10434 = vmatmul.msk.bf16.gmra.mxu0 %vm1141_vm1, %v12499_v30  ;;  %10758 = vmatmul.msk.bf16.gmra.mxu1 %vm1141_vm1, %v12434_v31 }
  0x82   : > { %11213 = vmatmul.msk.bf16.gmra.mxu2 %vm1141_vm1, %v12564_v32 }
  0x91   : > { %10435 = vmatmul.msk.bf16.gmra.mxu0 %vm1141_vm1, %v12500_v33  ;;  %10759 = vmatmul.msk.bf16.gmra.mxu1 %vm1141_vm1, %v12435_v34 }
  0x92   : > { %11214 = vmatmul.msk.bf16.gmra.mxu2 %vm1141_vm1, %v12565_v35  ;;  %v12651_v35 = vld [vmem:[%s16352_s5 + $0xd8] sm:$0xff] }
  0x93   : > { %5786 = vmatpush.bf16.msra.mxu3 %v12651_v35 }
  0xa1   : > { %10436 = vmatmul.msk.bf16.gmra.mxu0 %vm1141_vm1, %v12501_v36  ;;  %10760 = vmatmul.msk.bf16.gmra.mxu1 %vm1141_vm1, %v12436_v37 }
  0xa2   : > { %11215 = vmatmul.msk.bf16.gmra.mxu2 %vm1141_vm1, %v12566_v38 }
  0xae   : > { %v1347_v41 = vpop.f32.mrf.mxu0  ;;  %v2200_v42 = vpop.f32.mrf.mxu1 }
  0xaf   : > { %v2201_v56 = vadd.f32 %v2200_v42, %v1347_v41 }
  0xb1   : > { %10437 = vmatmul.msk.bf16.gmra.mxu0 %vm1141_vm1, %v12502_v39  ;;  %10761 = vmatmul.msk.bf16.gmra.mxu1 %vm1141_vm1, %v12437_v40 }
  0xb2   : > { %11216 = vmatmul.msk.bf16.gmra.mxu2 %vm1141_vm1, %v12567_v43 }
  0xb5   : > { %v3186_v44 = vpop.f32.mrf.mxu2 }
  0xb6   : > { %v1349_v45 = vpop.f32.mrf.mxu0  ;;  %v2202_v46 = vpop.f32.mrf.mxu1  ;;  %v3506_v63 = vadd.f32 %v3186_v44, %v2201_v56 }
  0xb7   : > { %v2203_v6 = vadd.f32 %v2202_v46, %v1349_v45  ;;  %v12650_v45 = vld [vmem:[%s16352_s5 + $0xd0] sm:$0xff] }
  0xb8   : > { %v3638_v3 = vadd.f32 %v13219_v0, %v3506_v63  ;;  %5787 = vmatpush.bf16.msra.mxu3 %v12650_v45 }
  0xba   : > { %v3894_v11 = vmul.f32 0.01, %v3638_v3  ;;  %vm3766_vm2 = vcmp.ge.f32.partialorder %v3638_v3, 0.0 }
  0xbc   : > { %v4022_v16 = vsel %vm3766_vm2, %v3638_v3, %v3894_v11  ;;  %v12648_v3 = vld [vmem:[%s16352_s5 + $0xc0] sm:$0xff] }
  0xbd   : > { %v3188_v47 = vpop.f32.mrf.mxu2 }
  0xbe   : > { %v1352_v50 = vpop.f32.mrf.mxu0  ;;  %v2205_v51 = vpop.f32.mrf.mxu1  ;;  %v3507_v12 = vadd.f32 %v3188_v47, %v2203_v6  ;;  %v13298_v6 = vld [vmem:[%s16397_s4] ss:$0 sm:$0xff] }
  0xbf   : > { %v2206_v17 = vadd.f32 %v2205_v51, %v1352_v50  ;;  %v12649_v50 = vld [vmem:[%s16352_s5 + $0xc8] sm:$0xff] }
  0xc0   : > { %v3639_v18 = vadd.f32 %v13219_v0, %v3507_v12  ;;  %5788 = vmatpush.bf16.msra.mxu3 %v12649_v50 }
  0xc1   : > { %10438 = vmatmul.msk.bf16.gmra.mxu0 %vm1141_vm1, %v12503_v48  ;;  %10762 = vmatmul.msk.bf16.gmra.mxu1 %vm1141_vm1, %v12438_v49 }
  0xc2   : > { %11217 = vmatmul.msk.bf16.gmra.mxu2 %vm1141_vm1, %v12568_v52  ;;  %v3895_v31 = vmul.f32 0.01, %v3639_v18  ;;  %vm3767_vm4 = vcmp.ge.f32.partialorder %v3639_v18, 0.0 }
  0xc4   : > { %v4023_v37 = vsel %vm3767_vm4, %v3639_v18, %v3895_v31  ;;  %5789 = vmatpush.bf16.msra.mxu3 %v12648_v3 }
  0xc5   : > { %v3191_v53 = vpop.f32.mrf.mxu2 }
  0xc6   : > { %v13207_v54 = vpop.f32.mrf.mxu0  ;;  %v13209_v55 = vpop.f32.mrf.mxu1  ;;  %v3508_v30 = vadd.f32 %v3191_v53, %v2206_v17 }
  0xc7   : > { %v2208_v41 = vadd.f32 %v13209_v55, %v13207_v54  ;;  %v13285_v55 = vld [vmem:[%s16396_s3] ss:$0 sm:$0xff] }
  0xc8   : > { %v3640_v36 = vadd.f32 %v13219_v0, %v3508_v30 }
  0xca   : > { %v3896_v46 = vmul.f32 0.01, %v3640_v36  ;;  %vm3768_vm6 = vcmp.ge.f32.partialorder %v3640_v36, 0.0 }
  0xcc   : > { %v4024_v51 = vsel %vm3768_vm6, %v3640_v36, %v3896_v46  ;;  %v12508_v36 = vld [vmem:[%s13145_s1 + $0x80] sm:$0xff] }
  0xcd   : > { %v13211_v57 = vpop.f32.mrf.mxu2 }
  0xce   : > { %v1357_v60 = vpop.f32.mrf.mxu0  ;;  %v2210_v61 = vpop.f32.mrf.mxu1  ;;  %v3509_v47 = vadd.f32 %v13211_v57, %v2208_v41 }
  0xcf   : > { %v2211_v1 = vadd.f32 %v2210_v61, %v1357_v60  ;;  %v12571_v60 = vld [vmem:[%s13145_s1 + $0x80] sm:$0xff] }
  0xd0   : > { %v3641_v52 = vadd.f32 %v13219_v0, %v3509_v47 }
  0xd1   : > { %10439 = vmatmul.msk.bf16.gmra.mxu0 %vm1141_vm1, %v12504_v58  ;;  %10763 = vmatmul.msk.bf16.gmra.mxu1 %vm1141_vm1, %v12439_v59  ;;  %v12506_v58 = vld [vmem:[%s13145_s1 + $0x70] sm:$0xff]  ;;  %v12441_v59 = vld [vmem:[%s13145_s1 + $0x60] sm:$0xff] }
  0xd2   : > { %11218 = vmatmul.msk.bf16.gmra.mxu2 %vm1141_vm1, %v12569_v62  ;;  %vm3769_vm8 = vcmp.ge.f32.partialorder %v3641_v52, 0.0 }
  0xd5   : > { %v3196_v4 = vpop.f32.mrf.mxu2 }
  0xd6   : > { %v3510_v7 = vadd.f32 %v3196_v4, %v2211_v1  ;;  %v1359_v8 = vpop.f32.mrf.mxu0  ;;  %v2212_v9 = vpop.f32.mrf.mxu1 }
  0xd7   : > { %v2213_v20 = vadd.f32 %v2212_v9, %v1359_v8 }
  0xd8   : > { %v3642_v13 = vadd.f32 %v13219_v0, %v3510_v7  ;;  %v3897_v7 = vmul.f32 0.01, %v3641_v52 }
  0xda   : > { %vm3770_vm3 = vcmp.ge.f32.partialorder %v3642_v13, 0.0  ;;  %v3898_v14 = vmul.f32 0.01, %v3642_v13  ;;  %v4025_v12 = vsel %vm3769_vm8, %v3641_v52, %v3897_v7 }
  0xdc   : > { %v4026_v19 = vsel %vm3770_vm3, %v3642_v13, %v3898_v14 }
  0xdd   : > { %v4150_v21 = vmax.f32 %v4022_v16, %v4026_v19  ;;  %v3198_v22 = vpop.f32.mrf.mxu2  ;;  %v12507_v19 = vld [vmem:[%s13145_s1 + $0x78] sm:$0xff] }
  0xde   : > { %v3511_v25 = vadd.f32 %v3198_v22, %v2213_v20  ;;  %v1362_v26 = vpop.f32.mrf.mxu0  ;;  %v2215_v27 = vpop.f32.mrf.mxu1  ;;  %v12442_v20 = vld [vmem:[%s13145_s1 + $0x68] sm:$0xff] }
  0xdf   : > { %4214 = vst [vmem:[#allocation3] sm:$0xff] %v4150_v21  ;;  %v2216_v34 = vadd.f32 %v2215_v27, %v1362_v26  ;;  %v12572_v21 = vld [vmem:[%s13145_s1 + $0x88] sm:$0xff] }
  0xe0   : > { %v3643_v32 = vadd.f32 %v13219_v0, %v3511_v25 }
  0xe1   : > { %10440 = vmatmul.msk.bf16.gmra.mxu0 %vm1141_vm1, %v12505_v23  ;;  %10764 = vmatmul.msk.bf16.gmra.mxu1 %vm1141_vm1, %v12440_v24 }
  0xe2   : > { %vm3771_vm5 = vcmp.ge.f32.partialorder %v3643_v32, 0.0  ;;  %v3899_v33 = vmul.f32 0.01, %v3643_v32  ;;  %11219 = vmatmul.msk.bf16.gmra.mxu2 %vm1141_vm1, %v12570_v28 }
  0xe4   : > { %v4027_v38 = vsel %vm3771_vm5, %v3643_v32, %v3899_v33 }
  0xe5   : > { %v4151_v39 = vmax.f32 %v4023_v37, %v4027_v38  ;;  %v3201_v40 = vpop.f32.mrf.mxu2 }
  0xe6   : > { %v3512_v42 = vadd.f32 %v3201_v40, %v2216_v34  ;;  %v1364_v43 = vpop.f32.mrf.mxu0  ;;  %v2217_v44 = vpop.f32.mrf.mxu1  ;;  %v12573_v40 = vld [vmem:[%s13145_s1 + $0x90] sm:$0xff] }
  0xe7   : > { %4215 = vst [vmem:[#allocation3 + $0x8] sm:$0xff] %v4151_v39  ;;  %v2218_v54 = vadd.f32 %v2217_v44, %v1364_v43  ;;  %v12443_v39 = vld [vmem:[%s13145_s1 + $0x70] sm:$0xff] }
  0xe8   : > { %v3644_v48 = vadd.f32 %v13219_v0, %v3512_v42 }
  0xea   : > { %vm3772_vm7 = vcmp.ge.f32.partialorder %v3644_v48, 0.0  ;;  %v3900_v49 = vmul.f32 0.01, %v3644_v48 }
  0xec   : > { %v4028_v53 = vsel %vm3772_vm7, %v3644_v48, %v3900_v49 }
  0xed   : > { %v4152_v56 = vmax.f32 %v4024_v51, %v4028_v53  ;;  %v3203_v57 = vpop.f32.mrf.mxu2 }
  0xee   : > { %v4278_v61 = vld [vmem:[#allocation3] ss:$2 sm:$0xff]  ;;  %v4342_v62 = vld [vmem:[#allocation3 + $0x1] ss:$2 sm:$0xff]  ;;  %v3513_v63 = vadd.f32 %v3203_v57, %v2218_v54  ;;  %v1367_v1 = vpop.f32.mrf.mxu0  ;;  %v2220_v2 = vpop.f32.mrf.mxu1 }
  0xef   : > { %4216 = vst [vmem:[#allocation3 + $0x10] sm:$0xff] %v4152_v56  ;;  %v4405_v4 = vmax.f32 %v4278_v61, %v4342_v62  ;;  %v2221_v34 = vadd.f32 %v2220_v2, %v1367_v1 }
  0xf0   : > { %v3645_v8 = vadd.f32 %v13219_v0, %v3513_v63 }
  0xf1   : > { %10441 = vmatmul.msk.bf16.gmra.mxu0 %vm1141_vm1, %v12506_v58  ;;  %10765 = vmatmul.msk.bf16.gmra.mxu1 %vm1141_vm1, %v12441_v59  ;;  %v4441_v9 = vmul.f32 %v13285_v55, %v4405_v4 }
  0xf2   : > { %vm3773_vm9 = vcmp.ge.f32.partialorder %v3645_v8, 0.0  ;;  %v3901_v10 = vmul.f32 0.01, %v3645_v8  ;;  %11220 = vmatmul.msk.bf16.gmra.mxu2 %vm1141_vm1, %v12571_v60 }
  0xf3   : > { %v4477_v11 = vadd.f32 %v13298_v6, %v4441_v9 }
  0xf4   : > { %v4029_v13 = vsel %vm3773_vm9, %v3645_v8, %v3901_v10  ;;  %v12509_v10 = vld [vmem:[%s13145_s1 + $0x88] sm:$0xff] }
  0xf5   : > { %v4153_v14 = vmax.f32 %v4025_v12, %v4029_v13  ;;  %v3206_v15 = vpop.f32.mrf.mxu2  ;;  %4549 = vst [vmem:[#allocation2 + $0x19] sm:$0xff] %v4477_v11  ;;  %v12444_v11 = vld [vmem:[%s13145_s1 + $0x78] sm:$0xff] }
  0xf6   : > { %v1369_v16 = vpop.f32.mrf.mxu0  ;;  %v2222_v17 = vpop.f32.mrf.mxu1  ;;  %v3514_v48 = vadd.f32 %v3206_v15, %v2221_v34  ;;  %v12574_v15 = vld [vmem:[%s13145_s1 + $0x98] sm:$0xff] }
  0xf7   : > { %4217 = vst [vmem:[#allocation3 + $0x18] sm:$0xff] %v4153_v14  ;;  %v2223_v56 = vadd.f32 %v2222_v17, %v1369_v16 }
  0xf8   : > { %v3646_v53 = vadd.f32 %v13219_v0, %v3514_v48 }
  0xfa   : > { %v3902_v60 = vmul.f32 0.01, %v3646_v53  ;;  %vm3774_vm10 = vcmp.ge.f32.partialorder %v3646_v53, 0.0 }
  0xfc   : > { %v5109_v27 = vld [vmem:[#allocation2 + $0x18] sm:$0xff]  ;;  %v4030_v1 = vsel %vm3774_vm10, %v3646_v53, %v3902_v60 }
  0xfd   : > { %v3208_v18 = vpop.f32.mrf.mxu2  ;;  %v13324_v28 = vld [vmem:[#allocation2 + $0x18] sm:$0xff]  ;;  %v5141_v35 = vpack.c.bf16 %v5109_v27, %v5109_v27 }
  0xfe   : > { %v4280_v22 = vld [vmem:[#allocation3 + $0x10] ss:$2 sm:$0xff]  ;;  %v4344_v23 = vld [vmem:[#allocation3 + $0x11] ss:$2 sm:$0xff]  ;;  %v1372_v24 = vpop.f32.mrf.mxu0  ;;  %v2225_v25 = vpop.f32.mrf.mxu1  ;;  %16398 = vst [vmem:[#allocation14_spill] sm:$0xff] %v13324_v28  ;;  %v3515_v61 = vadd.f32 %v3208_v18, %v2223_v56 }
  0xff   : > { %v4406_v26 = vmax.f32 %v4280_v22, %v4344_v23  ;;  %7657 = vst [vmem:[#allocation2 + $0x18] sm:$0x1] %v12981_v5  ;;  %v5333_v49 = vunpack.c.l.b16 %v5141_v35  ;;  %v2226_v3 = vadd.f32 %v2225_v25, %v1372_v24 }
 0x100   : > { %v3647_v2 = vadd.f32 %v13219_v0, %v3515_v61 }
 0x101   : > { %10442 = vmatmul.msk.bf16.gmra.mxu0 %vm1141_vm1, %v12507_v19  ;;  %10766 = vmatmul.msk.bf16.gmra.mxu1 %vm1141_vm1, %v12442_v20  ;;  %v4442_v29 = vmul.f32 %v13285_v55, %v4406_v26 }
 0x102   : > { %11221 = vmatmul.msk.bf16.gmra.mxu2 %vm1141_vm1, %v12572_v21  ;;  %v3903_v16 = vmul.f32 0.01, %v3647_v2  ;;  %vm3775_vm12 = vcmp.ge.f32.partialorder %v3647_v2, 0.0 }
 0x103   : > { %v4478_v30 = vadd.f32 %v13298_v6, %v4442_v29 }
 0x104   : > { %v4031_v21 = vsel %vm3775_vm12, %v3647_v2, %v3903_v16 }
 0x105   : > { %v3211_v31 = vpop.f32.mrf.mxu2  ;;  %4550 = vst [vmem:[#allocation2 + $0x21] sm:$0xff] %v4478_v30 }
 0x106   : > { %v13332_v32 = vpop.f32.mrf.mxu0  ;;  %v13334_v33 = vpop.f32.mrf.mxu1  ;;  %v3516_v17 = vadd.f32 %v3211_v31, %v2226_v3  ;;  %v12511_v3 = vld [vmem:[%s13145_s1 + $0x98] sm:$0xff] }
 0x107   : > { %v2228_v26 = vadd.f32 %v13334_v33, %v13332_v32 }
 0x108   : > { %v3648_v22 = vadd.f32 %v13219_v0, %v3516_v17 }
 0x10a   : > { %v3904_v31 = vmul.f32 0.01, %v3648_v22  ;;  %vm3776_vm14 = vcmp.ge.f32.partialorder %v3648_v22, 0.0 }
 0x10c   : > { %v5110_v37 = vld [vmem:[#allocation2 + $0x20] sm:$0xff] }
 0x10d   : > { %v13337_v38 = vpop.f32.mrf.mxu2  ;;  %v5142_v41 = vpack.c.bf16 %v5110_v37, %v5110_v37  ;;  %v13341_v42 = vld [vmem:[#allocation2 + $0x21] sm:$0xff]  ;;  %v4032_v37 = vsel %vm3776_vm14, %v3648_v22, %v3904_v31 }
 0x10e   : > { %v1377_v43 = vpop.f32.mrf.mxu0  ;;  %v2230_v44 = vpop.f32.mrf.mxu1  ;;  %v13343_v45 = vld [vmem:[#allocation2 + $0x1a] sm:$0xff]  ;;  %v3517_v34 = vadd.f32 %v13337_v38, %v2228_v26  ;;  %v12577_v26 = vld [vmem:[%s13145_s1 + $0xb0] sm:$0xff] }
 0x10f   : > { %v13345_v46 = vld [vmem:[#allocation2 + $0x1a] sm:$0xff]  ;;  %v5334_v50 = vunpack.c.l.b16 %v5142_v41  ;;  %v2231_v52 = vadd.f32 %v2230_v44, %v1377_v43  ;;  %v12510_v43 = vld [vmem:[%s13145_s1 + $0x90] sm:$0xff] }
 0x110   : > { %16399 = vst [vmem:[#allocation15_spill] sm:$0xff] %v13345_v46  ;;  %v13347_v47 = vld [vmem:[#allocation2 + $0x20] sm:$0xff] }
 0x111   : > { %16400 = vst [vmem:[#allocation16_spill] sm:$0xff] %v13347_v47  ;;  %10443 = vmatmul.msk.bf16.gmra.mxu0 %vm1141_vm1, %v12508_v36  ;;  %10767 = vmatmul.msk.bf16.gmra.mxu1 %vm1141_vm1, %v12443_v39  ;;  %v5365_v51 = vpack.c.b16 %v5334_v50, %v5333_v49  ;;  %v3649_v39 = vadd.f32 %v13219_v0, %v3517_v34  ;;  %v12445_v44 = vld [vmem:[%s13145_s1 + $0x80] sm:$0xff] }
 0x112   : > { %7665 = vst [vmem:[#allocation2 + $0x21] sm:$0x1] %v12981_v5  ;;  %11222 = vmatmul.msk.bf16.gmra.mxu2 %vm1141_vm1, %v12573_v40 }
 0x113   : > { %5790 = vmatmul.bf16.vlgmr.msra.gmra.mxu3 %v5365_v51  ;;  %vm3777_vm0 = vcmp.ge.f32.partialorder %v3649_v39, 0.0 }
 0x115   : > { %v3216_v54 = vpop.f32.mrf.mxu2 }
 0x116   : > { %v3518_v57 = vadd.f32 %v3216_v54, %v2231_v52  ;;  %v1379_v58 = vpop.f32.mrf.mxu0  ;;  %v2232_v59 = vpop.f32.mrf.mxu1  ;;  %v12575_v52 = vld [vmem:[%s13145_s1 + $0xa0] sm:$0xff]  ;;  %v3905_v54 = vmul.f32 0.01, %v3649_v39 }
 0x117   : > { %v2233_v7 = vadd.f32 %v2232_v59, %v1379_v58 }
 0x118   : > { %v3650_v62 = vadd.f32 %v13219_v0, %v3518_v57  ;;  %v4033_v60 = vsel %vm3777_vm0, %v3649_v39, %v3905_v54 }
 0x11a   : > { %vm3778_vm11 = vcmp.ge.f32.partialorder %v3650_v62, 0.0  ;;  %v3906_v63 = vmul.f32 0.01, %v3650_v62 }
 0x11c   : > { %v4034_v4 = vsel %vm3778_vm11, %v3650_v62, %v3906_v63 }
 0x11d   : > { %v4154_v8 = vmax.f32 %v4030_v1, %v4034_v4  ;;  %v3218_v9 = vpop.f32.mrf.mxu2  ;;  %v12446_v4 = vld [vmem:[%s13145_s1 + $0x88] sm:$0xff] }
 0x11e   : > { %v3519_v12 = vadd.f32 %v3218_v9, %v2233_v7  ;;  %v1382_v13 = vpop.f32.mrf.mxu0  ;;  %v2235_v14 = vpop.f32.mrf.mxu1  ;;  %v12576_v7 = vld [vmem:[%s13145_s1 + $0xa8] sm:$0xff] }
 0x11f   : > { %4218 = vst [vmem:[#allocation3 + $0x20] sm:$0xff] %v4154_v8  ;;  %v2236_v20 = vadd.f32 %v2235_v14, %v1382_v13 }
 0x120   : > { %v3651_v18 = vadd.f32 %v13219_v0, %v3519_v12 }
 0x121   : > { %10444 = vmatmul.msk.bf16.gmra.mxu0 %vm1141_vm1, %v12509_v10  ;;  %10768 = vmatmul.msk.bf16.gmra.mxu1 %vm1141_vm1, %v12444_v11 }
 0x122   : > { %vm3779_vm13 = vcmp.ge.f32.partialorder %v3651_v18, 0.0  ;;  %v3907_v19 = vmul.f32 0.01, %v3651_v18  ;;  %11223 = vmatmul.msk.bf16.gmra.mxu2 %vm1141_vm1, %v12574_v15 }
 0x124   : > { %v4035_v23 = vsel %vm3779_vm13, %v3651_v18, %v3907_v19 }
 0x125   : > { %v4155_v24 = vmax.f32 %v4031_v21, %v4035_v23  ;;  %v3221_v25 = vpop.f32.mrf.mxu2  ;;  %v12512_v23 = vld [vmem:[%s13145_s1 + $0xa0] sm:$0xff] }
 0x126   : > { %v3520_v27 = vadd.f32 %v3221_v25, %v2236_v20  ;;  %v1384_v29 = vpop.f32.mrf.mxu0  ;;  %v2237_v30 = vpop.f32.mrf.mxu1  ;;  %v12447_v25 = vld [vmem:[%s13145_s1 + $0x90] sm:$0xff] }
 0x127   : > { %4219 = vst [vmem:[#allocation3 + $0x28] sm:$0xff] %v4155_v24  ;;  %v2238_v32 = vadd.f32 %v2237_v30, %v1384_v29 }
 0x128   : > { %v3652_v35 = vadd.f32 %v13219_v0, %v3520_v27 }
 0x12a   : > { %vm3780_vm15 = vcmp.ge.f32.partialorder %v3652_v35, 0.0  ;;  %v3908_v36 = vmul.f32 0.01, %v3652_v35 }
 0x12c   : > { %v4036_v40 = vsel %vm3780_vm15, %v3652_v35, %v3908_v36 }
 0x12d   : > { %v4156_v33 = vmax.f32 %v4032_v37, %v4036_v40  ;;  %v3223_v41 = vpop.f32.mrf.mxu2 }
 0x12e   : > { %v4282_v48 = vld [vmem:[#allocation3 + $0x20] ss:$2 sm:$0xff]  ;;  %v4346_v49 = vld [vmem:[#allocation3 + $0x21] ss:$2 sm:$0xff]  ;;  %v3521_v50 = vadd.f32 %v3223_v41, %v2238_v32  ;;  %v1387_v51 = vpop.f32.mrf.mxu0  ;;  %v2240_v38 = vpop.f32.mrf.mxu1 }
 0x12f   : > { %4220 = vst [vmem:[#allocation3 + $0x30] sm:$0xff] %v4156_v33  ;;  %v4407_v53 = vmax.f32 %v4282_v48, %v4346_v49  ;;  %v2241_v22 = vadd.f32 %v2240_v38, %v1387_v51 }
 0x130   : > { %v3653_v56 = vadd.f32 %v13219_v0, %v3521_v50 }
 0x131   : > { %10445 = vmatmul.msk.bf16.gmra.mxu0 %vm1141_vm1, %v12510_v43  ;;  %10769 = vmatmul.msk.bf16.gmra.mxu1 %vm1141_vm1, %v12445_v44  ;;  %v4443_v57 = vmul.f32 %v13285_v55, %v4407_v53 }
 0x132   : > { %vm3781_vm2 = vcmp.ge.f32.partialorder %v3653_v56, 0.0  ;;  %v3909_v58 = vmul.f32 0.01, %v3653_v56  ;;  %11224 = vmatmul.msk.bf16.gmra.mxu2 %vm1141_vm1, %v12575_v52 }
 0x133   : > { %v4479_v59 = vadd.f32 %v13298_v6, %v4443_v57 }
 0x134   : > { %v4037_v61 = vsel %vm3781_vm2, %v3653_v56, %v3909_v58 }
 0x135   : > { %v4157_v62 = vmax.f32 %v4033_v60, %v4037_v61  ;;  %v3226_v63 = vpop.f32.mrf.mxu2  ;;  %4551 = vst [vmem:[#allocation2 + $0x31] sm:$0xff] %v4479_v59 }
 0x136   : > { %v1389_v1 = vpop.f32.mrf.mxu0  ;;  %v2242_v2 = vpop.f32.mrf.mxu1  ;;  %v3522_v33 = vadd.f32 %v3226_v63, %v2241_v22 }
 0x137   : > { %4221 = vst [vmem:[#allocation3 + $0x38] sm:$0xff] %v4157_v62  ;;  %v2243_v51 = vadd.f32 %v2242_v2, %v1389_v1 }
 0x138   : > { %v3654_v49 = vadd.f32 %v13219_v0, %v3522_v33 }
 0x13a   : > { %v3910_v54 = vmul.f32 0.01, %v3654_v49  ;;  %vm3782_vm3 = vcmp.ge.f32.partialorder %v3654_v49, 0.0 }
 0x13c   : > { %v5111_v9 = vld [vmem:[#allocation2 + $0x30] sm:$0xff]  ;;  %v4038_v59 = vsel %vm3782_vm3, %v3654_v49, %v3910_v54 }
 0x13d   : > { %v3228_v8 = vpop.f32.mrf.mxu2  ;;  %v13381_v10 = vld [vmem:[#allocation2 + $0x30] sm:$0xff]  ;;  %v5143_v24 = vpack.c.bf16 %v5111_v9, %v5111_v9 }
 0x13e   : > { %v13383_v11 = vld [vmem:[#allocation2 + $0x30] sm:$0xff]  ;;  %v4284_v12 = vld [vmem:[#allocation3 + $0x30] ss:$2 sm:$0xff]  ;;  %v4348_v13 = vld [vmem:[#allocation3 + $0x31] ss:$2 sm:$0xff]  ;;  %v1392_v14 = vpop.f32.mrf.mxu0  ;;  %v2245_v15 = vpop.f32.mrf.mxu1  ;;  %v3523_v56 = vadd.f32 %v3228_v8, %v2243_v51 }
 0x13f   : > { %16401 = vst [vmem:[#allocation17_spill] sm:$0xff] %v13383_v11  ;;  %v4408_v16 = vmax.f32 %v4284_v12, %v4348_v13  ;;  %v5335_v41 = vunpack.c.l.b16 %v5143_v24  ;;  %v2246_v61 = vadd.f32 %v2245_v15, %v1392_v14  ;;  %v12578_v13 = vld [vmem:[%s13145_s1 + $0xb8] sm:$0xff]  ;;  %v12449_v51 = vld [vmem:[%s13145_s1 + $0xa0] sm:$0xff] }
 0x140   : > { %7658 = vst [vmem:[#allocation2 + $0x30] sm:$0x1] %v12981_v5  ;;  %v3655_v60 = vadd.f32 %v13219_v0, %v3523_v56  ;;  %v12579_v56 = vld [vmem:[%s13145_s1 + $0xc0] sm:$0xff] }
 0x141   : > { %10446 = vmatmul.msk.bf16.gmra.mxu0 %vm1141_vm1, %v12511_v3  ;;  %10770 = vmatmul.msk.bf16.gmra.mxu1 %vm1141_vm1, %v12446_v4  ;;  %v4444_v17 = vmul.f32 %v13285_v55, %v4408_v16  ;;  %v12513_v3 = vld [vmem:[%s13145_s1 + $0xa8] sm:$0xff]  ;;  %v12448_v4 = vld [vmem:[%s13145_s1 + $0x98] sm:$0xff] }
 0x142   : > { %11225 = vmatmul.msk.bf16.gmra.mxu2 %vm1141_vm1, %v12576_v7  ;;  %v3911_v8 = vmul.f32 0.01, %v3655_v60  ;;  %vm3783_vm5 = vcmp.ge.f32.partialorder %v3655_v60, 0.0 }
 0x143   : > { %v4480_v18 = vadd.f32 %v13298_v6, %v4444_v17 }
 0x145   : > { %v3231_v19 = vpop.f32.mrf.mxu2  ;;  %4552 = vst [vmem:[#allocation2 + $0x39] sm:$0xff] %v4480_v18  ;;  %v4039_v18 = vsel %vm3783_vm5, %v3655_v60, %v3911_v8 }
 0x146   : > { %v13391_v20 = vpop.f32.mrf.mxu0  ;;  %v13393_v21 = vpop.f32.mrf.mxu1  ;;  %v3524_v16 = vadd.f32 %v3231_v19, %v2246_v61 }
 0x147   : > { %v2248_v19 = vadd.f32 %v13393_v21, %v13391_v20 }
 0x148   : > { %v3656_v22 = vadd.f32 %v13219_v0, %v3524_v16 }
 0x14a   : > { %vm3784_vm7 = vcmp.ge.f32.partialorder %v3656_v22, 0.0 }
 0x14c   : > { %v5112_v27 = vld [vmem:[#allocation2 + $0x38] sm:$0xff] }
 0x14d   : > { %v13398_v29 = vpop.f32.mrf.mxu2  ;;  %v5144_v30 = vpack.c.bf16 %v5112_v27, %v5112_v27  ;;  %v13400_v31 = vld [vmem:[#allocation2 + $0x38] sm:$0xff] }
 0x14e   : > { %v13402_v34 = vld [vmem:[#allocation2 + $0x39] sm:$0xff]  ;;  %v1397_v36 = vpop.f32.mrf.mxu0  ;;  %v2250_v37 = vpop.f32.mrf.mxu1 }
 0x14f   : > { %v13404_v35 = vld [vmem:[#allocation2 + $0x32] sm:$0xff]  ;;  %v5336_v43 = vunpack.c.l.b16 %v5144_v30  ;;  %v2251_v48 = vadd.f32 %v2250_v37, %v1397_v36  ;;  %v3912_v36 = vmul.f32 0.01, %v3656_v22  ;;  %v3525_v37 = vadd.f32 %v13398_v29, %v2248_v19 }
 0x150   : > { %v13406_v39 = vld [vmem:[#allocation2 + $0x32] sm:$0xff] }
 0x151   : > { %16402 = vst [vmem:[#allocation18_spill] sm:$0xff] %v13406_v39  ;;  %v13408_v40 = vld [vmem:[#allocation2 + $0x38] sm:$0xff]  ;;  %10447 = vmatmul.msk.bf16.gmra.mxu0 %vm1141_vm1, %v12512_v23  ;;  %10771 = vmatmul.msk.bf16.gmra.mxu1 %vm1141_vm1, %v12447_v25  ;;  %v5366_v44 = vpack.c.b16 %v5336_v43, %v5335_v41  ;;  %v4040_v43 = vsel %vm3784_vm7, %v3656_v22, %v3912_v36 }
 0x152   : > { %16403 = vst [vmem:[#allocation19_spill] sm:$0xff] %v13408_v40  ;;  %v13410_v32 = vld [vmem:[#allocation2 + $0x39] sm:$0xff]  ;;  %11226 = vmatmul.msk.bf16.gmra.mxu2 %vm1141_vm1, %v12577_v26 }
 0x153   : > { %16404 = vst [vmem:[#allocation20_spill] sm:$0xff] %v13410_v32  ;;  %5795 = vmatmul.bf16.gmra.mxu3 %v5366_v44  ;;  %v3657_v44 = vadd.f32 %v13219_v0, %v3525_v37  ;;  %v12516_v37 = vld [vmem:[%s13145_s1 + $0xc0] sm:$0xff] }
 0x154   : > { %7666 = vst [vmem:[#allocation2 + $0x39] sm:$0x1] %v12981_v5 }
 0x155   : > { %v3236_v50 = vpop.f32.mrf.mxu2  ;;  %vm3785_vm9 = vcmp.ge.f32.partialorder %v3657_v44, 0.0 }
 0x156   : > { %v3526_v38 = vadd.f32 %v3236_v50, %v2251_v48  ;;  %v1399_v52 = vpop.f32.mrf.mxu0  ;;  %v2252_v53 = vpop.f32.mrf.mxu1  ;;  %v12514_v50 = vld [vmem:[%s13145_s1 + $0xb0] sm:$0xff] }
 0x157   : > { %v2253_v63 = vadd.f32 %v2252_v53, %v1399_v52 }
 0x158   : > { %v3658_v57 = vadd.f32 %v13219_v0, %v3526_v38 }
 0x15a   : > { %vm3786_vm4 = vcmp.ge.f32.partialorder %v3658_v57, 0.0  ;;  %v3914_v58 = vmul.f32 0.01, %v3658_v57 }
 0x15c   : > { %v4042_v62 = vsel %vm3786_vm4, %v3658_v57, %v3914_v58  ;;  %v3913_v58 = vmul.f32 0.01, %v3657_v44 }
 0x15d   : > { %v4158_v1 = vmax.f32 %v4038_v59, %v4042_v62  ;;  %v3238_v2 = vpop.f32.mrf.mxu2 }
 0x15e   : > { %v3527_v7 = vadd.f32 %v3238_v2, %v2253_v63  ;;  %v1402_v9 = vpop.f32.mrf.mxu0  ;;  %v2255_v12 = vpop.f32.mrf.mxu1  ;;  %v4041_v63 = vsel %vm3785_vm9, %v3657_v44, %v3913_v58 }
 0x15f   : > { %4222 = vst [vmem:[#allocation3 + $0x40] sm:$0xff] %v4158_v1  ;;  %v2256_v15 = vadd.f32 %v2255_v12, %v1402_v9  ;;  %v12515_v9 = vld [vmem:[%s13145_s1 + $0xb8] sm:$0xff]  ;;  %v12450_v12 = vld [vmem:[%s13145_s1 + $0xa8] sm:$0xff] }
 0x160   : > { %v3659_v17 = vadd.f32 %v13219_v0, %v3527_v7 }
 0x161   : > { %10448 = vmatmul.msk.bf16.gmra.mxu0 %vm1141_vm1, %v12513_v3  ;;  %10772 = vmatmul.msk.bf16.gmra.mxu1 %vm1141_vm1, %v12448_v4 }
 0x162   : > { %vm3787_vm6 = vcmp.ge.f32.partialorder %v3659_v17, 0.0  ;;  %v3915_v14 = vmul.f32 0.01, %v3659_v17  ;;  %11227 = vmatmul.msk.bf16.gmra.mxu2 %vm1141_vm1, %v12578_v13  ;;  %v12580_v13 = vld [vmem:[%s13145_s1 + $0xc8] sm:$0xff] }
 0x164   : > { %v4043_v23 = vsel %vm3787_vm6, %v3659_v17, %v3915_v14 }
 0x165   : > { %v4159_v24 = vmax.f32 %v4039_v18, %v4043_v23  ;;  %v3241_v25 = vpop.f32.mrf.mxu2 }
 0x166   : > { %v3528_v26 = vadd.f32 %v3241_v25, %v2256_v15  ;;  %v1404_v27 = vpop.f32.mrf.mxu0  ;;  %v2257_v30 = vpop.f32.mrf.mxu1 }
 0x167   : > { %4223 = vst [vmem:[#allocation3 + $0x48] sm:$0xff] %v4159_v24  ;;  %v2258_v20 = vadd.f32 %v2257_v30, %v1404_v27 }
 0x168   : > { %v3660_v33 = vadd.f32 %v13219_v0, %v3528_v26 }
 0x16a   : > { %vm3788_vm8 = vcmp.ge.f32.partialorder %v3660_v33, 0.0  ;;  %v3916_v41 = vmul.f32 0.01, %v3660_v33 }
 0x16c   : > { %v4044_v48 = vsel %vm3788_vm8, %v3660_v33, %v3916_v41  ;;  %v12451_v41 = vld [vmem:[%s13145_s1 + $0xb0] sm:$0xff] }
 0x16d   : > { %v4160_v21 = vmax.f32 %v4040_v43, %v4044_v48  ;;  %v3243_v49 = vpop.f32.mrf.mxu2  ;;  %v12581_v43 = vld [vmem:[%s13145_s1 + $0xd0] sm:$0xff] }
 0x16e   : > { %v4286_v38 = vld [vmem:[#allocation3 + $0x40] ss:$2 sm:$0xff]  ;;  %v4350_v52 = vld [vmem:[#allocation3 + $0x41] ss:$2 sm:$0xff]  ;;  %v3529_v53 = vadd.f32 %v3243_v49, %v2258_v20  ;;  %v1407_v54 = vpop.f32.mrf.mxu0  ;;  %v2260_v29 = vpop.f32.mrf.mxu1 }
 0x16f   : > { %4224 = vst [vmem:[#allocation3 + $0x50] sm:$0xff] %v4160_v21  ;;  %v4409_v57 = vmax.f32 %v4286_v38, %v4350_v52  ;;  %v2261_v36 = vadd.f32 %v2260_v29, %v1407_v54 }
 0x170   : > { %v3661_v59 = vadd.f32 %v13219_v0, %v3529_v53 }
 0x171   : > { %10449 = vmatmul.msk.bf16.gmra.mxu0 %vm1141_vm1, %v12514_v50  ;;  %10773 = vmatmul.msk.bf16.gmra.mxu1 %vm1141_vm1, %v12449_v51  ;;  %v4445_v60 = vmul.f32 %v13285_v55, %v4409_v57 }
 0x172   : > { %vm3789_vm10 = vcmp.ge.f32.partialorder %v3661_v59, 0.0  ;;  %v3917_v61 = vmul.f32 0.01, %v3661_v59  ;;  %11228 = vmatmul.msk.bf16.gmra.mxu2 %vm1141_vm1, %v12579_v56 }
 0x173   : > { %v4481_v62 = vadd.f32 %v13298_v6, %v4445_v60 }
 0x174   : > { %v4045_v1 = vsel %vm3789_vm10, %v3661_v59, %v3917_v61 }
 0x175   : > { %v4161_v2 = vmax.f32 %v4041_v63, %v4045_v1  ;;  %v3246_v3 = vpop.f32.mrf.mxu2  ;;  %4553 = vst [vmem:[#allocation2 + $0x49] sm:$0xff] %v4481_v62 }
 0x176   : > { %v1409_v4 = vpop.f32.mrf.mxu0  ;;  %v2262_v7 = vpop.f32.mrf.mxu1  ;;  %v3530_v29 = vadd.f32 %v3246_v3, %v2261_v36 }
 0x177   : > { %4225 = vst [vmem:[#allocation3 + $0x58] sm:$0xff] %v4161_v2  ;;  %v2263_v62 = vadd.f32 %v2262_v7, %v1409_v4 }
 0x178   : > { %v3662_v60 = vadd.f32 %v13219_v0, %v3530_v29 }
 0x17a   : > { %v3918_v2 = vmul.f32 0.01, %v3662_v60  ;;  %vm3790_vm11 = vcmp.ge.f32.partialorder %v3662_v60, 0.0 }
 0x17c   : > { %v5113_v16 = vld [vmem:[#allocation2 + $0x48] sm:$0xff] }
 0x17d   : > { %v3248_v8 = vpop.f32.mrf.mxu2  ;;  %v13444_v17 = vld [vmem:[#allocation2 + $0x48] sm:$0xff]  ;;  %v5145_v33 = vpack.c.bf16 %v5113_v16, %v5113_v16 }
 0x17e   : > { %v13446_v14 = vld [vmem:[#allocation2 + $0x48] sm:$0xff]  ;;  %v1412_v22 = vpop.f32.mrf.mxu0  ;;  %v2265_v23 = vpop.f32.mrf.mxu1 }
 0x17f   : > { %16405 = vst [vmem:[#allocation21_spill] sm:$0xff] %v13446_v14  ;;  %v4288_v15 = vld [vmem:[#allocation3 + $0x50] ss:$2 sm:$0xff]  ;;  %v4352_v18 = vld [vmem:[#allocation3 + $0x51] ss:$2 sm:$0xff]  ;;  %v5337_v56 = vunpack.c.l.b16 %v5145_v33  ;;  %v12582_v33 = vld [vmem:[%s13145_s1 + $0xd8] sm:$0xff] }
 0x180   : > { %7659 = vst [vmem:[#allocation2 + $0x48] sm:$0x1] %v12981_v5  ;;  %v4410_v24 = vmax.f32 %v4288_v15, %v4352_v18  ;;  %v2266_v15 = vadd.f32 %v2265_v23, %v1412_v22 }
 0x181   : > { %10450 = vmatmul.msk.bf16.gmra.mxu0 %vm1141_vm1, %v12515_v9  ;;  %10774 = vmatmul.msk.bf16.gmra.mxu1 %vm1141_vm1, %v12450_v12 }
 0x182   : > { %v4446_v25 = vmul.f32 %v13285_v55, %v4410_v24  ;;  %11229 = vmatmul.msk.bf16.gmra.mxu2 %vm1141_vm1, %v12580_v13  ;;  %v4046_v13 = vsel %vm3790_vm11, %v3662_v60, %v3918_v2 }
 0x184   : > { %v4482_v19 = vadd.f32 %v13298_v6, %v4446_v25  ;;  %v12517_v25 = vld [vmem:[%s13145_s1 + $0xc8] sm:$0xff] }
 0x185   : > { %v3251_v26 = vpop.f32.mrf.mxu2 }
 0x186   : > { %4554 = vst [vmem:[#allocation2 + $0x51] sm:$0xff] %v4482_v19  ;;  %v13454_v27 = vpop.f32.mrf.mxu0  ;;  %v13456_v30 = vpop.f32.mrf.mxu1  ;;  %v12452_v19 = vld [vmem:[%s13145_s1 + $0xb8] sm:$0xff] }
 0x18d   : > { %v5114_v44 = vld [vmem:[#allocation2 + $0x50] sm:$0xff]  ;;  %v13461_v48 = vpop.f32.mrf.mxu2 }
 0x18e   : > { %v5146_v20 = vpack.c.bf16 %v5114_v44, %v5114_v44  ;;  %v13463_v21 = vld [vmem:[#allocation2 + $0x50] sm:$0xff]  ;;  %v1417_v51 = vpop.f32.mrf.mxu0  ;;  %v2270_v38 = vpop.f32.mrf.mxu1 }
 0x18f   : > { %v13465_v49 = vld [vmem:[#allocation2 + $0x51] sm:$0xff]  ;;  %v2271_v59 = vadd.f32 %v2270_v38, %v1417_v51 }
 0x190   : > { %v13467_v50 = vld [vmem:[#allocation2 + $0x4a] sm:$0xff]  ;;  %v5338_v57 = vunpack.c.l.b16 %v5146_v20 }
 0x191   : > { %v13469_v52 = vld [vmem:[#allocation2 + $0x4a] sm:$0xff]  ;;  %10451 = vmatmul.msk.bf16.gmra.mxu0 %vm1141_vm1, %v12516_v37  ;;  %10775 = vmatmul.msk.bf16.gmra.mxu1 %vm1141_vm1, %v12451_v41 }
 0x192   : > { %16406 = vst [vmem:[#allocation22_spill] sm:$0xff] %v13469_v52  ;;  %v13471_v53 = vld [vmem:[#allocation2 + $0x50] sm:$0xff]  ;;  %v5367_v58 = vpack.c.b16 %v5338_v57, %v5337_v56  ;;  %11230 = vmatmul.msk.bf16.gmra.mxu2 %vm1141_vm1, %v12581_v43  ;;  %v3532_v43 = vadd.f32 %v3251_v26, %v2266_v15  ;;  %v2268_v26 = vadd.f32 %v13456_v30, %v13454_v27  ;;  %v13497_v27 = vld [vmem:[%s16395_s2] ss:$0 sm:$0xff] }
 0x193   : > { %16407 = vst [vmem:[#allocation23_spill] sm:$0xff] %v13471_v53  ;;  %v13473_v54 = vld [vmem:[#allocation2 + $0x51] sm:$0xff] }
 0x194   : > { %16408 = vst [vmem:[#allocation24_spill] sm:$0xff] %v13473_v54  ;;  %5800 = vmatmul.bf16.gmra.mxu3 %v5367_v58  ;;  %v3664_v51 = vadd.f32 %v13219_v0, %v3532_v43  ;;  %v12594_v53 = vld [vmem:[%s13145_s1 + $0x138] sm:$0xff] }
 0x195   : > { %7667 = vst [vmem:[#allocation2 + $0x51] sm:$0x1] %v12981_v5  ;;  %v3256_v61 = vpop.f32.mrf.mxu2  ;;  %v3531_v5 = vadd.f32 %v3248_v8, %v2263_v62 }
 0x196   : > { %v3534_v63 = vadd.f32 %v3256_v61, %v2271_v59  ;;  %v1419_v1 = vpop.f32.mrf.mxu0  ;;  %v2272_v3 = vpop.f32.mrf.mxu1  ;;  %v3920_v60 = vmul.f32 0.01, %v3664_v51  ;;  %v3533_v61 = vadd.f32 %v13461_v48, %v2268_v26  ;;  %vm3792_vm15 = vcmp.ge.f32.partialorder %v3664_v51, 0.0  ;;  %v12453_v48 = vld [vmem:[%s13145_s1 + $0xc0] sm:$0xff] }
 0x197   : > { %v3663_v16 = vadd.f32 %v13219_v0, %v3531_v5  ;;  %v2273_v24 = vadd.f32 %v2272_v3, %v1419_v1 }
 0x198   : > { %v3666_v9 = vadd.f32 %v13219_v0, %v3534_v63  ;;  %v4048_v1 = vsel %vm3792_vm15, %v3664_v51, %v3920_v60  ;;  %v3665_v30 = vadd.f32 %v13497_v27, %v3533_v61  ;;  %v12584_v51 = vld [vmem:[%s13145_s1 + $0xe8] sm:$0xff]  ;;  %v13516_v60 = vld [vmem:[#allocation2] sm:$0xff] }
 0x199   : > { %v3919_v8 = vmul.f32 0.01, %v3663_v16  ;;  %vm3791_vm13 = vcmp.ge.f32.partialorder %v3663_v16, 0.0 }
 0x19a   : > { %vm3794_vm12 = vcmp.ge.f32.partialorder %v3666_v9, 0.0  ;;  %v3922_v12 = vmul.f32 0.01, %v3666_v9  ;;  %vm3793_vm2 = vcmp.ge.f32.partialorder %v3665_v30, 0.0 }
 0x19b   : > { %v4047_v20 = vsel %vm3791_vm13, %v3663_v16, %v3919_v8 }
 0x19c   : > { %v4050_v18 = vsel %vm3794_vm12, %v3666_v9, %v3922_v12  ;;  %v12518_v12 = vld [vmem:[%s13145_s1 + $0xd0] sm:$0xff] }
 0x19d   : > { %v4162_v4 = vmax.f32 %v4046_v13, %v4050_v18  ;;  %v3258_v7 = vpop.f32.mrf.mxu2  ;;  %v12583_v18 = vld [vmem:[%s13145_s1 + $0xe0] sm:$0xff] }
 0x19e   : > { %v3535_v36 = vadd.f32 %v3258_v7, %v2273_v24  ;;  %v1422_v37 = vpop.f32.mrf.mxu0  ;;  %v2275_v41 = vpop.f32.mrf.mxu1  ;;  %v3921_v7 = vmul.f32 0.01, %v3665_v30 }
 0x19f   : > { %4226 = vst [vmem:[#allocation3 + $0x60] sm:$0xff] %v4162_v4  ;;  %v2276_v23 = vadd.f32 %v2275_v41, %v1422_v37 }
 0x1a0   : > { %v3667_v44 = vadd.f32 %v13219_v0, %v3535_v36 }
 0x1a1   : > { %10452 = vmatmul.msk.bf16.gmra.mxu0 %vm1141_vm1, %v12517_v25  ;;  %10776 = vmatmul.msk.bf16.gmra.mxu1 %vm1141_vm1, %v12452_v19 }
 0x1a2   : > { %vm3795_vm14 = vcmp.ge.f32.partialorder %v3667_v44, 0.0  ;;  %v3923_v22 = vmul.f32 0.01, %v3667_v44  ;;  %11231 = vmatmul.msk.bf16.gmra.mxu2 %vm1141_vm1, %v12582_v33  ;;  %v4049_v33 = vsel %vm3793_vm2, %v3665_v30, %v3921_v7 }
 0x1a4   : > { %v4051_v38 = vsel %vm3795_vm14, %v3667_v44, %v3923_v22 }
 0x1a5   : > { %v4163_v29 = vmax.f32 %v4047_v20, %v4051_v38  ;;  %v3261_v56 = vpop.f32.mrf.mxu2  ;;  %v12454_v20 = vld [vmem:[%s13145_s1 + $0xc8] sm:$0xff] }
 0x1a6   : > { %v3536_v57 = vadd.f32 %v3261_v56, %v2276_v23  ;;  %v1424_v58 = vpop.f32.mrf.mxu0  ;;  %v2277_v59 = vpop.f32.mrf.mxu1  ;;  %v12519_v23 = vld [vmem:[%s13145_s1 + $0xd8] sm:$0xff] }
 0x1a7   : > { %4227 = vst [vmem:[#allocation3 + $0x68] sm:$0xff] %v4163_v29  ;;  %v2278_v3 = vadd.f32 %v2277_v59, %v1424_v58 }
 0x1a8   : > { %v3668_v62 = vadd.f32 %v13219_v0, %v3536_v57 }
 0x1aa   : > { %vm3796_vm0 = vcmp.ge.f32.partialorder %v3668_v62, 0.0  ;;  %v3924_v63 = vmul.f32 0.01, %v3668_v62 }
 0x1ac   : > { %v4052_v2 = vsel %vm3796_vm0, %v3668_v62, %v3924_v63 }
 0x1ad   : > { %v4164_v5 = vmax.f32 %v4048_v1, %v4052_v2  ;;  %v3263_v9 = vpop.f32.mrf.mxu2 }
 0x1ae   : > { %v4290_v13 = vld [vmem:[#allocation3 + $0x60] ss:$2 sm:$0xff]  ;;  %v4354_v0 = vld [vmem:[#allocation3 + $0x61] ss:$2 sm:$0xff]  ;;  %v3537_v16 = vadd.f32 %v3263_v9, %v2278_v3  ;;  %v1427_v15 = vpop.f32.mrf.mxu0  ;;  %v2280_v24 = vpop.f32.mrf.mxu1  ;;  %v12520_v9 = vld [vmem:[%s13145_s1 + $0xe0] sm:$0xff] }
 0x1af   : > { %4228 = vst [vmem:[#allocation3 + $0x70] sm:$0xff] %v4164_v5  ;;  %v4411_v4 = vmax.f32 %v4290_v13, %v4354_v0  ;;  %v2281_v5 = vadd.f32 %v2280_v24, %v1427_v15  ;;  %v12585_v13 = vld [vmem:[%s13145_s1 + $0xf0] sm:$0xff] }
 0x1b0   : > { %v3669_v25 = vadd.f32 %v13497_v27, %v3537_v16 }
 0x1b1   : > { %10453 = vmatmul.msk.bf16.gmra.mxu0 %vm1141_vm1, %v12518_v12  ;;  %10777 = vmatmul.msk.bf16.gmra.mxu1 %vm1141_vm1, %v12453_v48  ;;  %v4447_v19 = vmul.f32 %v13285_v55, %v4411_v4  ;;  %v12455_v48 = vld [vmem:[%s13145_s1 + $0xd0] sm:$0xff] }
 0x1b2   : > { %vm3797_vm3 = vcmp.ge.f32.partialorder %v3669_v25, 0.0  ;;  %v3925_v36 = vmul.f32 0.01, %v3669_v25  ;;  %11232 = vmatmul.msk.bf16.gmra.mxu2 %vm1141_vm1, %v12583_v18 }
 0x1b3   : > { %v4483_v37 = vadd.f32 %v13298_v6, %v4447_v19 }
 0x1b4   : > { %v4053_v41 = vsel %vm3797_vm3, %v3669_v25, %v3925_v36 }
 0x1b5   : > { %v4165_v8 = vmax.f32 %v4049_v33, %v4053_v41  ;;  %v3266_v43 = vpop.f32.mrf.mxu2  ;;  %4555 = vst [vmem:[#allocation2 + $0x61] sm:$0xff] %v4483_v37 }
 0x1b6   : > { %v1429_v44 = vpop.f32.mrf.mxu0  ;;  %v2282_v22 = vpop.f32.mrf.mxu1  ;;  %v3538_v24 = vadd.f32 %v3266_v43, %v2281_v5 }
 0x1b7   : > { %4229 = vst [vmem:[#allocation3 + $0x78] sm:$0xff] %v4165_v8 }
 0x1bc   : > { %v5115_v29 = vld [vmem:[#allocation2 + $0x60] sm:$0xff] }
 0x1bd   : > { %v3268_v38 = vpop.f32.mrf.mxu2  ;;  %v13512_v56 = vld [vmem:[#allocation2 + $0x60] sm:$0xff]  ;;  %v5147_v12 = vpack.c.bf16 %v5115_v29, %v5115_v29 }
 0x1be   : > { %v13514_v26 = vld [vmem:[#allocation2 + $0x60] sm:$0xff]  ;;  %v1432_v59 = vpop.f32.mrf.mxu0  ;;  %v2285_v62 = vpop.f32.mrf.mxu1 }
 0x1bf   : > { %16409 = vst [vmem:[#allocation25_spill] sm:$0xff] %v13514_v26  ;;  %v4292_v57 = vld [vmem:[#allocation3 + $0x70] ss:$2 sm:$0xff]  ;;  %v4356_v58 = vld [vmem:[#allocation3 + $0x71] ss:$2 sm:$0xff]  ;;  %v5339_v37 = vunpack.c.l.b16 %v5147_v12  ;;  %v2286_v12 = vadd.f32 %v2285_v62, %v1432_v59 }
 0x1c0   : > { %7660 = vst [vmem:[#allocation2 + $0x60] sm:$0x1] %v13516_v60  ;;  %v4412_v61 = vmax.f32 %v4292_v57, %v4356_v58 }
 0x1c1   : > { %10454 = vmatmul.msk.bf16.gmra.mxu0 %vm1141_vm1, %v12519_v23  ;;  %10778 = vmatmul.msk.bf16.gmra.mxu1 %vm1141_vm1, %v12454_v20  ;;  %v3670_v23 = vadd.f32 %v13497_v27, %v3538_v24 }
 0x1c2   : > { %v4448_v63 = vmul.f32 %v13285_v55, %v4412_v61  ;;  %11233 = vmatmul.msk.bf16.gmra.mxu2 %vm1141_vm1, %v12584_v51  ;;  %v2283_v51 = vadd.f32 %v2282_v22, %v1429_v44 }
 0x1c3   : > { %v3926_v57 = vmul.f32 0.01, %v3670_v23  ;;  %vm3798_vm4 = vcmp.ge.f32.partialorder %v3670_v23, 0.0 }
 0x1c4   : > { %v4484_v1 = vadd.f32 %v13298_v6, %v4448_v63  ;;  %v3539_v61 = vadd.f32 %v3268_v38, %v2283_v51 }
 0x1c5   : > { %v3271_v30 = vpop.f32.mrf.mxu2  ;;  %v4054_v5 = vsel %vm3798_vm4, %v3670_v23, %v3926_v57 }
 0x1c6   : > { %4556 = vst [vmem:[#allocation2 + $0x69] sm:$0xff] %v4484_v1  ;;  %v13524_v2 = vpop.f32.mrf.mxu0  ;;  %v13526_v3 = vpop.f32.mrf.mxu1 }
 0x1cd   : > { %v5116_v0 = vld [vmem:[#allocation2 + $0x68] sm:$0xff]  ;;  %v13531_v16 = vpop.f32.mrf.mxu2 }
 0x1ce   : > { %v5148_v18 = vpack.c.bf16 %v5116_v0, %v5116_v0  ;;  %v13533_v55 = vld [vmem:[#allocation2 + $0x68] sm:$0xff]  ;;  %v1437_v7 = vpop.f32.mrf.mxu0  ;;  %v2290_v36 = vpop.f32.mrf.mxu1 }
 0x1cf   : > { %v13535_v4 = vld [vmem:[#allocation2 + $0x69] sm:$0xff]  ;;  %v2291_v8 = vadd.f32 %v2290_v36, %v1437_v7  ;;  %v12586_v36 = vld [vmem:[%s13145_s1 + $0xf8] sm:$0xff] }
 0x1d0   : > { %v13537_v6 = vld [vmem:[#allocation2 + $0x62] sm:$0xff]  ;;  %v5340_v33 = vunpack.c.l.b16 %v5148_v18  ;;  %v12456_v18 = vld [vmem:[%s13145_s1 + $0xd8] sm:$0xff] }
 0x1d1   : > { %v13539_v25 = vld [vmem:[#allocation2 + $0x62] sm:$0xff]  ;;  %10455 = vmatmul.msk.bf16.gmra.mxu0 %vm1141_vm1, %v12520_v9  ;;  %10779 = vmatmul.msk.bf16.gmra.mxu1 %vm1141_vm1, %v12455_v48  ;;  %v3671_v9 = vadd.f32 %v13497_v27, %v3539_v61 }
 0x1d2   : > { %16410 = vst [vmem:[#allocation26_spill] sm:$0xff] %v13539_v25  ;;  %v13541_v19 = vld [vmem:[#allocation2 + $0x68] sm:$0xff]  ;;  %v5368_v41 = vpack.c.b16 %v5340_v33, %v5339_v37  ;;  %11234 = vmatmul.msk.bf16.gmra.mxu2 %vm1141_vm1, %v12585_v13  ;;  %v3540_v33 = vadd.f32 %v3271_v30, %v2286_v12  ;;  %v2288_v30 = vadd.f32 %v13526_v3, %v13524_v2 }
 0x1d3   : > { %16411 = vst [vmem:[#allocation27_spill] sm:$0xff] %v13541_v19  ;;  %v13543_v15 = vld [vmem:[#allocation2 + $0x69] sm:$0xff]  ;;  %v3927_v38 = vmul.f32 0.01, %v3671_v9  ;;  %vm3799_vm6 = vcmp.ge.f32.partialorder %v3671_v9, 0.0 }
 0x1d4   : > { %16412 = vst [vmem:[#allocation28_spill] sm:$0xff] %v13543_v15  ;;  %5805 = vmatmul.bf16.gmra.mxu3 %v5368_v41  ;;  %v12521_v0 = vld [vmem:[%s13145_s1 + $0xe8] sm:$0xff]  ;;  %v3672_v23 = vadd.f32 %v13497_v27, %v3540_v33 }
 0x1d5   : > { %7668 = vst [vmem:[#allocation2 + $0x69] sm:$0x1] %v13516_v60  ;;  %v3276_v20 = vpop.f32.mrf.mxu2 }
 0x1d6   : > { %v3542_v29 = vadd.f32 %v3276_v20, %v2291_v8  ;;  %v1439_v43 = vpop.f32.mrf.mxu0  ;;  %v2292_v58 = vpop.f32.mrf.mxu1  ;;  %v4055_v8 = vsel %vm3799_vm6, %v3671_v9, %v3927_v38  ;;  %v3928_v61 = vmul.f32 0.01, %v3672_v23  ;;  %vm3800_vm8 = vcmp.ge.f32.partialorder %v3672_v23, 0.0 }
 0x1d7   : > { %v2293_v13 = vadd.f32 %v2292_v58, %v1439_v43 }
 0x1d8   : > { %v3674_v63 = vadd.f32 %v13497_v27, %v3542_v29  ;;  %v4056_v9 = vsel %vm3800_vm8, %v3672_v23, %v3928_v61  ;;  %v12458_v61 = vld [vmem:[%s13145_s1 + $0xe8] sm:$0xff] }
 0x1da   : > { %vm3802_vm5 = vcmp.ge.f32.partialorder %v3674_v63, 0.0  ;;  %v3930_v1 = vmul.f32 0.01, %v3674_v63 }
 0x1dc   : > { %v4058_v48 = vsel %vm3802_vm5, %v3674_v63, %v3930_v1  ;;  %v3541_v63 = vadd.f32 %v13531_v16, %v2288_v30  ;;  %v12587_v16 = vld [vmem:[%s13145_s1 + $0x100] sm:$0xff] }
 0x1dd   : > { %v4166_v44 = vmax.f32 %v4054_v5, %v4058_v48  ;;  %v3278_v22 = vpop.f32.mrf.mxu2 }
 0x1de   : > { %v3543_v7 = vadd.f32 %v3278_v22, %v2293_v13  ;;  %v1442_v24 = vpop.f32.mrf.mxu0  ;;  %v2295_v37 = vpop.f32.mrf.mxu1  ;;  %v3673_v12 = vadd.f32 %v13497_v27, %v3541_v63  ;;  %v12457_v22 = vld [vmem:[%s13145_s1 + $0xe0] sm:$0xff]  ;;  %v12588_v63 = vld [vmem:[%s13145_s1 + $0x108] sm:$0xff] }
 0x1df   : > { %4230 = vst [vmem:[#allocation3 + $0x80] sm:$0xff] %v4166_v44  ;;  %v2296_v62 = vadd.f32 %v2295_v37, %v1442_v24  ;;  %v12522_v44 = vld [vmem:[%s13145_s1 + $0xf0] sm:$0xff] }
 0x1e0   : > { %v3675_v41 = vadd.f32 %v13497_v27, %v3543_v7  ;;  %v3929_v38 = vmul.f32 0.01, %v3673_v12  ;;  %vm3801_vm10 = vcmp.ge.f32.partialorder %v3673_v12, 0.0 }
 0x1e1   : > { %10456 = vmatmul.msk.bf16.gmra.mxu0 %vm1141_vm1, %v12521_v0  ;;  %10780 = vmatmul.msk.bf16.gmra.mxu1 %vm1141_vm1, %v12456_v18 }
 0x1e2   : > { %vm3803_vm7 = vcmp.ge.f32.partialorder %v3675_v41, 0.0  ;;  %v3931_v59 = vmul.f32 0.01, %v3675_v41  ;;  %11235 = vmatmul.msk.bf16.gmra.mxu2 %vm1141_vm1, %v12586_v36 }
 0x1e4   : > { %v4059_v20 = vsel %vm3803_vm7, %v3675_v41, %v3931_v59  ;;  %v13574_v41 = vld [vmem:[%s16396_s3] ss:$0 sm:$0xff] }
 0x1e5   : > { %v4167_v51 = vmax.f32 %v4055_v8, %v4059_v20  ;;  %v3281_v29 = vpop.f32.mrf.mxu2  ;;  %v13581_v8 = vld [vmem:[%s16397_s4] ss:$0 sm:$0xff]  ;;  %v4057_v20 = vsel %vm3801_vm10, %v3673_v12, %v3929_v38 }
 0x1e6   : > { %v3544_v43 = vadd.f32 %v3281_v29, %v2296_v62  ;;  %v1444_v57 = vpop.f32.mrf.mxu0  ;;  %v2297_v58 = vpop.f32.mrf.mxu1  ;;  %v12524_v38 = vld [vmem:[%s13145_s1 + $0x100] sm:$0xff] }
 0x1e7   : > { %4231 = vst [vmem:[#allocation3 + $0x88] sm:$0xff] %v4167_v51  ;;  %v2298_v2 = vadd.f32 %v2297_v58, %v1444_v57  ;;  %v12523_v58 = vld [vmem:[%s13145_s1 + $0xf8] sm:$0xff] }
 0x1e8   : > { %v3676_v1 = vadd.f32 %v13497_v27, %v3544_v43 }
 0x1ea   : > { %vm3804_vm9 = vcmp.ge.f32.partialorder %v3676_v1, 0.0  ;;  %v3932_v5 = vmul.f32 0.01, %v3676_v1 }
 0x1ec   : > { %v4060_v48 = vsel %vm3804_vm9, %v3676_v1, %v3932_v5 }
 0x1ed   : > { %v4168_v3 = vmax.f32 %v4056_v9, %v4060_v48  ;;  %v3283_v13 = vpop.f32.mrf.mxu2 }
 0x1ee   : > { %v4294_v0 = vld [vmem:[#allocation3 + $0x80] ss:$2 sm:$0xff]  ;;  %v4358_v18 = vld [vmem:[#allocation3 + $0x81] ss:$2 sm:$0xff]  ;;  %v3545_v7 = vadd.f32 %v3283_v13, %v2298_v2  ;;  %v1447_v24 = vpop.f32.mrf.mxu0  ;;  %v2300_v37 = vpop.f32.mrf.mxu1 }
 0x1ef   : > { %v4413_v36 = vmax.f32 %v4294_v0, %v4358_v18  ;;  %4232 = vst [vmem:[#allocation3 + $0x90] sm:$0xff] %v4168_v3 }
 0x1f0   : > { %v3677_v33 = vadd.f32 %v13497_v27, %v3545_v7 }
 0x1f1   : > { %10457 = vmatmul.msk.bf16.gmra.mxu0 %vm1141_vm1, %v12522_v44  ;;  %10781 = vmatmul.msk.bf16.gmra.mxu1 %vm1141_vm1, %v12457_v22  ;;  %v4449_v59 = vmul.f32 %v13574_v41, %v4413_v36  ;;  %v2301_v36 = vadd.f32 %v2300_v37, %v1447_v24 }
 0x1f2   : > { %vm3805_vm11 = vcmp.ge.f32.partialorder %v3677_v33, 0.0  ;;  %v3933_v62 = vmul.f32 0.01, %v3677_v33  ;;  %11236 = vmatmul.msk.bf16.gmra.mxu2 %vm1141_vm1, %v12587_v16 }
 0x1f3   : > { %v4485_v23 = vadd.f32 %v13581_v8, %v4449_v59  ;;  %v12459_v59 = vld [vmem:[%s13145_s1 + $0xf0] sm:$0xff] }
 0x1f4   : > { %v4061_v51 = vsel %vm3805_vm11, %v3677_v33, %v3933_v62  ;;  %v12589_v62 = vld [vmem:[%s13145_s1 + $0x110] sm:$0xff] }
 0x1f5   : > { %v4169_v29 = vmax.f32 %v4057_v20, %v4061_v51  ;;  %v3286_v30 = vpop.f32.mrf.mxu2  ;;  %4557 = vst [vmem:[#allocation2 + $0x79] sm:$0xff] %v4485_v23 }
 0x1f6   : > { %v1449_v43 = vpop.f32.mrf.mxu0  ;;  %v2302_v57 = vpop.f32.mrf.mxu1  ;;  %v3546_v37 = vadd.f32 %v3286_v30, %v2301_v36 }
 0x1f7   : > { %4233 = vst [vmem:[#allocation3 + $0x98] sm:$0xff] %v4169_v29  ;;  %v2303_v32 = vadd.f32 %v2302_v57, %v1449_v43  ;;  %v12525_v57 = vld [vmem:[%s13145_s1 + $0x108] sm:$0xff] }
 0x1f8   : > { %v3678_v15 = vadd.f32 %v13497_v27, %v3546_v37 }
 0x1fa   : > { %v3934_v36 = vmul.f32 0.01, %v3678_v15  ;;  %vm3806_vm12 = vcmp.ge.f32.partialorder %v3678_v15, 0.0 }
 0x1fc   : > { %v5117_v5 = vld [vmem:[#allocation2 + $0x78] sm:$0xff] }
 0x1fd   : > { %v3288_v1 = vpop.f32.mrf.mxu2  ;;  %v13587_v9 = vld [vmem:[#allocation2 + $0x78] sm:$0xff]  ;;  %v5149_v33 = vpack.c.bf16 %v5117_v5, %v5117_v5 }
 0x1fe   : > { %v13589_v48 = vld [vmem:[#allocation2 + $0x78] sm:$0xff]  ;;  %v4296_v2 = vld [vmem:[#allocation3 + $0x90] ss:$2 sm:$0xff]  ;;  %v4360_v3 = vld [vmem:[#allocation3 + $0x91] ss:$2 sm:$0xff]  ;;  %v1452_v12 = vpop.f32.mrf.mxu0  ;;  %v2305_v44 = vpop.f32.mrf.mxu1 }
 0x1ff   : > { %16413 = vst [vmem:[#allocation29_spill] sm:$0xff] %v13589_v48  ;;  %v4414_v13 = vmax.f32 %v4296_v2, %v4360_v3  ;;  %v2306_v37 = vadd.f32 %v2305_v44, %v1452_v12  ;;  %v12590_v48 = vld [vmem:[%s13145_s1 + $0x118] sm:$0xff] }
 0x200   : > { %7661 = vst [vmem:[#allocation2 + $0x78] sm:$0x1] %v13516_v60 }
 0x201   : > { %10458 = vmatmul.msk.bf16.gmra.mxu0 %vm1141_vm1, %v12523_v58  ;;  %10782 = vmatmul.msk.bf16.gmra.mxu1 %vm1141_vm1, %v12458_v61  ;;  %v4450_v22 = vmul.f32 %v13574_v41, %v4414_v13  ;;  %v5341_v13 = vunpack.c.l.b16 %v5149_v33 }
 0x202   : > { %11237 = vmatmul.msk.bf16.gmra.mxu2 %vm1141_vm1, %v12588_v63 }
 0x203   : > { %v4486_v0 = vadd.f32 %v13581_v8, %v4450_v22 }
 0x205   : > { %v3291_v18 = vpop.f32.mrf.mxu2  ;;  %4558 = vst [vmem:[#allocation2 + $0x81] sm:$0xff] %v4486_v0 }
 0x206   : > { %v13597_v7 = vpop.f32.mrf.mxu0  ;;  %v13599_v16 = vpop.f32.mrf.mxu1 }
 0x20c   : > { %v5118_v23 = vld [vmem:[#allocation2 + $0x80] sm:$0xff] }
 0x20d   : > { %v13604_v20 = vpop.f32.mrf.mxu2  ;;  %v5150_v51 = vpack.c.bf16 %v5118_v23, %v5118_v23  ;;  %v13606_v29 = vld [vmem:[#allocation2 + $0x80] sm:$0xff] }
 0x20e   : > { %v13608_v58 = vld [vmem:[#allocation2 + $0x81] sm:$0xff]  ;;  %v1457_v63 = vpop.f32.mrf.mxu0  ;;  %v2310_v5 = vpop.f32.mrf.mxu1 }
 0x20f   : > { %v13610_v61 = vld [vmem:[#allocation2 + $0x7a] sm:$0xff]  ;;  %v5342_v22 = vunpack.c.l.b16 %v5150_v51  ;;  %v2311_v23 = vadd.f32 %v2310_v5, %v1457_v63  ;;  %v4062_v63 = vsel %vm3806_vm12, %v3678_v15, %v3934_v36 }
 0x210   : > { %v13612_v2 = vld [vmem:[#allocation2 + $0x7a] sm:$0xff] }
 0x211   : > { %16414 = vst [vmem:[#allocation30_spill] sm:$0xff] %v13612_v2  ;;  %v13614_v3 = vld [vmem:[#allocation2 + $0x80] sm:$0xff]  ;;  %10459 = vmatmul.msk.bf16.gmra.mxu0 %vm1141_vm1, %v12524_v38  ;;  %10783 = vmatmul.msk.bf16.gmra.mxu1 %vm1141_vm1, %v12459_v59  ;;  %v5369_v0 = vpack.c.b16 %v5342_v22, %v5341_v13  ;;  %v3547_v38 = vadd.f32 %v3288_v1, %v2303_v32  ;;  %v12460_v22 = vld [vmem:[%s13145_s1 + $0xf8] sm:$0xff] }
 0x212   : > { %16415 = vst [vmem:[#allocation31_spill] sm:$0xff] %v13614_v3  ;;  %v13616_v24 = vld [vmem:[#allocation2 + $0x81] sm:$0xff]  ;;  %11238 = vmatmul.msk.bf16.gmra.mxu2 %vm1141_vm1, %v12589_v62  ;;  %v3548_v1 = vadd.f32 %v3291_v18, %v2306_v37  ;;  %v2308_v18 = vadd.f32 %v13599_v16, %v13597_v7 }
 0x213   : > { %16416 = vst [vmem:[#allocation32_spill] sm:$0xff] %v13616_v24  ;;  %5810 = vmatmul.bf16.gmra.mxu3 %v5369_v0  ;;  %v3679_v62 = vadd.f32 %v13497_v27, %v3547_v38 }
 0x214   : > { %7669 = vst [vmem:[#allocation2 + $0x81] sm:$0x1] %v13516_v60 }
 0x215   : > { %v3296_v54 = vpop.f32.mrf.mxu2  ;;  %v3935_v32 = vmul.f32 0.01, %v3679_v62  ;;  %vm3807_vm14 = vcmp.ge.f32.partialorder %v3679_v62, 0.0 }
 0x216   : > { %v3550_v24 = vadd.f32 %v3296_v54, %v2311_v23  ;;  %v1459_v30 = vpop.f32.mrf.mxu0  ;;  %v2312_v33 = vpop.f32.mrf.mxu1 }
 0x217   : > { %v2313_v13 = vadd.f32 %v2312_v33, %v1459_v30  ;;  %v4063_v44 = vsel %vm3807_vm14, %v3679_v62, %v3935_v32  ;;  %v3680_v30 = vadd.f32 %v13497_v27, %v3548_v1 }
 0x218   : > { %v3682_v59 = vadd.f32 %v13497_v27, %v3550_v24 }
 0x219   : > { %v3936_v37 = vmul.f32 0.01, %v3680_v30  ;;  %vm3808_vm0 = vcmp.ge.f32.partialorder %v3680_v30, 0.0 }
 0x21a   : > { %vm3810_vm13 = vcmp.ge.f32.partialorder %v3682_v59, 0.0  ;;  %v3938_v51 = vmul.f32 0.01, %v3682_v59 }
 0x21c   : > { %v4066_v5 = vsel %vm3810_vm13, %v3682_v59, %v3938_v51 }
 0x21d   : > { %v4170_v43 = vmax.f32 %v4062_v63, %v4066_v5  ;;  %v3298_v54 = vpop.f32.mrf.mxu2  ;;  %v4064_v5 = vsel %vm3808_vm0, %v3680_v30, %v3936_v37 }
 0x21e   : > { %v3551_v0 = vadd.f32 %v3298_v54, %v2313_v13  ;;  %v1462_v23 = vpop.f32.mrf.mxu0  ;;  %v2315_v3 = vpop.f32.mrf.mxu1 }
 0x21f   : > { %4234 = vst [vmem:[#allocation3 + $0xa0] sm:$0xff] %v4170_v43  ;;  %v2316_v12 = vadd.f32 %v2315_v3, %v1462_v23  ;;  %v3549_v3 = vadd.f32 %v13604_v20, %v2308_v18  ;;  %v12591_v20 = vld [vmem:[%s13145_s1 + $0x120] sm:$0xff] }
 0x220   : > { %v3683_v24 = vadd.f32 %v13497_v27, %v3551_v0 }
 0x221   : > { %10460 = vmatmul.msk.bf16.gmra.mxu0 %vm1141_vm1, %v12525_v57  ;;  %10784 = vmatmul.msk.bf16.gmra.mxu1 %vm1141_vm1, %v12460_v22  ;;  %v3681_v13 = vadd.f32 %v13497_v27, %v3549_v3  ;;  %v12526_v57 = vld [vmem:[%s13145_s1 + $0x110] sm:$0xff]  ;;  %v12461_v22 = vld [vmem:[%s13145_s1 + $0x100] sm:$0xff]  ;;  %v12527_v3 = vld [vmem:[%s13145_s1 + $0x118] sm:$0xff] }
 0x222   : > { %vm3811_vm15 = vcmp.ge.f32.partialorder %v3683_v24, 0.0  ;;  %v3939_v15 = vmul.f32 0.01, %v3683_v24  ;;  %11239 = vmatmul.msk.bf16.gmra.mxu2 %vm1141_vm1, %v12590_v48 }
 0x223   : > { %vm3809_vm3 = vcmp.ge.f32.partialorder %v3681_v13, 0.0 }
 0x224   : > { %v4067_v36 = vsel %vm3811_vm15, %v3683_v24, %v3939_v15 }
 0x225   : > { %v4171_v33 = vmax.f32 %v4063_v44, %v4067_v36  ;;  %v3301_v38 = vpop.f32.mrf.mxu2 }
 0x226   : > { %v3552_v59 = vadd.f32 %v3301_v38, %v2316_v12  ;;  %v1464_v51 = vpop.f32.mrf.mxu0  ;;  %v2317_v63 = vpop.f32.mrf.mxu1  ;;  %v3937_v12 = vmul.f32 0.01, %v3681_v13 }
 0x227   : > { %4235 = vst [vmem:[#allocation3 + $0xa8] sm:$0xff] %v4171_v33  ;;  %v2318_v7 = vadd.f32 %v2317_v63, %v1464_v51 }
 0x228   : > { %v3684_v48 = vadd.f32 %v13497_v27, %v3552_v59  ;;  %v4065_v38 = vsel %vm3809_vm3, %v3681_v13, %v3937_v12 }
 0x22a   : > { %vm3812_vm2 = vcmp.ge.f32.partialorder %v3684_v48, 0.0  ;;  %v3940_v62 = vmul.f32 0.01, %v3684_v48 }
 0x22c   : > { %v4068_v43 = vsel %vm3812_vm2, %v3684_v48, %v3940_v62  ;;  %v12462_v48 = vld [vmem:[%s13145_s1 + $0x108] sm:$0xff] }
 0x22d   : > { %v4172_v16 = vmax.f32 %v4064_v5, %v4068_v43  ;;  %v3303_v54 = vpop.f32.mrf.mxu2  ;;  %v12592_v62 = vld [vmem:[%s13145_s1 + $0x128] sm:$0xff] }
 0x22e   : > { %v4298_v0 = vld [vmem:[#allocation3 + $0xa0] ss:$2 sm:$0xff]  ;;  %v4362_v23 = vld [vmem:[#allocation3 + $0xa1] ss:$2 sm:$0xff]  ;;  %v3553_v32 = vadd.f32 %v3303_v54, %v2318_v7  ;;  %v1467_v1 = vpop.f32.mrf.mxu0  ;;  %v2320_v24 = vpop.f32.mrf.mxu1 }
 0x22f   : > { %4236 = vst [vmem:[#allocation3 + $0xb0] sm:$0xff] %v4172_v16  ;;  %v4415_v15 = vmax.f32 %v4298_v0, %v4362_v23 }
 0x230   : > { %v3685_v44 = vadd.f32 %v13497_v27, %v3553_v32 }
 0x231   : > { %10461 = vmatmul.msk.bf16.gmra.mxu0 %vm1141_vm1, %v12526_v57  ;;  %10785 = vmatmul.msk.bf16.gmra.mxu1 %vm1141_vm1, %v12461_v22  ;;  %v4451_v30 = vmul.f32 %v13574_v41, %v4415_v15 }
 0x232   : > { %vm3813_vm4 = vcmp.ge.f32.partialorder %v3685_v44, 0.0  ;;  %v3941_v36 = vmul.f32 0.01, %v3685_v44  ;;  %11240 = vmatmul.msk.bf16.gmra.mxu2 %vm1141_vm1, %v12591_v20 }
 0x233   : > { %v4487_v33 = vadd.f32 %v13581_v8, %v4451_v30  ;;  %v12528_v30 = vld [vmem:[%s13145_s1 + $0x120] sm:$0xff] }
 0x234   : > { %v4069_v18 = vsel %vm3813_vm4, %v3685_v44, %v3941_v36  ;;  %v2321_v44 = vadd.f32 %v2320_v24, %v1467_v1 }
 0x235   : > { %v4173_v59 = vmax.f32 %v4065_v38, %v4069_v18  ;;  %v3306_v51 = vpop.f32.mrf.mxu2  ;;  %4559 = vst [vmem:[#allocation2 + $0x91] sm:$0xff] %v4487_v33  ;;  %v12463_v33 = vld [vmem:[%s13145_s1 + $0x110] sm:$0xff] }
 0x236   : > { %v1469_v63 = vpop.f32.mrf.mxu0  ;;  %v2322_v37 = vpop.f32.mrf.mxu1  ;;  %v12593_v38 = vld [vmem:[%s13145_s1 + $0x130] sm:$0xff]  ;;  %v3554_v24 = vadd.f32 %v3306_v51, %v2321_v44 }
 0x237   : > { %4237 = vst [vmem:[#allocation3 + $0xb8] sm:$0xff] %v4173_v59  ;;  %v2323_v14 = vadd.f32 %v2322_v37, %v1469_v63  ;;  %v12529_v37 = vld [vmem:[%s13145_s1 + $0x128] sm:$0xff] }
 0x238   : > { %v3686_v19 = vadd.f32 %v13497_v27, %v3554_v24 }
 0x23a   : > { %v3942_v44 = vmul.f32 0.01, %v3686_v19  ;;  %vm3814_vm5 = vcmp.ge.f32.partialorder %v3686_v19, 0.0 }
 0x23c   : > { %v5119_v43 = vld [vmem:[#allocation2 + $0x90] sm:$0xff] }
 0x23d   : > { %v3308_v5 = vpop.f32.mrf.mxu2  ;;  %v13650_v7 = vld [vmem:[#allocation2 + $0x90] sm:$0xff]  ;;  %v5151_v36 = vpack.c.bf16 %v5119_v43, %v5119_v43 }
 0x23e   : > { %v13652_v16 = vld [vmem:[#allocation2 + $0x90] sm:$0xff]  ;;  %v4300_v54 = vld [vmem:[#allocation3 + $0xb0] ss:$2 sm:$0xff]  ;;  %v4364_v57 = vld [vmem:[#allocation3 + $0xb1] ss:$2 sm:$0xff]  ;;  %v1472_v13 = vpop.f32.mrf.mxu0  ;;  %v2325_v22 = vpop.f32.mrf.mxu1 }
 0x23f   : > { %16417 = vst [vmem:[#allocation33_spill] sm:$0xff] %v13652_v16  ;;  %v4416_v0 = vmax.f32 %v4300_v54, %v4364_v57 }
 0x240   : > { %7662 = vst [vmem:[#allocation2 + $0x90] sm:$0x1] %v13516_v60 }
 0x241   : > { %10462 = vmatmul.msk.bf16.gmra.mxu0 %vm1141_vm1, %v12527_v3  ;;  %10786 = vmatmul.msk.bf16.gmra.mxu1 %vm1141_vm1, %v12462_v48  ;;  %v4452_v23 = vmul.f32 %v13574_v41, %v4416_v0 }
 0x242   : > { %11241 = vmatmul.msk.bf16.gmra.mxu2 %vm1141_vm1, %v12592_v62 }
 0x243   : > { %v4488_v32 = vadd.f32 %v13581_v8, %v4452_v23 }
 0x245   : > { %v3311_v20 = vpop.f32.mrf.mxu2  ;;  %4560 = vst [vmem:[#allocation2 + $0x99] sm:$0xff] %v4488_v32  ;;  %v5343_v32 = vunpack.c.l.b16 %v5151_v36 }
 0x246   : > { %v13660_v15 = vpop.f32.mrf.mxu0  ;;  %v13662_v12 = vpop.f32.mrf.mxu1 }
 0x24c   : > { %v5120_v18 = vld [vmem:[#allocation2 + $0x98] sm:$0xff] }
 0x24d   : > { %v13667_v59 = vpop.f32.mrf.mxu2  ;;  %v5152_v3 = vpack.c.bf16 %v5120_v18, %v5120_v18  ;;  %v13669_v48 = vld [vmem:[#allocation2 + $0x98] sm:$0xff] }
 0x24e   : > { %v13671_v62 = vld [vmem:[#allocation2 + $0x99] sm:$0xff]  ;;  %v1477_v57 = vpop.f32.mrf.mxu0  ;;  %v2330_v43 = vpop.f32.mrf.mxu1 }
 0x24f   : > { %v13673_v54 = vld [vmem:[#allocation2 + $0x92] sm:$0xff]  ;;  %v5344_v16 = vunpack.c.l.b16 %v5152_v3  ;;  %v2331_v26 = vadd.f32 %v2330_v43, %v1477_v57  ;;  %v4070_v3 = vsel %vm3814_vm5, %v3686_v19, %v3942_v44  ;;  %v2326_v57 = vadd.f32 %v2325_v22, %v1472_v13 }
 0x250   : > { %v13675_v0 = vld [vmem:[#allocation2 + $0x92] sm:$0xff] }
 0x251   : > { %16418 = vst [vmem:[#allocation34_spill] sm:$0xff] %v13675_v0  ;;  %v13677_v23 = vld [vmem:[#allocation2 + $0x98] sm:$0xff]  ;;  %10463 = vmatmul.msk.bf16.gmra.mxu0 %vm1141_vm1, %v12528_v30  ;;  %10787 = vmatmul.msk.bf16.gmra.mxu1 %vm1141_vm1, %v12463_v33  ;;  %v5370_v18 = vpack.c.b16 %v5344_v16, %v5343_v32  ;;  %v3555_v30 = vadd.f32 %v3308_v5, %v2323_v14 }
 0x252   : > { %16419 = vst [vmem:[#allocation35_spill] sm:$0xff] %v13677_v23  ;;  %v13679_v1 = vld [vmem:[#allocation2 + $0x99] sm:$0xff]  ;;  %11242 = vmatmul.msk.bf16.gmra.mxu2 %vm1141_vm1, %v12593_v38  ;;  %v3556_v5 = vadd.f32 %v3311_v20, %v2326_v57  ;;  %v2328_v20 = vadd.f32 %v13662_v12, %v13660_v15 }
 0x253   : > { %16420 = vst [vmem:[#allocation36_spill] sm:$0xff] %v13679_v1  ;;  %5815 = vmatmul.bf16.gmra.mxu3 %v5370_v18  ;;  %v3687_v38 = vadd.f32 %v13497_v27, %v3555_v30  ;;  %v12602_v0 = vld [vmem:[%s13145_s1 + $0x178] sm:$0xff] }
 0x254   : > { %7670 = vst [vmem:[#allocation2 + $0x99] sm:$0x1] %v13516_v60 }
 0x255   : > { %v3316_v23 = vpop.f32.mrf.mxu2  ;;  %v3943_v14 = vmul.f32 0.01, %v3687_v38  ;;  %vm3815_vm7 = vcmp.ge.f32.partialorder %v3687_v38, 0.0 }
 0x256   : > { %v3558_v1 = vadd.f32 %v3316_v23, %v2331_v26  ;;  %v1479_v51 = vpop.f32.mrf.mxu0  ;;  %v2332_v36 = vpop.f32.mrf.mxu1  ;;  %v12464_v23 = vld [vmem:[%s13145_s1 + $0x118] sm:$0xff] }
 0x257   : > { %v2333_v43 = vadd.f32 %v2332_v36, %v1479_v51  ;;  %v4071_v22 = vsel %vm3815_vm7, %v3687_v38, %v3943_v14  ;;  %v3688_v51 = vadd.f32 %v13497_v27, %v3556_v5 }
 0x258   : > { %v3690_v33 = vadd.f32 %v13497_v27, %v3558_v1 }
 0x259   : > { %v3944_v57 = vmul.f32 0.01, %v3688_v51  ;;  %vm3816_vm9 = vcmp.ge.f32.partialorder %v3688_v51, 0.0 }
 0x25a   : > { %vm3818_vm6 = vcmp.ge.f32.partialorder %v3690_v33, 0.0  ;;  %v3946_v16 = vmul.f32 0.01, %v3690_v33 }
 0x25c   : > { %v4074_v24 = vsel %vm3818_vm6, %v3690_v33, %v3946_v16 }
 0x25d   : > { %v4174_v63 = vmax.f32 %v4070_v3, %v4074_v24  ;;  %v3318_v26 = vpop.f32.mrf.mxu2  ;;  %v4072_v24 = vsel %vm3816_vm9, %v3688_v51, %v3944_v57 }
 0x25e   : > { %v3559_v32 = vadd.f32 %v3318_v26, %v2333_v43  ;;  %v1482_v18 = vpop.f32.mrf.mxu0  ;;  %v2335_v11 = vpop.f32.mrf.mxu1 }
 0x25f   : > { %4238 = vst [vmem:[#allocation3 + $0xc0] sm:$0xff] %v4174_v63  ;;  %v2336_v13 = vadd.f32 %v2335_v11, %v1482_v18  ;;  %v3557_v11 = vadd.f32 %v13667_v59, %v2328_v20  ;;  %v12595_v59 = vld [vmem:[%s13145_s1 + $0x140] sm:$0xff] }
 0x260   : > { %v3691_v1 = vadd.f32 %v13497_v27, %v3559_v32 }
 0x261   : > { %10464 = vmatmul.msk.bf16.gmra.mxu0 %vm1141_vm1, %v12529_v37  ;;  %10788 = vmatmul.msk.bf16.gmra.mxu1 %vm1141_vm1, %v12464_v23  ;;  %v3689_v43 = vadd.f32 %v13497_v27, %v3557_v11  ;;  %v12530_v37 = vld [vmem:[%s13145_s1 + $0x130] sm:$0xff]  ;;  %v12465_v23 = vld [vmem:[%s13145_s1 + $0x120] sm:$0xff]  ;;  %v12531_v11 = vld [vmem:[%s13145_s1 + $0x138] sm:$0xff] }
 0x262   : > { %vm3819_vm8 = vcmp.ge.f32.partialorder %v3691_v1, 0.0  ;;  %v3947_v19 = vmul.f32 0.01, %v3691_v1  ;;  %11243 = vmatmul.msk.bf16.gmra.mxu2 %vm1141_vm1, %v12594_v53 }
 0x263   : > { %vm3817_vm11 = vcmp.ge.f32.partialorder %v3689_v43, 0.0 }
 0x264   : > { %v4075_v44 = vsel %vm3819_vm8, %v3691_v1, %v3947_v19 }
 0x265   : > { %v4175_v36 = vmax.f32 %v4071_v22, %v4075_v44  ;;  %v3321_v30 = vpop.f32.mrf.mxu2 }
 0x266   : > { %v3560_v33 = vadd.f32 %v3321_v30, %v2336_v13  ;;  %v1484_v16 = vpop.f32.mrf.mxu0  ;;  %v2337_v3 = vpop.f32.mrf.mxu1  ;;  %v3945_v13 = vmul.f32 0.01, %v3689_v43 }
 0x267   : > { %4239 = vst [vmem:[#allocation3 + $0xc8] sm:$0xff] %v4175_v36  ;;  %v2338_v15 = vadd.f32 %v2337_v3, %v1484_v16 }
 0x268   : > { %v3692_v53 = vadd.f32 %v13497_v27, %v3560_v33  ;;  %v4073_v30 = vsel %vm3817_vm11, %v3689_v43, %v3945_v13 }
 0x26a   : > { %vm3820_vm10 = vcmp.ge.f32.partialorder %v3692_v53, 0.0  ;;  %v3948_v38 = vmul.f32 0.01, %v3692_v53 }
 0x26c   : > { %v4076_v63 = vsel %vm3820_vm10, %v3692_v53, %v3948_v38  ;;  %v12466_v53 = vld [vmem:[%s13145_s1 + $0x128] sm:$0xff] }
 0x26d   : > { %v4176_v12 = vmax.f32 %v4072_v24, %v4076_v63  ;;  %v3323_v26 = vpop.f32.mrf.mxu2  ;;  %v12596_v38 = vld [vmem:[%s13145_s1 + $0x148] sm:$0xff] }
 0x26e   : > { %v4302_v32 = vld [vmem:[#allocation3 + $0xc0] ss:$2 sm:$0xff]  ;;  %v4366_v18 = vld [vmem:[#allocation3 + $0xc1] ss:$2 sm:$0xff]  ;;  %v3561_v14 = vadd.f32 %v3323_v26, %v2338_v15  ;;  %v1487_v5 = vpop.f32.mrf.mxu0  ;;  %v2340_v1 = vpop.f32.mrf.mxu1 }
 0x26f   : > { %4240 = vst [vmem:[#allocation3 + $0xd0] sm:$0xff] %v4176_v12  ;;  %v4417_v19 = vmax.f32 %v4302_v32, %v4366_v18 }
 0x270   : > { %v3693_v22 = vadd.f32 %v13497_v27, %v3561_v14 }
 0x271   : > { %10465 = vmatmul.msk.bf16.gmra.mxu0 %vm1141_vm1, %v12530_v37  ;;  %10789 = vmatmul.msk.bf16.gmra.mxu1 %vm1141_vm1, %v12465_v23  ;;  %v4453_v51 = vmul.f32 %v13574_v41, %v4417_v19 }
 0x272   : > { %vm3821_vm12 = vcmp.ge.f32.partialorder %v3693_v22, 0.0  ;;  %v3949_v44 = vmul.f32 0.01, %v3693_v22  ;;  %11244 = vmatmul.msk.bf16.gmra.mxu2 %vm1141_vm1, %v12595_v59 }
 0x273   : > { %v4489_v36 = vadd.f32 %v13581_v8, %v4453_v51  ;;  %v12532_v51 = vld [vmem:[%s13145_s1 + $0x140] sm:$0xff] }
 0x274   : > { %v4077_v20 = vsel %vm3821_vm12, %v3693_v22, %v3949_v44  ;;  %v2341_v22 = vadd.f32 %v2340_v1, %v1487_v5 }
 0x275   : > { %v4177_v33 = vmax.f32 %v4073_v30, %v4077_v20  ;;  %v3326_v16 = vpop.f32.mrf.mxu2  ;;  %4561 = vst [vmem:[#allocation2 + $0xa9] sm:$0xff] %v4489_v36  ;;  %v12467_v36 = vld [vmem:[%s13145_s1 + $0x130] sm:$0xff] }
 0x276   : > { %v1489_v3 = vpop.f32.mrf.mxu0  ;;  %v2342_v57 = vpop.f32.mrf.mxu1  ;;  %v12597_v30 = vld [vmem:[%s13145_s1 + $0x150] sm:$0xff]  ;;  %v3562_v1 = vadd.f32 %v3326_v16, %v2341_v22 }
 0x277   : > { %4241 = vst [vmem:[#allocation3 + $0xd8] sm:$0xff] %v4177_v33  ;;  %v2343_v47 = vadd.f32 %v2342_v57, %v1489_v3  ;;  %v12533_v57 = vld [vmem:[%s13145_s1 + $0x148] sm:$0xff] }
 0x278   : > { %v3694_v28 = vadd.f32 %v13497_v27, %v3562_v1 }
 0x27a   : > { %v3950_v22 = vmul.f32 0.01, %v3694_v28  ;;  %vm3822_vm13 = vcmp.ge.f32.partialorder %v3694_v28, 0.0 }
 0x27c   : > { %v5121_v63 = vld [vmem:[#allocation2 + $0xa8] sm:$0xff] }
 0x27d   : > { %v3328_v24 = vpop.f32.mrf.mxu2  ;;  %v13713_v15 = vld [vmem:[#allocation2 + $0xa8] sm:$0xff]  ;;  %v5153_v44 = vpack.c.bf16 %v5121_v63, %v5121_v63 }
 0x27e   : > { %v13715_v12 = vld [vmem:[#allocation2 + $0xa8] sm:$0xff]  ;;  %v1492_v43 = vpop.f32.mrf.mxu0  ;;  %v2345_v23 = vpop.f32.mrf.mxu1 }
 0x27f   : > { %16421 = vst [vmem:[#allocation37_spill] sm:$0xff] %v13715_v12  ;;  %v4304_v26 = vld [vmem:[#allocation3 + $0xd0] ss:$2 sm:$0xff]  ;;  %v4368_v37 = vld [vmem:[#allocation3 + $0xd1] ss:$2 sm:$0xff] }
 0x280   : > { %7663 = vst [vmem:[#allocation2 + $0xa8] sm:$0x1] %v13516_v60  ;;  %v4418_v32 = vmax.f32 %v4304_v26, %v4368_v37 }
 0x281   : > { %10466 = vmatmul.msk.bf16.gmra.mxu0 %vm1141_vm1, %v12531_v11  ;;  %10790 = vmatmul.msk.bf16.gmra.mxu1 %vm1141_vm1, %v12466_v53 }
 0x282   : > { %v4454_v18 = vmul.f32 %v13574_v41, %v4418_v32  ;;  %11245 = vmatmul.msk.bf16.gmra.mxu2 %vm1141_vm1, %v12596_v38 }
 0x284   : > { %v4490_v14 = vadd.f32 %v13581_v8, %v4454_v18 }
 0x285   : > { %v3331_v59 = vpop.f32.mrf.mxu2 }
 0x286   : > { %4562 = vst [vmem:[#allocation2 + $0xb1] sm:$0xff] %v4490_v14  ;;  %v13723_v19 = vpop.f32.mrf.mxu0  ;;  %v13725_v13 = vpop.f32.mrf.mxu1  ;;  %v5345_v14 = vunpack.c.l.b16 %v5153_v44 }
 0x28d   : > { %v5122_v20 = vld [vmem:[#allocation2 + $0xb0] sm:$0xff]  ;;  %v13730_v33 = vpop.f32.mrf.mxu2 }
 0x28e   : > { %v5154_v11 = vpack.c.bf16 %v5122_v20, %v5122_v20  ;;  %v13732_v53 = vld [vmem:[#allocation2 + $0xb0] sm:$0xff]  ;;  %v1497_v37 = vpop.f32.mrf.mxu0  ;;  %v2350_v63 = vpop.f32.mrf.mxu1 }
 0x28f   : > { %v13734_v38 = vld [vmem:[#allocation2 + $0xb1] sm:$0xff]  ;;  %v2351_v40 = vadd.f32 %v2350_v63, %v1497_v37 }
 0x290   : > { %16422 = vst [vmem:[#allocation38_spill] sm:$0xff] %v13734_v38  ;;  %v13736_v26 = vld [vmem:[#allocation2 + $0xaa] sm:$0xff]  ;;  %v5346_v12 = vunpack.c.l.b16 %v5154_v11  ;;  %v2346_v11 = vadd.f32 %v2345_v23, %v1492_v43 }
 0x291   : > { %16423 = vst [vmem:[#allocation39_spill] sm:$0xff] %v13736_v26  ;;  %v13738_v32 = vld [vmem:[#allocation2 + $0xaa] sm:$0xff]  ;;  %10467 = vmatmul.msk.bf16.gmra.mxu0 %vm1141_vm1, %v12532_v51  ;;  %10791 = vmatmul.msk.bf16.gmra.mxu1 %vm1141_vm1, %v12467_v36  ;;  %v4078_v36 = vsel %vm3822_vm13, %v3694_v28, %v3950_v22 }
 0x292   : > { %16424 = vst [vmem:[#allocation40_spill] sm:$0xff] %v13738_v32  ;;  %v13740_v18 = vld [vmem:[#allocation2 + $0xb0] sm:$0xff]  ;;  %v5371_v20 = vpack.c.b16 %v5346_v12, %v5345_v14  ;;  %11246 = vmatmul.msk.bf16.gmra.mxu2 %vm1141_vm1, %v12597_v30 }
 0x293   : > { %16425 = vst [vmem:[#allocation41_spill] sm:$0xff] %v13740_v18  ;;  %v13742_v5 = vld [vmem:[#allocation2 + $0xb1] sm:$0xff] }
 0x294   : > { %16426 = vst [vmem:[#allocation42_spill] sm:$0xff] %v13742_v5  ;;  %5820 = vmatmul.bf16.gmra.mxu3 %v5371_v20  ;;  %v12598_v20 = vld [vmem:[%s13145_s1 + $0x158] sm:$0xff] }
 0x295   : > { %7671 = vst [vmem:[#allocation2 + $0xb1] sm:$0x1] %v13516_v60  ;;  %v3336_v18 = vpop.f32.mrf.mxu2  ;;  %v3563_v60 = vadd.f32 %v3328_v24, %v2343_v47  ;;  %v3564_v24 = vadd.f32 %v3331_v59, %v2346_v11 }
 0x296   : > { %v3566_v5 = vadd.f32 %v3336_v18, %v2351_v40  ;;  %v1499_v16 = vpop.f32.mrf.mxu0  ;;  %v2352_v44 = vpop.f32.mrf.mxu1  ;;  %v12468_v18 = vld [vmem:[%s13145_s1 + $0x138] sm:$0xff] }
 0x297   : > { %v3695_v30 = vadd.f32 %v13497_v27, %v3563_v60  ;;  %v2353_v1 = vadd.f32 %v2352_v44, %v1499_v16  ;;  %v13761_v16 = vld [vmem:[%s16395_s2] ss:$0 sm:$0xff]  ;;  %v2348_v60 = vadd.f32 %v13725_v13, %v13723_v19 }
 0x298   : > { %v3698_v51 = vadd.f32 %v13497_v27, %v3566_v5  ;;  %v3696_v59 = vadd.f32 %v13761_v16, %v3564_v24 }
 0x299   : > { %v3951_v47 = vmul.f32 0.01, %v3695_v30  ;;  %vm3823_vm15 = vcmp.ge.f32.partialorder %v3695_v30, 0.0 }
 0x29a   : > { %vm3826_vm14 = vcmp.ge.f32.partialorder %v3698_v51, 0.0  ;;  %v3954_v12 = vmul.f32 0.01, %v3698_v51  ;;  %vm3824_vm2 = vcmp.ge.f32.partialorder %v3696_v59, 0.0 }
 0x29b   : > { %v4079_v23 = vsel %vm3823_vm15, %v3695_v30, %v3951_v47  ;;  %v3565_v30 = vadd.f32 %v13730_v33, %v2348_v60  ;;  %v12599_v33 = vld [vmem:[%s13145_s1 + $0x160] sm:$0xff] }
 0x29c   : > { %v4082_v37 = vsel %vm3826_vm14, %v3698_v51, %v3954_v12 }
 0x29d   : > { %v4178_v3 = vmax.f32 %v4078_v36, %v4082_v37  ;;  %v3338_v40 = vpop.f32.mrf.mxu2  ;;  %v3952_v36 = vmul.f32 0.01, %v3696_v59 }
 0x29e   : > { %v3567_v63 = vadd.f32 %v3338_v40, %v2353_v1  ;;  %v1502_v14 = vpop.f32.mrf.mxu0  ;;  %v2355_v32 = vpop.f32.mrf.mxu1 }
 0x29f   : > { %4242 = vst [vmem:[#allocation3 + $0xe0] sm:$0xff] %v4178_v3  ;;  %v2356_v43 = vadd.f32 %v2355_v32, %v1502_v14  ;;  %v4080_v1 = vsel %vm3824_vm2, %v3696_v59, %v3952_v36  ;;  %v3697_v3 = vadd.f32 %v13761_v16, %v3565_v30  ;;  %v12535_v30 = vld [vmem:[%s13145_s1 + $0x158] sm:$0xff] }
 0x2a0   : > { %v3699_v5 = vadd.f32 %v13497_v27, %v3567_v63  ;;  %v12469_v63 = vld [vmem:[%s13145_s1 + $0x140] sm:$0xff] }
 0x2a1   : > { %10468 = vmatmul.msk.bf16.gmra.mxu0 %vm1141_vm1, %v12533_v57  ;;  %10792 = vmatmul.msk.bf16.gmra.mxu1 %vm1141_vm1, %v12468_v18  ;;  %v12534_v18 = vld [vmem:[%s13145_s1 + $0x150] sm:$0xff]  ;;  %vm3825_vm4 = vcmp.ge.f32.partialorder %v3697_v3, 0.0 }
 0x2a2   : > { %vm3827_vm0 = vcmp.ge.f32.partialorder %v3699_v5, 0.0  ;;  %v3955_v28 = vmul.f32 0.01, %v3699_v5  ;;  %11247 = vmatmul.msk.bf16.gmra.mxu2 %vm1141_vm1, %v12598_v20 }
 0x2a4   : > { %v4083_v22 = vsel %vm3827_vm0, %v3699_v5, %v3955_v28 }
 0x2a5   : > { %v4179_v27 = vmax.f32 %v4079_v23, %v4083_v22  ;;  %v3341_v44 = vpop.f32.mrf.mxu2 }
 0x2a6   : > { %v3568_v51 = vadd.f32 %v3341_v44, %v2356_v43  ;;  %v1504_v12 = vpop.f32.mrf.mxu0  ;;  %v2357_v32 = vpop.f32.mrf.mxu1  ;;  %v3953_v43 = vmul.f32 0.01, %v3697_v3 }
 0x2a7   : > { %4243 = vst [vmem:[#allocation3 + $0xe8] sm:$0xff] %v4179_v27  ;;  %v2358_v19 = vadd.f32 %v2357_v32, %v1504_v12 }
 0x2a8   : > { %v3700_v11 = vadd.f32 %v13761_v16, %v3568_v51  ;;  %v4081_v44 = vsel %vm3825_vm4, %v3697_v3, %v3953_v43 }
 0x2aa   : > { %vm3828_vm3 = vcmp.ge.f32.partialorder %v3700_v11, 0.0  ;;  %v3956_v37 = vmul.f32 0.01, %v3700_v11 }
 0x2ac   : > { %v4084_v40 = vsel %vm3828_vm3, %v3700_v11, %v3956_v37  ;;  %v12470_v11 = vld [vmem:[%s13145_s1 + $0x148] sm:$0xff] }
 0x2ad   : > { %v4180_v13 = vmax.f32 %v4080_v1, %v4084_v40  ;;  %v3343_v57 = vpop.f32.mrf.mxu2  ;;  %v12600_v37 = vld [vmem:[%s13145_s1 + $0x168] sm:$0xff] }
 0x2ae   : > { %v4306_v14 = vld [vmem:[#allocation3 + $0xe0] ss:$2 sm:$0xff]  ;;  %v4370_v20 = vld [vmem:[#allocation3 + $0xe1] ss:$2 sm:$0xff]  ;;  %v3569_v47 = vadd.f32 %v3343_v57, %v2358_v19  ;;  %v1507_v24 = vpop.f32.mrf.mxu0  ;;  %v2360_v5 = vpop.f32.mrf.mxu1 }
 0x2af   : > { %4244 = vst [vmem:[#allocation3 + $0xf0] sm:$0xff] %v4180_v13  ;;  %v4419_v28 = vmax.f32 %v4306_v14, %v4370_v20 }
 0x2b0   : > { %v3701_v23 = vadd.f32 %v13761_v16, %v3569_v47 }
 0x2b1   : > { %10469 = vmatmul.msk.bf16.gmra.mxu0 %vm1141_vm1, %v12534_v18  ;;  %10793 = vmatmul.msk.bf16.gmra.mxu1 %vm1141_vm1, %v12469_v63  ;;  %v4455_v59 = vmul.f32 %v13574_v41, %v4419_v28  ;;  %v13785_v63 = vld [vmem:[#allocation2] sm:$0xff] }
 0x2b2   : > { %vm3829_vm5 = vcmp.ge.f32.partialorder %v3701_v23, 0.0  ;;  %v3957_v22 = vmul.f32 0.01, %v3701_v23  ;;  %11248 = vmatmul.msk.bf16.gmra.mxu2 %vm1141_vm1, %v12599_v33 }
 0x2b3   : > { %v4491_v27 = vadd.f32 %v13581_v8, %v4455_v59  ;;  %v2361_v59 = vadd.f32 %v2360_v5, %v1507_v24 }
 0x2b4   : > { %v4085_v60 = vsel %vm3829_vm5, %v3701_v23, %v3957_v22  ;;  %v12536_v22 = vld [vmem:[%s13145_s1 + $0x160] sm:$0xff] }
 0x2b5   : > { %v4181_v51 = vmax.f32 %v4081_v44, %v4085_v60  ;;  %v3346_v12 = vpop.f32.mrf.mxu2  ;;  %4563 = vst [vmem:[#allocation2 + $0xc1] sm:$0xff] %v4491_v27  ;;  %v12471_v44 = vld [vmem:[%s13145_s1 + $0x150] sm:$0xff] }
 0x2b6   : > { %v1509_v32 = vpop.f32.mrf.mxu0  ;;  %v2362_v36 = vpop.f32.mrf.mxu1  ;;  %v12601_v60 = vld [vmem:[%s13145_s1 + $0x170] sm:$0xff]  ;;  %v3570_v5 = vadd.f32 %v3346_v12, %v2361_v59 }
 0x2b7   : > { %4245 = vst [vmem:[#allocation3 + $0xf8] sm:$0xff] %v4181_v51 }
 0x2b8   : > { %v3702_v12 = vadd.f32 %v13761_v16, %v3570_v5 }
 0x2ba   : > { %vm3830_vm6 = vcmp.ge.f32.partialorder %v3702_v12, 0.0 }
 0x2bc   : > { %v5123_v40 = vld [vmem:[#allocation2 + $0xc0] sm:$0xff] }
 0x2bd   : > { %v3348_v1 = vpop.f32.mrf.mxu2  ;;  %v13781_v19 = vld [vmem:[#allocation2 + $0xc0] sm:$0xff]  ;;  %v5155_v27 = vpack.c.bf16 %v5123_v40, %v5123_v40 }
 0x2be   : > { %16427 = vst [vmem:[#allocation43_spill] sm:$0xff] %v13781_v19  ;;  %v13783_v13 = vld [vmem:[#allocation2 + $0xc0] sm:$0xff]  ;;  %v1512_v3 = vpop.f32.mrf.mxu0  ;;  %v2365_v14 = vpop.f32.mrf.mxu1 }
 0x2bf   : > { %16428 = vst [vmem:[#allocation44_spill] sm:$0xff] %v13783_v13  ;;  %v4308_v57 = vld [vmem:[#allocation3 + $0xf0] ss:$2 sm:$0xff]  ;;  %v4372_v18 = vld [vmem:[#allocation3 + $0xf1] ss:$2 sm:$0xff]  ;;  %v2366_v5 = vadd.f32 %v2365_v14, %v1512_v3 }
 0x2c0   : > { %7664 = vst [vmem:[#allocation2 + $0xc0] sm:$0x1] %v13785_v63  ;;  %v4420_v20 = vmax.f32 %v4308_v57, %v4372_v18 }
 0x2c1   : > { %10470 = vmatmul.msk.bf16.gmra.mxu0 %vm1141_vm1, %v12535_v30  ;;  %10794 = vmatmul.msk.bf16.gmra.mxu1 %vm1141_vm1, %v12470_v11 }
 0x2c2   : > { %v4456_v47 = vmul.f32 %v13574_v41, %v4420_v20  ;;  %11249 = vmatmul.msk.bf16.gmra.mxu2 %vm1141_vm1, %v12600_v37 }
 0x2c4   : > { %v4492_v33 = vadd.f32 %v13581_v8, %v4456_v47  ;;  %v5347_v47 = vunpack.c.l.b16 %v5155_v27  ;;  %v2363_v27 = vadd.f32 %v2362_v36, %v1509_v32 }
 0x2c5   : > { %v3351_v28 = vpop.f32.mrf.mxu2 }
 0x2c6   : > { %4564 = vst [vmem:[#allocation2 + $0xc9] sm:$0xff] %v4492_v33  ;;  %v13793_v43 = vpop.f32.mrf.mxu0  ;;  %v13795_v23 = vpop.f32.mrf.mxu1 }
 0x2cd   : > { %v5124_v51 = vld [vmem:[#allocation2 + $0xc8] sm:$0xff]  ;;  %v13800_v30 = vpop.f32.mrf.mxu2 }
 0x2ce   : > { %v5156_v11 = vpack.c.bf16 %v5124_v51, %v5124_v51  ;;  %v13802_v41 = vld [vmem:[#allocation2 + $0xc8] sm:$0xff]  ;;  %v1517_v57 = vpop.f32.mrf.mxu0  ;;  %v2370_v40 = vpop.f32.mrf.mxu1  ;;  %v12639_v51 = vld [vmem:[%s16352_s5 + $0x78] sm:$0xff] }
 0x2cf   : > { %v13804_v37 = vld [vmem:[#allocation2 + $0xc9] sm:$0xff]  ;;  %6282 = vmatpush.bf16.msrb.mxu0 %v12639_v51 }
 0x2d0   : > { %16429 = vst [vmem:[#allocation45_spill] sm:$0xff] %v13804_v37  ;;  %v13806_v8 = vld [vmem:[#allocation2 + $0xc2] sm:$0xff]  ;;  %v5348_v33 = vunpack.c.l.b16 %v5156_v11 }
 0x2d1   : > { %16430 = vst [vmem:[#allocation46_spill] sm:$0xff] %v13806_v8  ;;  %v13808_v18 = vld [vmem:[#allocation2 + $0xc2] sm:$0xff]  ;;  %10471 = vmatmul.msk.bf16.gmra.mxu0 %vm1141_vm1, %v12536_v22  ;;  %10795 = vmatmul.msk.bf16.gmra.mxu1 %vm1141_vm1, %v12471_v44  ;;  %v3571_v22 = vadd.f32 %v3348_v1, %v2363_v27  ;;  %v3572_v27 = vadd.f32 %v3351_v28, %v2366_v5 }
 0x2d2   : > { %16431 = vst [vmem:[#allocation47_spill] sm:$0xff] %v13808_v18  ;;  %v13810_v20 = vld [vmem:[#allocation2 + $0xc8] sm:$0xff]  ;;  %v5372_v13 = vpack.c.b16 %v5348_v33, %v5347_v47  ;;  %v2371_v18 = vadd.f32 %v2370_v40, %v1517_v57  ;;  %11250 = vmatmul.msk.bf16.gmra.mxu2 %vm1141_vm1, %v12601_v60  ;;  %v12472_v33 = vld [vmem:[%s13145_s1 + $0x158] sm:$0xff]  ;;  %v2368_v28 = vadd.f32 %v13795_v23, %v13793_v43 }
 0x2d3   : > { %16432 = vst [vmem:[#allocation48_spill] sm:$0xff] %v13810_v20  ;;  %v13812_v24 = vld [vmem:[#allocation2 + $0xc9] sm:$0xff]  ;;  %v3958_v20 = vmul.f32 0.01, %v3702_v12  ;;  %v3703_v40 = vadd.f32 %v13761_v16, %v3571_v22 }
 0x2d4   : > { %16433 = vst [vmem:[#allocation49_spill] sm:$0xff] %v13812_v24  ;;  %5825 = vmatmul.bf16.gmra.mxu3 %v5372_v13 }
 0x2d5   : > { %7672 = vst [vmem:[#allocation2 + $0xc9] sm:$0x1] %v13785_v63  ;;  %v3356_v59 = vpop.f32.mrf.mxu2  ;;  %v4086_v60 = vsel %vm3830_vm6, %v3702_v12, %v3958_v20  ;;  %v3959_v1 = vmul.f32 0.01, %v3703_v40  ;;  %vm3831_vm8 = vcmp.ge.f32.partialorder %v3703_v40, 0.0  ;;  %v3704_v20 = vadd.f32 %v13761_v16, %v3572_v27 }
 0x2d6   : > { %v3574_v11 = vadd.f32 %v3356_v59, %v2371_v18  ;;  %v1519_v24 = vpop.f32.mrf.mxu0  ;;  %v2372_v46 = vpop.f32.mrf.mxu1  ;;  %v12537_v18 = vld [vmem:[%s13145_s1 + $0x168] sm:$0xff] }
 0x2d7   : > { %v2373_v47 = vadd.f32 %v2372_v46, %v1519_v24  ;;  %v4087_v14 = vsel %vm3831_vm8, %v3703_v40, %v3959_v1  ;;  %v3960_v5 = vmul.f32 0.01, %v3704_v20  ;;  %vm3832_vm10 = vcmp.ge.f32.partialorder %v3704_v20, 0.0 }
 0x2d8   : > { %v3706_v44 = vadd.f32 %v13761_v16, %v3574_v11 }
 0x2da   : > { %vm3834_vm7 = vcmp.ge.f32.partialorder %v3706_v44, 0.0  ;;  %v3962_v57 = vmul.f32 0.01, %v3706_v44 }
 0x2dc   : > { %v4090_v13 = vsel %vm3834_vm7, %v3706_v44, %v3962_v57 }
 0x2dd   : > { %v4182_v32 = vmax.f32 %v4086_v60, %v4090_v13  ;;  %v3358_v36 = vpop.f32.mrf.mxu2  ;;  %v4088_v13 = vsel %vm3832_vm10, %v3704_v20, %v3960_v5  ;;  %v13846_v20 = vld [vmem:[%s16396_s3] ss:$0 sm:$0xff] }
 0x2de   : > { %v3575_v51 = vadd.f32 %v3358_v36, %v2373_v47  ;;  %v1522_v59 = vpop.f32.mrf.mxu0  ;;  %v2375_v2 = vpop.f32.mrf.mxu1 }
 0x2df   : > { %4246 = vst [vmem:[#allocation3 + $0x100] sm:$0xff] %v4182_v32  ;;  %v2376_v3 = vadd.f32 %v2375_v2, %v1522_v59  ;;  %v3573_v2 = vadd.f32 %v13800_v30, %v2368_v28  ;;  %v12603_v30 = vld [vmem:[%s13145_s1 + $0x180] sm:$0xff] }
 0x2e0   : > { %v3707_v11 = vadd.f32 %v13761_v16, %v3575_v51 }
 0x2e1   : > { %10472 = vmatmul.msk.bf16.gmra.mxu0 %vm1141_vm1, %v12537_v18  ;;  %10796 = vmatmul.msk.bf16.gmra.mxu1 %vm1141_vm1, %v12472_v33  ;;  %v3705_v47 = vadd.f32 %v13761_v16, %v3573_v2  ;;  %v12538_v18 = vld [vmem:[%s13145_s1 + $0x170] sm:$0xff]  ;;  %v12473_v33 = vld [vmem:[%s13145_s1 + $0x160] sm:$0xff] }
 0x2e2   : > { %vm3835_vm9 = vcmp.ge.f32.partialorder %v3707_v11, 0.0  ;;  %v3963_v46 = vmul.f32 0.01, %v3707_v11  ;;  %11251 = vmatmul.msk.bf16.gmra.mxu2 %vm1141_vm1, %v12602_v0 }
 0x2e3   : > { %vm3833_vm12 = vcmp.ge.f32.partialorder %v3705_v47, 0.0 }
 0x2e4   : > { %v4091_v24 = vsel %vm3835_vm9, %v3707_v11, %v3963_v46 }
 0x2e5   : > { %v4183_v12 = vmax.f32 %v4087_v14, %v4091_v24  ;;  %v3361_v22 = vpop.f32.mrf.mxu2 }
 0x2e6   : > { %v3576_v44 = vadd.f32 %v3361_v22, %v2376_v3  ;;  %v1524_v57 = vpop.f32.mrf.mxu0  ;;  %v2377_v60 = vpop.f32.mrf.mxu1  ;;  %v3961_v3 = vmul.f32 0.01, %v3705_v47  ;;  %v13853_v22 = vld [vmem:[%s16397_s4] ss:$0 sm:$0xff] }
 0x2e7   : > { %4247 = vst [vmem:[#allocation3 + $0x108] sm:$0xff] %v4183_v12  ;;  %v2378_v43 = vadd.f32 %v2377_v60, %v1524_v57 }
 0x2e8   : > { %v3708_v0 = vadd.f32 %v13761_v16, %v3576_v44  ;;  %v4089_v44 = vsel %vm3833_vm12, %v3705_v47, %v3961_v3 }
 0x2ea   : > { %vm3836_vm11 = vcmp.ge.f32.partialorder %v3708_v0, 0.0  ;;  %v3964_v40 = vmul.f32 0.01, %v3708_v0 }
 0x2ec   : > { %v4092_v32 = vsel %vm3836_vm11, %v3708_v0, %v3964_v40 }
 0x2ed   : > { %v4184_v23 = vmax.f32 %v4088_v13, %v4092_v32  ;;  %v3363_v36 = vpop.f32.mrf.mxu2  ;;  %v12539_v13 = vld [vmem:[%s13145_s1 + $0x178] sm:$0xff]  ;;  %v12474_v32 = vld [vmem:[%s13145_s1 + $0x168] sm:$0xff] }
 0x2ee   : > { %v4310_v51 = vld [vmem:[#allocation3 + $0x100] ss:$2 sm:$0xff]  ;;  %v4374_v59 = vld [vmem:[#allocation3 + $0x101] ss:$2 sm:$0xff]  ;;  %v3577_v1 = vadd.f32 %v3363_v36, %v2378_v43  ;;  %v1527_v27 = vpop.f32.mrf.mxu0  ;;  %v2380_v11 = vpop.f32.mrf.mxu1 }
 0x2ef   : > { %4248 = vst [vmem:[#allocation3 + $0x110] sm:$0xff] %v4184_v23  ;;  %v4421_v46 = vmax.f32 %v4310_v51, %v4374_v59 }
 0x2f0   : > { %v3709_v14 = vadd.f32 %v13761_v16, %v3577_v1 }
 0x2f1   : > { %10473 = vmatmul.msk.bf16.gmra.mxu0 %vm1141_vm1, %v12538_v18  ;;  %10797 = vmatmul.msk.bf16.gmra.mxu1 %vm1141_vm1, %v12473_v33  ;;  %v4457_v24 = vmul.f32 %v13846_v20, %v4421_v46  ;;  %v12604_v18 = vld [vmem:[%s13145_s1 + $0x188] sm:$0xff] }
 0x2f2   : > { %vm3837_vm13 = vcmp.ge.f32.partialorder %v3709_v14, 0.0  ;;  %v3965_v12 = vmul.f32 0.01, %v3709_v14  ;;  %11252 = vmatmul.msk.bf16.gmra.mxu2 %vm1141_vm1, %v12603_v30 }
 0x2f3   : > { %v4493_v28 = vadd.f32 %v13853_v22, %v4457_v24 }
 0x2f4   : > { %v4093_v57 = vsel %vm3837_vm13, %v3709_v14, %v3965_v12  ;;  %v2381_v12 = vadd.f32 %v2380_v11, %v1527_v27 }
 0x2f5   : > { %v4185_v60 = vmax.f32 %v4089_v44, %v4093_v57  ;;  %v3366_v5 = vpop.f32.mrf.mxu2  ;;  %4565 = vst [vmem:[#allocation2 + $0xd9] sm:$0xff] %v4493_v28  ;;  %v12540_v57 = vld [vmem:[%s13145_s1 + $0x180] sm:$0xff] }
 0x2f6   : > { %v13856_v2 = vpop.f32.mrf.mxu0  ;;  %v13858_v0 = vpop.f32.mrf.mxu1  ;;  %v3578_v11 = vadd.f32 %v3366_v5, %v2381_v12 }
 0x2f7   : > { %4249 = vst [vmem:[#allocation3 + $0x118] sm:$0xff] %v4185_v60  ;;  %v12475_v60 = vld [vmem:[%s13145_s1 + $0x170] sm:$0xff] }
 0x2fc   : > { %v5125_v3 = vld [vmem:[#allocation2 + $0xd8] sm:$0xff] }
 0x2fd   : > { %v13860_v40 = vpop.f32.mrf.mxu2  ;;  %v6475_v14 = vld [vmem:[#allocation2 + $0xd8] sm:$0xff]  ;;  %v5157_v28 = vpack.c.bf16 %v5125_v3, %v5125_v3 }
 0x2fe   : > { %v4312_v43 = vld [vmem:[#allocation3 + $0x110] ss:$2 sm:$0xff]  ;;  %v4376_v23 = vld [vmem:[#allocation3 + $0x111] ss:$2 sm:$0xff]  ;;  %v13864_v36 = vpop.f32.mrf.mxu0  ;;  %v13867_v33 = vpop.f32.mrf.mxu1  ;;  %v6507_v44 = vpack.c.bf16 %v6475_v14, %v6475_v14  ;;  %v12605_v14 = vld [vmem:[%s13145_s1 + $0x190] sm:$0xff] }
 0x2ff   : > { %v4422_v47 = vmax.f32 %v4312_v43, %v4376_v23  ;;  %v4663_v24 = vld [vmem:[#allocation2 + $0xd9] sm:$0xff]  ;;  %v5349_v8 = vunpack.c.l.b16 %v5157_v28 }
 0x300   : > { %v6539_v27 = vld [vmem:[#allocation2 + $0xd9] sm:$0xff]  ;;  %v13889_v37 = vunpack.c.l.b16 %v6507_v44 }
 0x301   : > { %10474 = vmatmul.msk.bf16.gmra.mxu0 %vm1141_vm1, %v12539_v13  ;;  %10798 = vmatmul.msk.bf16.gmra.mxu1 %vm1141_vm1, %v12474_v32  ;;  %v4458_v51 = vmul.f32 %v13846_v20, %v4422_v47  ;;  %v4695_v13 = vpack.c.bf16 %v4663_v24, %v4663_v24  ;;  %v4599_v32 = vld [vmem:[#allocation2 + $0xd8] sm:$0xff] }
 0x302   : > { %11253 = vmatmul.msk.bf16.gmra.mxu2 %vm1141_vm1, %v12604_v18 }
 0x303   : > { %v4494_v59 = vadd.f32 %v13853_v22, %v4458_v51 }
 0x305   : > { %v13874_v1 = vpop.f32.mrf.mxu2  ;;  %4566 = vst [vmem:[#allocation2 + $0xe1] sm:$0xff] %v4494_v59 }
 0x306   : > { %v13876_v30 = vpop.f32.mrf.mxu0  ;;  %v13878_v46 = vpop.f32.mrf.mxu1 }
 0x30c   : > { %v5126_v43 = vld [vmem:[#allocation2 + $0xe0] sm:$0xff] }
 0x30d   : > { %v6476_v23 = vld [vmem:[#allocation2 + $0xe0] sm:$0xff]  ;;  %v13882_v47 = vpop.f32.mrf.mxu2  ;;  %v5158_v51 = vpack.c.bf16 %v5126_v43, %v5126_v43 }
 0x30e   : > { %v4664_v18 = vld [vmem:[#allocation2 + $0xe1] sm:$0xff]  ;;  %v6508_v59 = vpack.c.bf16 %v6476_v23, %v6476_v23  ;;  %v1537_v3 = vpop.f32.mrf.mxu0  ;;  %v2390_v38 = vpop.f32.mrf.mxu1  ;;  %v4919_v23 = vunpack.c.l.b16 %v4695_v13  ;;  %v3710_v13 = vadd.f32 %v13761_v16, %v3578_v11 }
 0x30f   : > { %v4696_v25 = vpack.c.bf16 %v4664_v18, %v4664_v18  ;;  %v13884_v52 = vld [vmem:[#allocation2 + $0xda] sm:$0xff]  ;;  %v5350_v19 = vunpack.c.l.b16 %v5158_v51  ;;  %v2391_v44 = vadd.f32 %v2390_v38, %v1537_v3 }
 0x310   : > { %16434 = vst [vmem:[#allocation50_spill] sm:$0xff] %v13884_v52  ;;  %v13886_v39 = vld [vmem:[#allocation2 + $0xda] sm:$0xff]  ;;  %v13892_v43 = vunpack.c.l.b16 %v6508_v59  ;;  %v6571_v52 = vpack.c.bf16 %v6539_v27, %v6539_v27  ;;  %v3966_v27 = vmul.f32 0.01, %v3710_v13  ;;  %vm3838_vm14 = vcmp.ge.f32.partialorder %v3710_v13, 0.0 }
 0x311   : > { %16435 = vst [vmem:[#allocation51_spill] sm:$0xff] %v13886_v39  ;;  %v4600_v24 = vld [vmem:[#allocation2 + $0xe0] sm:$0xff]  ;;  %v4920_v18 = vunpack.c.l.b16 %v4696_v25  ;;  %v4631_v39 = vpack.c.bf16 %v4599_v32, %v4599_v32  ;;  %10475 = vmatmul.msk.bf16.gmra.mxu0 %vm1141_vm1, %v12540_v57  ;;  %10799 = vmatmul.msk.bf16.gmra.mxu1 %vm1141_vm1, %v12475_v60  ;;  %v5373_v5 = vpack.c.b16 %v5350_v19, %v5349_v8 }
 0x312   : > { %v6540_v26 = vld [vmem:[#allocation2 + $0xe1] sm:$0xff]  ;;  %7655 = vst [vmem:[#allocation2 + $0xd8] sm:$0xff] %v13785_v63  ;;  %11254 = vmatmul.msk.bf16.gmra.mxu2 %vm1141_vm1, %v12605_v14  ;;  %v4632_v25 = vpack.c.bf16 %v4600_v24, %v4600_v24  ;;  %v13907_v60 = vunpack.c.l.b16 %v6571_v52  ;;  %v2383_v8 = vadd.f32 %v13858_v0, %v13856_v2  ;;  %v4094_v0 = vsel %vm3838_vm14, %v3710_v13, %v3966_v27 }
 0x313   : > { %7656 = vst [vmem:[#allocation2 + $0xe0] sm:$0x3] %v13785_v63  ;;  %v13899_v28 = vpack.c.b16 %v4920_v18, %v4919_v23  ;;  %5830 = vmatmul.bf16.gmra.mxu3 %v5373_v5  ;;  %v6572_v63 = vpack.c.bf16 %v6540_v26, %v6540_v26  ;;  %v13903_v51 = vunpack.c.l.b16 %v4631_v39  ;;  %v2386_v24 = vadd.f32 %v13867_v33, %v13864_v36  ;;  %v12606_v26 = vld [vmem:[%s13145_s1 + $0x198] sm:$0xff] }
 0x314   : > { %v13905_v57 = vunpack.c.l.b16 %v4632_v25  ;;  %16438 = vst [vmem:[#allocation54_spill] sm:$0xff] %v13907_v60  ;;  %v3579_v52 = vadd.f32 %v13860_v40, %v2383_v8  ;;  %v12541_v25 = vld [vmem:[%s13145_s1 + $0x188] sm:$0xff] }
 0x315   : > { %v3376_v32 = vpop.f32.mrf.mxu2  ;;  %16436 = vst [vmem:[#allocation52_spill] sm:$0xff] %v13903_v51  ;;  %v13909_v19 = vunpack.c.l.b16 %v6572_v63  ;;  %v12476_v63 = vld [vmem:[%s13145_s1 + $0x178] sm:$0xff]  ;;  %v12661_v60 = vld [vmem:[%s16352_s5 + $0x128] sm:$0xff] }
 0x316   : > { %16437 = vst [vmem:[#allocation53_spill] sm:$0xff] %v13905_v57  ;;  %v3582_v38 = vadd.f32 %v3376_v32, %v2391_v44  ;;  %v1539_v59 = vpop.f32.mrf.mxu0  ;;  %v2392_v11 = vpop.f32.mrf.mxu1  ;;  %v3711_v14 = vadd.f32 %v13761_v16, %v3579_v52  ;;  %v12622_v57 = vld [vmem:[%s13145_s1 + $0x218] sm:$0xff] }
 0x317   : > { %16439 = vst [vmem:[#allocation55_spill] sm:$0xff] %v13909_v19  ;;  %v2393_v18 = vadd.f32 %v2392_v11, %v1539_v59 }
 0x318   : > { %v3714_v3 = vadd.f32 %v13761_v16, %v3582_v38  ;;  %v3967_v8 = vmul.f32 0.01, %v3711_v14  ;;  %v3580_v38 = vadd.f32 %v13874_v1, %v2386_v24  ;;  %vm3839_vm0 = vcmp.ge.f32.partialorder %v3711_v14, 0.0 }
 0x319   : > { %v2388_v1 = vadd.f32 %v13878_v46, %v13876_v30 }
 0x31a   : > { %vm3842_vm15 = vcmp.ge.f32.partialorder %v3714_v3, 0.0  ;;  %v3970_v2 = vmul.f32 0.01, %v3714_v3  ;;  %v4095_v59 = vsel %vm3839_vm0, %v3711_v14, %v3967_v8  ;;  %v3712_v27 = vadd.f32 %v13761_v16, %v3580_v38  ;;  %v12607_v38 = vld [vmem:[%s13145_s1 + $0x1a0] sm:$0xff] }
 0x31c   : > { %v4098_v23 = vsel %vm3842_vm15, %v3714_v3, %v3970_v2  ;;  %vm3840_vm3 = vcmp.ge.f32.partialorder %v3712_v27, 0.0 }
 0x31d   : > { %v4186_v5 = vmax.f32 %v4094_v0, %v4098_v23  ;;  %v3378_v44 = vpop.f32.mrf.mxu2  ;;  %v3968_v23 = vmul.f32 0.01, %v3712_v27 }
 0x31e   : > { %v3583_v32 = vadd.f32 %v3378_v44, %v2393_v18  ;;  %v1542_v39 = vpop.f32.mrf.mxu0  ;;  %v2395_v40 = vpop.f32.mrf.mxu1 }
 0x31f   : > { %4250 = vst [vmem:[#allocation3 + $0x120] sm:$0xff] %v4186_v5  ;;  %v2396_v33 = vadd.f32 %v2395_v40, %v1542_v39  ;;  %v3581_v39 = vadd.f32 %v13882_v47, %v2388_v1  ;;  %v4096_v18 = vsel %vm3840_vm3, %v3712_v27, %v3968_v23 }
 0x320   : > { %v3715_v13 = vadd.f32 %v13761_v16, %v3583_v32  ;;  %v12477_v32 = vld [vmem:[%s13145_s1 + $0x180] sm:$0xff] }
 0x321   : > { %10476 = vmatmul.msk.bf16.gmra.mxu0 %vm1141_vm1, %v12541_v25  ;;  %10800 = vmatmul.msk.bf16.gmra.mxu1 %vm1141_vm1, %v12476_v63  ;;  %v3713_v5 = vadd.f32 %v13761_v16, %v3581_v39  ;;  %v12542_v63 = vld [vmem:[%s13145_s1 + $0x190] sm:$0xff] }
 0x322   : > { %vm3843_vm2 = vcmp.ge.f32.partialorder %v3715_v13, 0.0  ;;  %v3971_v36 = vmul.f32 0.01, %v3715_v13  ;;  %11255 = vmatmul.msk.bf16.gmra.mxu2 %vm1141_vm1, %v12606_v26 }
 0x323   : > { %vm3841_vm5 = vcmp.ge.f32.partialorder %v3713_v5, 0.0 }
 0x324   : > { %v4099_v11 = vsel %vm3843_vm2, %v3715_v13, %v3971_v36 }
 0x325   : > { %v4187_v52 = vmax.f32 %v4095_v59, %v4099_v11  ;;  %v3381_v3 = vpop.f32.mrf.mxu2  ;;  %v3969_v59 = vmul.f32 0.01, %v3713_v5 }
 0x326   : > { %v3584_v2 = vadd.f32 %v3381_v3, %v2396_v33  ;;  %v1544_v0 = vpop.f32.mrf.mxu0  ;;  %v2397_v24 = vpop.f32.mrf.mxu1 }
 0x327   : > { %4251 = vst [vmem:[#allocation3 + $0x128] sm:$0xff] %v4187_v52  ;;  %v2398_v30 = vadd.f32 %v2397_v24, %v1544_v0  ;;  %v4097_v1 = vsel %vm3841_vm5, %v3713_v5, %v3969_v59 }
 0x328   : > { %v3716_v26 = vadd.f32 %v13761_v16, %v3584_v2 }
 0x32a   : > { %vm3844_vm4 = vcmp.ge.f32.partialorder %v3716_v26, 0.0  ;;  %v3972_v14 = vmul.f32 0.01, %v3716_v26 }
 0x32c   : > { %v4100_v44 = vsel %vm3844_vm4, %v3716_v26, %v3972_v14  ;;  %v12543_v14 = vld [vmem:[%s13145_s1 + $0x198] sm:$0xff] }
 0x32d   : > { %v4188_v46 = vmax.f32 %v4096_v18, %v4100_v44  ;;  %v3383_v25 = vpop.f32.mrf.mxu2  ;;  %v12478_v18 = vld [vmem:[%s13145_s1 + $0x188] sm:$0xff] }
 0x32e   : > { %v3585_v40 = vadd.f32 %v3383_v25, %v2398_v30  ;;  %v1547_v8 = vpop.f32.mrf.mxu0  ;;  %v4314_v13 = vld [vmem:[#allocation3 + $0x120] ss:$2 sm:$0xff]  ;;  %v4378_v36 = vld [vmem:[#allocation3 + $0x121] ss:$2 sm:$0xff]  ;;  %v2400_v47 = vpop.f32.mrf.mxu1  ;;  %v12608_v30 = vld [vmem:[%s13145_s1 + $0x1a8] sm:$0xff] }
 0x32f   : > { %4252 = vst [vmem:[#allocation3 + $0x130] sm:$0xff] %v4188_v46  ;;  %v4423_v33 = vmax.f32 %v4314_v13, %v4378_v36  ;;  %v2401_v59 = vadd.f32 %v2400_v47, %v1547_v8 }
 0x330   : > { %v3717_v11 = vadd.f32 %v13761_v16, %v3585_v40 }
 0x331   : > { %10477 = vmatmul.msk.bf16.gmra.mxu0 %vm1141_vm1, %v12542_v63  ;;  %10801 = vmatmul.msk.bf16.gmra.mxu1 %vm1141_vm1, %v12477_v32  ;;  %v4459_v27 = vmul.f32 %v13846_v20, %v4423_v33 }
 0x332   : > { %vm3845_vm6 = vcmp.ge.f32.partialorder %v3717_v11, 0.0  ;;  %v3973_v52 = vmul.f32 0.01, %v3717_v11  ;;  %11256 = vmatmul.msk.bf16.gmra.mxu2 %vm1141_vm1, %v12607_v38 }
 0x333   : > { %v4495_v3 = vadd.f32 %v13853_v22, %v4459_v27 }
 0x334   : > { %v4101_v2 = vsel %vm3845_vm6, %v3717_v11, %v3973_v52 }
 0x335   : > { %v4189_v0 = vmax.f32 %v4097_v1, %v4101_v2  ;;  %v3386_v24 = vpop.f32.mrf.mxu2  ;;  %4567 = vst [vmem:[#allocation2 + $0xf1] sm:$0xff] %v4495_v3  ;;  %v12544_v3 = vld [vmem:[%s13145_s1 + $0x1a0] sm:$0xff]  ;;  %v12479_v1 = vld [vmem:[%s13145_s1 + $0x190] sm:$0xff] }
 0x336   : > { %v1549_v23 = vpop.f32.mrf.mxu0  ;;  %v2402_v39 = vpop.f32.mrf.mxu1 }
 0x337   : > { %4253 = vst [vmem:[#allocation3 + $0x138] sm:$0xff] %v4189_v0 }
 0x33c   : > { %v5127_v33 = vld [vmem:[#allocation2 + $0xf0] sm:$0xff] }
 0x33d   : > { %v3388_v26 = vpop.f32.mrf.mxu2  ;;  %v5159_v11 = vpack.c.bf16 %v5127_v33, %v5127_v33 }
 0x33e   : > { %v1552_v44 = vpop.f32.mrf.mxu0  ;;  %v4316_v46 = vld [vmem:[#allocation3 + $0x130] ss:$2 sm:$0xff]  ;;  %v4380_v25 = vld [vmem:[#allocation3 + $0x131] ss:$2 sm:$0xff]  ;;  %v2405_v63 = vpop.f32.mrf.mxu1 }
 0x33f   : > { %v4424_v32 = vmax.f32 %v4316_v46, %v4380_v25  ;;  %v5351_v46 = vunpack.c.l.b16 %v5159_v11 }
 0x341   : > { %10478 = vmatmul.msk.bf16.gmra.mxu0 %vm1141_vm1, %v12543_v14  ;;  %10802 = vmatmul.msk.bf16.gmra.mxu1 %vm1141_vm1, %v12478_v18  ;;  %v4460_v5 = vmul.f32 %v13846_v20, %v4424_v32  ;;  %v12609_v14 = vld [vmem:[%s13145_s1 + $0x1b0] sm:$0xff]  ;;  %v3586_v18 = vadd.f32 %v3386_v24, %v2401_v59 }
 0x342   : > { %11257 = vmatmul.msk.bf16.gmra.mxu2 %vm1141_vm1, %v12608_v30  ;;  %v12638_v32 = vld [vmem:[%s16352_s5 + $0x70] sm:$0xff] }
 0x343   : > { %v4496_v40 = vadd.f32 %v13853_v22, %v4460_v5  ;;  %6283 = vmatpush.bf16.msrb.mxu0 %v12638_v32  ;;  %v3718_v5 = vadd.f32 %v13761_v16, %v3586_v18  ;;  %v2406_v18 = vadd.f32 %v2405_v63, %v1552_v44  ;;  %v12480_v32 = vld [vmem:[%s13145_s1 + $0x198] sm:$0xff] }
 0x345   : > { %v3391_v38 = vpop.f32.mrf.mxu2  ;;  %4568 = vst [vmem:[#allocation2 + $0xf9] sm:$0xff] %v4496_v40  ;;  %v2403_v40 = vadd.f32 %v2402_v39, %v1549_v23  ;;  %v3974_v11 = vmul.f32 0.01, %v3718_v5  ;;  %vm3846_vm7 = vcmp.ge.f32.partialorder %v3718_v5, 0.0 }
 0x346   : > { %v13953_v13 = vpop.f32.mrf.mxu0  ;;  %v13955_v36 = vpop.f32.mrf.mxu1 }
 0x34c   : > { %v5128_v27 = vld [vmem:[#allocation2 + $0xf8] sm:$0xff] }
 0x34d   : > { %v13957_v52 = vpop.f32.mrf.mxu2  ;;  %v5160_v2 = vpack.c.bf16 %v5128_v27, %v5128_v27 }
 0x34e   : > { %v1557_v0 = vpop.f32.mrf.mxu0  ;;  %v2410_v30 = vpop.f32.mrf.mxu1 }
 0x34f   : > { %v5352_v25 = vunpack.c.l.b16 %v5160_v2  ;;  %v2411_v47 = vadd.f32 %v2410_v30, %v1557_v0  ;;  %v4102_v0 = vsel %vm3846_vm7, %v3718_v5, %v3974_v11 }
 0x351   : > { %10479 = vmatmul.msk.bf16.gmra.mxu0 %vm1141_vm1, %v12544_v3  ;;  %10803 = vmatmul.msk.bf16.gmra.mxu1 %vm1141_vm1, %v12479_v1  ;;  %v5374_v8 = vpack.c.b16 %v5352_v25, %v5351_v46  ;;  %v3587_v3 = vadd.f32 %v3388_v26, %v2403_v40  ;;  %v12545_v25 = vld [vmem:[%s13145_s1 + $0x1a8] sm:$0xff]  ;;  %v3588_v40 = vadd.f32 %v3391_v38, %v2406_v18 }
 0x352   : > { %11258 = vmatmul.msk.bf16.gmra.mxu2 %vm1141_vm1, %v12609_v14  ;;  %v2408_v38 = vadd.f32 %v13955_v36, %v13953_v13 }
 0x353   : > { %5835 = vmatmul.bf16.gmra.mxu3 %v5374_v8  ;;  %v3719_v14 = vadd.f32 %v13761_v16, %v3587_v3 }
 0x355   : > { %v3396_v24 = vpop.f32.mrf.mxu2  ;;  %v3975_v26 = vmul.f32 0.01, %v3719_v14  ;;  %vm3847_vm9 = vcmp.ge.f32.partialorder %v3719_v14, 0.0 }
 0x356   : > { %v3590_v33 = vadd.f32 %v3396_v24, %v2411_v47  ;;  %v1559_v59 = vpop.f32.mrf.mxu0  ;;  %v2412_v27 = vpop.f32.mrf.mxu1  ;;  %v12610_v24 = vld [vmem:[%s13145_s1 + $0x1b8] sm:$0xff] }
 0x357   : > { %v2413_v46 = vadd.f32 %v2412_v27, %v1559_v59  ;;  %v4103_v5 = vsel %vm3847_vm9, %v3719_v14, %v3975_v26  ;;  %v3720_v59 = vadd.f32 %v13761_v16, %v3588_v40  ;;  %v12611_v26 = vld [vmem:[%s13145_s1 + $0x1c0] sm:$0xff] }
 0x358   : > { %v3722_v1 = vadd.f32 %v13761_v16, %v3590_v33 }
 0x359   : > { %v3976_v18 = vmul.f32 0.01, %v3720_v59  ;;  %vm3848_vm11 = vcmp.ge.f32.partialorder %v3720_v59, 0.0 }
 0x35a   : > { %vm3850_vm8 = vcmp.ge.f32.partialorder %v3722_v1, 0.0  ;;  %v3978_v2 = vmul.f32 0.01, %v3722_v1 }
 0x35c   : > { %v4106_v30 = vsel %vm3850_vm8, %v3722_v1, %v3978_v2 }
 0x35d   : > { %v4190_v23 = vmax.f32 %v4102_v0, %v4106_v30  ;;  %v3398_v39 = vpop.f32.mrf.mxu2 }
 0x35e   : > { %v3591_v8 = vadd.f32 %v3398_v39, %v2413_v46  ;;  %v1562_v47 = vpop.f32.mrf.mxu0  ;;  %v2415_v12 = vpop.f32.mrf.mxu1  ;;  %v4104_v46 = vsel %vm3848_vm11, %v3720_v59, %v3976_v18 }
 0x35f   : > { %4254 = vst [vmem:[#allocation3 + $0x140] sm:$0xff] %v4190_v23  ;;  %v2416_v63 = vadd.f32 %v2415_v12, %v1562_v47  ;;  %v3589_v12 = vadd.f32 %v13957_v52, %v2408_v38 }
 0x360   : > { %v3723_v33 = vadd.f32 %v13761_v16, %v3591_v8  ;;  %v12481_v8 = vld [vmem:[%s13145_s1 + $0x1a0] sm:$0xff] }
 0x361   : > { %10480 = vmatmul.msk.bf16.gmra.mxu0 %vm1141_vm1, %v12545_v25  ;;  %10804 = vmatmul.msk.bf16.gmra.mxu1 %vm1141_vm1, %v12480_v32  ;;  %v3721_v23 = vadd.f32 %v13761_v16, %v3589_v12  ;;  %v12546_v32 = vld [vmem:[%s13145_s1 + $0x1b0] sm:$0xff] }
 0x362   : > { %vm3851_vm10 = vcmp.ge.f32.partialorder %v3723_v33, 0.0  ;;  %v3979_v44 = vmul.f32 0.01, %v3723_v33  ;;  %11259 = vmatmul.msk.bf16.gmra.mxu2 %vm1141_vm1, %v12610_v24 }
 0x363   : > { %vm3849_vm13 = vcmp.ge.f32.partialorder %v3721_v23, 0.0 }
 0x364   : > { %v4107_v11 = vsel %vm3851_vm10, %v3723_v33, %v3979_v44 }
 0x365   : > { %v4191_v27 = vmax.f32 %v4103_v5, %v4107_v11  ;;  %v3401_v3 = vpop.f32.mrf.mxu2 }
 0x366   : > { %v3592_v1 = vadd.f32 %v3401_v3, %v2416_v63  ;;  %v1564_v2 = vpop.f32.mrf.mxu0  ;;  %v2417_v0 = vpop.f32.mrf.mxu1  ;;  %v3977_v63 = vmul.f32 0.01, %v3721_v23 }
 0x367   : > { %4255 = vst [vmem:[#allocation3 + $0x148] sm:$0xff] %v4191_v27  ;;  %v2418_v13 = vadd.f32 %v2417_v0, %v1564_v2 }
 0x368   : > { %v3724_v14 = vadd.f32 %v13761_v16, %v3592_v1  ;;  %v4105_v3 = vsel %vm3849_vm13, %v3721_v23, %v3977_v63 }
 0x36a   : > { %vm3852_vm12 = vcmp.ge.f32.partialorder %v3724_v14, 0.0  ;;  %v3980_v30 = vmul.f32 0.01, %v3724_v14 }
 0x36c   : > { %v4108_v39 = vsel %vm3852_vm12, %v3724_v14, %v3980_v30  ;;  %v12547_v14 = vld [vmem:[%s13145_s1 + $0x1b8] sm:$0xff]  ;;  %v12482_v30 = vld [vmem:[%s13145_s1 + $0x1a8] sm:$0xff] }
 0x36d   : > { %v4192_v36 = vmax.f32 %v4104_v46, %v4108_v39  ;;  %v3403_v25 = vpop.f32.mrf.mxu2  ;;  %v12612_v39 = vld [vmem:[%s13145_s1 + $0x1c8] sm:$0xff] }
 0x36e   : > { %v3593_v47 = vadd.f32 %v3403_v25, %v2418_v13  ;;  %v1567_v24 = vpop.f32.mrf.mxu0  ;;  %v4318_v40 = vld [vmem:[#allocation3 + $0x140] ss:$2 sm:$0xff]  ;;  %v4382_v33 = vld [vmem:[#allocation3 + $0x141] ss:$2 sm:$0xff]  ;;  %v2420_v52 = vpop.f32.mrf.mxu1 }
 0x36f   : > { %4256 = vst [vmem:[#allocation3 + $0x150] sm:$0xff] %v4192_v36  ;;  %v4425_v44 = vmax.f32 %v4318_v40, %v4382_v33 }
 0x370   : > { %v3725_v5 = vadd.f32 %v13761_v16, %v3593_v47 }
 0x371   : > { %10481 = vmatmul.msk.bf16.gmra.mxu0 %vm1141_vm1, %v12546_v32  ;;  %10805 = vmatmul.msk.bf16.gmra.mxu1 %vm1141_vm1, %v12481_v8  ;;  %v4461_v59 = vmul.f32 %v13846_v20, %v4425_v44  ;;  %v2421_v44 = vadd.f32 %v2420_v52, %v1567_v24 }
 0x372   : > { %vm3853_vm14 = vcmp.ge.f32.partialorder %v3725_v5, 0.0  ;;  %v3981_v11 = vmul.f32 0.01, %v3725_v5  ;;  %11260 = vmatmul.msk.bf16.gmra.mxu2 %vm1141_vm1, %v12611_v26 }
 0x373   : > { %v4497_v27 = vadd.f32 %v13853_v22, %v4461_v59 }
 0x374   : > { %v4109_v38 = vsel %vm3853_vm14, %v3725_v5, %v3981_v11  ;;  %v12548_v11 = vld [vmem:[%s13145_s1 + $0x1c0] sm:$0xff] }
 0x375   : > { %v4193_v1 = vmax.f32 %v4105_v3, %v4109_v38  ;;  %v3406_v2 = vpop.f32.mrf.mxu2  ;;  %4569 = vst [vmem:[#allocation2 + $0x109] sm:$0xff] %v4497_v27  ;;  %v12483_v27 = vld [vmem:[%s13145_s1 + $0x1b0] sm:$0xff] }
 0x376   : > { %v1569_v0 = vpop.f32.mrf.mxu0  ;;  %v2422_v18 = vpop.f32.mrf.mxu1 }
 0x377   : > { %4257 = vst [vmem:[#allocation3 + $0x158] sm:$0xff] %v4193_v1  ;;  %v12613_v1 = vld [vmem:[%s13145_s1 + $0x1d0] sm:$0xff] }
 0x37c   : > { %v5129_v33 = vld [vmem:[#allocation2 + $0x108] sm:$0xff] }
 0x37d   : > { %v3408_v12 = vpop.f32.mrf.mxu2  ;;  %v5161_v63 = vpack.c.bf16 %v5129_v33, %v5129_v33 }
 0x37e   : > { %v1572_v46 = vpop.f32.mrf.mxu0  ;;  %v4320_v13 = vld [vmem:[#allocation3 + $0x150] ss:$2 sm:$0xff]  ;;  %v4384_v36 = vld [vmem:[#allocation3 + $0x151] ss:$2 sm:$0xff]  ;;  %v2425_v25 = vpop.f32.mrf.mxu1 }
 0x37f   : > { %v4426_v32 = vmax.f32 %v4320_v13, %v4384_v36 }
 0x381   : > { %10482 = vmatmul.msk.bf16.gmra.mxu0 %vm1141_vm1, %v12547_v14  ;;  %10806 = vmatmul.msk.bf16.gmra.mxu1 %vm1141_vm1, %v12482_v30  ;;  %v4462_v23 = vmul.f32 %v13846_v20, %v4426_v32  ;;  %v3594_v14 = vadd.f32 %v3406_v2, %v2421_v44 }
 0x382   : > { %11261 = vmatmul.msk.bf16.gmra.mxu2 %vm1141_vm1, %v12612_v39  ;;  %v5353_v39 = vunpack.c.l.b16 %v5161_v63 }
 0x383   : > { %v4498_v8 = vadd.f32 %v13853_v22, %v4462_v23  ;;  %v3726_v24 = vadd.f32 %v13761_v16, %v3594_v14  ;;  %v2423_v23 = vadd.f32 %v2422_v18, %v1569_v0  ;;  %v2426_v18 = vadd.f32 %v2425_v25, %v1572_v46 }
 0x385   : > { %v3411_v47 = vpop.f32.mrf.mxu2  ;;  %4570 = vst [vmem:[#allocation2 + $0x111] sm:$0xff] %v4498_v8  ;;  %v3982_v2 = vmul.f32 0.01, %v3726_v24  ;;  %vm3854_vm15 = vcmp.ge.f32.partialorder %v3726_v24, 0.0  ;;  %v3595_v63 = vadd.f32 %v3408_v12, %v2423_v23  ;;  %v12484_v12 = vld [vmem:[%s13145_s1 + $0x1b8] sm:$0xff] }
 0x386   : > { %v14001_v26 = vpop.f32.mrf.mxu0  ;;  %v14003_v40 = vpop.f32.mrf.mxu1  ;;  %v3596_v23 = vadd.f32 %v3411_v47, %v2426_v18 }
 0x387   : > { %v2428_v47 = vadd.f32 %v14003_v40, %v14001_v26 }
 0x38c   : > { %v5130_v5 = vld [vmem:[#allocation2 + $0x110] sm:$0xff] }
 0x38d   : > { %v14005_v59 = vpop.f32.mrf.mxu2  ;;  %v5162_v3 = vpack.c.bf16 %v5130_v5, %v5130_v5  ;;  %v14017_v5 = vld [vmem:[%s16395_s2] ss:$0 sm:$0xff] }
 0x38e   : > { %v1577_v38 = vpop.f32.mrf.mxu0  ;;  %v2430_v30 = vpop.f32.mrf.mxu1  ;;  %v3727_v0 = vadd.f32 %v14017_v5, %v3595_v63 }
 0x38f   : > { %v5354_v13 = vunpack.c.l.b16 %v5162_v3  ;;  %v2431_v32 = vadd.f32 %v2430_v30, %v1577_v38  ;;  %v12549_v30 = vld [vmem:[%s13145_s1 + $0x1c8] sm:$0xff] }
 0x390   : > { %vm3855_vm2 = vcmp.ge.f32.partialorder %v3727_v0, 0.0 }
 0x391   : > { %10483 = vmatmul.msk.bf16.gmra.mxu0 %vm1141_vm1, %v12548_v11  ;;  %10807 = vmatmul.msk.bf16.gmra.mxu1 %vm1141_vm1, %v12483_v27  ;;  %v5375_v36 = vpack.c.b16 %v5354_v13, %v5353_v39  ;;  %v4110_v27 = vsel %vm3854_vm15, %v3726_v24, %v3982_v2 }
 0x392   : > { %11262 = vmatmul.msk.bf16.gmra.mxu2 %vm1141_vm1, %v12613_v1 }
 0x393   : > { %5840 = vmatmul.bf16.gmra.mxu3 %v5375_v36  ;;  %v12614_v36 = vld [vmem:[%s13145_s1 + $0x1d8] sm:$0xff] }
 0x395   : > { %v3416_v52 = vpop.f32.mrf.mxu2 }
 0x396   : > { %v3598_v8 = vadd.f32 %v3416_v52, %v2431_v32  ;;  %v1579_v33 = vpop.f32.mrf.mxu0  ;;  %v2432_v44 = vpop.f32.mrf.mxu1  ;;  %v3983_v52 = vmul.f32 0.01, %v3727_v0 }
 0x397   : > { %v2433_v38 = vadd.f32 %v2432_v44, %v1579_v33  ;;  %v3728_v33 = vadd.f32 %v14017_v5, %v3596_v23 }
 0x398   : > { %v3730_v11 = vadd.f32 %v14017_v5, %v3598_v8  ;;  %v4111_v24 = vsel %vm3855_vm2, %v3727_v0, %v3983_v52  ;;  %v12615_v52 = vld [vmem:[%s13145_s1 + $0x1e0] sm:$0xff] }
 0x399   : > { %v3984_v18 = vmul.f32 0.01, %v3728_v33  ;;  %vm3856_vm4 = vcmp.ge.f32.partialorder %v3728_v33, 0.0 }
 0x39a   : > { %vm3858_vm0 = vcmp.ge.f32.partialorder %v3730_v11, 0.0  ;;  %v3986_v16 = vmul.f32 0.01, %v3730_v11 }
 0x39c   : > { %v4114_v3 = vsel %vm3858_vm0, %v3730_v11, %v3986_v16 }
 0x39d   : > { %v4194_v1 = vmax.f32 %v4110_v27, %v4114_v3  ;;  %v3418_v14 = vpop.f32.mrf.mxu2  ;;  %v3597_v3 = vadd.f32 %v14005_v59, %v2428_v47 }
 0x39e   : > { %v3599_v39 = vadd.f32 %v3418_v14, %v2433_v38  ;;  %v1582_v13 = vpop.f32.mrf.mxu0  ;;  %v2435_v32 = vpop.f32.mrf.mxu1 }
 0x39f   : > { %4258 = vst [vmem:[#allocation3 + $0x160] sm:$0xff] %v4194_v1  ;;  %v2436_v25 = vadd.f32 %v2435_v32, %v1582_v13  ;;  %v4112_v1 = vsel %vm3856_vm4, %v3728_v33, %v3984_v18  ;;  %v3729_v14 = vadd.f32 %v14017_v5, %v3597_v3  ;;  %v12485_v13 = vld [vmem:[%s13145_s1 + $0x1c0] sm:$0xff] }
 0x3a0   : > { %v3731_v8 = vadd.f32 %v14017_v5, %v3599_v39  ;;  %v12550_v39 = vld [vmem:[%s13145_s1 + $0x1d0] sm:$0xff] }
 0x3a1   : > { %10484 = vmatmul.msk.bf16.gmra.mxu0 %vm1141_vm1, %v12549_v30  ;;  %10808 = vmatmul.msk.bf16.gmra.mxu1 %vm1141_vm1, %v12484_v12  ;;  %vm3857_vm6 = vcmp.ge.f32.partialorder %v3729_v14, 0.0 }
 0x3a2   : > { %vm3859_vm3 = vcmp.ge.f32.partialorder %v3731_v8, 0.0  ;;  %v3987_v46 = vmul.f32 0.01, %v3731_v8  ;;  %11263 = vmatmul.msk.bf16.gmra.mxu2 %vm1141_vm1, %v12614_v36 }
 0x3a4   : > { %v4115_v2 = vsel %vm3859_vm3, %v3731_v8, %v3987_v46 }
 0x3a5   : > { %v4195_v44 = vmax.f32 %v4111_v24, %v4115_v2  ;;  %v3421_v63 = vpop.f32.mrf.mxu2 }
 0x3a6   : > { %v3600_v11 = vadd.f32 %v3421_v63, %v2436_v25  ;;  %v1584_v16 = vpop.f32.mrf.mxu0  ;;  %v2437_v27 = vpop.f32.mrf.mxu1  ;;  %v3985_v25 = vmul.f32 0.01, %v3729_v14 }
 0x3a7   : > { %4259 = vst [vmem:[#allocation3 + $0x168] sm:$0xff] %v4195_v44  ;;  %v2438_v26 = vadd.f32 %v2437_v27, %v1584_v16 }
 0x3a8   : > { %v3732_v0 = vadd.f32 %v14017_v5, %v3600_v11  ;;  %v4113_v63 = vsel %vm3857_vm6, %v3729_v14, %v3985_v25 }
 0x3aa   : > { %vm3860_vm5 = vcmp.ge.f32.partialorder %v3732_v0, 0.0  ;;  %v3988_v38 = vmul.f32 0.01, %v3732_v0 }
 0x3ac   : > { %v4116_v30 = vsel %vm3860_vm5, %v3732_v0, %v3988_v38  ;;  %v12551_v0 = vld [vmem:[%s13145_s1 + $0x1d8] sm:$0xff]  ;;  %v12486_v38 = vld [vmem:[%s13145_s1 + $0x1c8] sm:$0xff] }
 0x3ad   : > { %v4196_v40 = vmax.f32 %v4112_v1, %v4116_v30  ;;  %v3423_v12 = vpop.f32.mrf.mxu2  ;;  %v12616_v30 = vld [vmem:[%s13145_s1 + $0x1e8] sm:$0xff] }
 0x3ae   : > { %v3601_v36 = vadd.f32 %v3423_v12, %v2438_v26  ;;  %v1587_v32 = vpop.f32.mrf.mxu0  ;;  %v4322_v23 = vld [vmem:[#allocation3 + $0x160] ss:$2 sm:$0xff]  ;;  %v4386_v8 = vld [vmem:[#allocation3 + $0x161] ss:$2 sm:$0xff]  ;;  %v2440_v59 = vpop.f32.mrf.mxu1 }
 0x3af   : > { %4260 = vst [vmem:[#allocation3 + $0x170] sm:$0xff] %v4196_v40  ;;  %v4427_v46 = vmax.f32 %v4322_v23, %v4386_v8 }
 0x3b0   : > { %v3733_v24 = vadd.f32 %v14017_v5, %v3601_v36 }
 0x3b1   : > { %10485 = vmatmul.msk.bf16.gmra.mxu0 %vm1141_vm1, %v12550_v39  ;;  %10809 = vmatmul.msk.bf16.gmra.mxu1 %vm1141_vm1, %v12485_v13  ;;  %v4463_v33 = vmul.f32 %v13846_v20, %v4427_v46  ;;  %v2441_v46 = vadd.f32 %v2440_v59, %v1587_v32  ;;  %v12679_v32 = vld [vmem:[%s16352_s5 + $0x1b8] sm:$0xff]  ;;  %v12637_v59 = vld [vmem:[%s16352_s5 + $0x68] sm:$0xff] }
 0x3b2   : > { %vm3861_vm7 = vcmp.ge.f32.partialorder %v3733_v24, 0.0  ;;  %v3989_v2 = vmul.f32 0.01, %v3733_v24  ;;  %11264 = vmatmul.msk.bf16.gmra.mxu2 %vm1141_vm1, %v12615_v52  ;;  %6284 = vmatpush.bf16.msrb.mxu0 %v12637_v59 }
 0x3b3   : > { %v4499_v44 = vadd.f32 %v13853_v22, %v4463_v33  ;;  %7134 = vmatpush.bf16.msrb.mxu2 %v12679_v32 }
 0x3b4   : > { %v4117_v47 = vsel %vm3861_vm7, %v3733_v24, %v3989_v2  ;;  %v12552_v2 = vld [vmem:[%s13145_s1 + $0x1e0] sm:$0xff] }
 0x3b5   : > { %v4197_v11 = vmax.f32 %v4113_v63, %v4117_v47  ;;  %v3426_v16 = vpop.f32.mrf.mxu2  ;;  %4571 = vst [vmem:[#allocation2 + $0x121] sm:$0xff] %v4499_v44  ;;  %v12487_v44 = vld [vmem:[%s13145_s1 + $0x1d0] sm:$0xff] }
 0x3b6   : > { %v1589_v27 = vpop.f32.mrf.mxu0  ;;  %v2442_v18 = vpop.f32.mrf.mxu1  ;;  %v12617_v47 = vld [vmem:[%s13145_s1 + $0x1f0] sm:$0xff] }
 0x3b7   : > { %4261 = vst [vmem:[#allocation3 + $0x178] sm:$0xff] %v4197_v11  ;;  %v3602_v11 = vadd.f32 %v3426_v16, %v2441_v46 }
 0x3bc   : > { %v5131_v8 = vld [vmem:[#allocation2 + $0x120] sm:$0xff] }
 0x3bd   : > { %v3428_v3 = vpop.f32.mrf.mxu2  ;;  %v5163_v25 = vpack.c.bf16 %v5131_v8, %v5131_v8 }
 0x3be   : > { %v1592_v1 = vpop.f32.mrf.mxu0  ;;  %v4324_v26 = vld [vmem:[#allocation3 + $0x170] ss:$2 sm:$0xff]  ;;  %v4388_v40 = vld [vmem:[#allocation3 + $0x171] ss:$2 sm:$0xff]  ;;  %v2445_v12 = vpop.f32.mrf.mxu1 }
 0x3bf   : > { %v4428_v39 = vmax.f32 %v4324_v26, %v4388_v40  ;;  %v12647_v26 = vld [vmem:[%s16352_s5 + $0xb8] sm:$0xff] }
 0x3c0   : > { %6371 = vmatpush.bf16.msrb.mxu1 %v12647_v26  ;;  %v12618_v26 = vld [vmem:[%s13145_s1 + $0x1f8] sm:$0xff] }
 0x3c1   : > { %10486 = vmatmul.msk.bf16.gmra.mxu0 %vm1141_vm1, %v12551_v0  ;;  %10810 = vmatmul.msk.bf16.gmra.mxu1 %vm1141_vm1, %v12486_v38  ;;  %v4464_v14 = vmul.f32 %v13846_v20, %v4428_v39  ;;  %v3734_v39 = vadd.f32 %v14017_v5, %v3602_v11  ;;  %v2446_v11 = vadd.f32 %v2445_v12, %v1592_v1 }
 0x3c2   : > { %11265 = vmatmul.msk.bf16.gmra.mxu2 %vm1141_vm1, %v12616_v30  ;;  %v12663_v30 = vld [vmem:[%s16352_s5 + $0x138] sm:$0xff] }
 0x3c3   : > { %v4500_v13 = vadd.f32 %v13853_v22, %v4464_v14  ;;  %v5355_v22 = vunpack.c.l.b16 %v5163_v25  ;;  %5871 = vmatpush.bf16.msrb.mxu3 %v12663_v30  ;;  %v3990_v25 = vmul.f32 0.01, %v3734_v39  ;;  %vm3862_vm8 = vcmp.ge.f32.partialorder %v3734_v39, 0.0  ;;  %v12488_v30 = vld [vmem:[%s13145_s1 + $0x1d8] sm:$0xff] }
 0x3c5   : > { %v3431_v36 = vpop.f32.mrf.mxu2  ;;  %4572 = vst [vmem:[#allocation2 + $0x129] sm:$0xff] %v4500_v13  ;;  %v2443_v13 = vadd.f32 %v2442_v18, %v1589_v27 }
 0x3c6   : > { %v14051_v52 = vpop.f32.mrf.mxu0  ;;  %v14053_v23 = vpop.f32.mrf.mxu1 }
 0x3cc   : > { %v5132_v24 = vld [vmem:[#allocation2 + $0x128] sm:$0xff] }
 0x3cd   : > { %v14055_v33 = vpop.f32.mrf.mxu2  ;;  %v5164_v20 = vpack.c.bf16 %v5132_v24, %v5132_v24 }
 0x3ce   : > { %v1597_v63 = vpop.f32.mrf.mxu0  ;;  %v2450_v0 = vpop.f32.mrf.mxu1 }
 0x3cf   : > { %v5356_v38 = vunpack.c.l.b16 %v5164_v20  ;;  %v2451_v40 = vadd.f32 %v2450_v0, %v1597_v63  ;;  %v4118_v63 = vsel %vm3862_vm8, %v3734_v39, %v3990_v25 }
 0x3d1   : > { %10487 = vmatmul.msk.bf16.gmra.mxu0 %vm1141_vm1, %v12552_v2  ;;  %10811 = vmatmul.msk.bf16.gmra.mxu1 %vm1141_vm1, %v12487_v44  ;;  %v5376_v16 = vpack.c.b16 %v5356_v38, %v5355_v22  ;;  %v3603_v2 = vadd.f32 %v3428_v3, %v2443_v13  ;;  %v12553_v38 = vld [vmem:[%s13145_s1 + $0x1e8] sm:$0xff] }
 0x3d2   : > { %11266 = vmatmul.msk.bf16.gmra.mxu2 %vm1141_vm1, %v12617_v47 }
 0x3d3   : > { %5845 = vmatmul.bf16.gmra.mxu3 %v5376_v16  ;;  %v3735_v47 = vadd.f32 %v14017_v5, %v3603_v2 }
 0x3d5   : > { %v3436_v14 = vpop.f32.mrf.mxu2  ;;  %v3991_v3 = vmul.f32 0.01, %v3735_v47  ;;  %vm3863_vm10 = vcmp.ge.f32.partialorder %v3735_v47, 0.0 }
 0x3d6   : > { %v3606_v8 = vadd.f32 %v3436_v14, %v2451_v40  ;;  %v1599_v46 = vpop.f32.mrf.mxu0  ;;  %v2452_v24 = vpop.f32.mrf.mxu1  ;;  %v3604_v40 = vadd.f32 %v3431_v36, %v2446_v11  ;;  %v12662_v36 = vld [vmem:[%s16352_s5 + $0x130] sm:$0xff] }
 0x3d7   : > { %v2453_v22 = vadd.f32 %v2452_v24, %v1599_v46  ;;  %v4119_v39 = vsel %vm3863_vm10, %v3735_v47, %v3991_v3  ;;  %v2448_v24 = vadd.f32 %v14053_v23, %v14051_v52  ;;  %5872 = vmatpush.bf16.msrb.mxu3 %v12662_v36  ;;  %v14114_v36 = vld [vmem:[%s16397_s4] ss:$0 sm:$0xff] }
 0x3d8   : > { %v3738_v44 = vadd.f32 %v14017_v5, %v3606_v8  ;;  %v3736_v13 = vadd.f32 %v14017_v5, %v3604_v40 }
 0x3d9   : > { %v3605_v47 = vadd.f32 %v14055_v33, %v2448_v24  ;;  %v12619_v33 = vld [vmem:[%s13145_s1 + $0x200] sm:$0xff] }
 0x3da   : > { %vm3866_vm9 = vcmp.ge.f32.partialorder %v3738_v44, 0.0  ;;  %v3994_v20 = vmul.f32 0.01, %v3738_v44  ;;  %vm3864_vm12 = vcmp.ge.f32.partialorder %v3736_v13, 0.0 }
 0x3db   : > { %5873 = vmatpush.bf16.msrb.mxu3 %v12661_v60 }
 0x3dc   : > { %v4122_v0 = vsel %vm3866_vm9, %v3738_v44, %v3994_v20 }
 0x3dd   : > { %v4198_v27 = vmax.f32 %v4118_v63, %v4122_v0  ;;  %v3438_v18 = vpop.f32.mrf.mxu2  ;;  %v3992_v63 = vmul.f32 0.01, %v3736_v13 }
 0x3de   : > { %v3607_v32 = vadd.f32 %v3438_v18, %v2453_v22  ;;  %v1602_v59 = vpop.f32.mrf.mxu0  ;;  %v2455_v16 = vpop.f32.mrf.mxu1 }
 0x3df   : > { %4262 = vst [vmem:[#allocation3 + $0x180] sm:$0xff] %v4198_v27  ;;  %v2456_v12 = vadd.f32 %v2455_v16, %v1602_v59  ;;  %v4120_v22 = vsel %vm3864_vm12, %v3736_v13, %v3992_v63  ;;  %v3737_v27 = vadd.f32 %v14017_v5, %v3605_v47  ;;  %v12678_v63 = vld [vmem:[%s16352_s5 + $0x1b0] sm:$0xff] }
 0x3e0   : > { %v3739_v14 = vadd.f32 %v14017_v5, %v3607_v32  ;;  %v12489_v32 = vld [vmem:[%s13145_s1 + $0x1e0] sm:$0xff]  ;;  %7135 = vmatpush.bf16.msrb.mxu2 %v12678_v63 }
 0x3e1   : > { %10488 = vmatmul.msk.bf16.gmra.mxu0 %vm1141_vm1, %v12553_v38  ;;  %10812 = vmatmul.msk.bf16.gmra.mxu1 %vm1141_vm1, %v12488_v30  ;;  %v12554_v30 = vld [vmem:[%s13145_s1 + $0x1f0] sm:$0xff]  ;;  %vm3865_vm14 = vcmp.ge.f32.partialorder %v3737_v27, 0.0 }
 0x3e2   : > { %vm3867_vm11 = vcmp.ge.f32.partialorder %v3739_v14, 0.0  ;;  %v3995_v1 = vmul.f32 0.01, %v3739_v14  ;;  %11267 = vmatmul.msk.bf16.gmra.mxu2 %vm1141_vm1, %v12618_v26 }
 0x3e4   : > { %v4123_v8 = vsel %vm3867_vm11, %v3739_v14, %v3995_v1  ;;  %v3993_v1 = vmul.f32 0.01, %v3737_v27 }
 0x3e5   : > { %v4199_v46 = vmax.f32 %v4119_v39, %v4123_v8  ;;  %v3441_v25 = vpop.f32.mrf.mxu2  ;;  %v14107_v39 = vld [vmem:[%s16396_s3] ss:$0 sm:$0xff] }
 0x3e6   : > { %v3608_v2 = vadd.f32 %v3441_v25, %v2456_v12  ;;  %v1604_v44 = vpop.f32.mrf.mxu0  ;;  %v2457_v20 = vpop.f32.mrf.mxu1  ;;  %v4121_v25 = vsel %vm3865_vm14, %v3737_v27, %v3993_v1  ;;  %v12555_v27 = vld [vmem:[%s13145_s1 + $0x1f8] sm:$0xff] }
 0x3e7   : > { %4263 = vst [vmem:[#allocation3 + $0x188] sm:$0xff] %v4199_v46  ;;  %v2458_v23 = vadd.f32 %v2457_v20, %v1604_v44  ;;  %v12646_v20 = vld [vmem:[%s16352_s5 + $0xb0] sm:$0xff] }
 0x3e8   : > { %v3740_v11 = vadd.f32 %v14017_v5, %v3608_v2  ;;  %6372 = vmatpush.bf16.msrb.mxu1 %v12646_v20  ;;  %v12674_v20 = vld [vmem:[%s16352_s5 + $0x190] sm:$0xff] }
 0x3ea   : > { %vm3868_vm13 = vcmp.ge.f32.partialorder %v3740_v11, 0.0  ;;  %v3996_v0 = vmul.f32 0.01, %v3740_v11 }
 0x3ec   : > { %v4124_v52 = vsel %vm3868_vm13, %v3740_v11, %v3996_v0  ;;  %v12645_v0 = vld [vmem:[%s16352_s5 + $0xa8] sm:$0xff] }
 0x3ed   : > { %v4200_v18 = vmax.f32 %v4120_v22, %v4124_v52  ;;  %v3443_v38 = vpop.f32.mrf.mxu2  ;;  %v12677_v22 = vld [vmem:[%s16352_s5 + $0x1a8] sm:$0xff]  ;;  %6373 = vmatpush.bf16.msrb.mxu1 %v12645_v0 }
 0x3ee   : > { %v4326_v59 = vld [vmem:[#allocation3 + $0x180] ss:$2 sm:$0xff]  ;;  %v4390_v26 = vld [vmem:[#allocation3 + $0x181] ss:$2 sm:$0xff]  ;;  %v3609_v16 = vadd.f32 %v3443_v38, %v2458_v23  ;;  %v14096_v3 = vpop.f32.mrf.mxu0  ;;  %v14099_v14 = vpop.f32.mrf.mxu1  ;;  %7136 = vmatpush.bf16.msrb.mxu2 %v12677_v22  ;;  %v12490_v52 = vld [vmem:[%s13145_s1 + $0x1e8] sm:$0xff] }
 0x3ef   : > { %v4429_v40 = vmax.f32 %v4326_v59, %v4390_v26  ;;  %4264 = vst [vmem:[#allocation3 + $0x190] sm:$0xff] %v4200_v18  ;;  %v12636_v18 = vld [vmem:[%s16352_s5 + $0x60] sm:$0xff] }
 0x3f0   : > { %v3741_v12 = vadd.f32 %v14017_v5, %v3609_v16  ;;  %v12644_v38 = vld [vmem:[%s16352_s5 + $0xa0] sm:$0xff]  ;;  %v12620_v16 = vld [vmem:[%s13145_s1 + $0x208] sm:$0xff]  ;;  %6285 = vmatpush.bf16.msrb.mxu0 %v12636_v18 }
 0x3f1   : > { %10489 = vmatmul.msk.bf16.gmra.mxu0 %vm1141_vm1, %v12554_v30  ;;  %10813 = vmatmul.msk.bf16.gmra.mxu1 %vm1141_vm1, %v12489_v32  ;;  %v4465_v13 = vmul.f32 %v14107_v39, %v4429_v40  ;;  %v12676_v30 = vld [vmem:[%s16352_s5 + $0x1a0] sm:$0xff]  ;;  %v12641_v18 = vld [vmem:[%s16352_s5 + $0x88] sm:$0xff] }
 0x3f2   : > { %vm3869_vm15 = vcmp.ge.f32.partialorder %v3741_v12, 0.0  ;;  %v3997_v8 = vmul.f32 0.01, %v3741_v12  ;;  %11268 = vmatmul.msk.bf16.gmra.mxu2 %vm1141_vm1, %v12619_v33  ;;  %6374 = vmatpush.bf16.msrb.mxu1 %v12644_v38  ;;  %v12673_v38 = vld [vmem:[%s16352_s5 + $0x188] sm:$0xff] }
 0x3f3   : > { %v4501_v46 = vadd.f32 %v14114_v36, %v4465_v13  ;;  %7137 = vmatpush.bf16.msrb.mxu2 %v12676_v30  ;;  %v12643_v13 = vld [vmem:[%s16352_s5 + $0x98] sm:$0xff]  ;;  %v2461_v30 = vadd.f32 %v14099_v14, %v14096_v3  ;;  %v12632_v3 = vld [vmem:[%s16352_s5 + $0x40] sm:$0xff] }
 0x3f4   : > { %v4125_v24 = vsel %vm3869_vm15, %v3741_v12, %v3997_v8  ;;  %v12635_v12 = vld [vmem:[%s16352_s5 + $0x58] sm:$0xff]  ;;  %v12640_v14 = vld [vmem:[%s16352_s5 + $0x80] sm:$0xff] }
 0x3f5   : > { %v4201_v2 = vmax.f32 %v4121_v25, %v4125_v24  ;;  %v14117_v44 = vpop.f32.mrf.mxu2  ;;  %4573 = vst [vmem:[#allocation2 + $0x139] sm:$0xff] %v4501_v46  ;;  %v12675_v8 = vld [vmem:[%s16352_s5 + $0x198] sm:$0xff]  ;;  %6286 = vmatpush.bf16.msrb.mxu0 %v12635_v12  ;;  %v12634_v24 = vld [vmem:[%s16352_s5 + $0x50] sm:$0xff] }
 0x3f6   : > { %v14125_v47 = vpop.f32.mrf.mxu0  ;;  %v14127_v11 = vpop.f32.mrf.mxu1  ;;  %6375 = vmatpush.bf16.msrb.mxu1 %v12643_v13  ;;  %v14199_v12 = vld [vmem:[#allocation2 + $0x9] sm:$0xff] }
 0x3f7   : > { %4265 = vst [vmem:[#allocation3 + $0x198] sm:$0xff] %v4201_v2  ;;  %7138 = vmatpush.bf16.msrb.mxu2 %v12675_v8  ;;  %v12642_v2 = vld [vmem:[%s16352_s5 + $0x90] sm:$0xff]  ;;  %v14201_v13 = vld [vmem:[#allocation2 + $0x2] sm:$0xff] }
 0x3f9   : > { %6287 = vmatpush.bf16.msrb.mxu0 %v12634_v24  ;;  %v12672_v24 = vld [vmem:[%s16352_s5 + $0x180] sm:$0xff] }
 0x3fa   : > { %6376 = vmatpush.bf16.msrb.mxu1 %v12642_v2  ;;  %v12907_v2 = vld [vmem:[#allocation2 + $0x8] sm:$0xff] }
 0x3fb   : > { %7139 = vmatpush.bf16.msrb.mxu2 %v12674_v20 }
 0x3fc   : > { %v5133_v22 = vld [vmem:[#allocation2 + $0x138] sm:$0xff] }
 0x3fd   : > { %v14137_v23 = vpop.f32.mrf.mxu2 }
 0x3fe   : > { %v4328_v32 = vld [vmem:[#allocation3 + $0x190] ss:$2 sm:$0xff]  ;;  %v4392_v59 = vld [vmem:[#allocation3 + $0x191] ss:$2 sm:$0xff]  ;;  %v14148_v26 = vpop.f32.mrf.mxu0  ;;  %v14151_v40 = vpop.f32.mrf.mxu1  ;;  %6377 = vmatpush.bf16.msrb.mxu1 %v12641_v18 }
 0x3ff   : > { %v4430_v33 = vmax.f32 %v4328_v32, %v4392_v59  ;;  %v12556_v32 = vld [vmem:[%s13145_s1 + $0x200] sm:$0xff]  ;;  %v12491_v59 = vld [vmem:[%s13145_s1 + $0x1f0] sm:$0xff]  ;;  %7140 = vmatpush.bf16.msrb.mxu2 %v12673_v38 }
 0x401   : > { %10490 = vmatmul.msk.bf16.gmra.mxu0 %vm1141_vm1, %v12555_v27  ;;  %10814 = vmatmul.msk.bf16.gmra.mxu1 %vm1141_vm1, %v12490_v52  ;;  %v4466_v1 = vmul.f32 %v14107_v39, %v4430_v33  ;;  %v14182_v27 = vpop.f32.mrf.mxu3  ;;  %v12633_v52 = vld [vmem:[%s16352_s5 + $0x48] sm:$0xff] }
 0x402   : > { %11269 = vmatmul.msk.bf16.gmra.mxu2 %vm1141_vm1, %v12620_v16  ;;  %v5165_v16 = vpack.c.bf16 %v5133_v22, %v5133_v22  ;;  %6288 = vmatpush.bf16.msrb.mxu0 %v12633_v52  ;;  %v14197_v33 = vld [vmem:[#allocation2 + $0x1] sm:$0xff]  ;;  %v12621_v22 = vld [vmem:[%s13145_s1 + $0x210] sm:$0xff]  ;;  %v3610_v52 = vadd.f32 %v14117_v44, %v2461_v30 }
 0x403   : > { %v4502_v46 = vadd.f32 %v14114_v36, %v4466_v1  ;;  %7652 = vst [vmem:[#allocation2] sm:$0xff] %v12907_v2  ;;  %6378 = vmatpush.bf16.msrb.mxu1 %v12640_v14  ;;  %7141 = vmatpush.bf16.msrb.mxu2 %v12672_v24 }
 0x404   : > { %7653 = vst [vmem:[#allocation2 + $0x8] sm:$0x3] %v12907_v2  ;;  %v5357_v38 = vunpack.c.l.b16 %v5165_v16  ;;  %v3742_v30 = vadd.f32 %v14017_v5, %v3610_v52 }
 0x405   : > { %v14167_v25 = vpop.f32.mrf.mxu2  ;;  %4574 = vst [vmem:[#allocation2 + $0x141] sm:$0xff] %v4502_v46 }
 0x406   : > { %v14178_v63 = vpop.f32.mrf.mxu0  ;;  %v14180_v0 = vpop.f32.mrf.mxu1  ;;  %6289 = vmatpush.bf16.msrb.mxu0 %v12632_v3  ;;  %vm3870_vm0 = vcmp.ge.f32.partialorder %v3742_v30, 0.0 }
 0x409   : > { %v14222_v44 = vpop.f32.mrf.mxu3 }
 0x40c   : > { %v5134_v1 = vld [vmem:[#allocation2 + $0x140] sm:$0xff] }
 0x40d   : > { %v14203_v8 = vpop.f32.mrf.mxu2  ;;  %v5166_v46 = vpack.c.bf16 %v5134_v1, %v5134_v1 }
 0x40e   : > { %v1617_v20 = vpop.f32.mrf.mxu0  ;;  %v2470_v18 = vpop.f32.mrf.mxu1 }
 0x40f   : > { %v5358_v1 = vunpack.c.l.b16 %v5166_v46  ;;  %v2471_v51 = vadd.f32 %v2470_v18, %v1617_v20  ;;  %v2463_v46 = vadd.f32 %v14127_v11, %v14125_v47  ;;  %v2466_v47 = vadd.f32 %v14151_v40, %v14148_v26  ;;  %v12557_v18 = vld [vmem:[%s13145_s1 + $0x208] sm:$0xff] }
 0x411   : > { %10491 = vmatmul.msk.bf16.gmra.mxu0 %vm1141_vm1, %v12556_v32  ;;  %10815 = vmatmul.msk.bf16.gmra.mxu1 %vm1141_vm1, %v12491_v59  ;;  %v5377_v19 = vpack.c.b16 %v5358_v1, %v5357_v38  ;;  %v3998_v32 = vmul.f32 0.01, %v3742_v30  ;;  %v3611_v24 = vadd.f32 %v14137_v23, %v2463_v46  ;;  %v12492_v38 = vld [vmem:[%s13145_s1 + $0x1f8] sm:$0xff]  ;;  %s12937_s1 = scalar_lea.hbm %s16364_s17, 8 }
 0x412   : > { %11270 = vmatmul.msk.bf16.gmra.mxu2 %vm1141_vm1, %v12621_v22  ;;  %p12939_p1 = scmp.lt.s32.totalorder %s12937_s1, %s12933_s28 }
 0x413   : > { %5850 = vmatmul.bf16.gmra.mxu3 %v5377_v19  ;;  %v4126_v20 = vsel %vm3870_vm0, %v3742_v30, %v3998_v32  ;;  %v3743_v19 = vadd.f32 %v14017_v5, %v3611_v24 }
 0x414   : > { %p12940_p2 = por %p12939_p1, %p12938_p0 }
 0x415   : > { %v3456_v16 = vpop.f32.mrf.mxu2  ;;  %v3999_v46 = vmul.f32 0.01, %v3743_v19  ;;  %vm3871_vm3 = vcmp.ge.f32.partialorder %v3743_v19, 0.0 }
 0x416   : > { %v3614_v3 = vadd.f32 %v3456_v16, %v2471_v51  ;;  %v1619_v14 = vpop.f32.mrf.mxu0  ;;  %v2472_v59 = vpop.f32.mrf.mxu1  ;;  %p12941_p3 = pnand %p12940_p2, %p12936_p13 }
 0x417   : > { %v2473_v11 = vadd.f32 %v2472_v59, %v1619_v14  ;;  %v4710_v14 = vld [vmem:[#allocation2 + $0xa] sm:$0xff]  ;;  %v4127_v32 = vsel %vm3871_vm3, %v3743_v19, %v3999_v46  ;;  %v2468_v19 = vadd.f32 %v14180_v0, %v14178_v63  ;;  %v6493_v0 = vpack.c.bf16 %v13381_v10, %v13381_v10 }
 0x418   : > { %v3746_v60 = vadd.f32 %v14017_v5, %v3614_v3  ;;  %v3612_v3 = vadd.f32 %v14167_v25, %v2466_v47  ;;  %v4677_v25 = vpack.c.bf16 %v14197_v33, %v14197_v33  ;;  %v4678_v47 = vpack.c.bf16 %v14199_v12, %v14199_v12 }
 0x41a   : > { %vm3874_vm2 = vcmp.ge.f32.partialorder %v3746_v60, 0.0  ;;  %v4002_v2 = vmul.f32 0.01, %v3746_v60  ;;  %v3744_v59 = vadd.f32 %v14017_v5, %v3612_v3 }
 0x41c   : > { %v4130_v51 = vsel %vm3874_vm2, %v3746_v60, %v4002_v2  ;;  %v12660_v60 = vld [vmem:[%s16352_s5 + $0x120] sm:$0xff] }
 0x41d   : > { %v4202_v22 = vmax.f32 %v4126_v20, %v4130_v51  ;;  %v3458_v52 = vpop.f32.mrf.mxu2  ;;  %v4742_v51 = vpack.c.bf16 %v4710_v14, %v4710_v14  ;;  %5874 = vmatpush.bf16.msrb.mxu3 %v12660_v60 }
 0x41e   : > { %v3615_v1 = vadd.f32 %v3458_v52, %v2473_v11  ;;  %v1622_v16 = vpop.f32.mrf.mxu0  ;;  %v2475_v23 = vpop.f32.mrf.mxu1  ;;  %v6494_v52 = vpack.c.bf16 %v13400_v31, %v13400_v31 }
 0x41f   : > { %4266 = vst [vmem:[#allocation3 + $0x1a0] sm:$0xff] %v4202_v22  ;;  %v2476_v40 = vadd.f32 %v2475_v23, %v1622_v16  ;;  %v4998_v23 = vunpack.c.l.b16 %v4742_v51 }
 0x420   : > { %v3747_v30 = vadd.f32 %v14017_v5, %v3615_v1  ;;  %v4901_v1 = vunpack.c.l.b16 %v4677_v25  ;;  %v6686_v46 = vunpack.c.l.b16 %v6494_v52 }
 0x421   : > { %10492 = vmatmul.msk.bf16.gmra.mxu0 %vm1141_vm1, %v12557_v18  ;;  %10816 = vmatmul.msk.bf16.gmra.mxu1 %vm1141_vm1, %v12492_v38  ;;  %v4000_v18 = vmul.f32 0.01, %v3744_v59  ;;  %v3613_v38 = vadd.f32 %v14203_v8, %v2468_v19 }
 0x422   : > { %vm3875_vm4 = vcmp.ge.f32.partialorder %v3747_v30, 0.0  ;;  %v4003_v26 = vmul.f32 0.01, %v3747_v30  ;;  %11271 = vmatmul.msk.bf16.gmra.mxu2 %vm1141_vm1, %v12622_v57  ;;  %v4741_v57 = vpack.c.bf16 %v14201_v13, %v14201_v13  ;;  %vm3872_vm1 = vcmp.ge.f32.partialorder %v3744_v59, 0.0 }
 0x423   : > { %v4902_v13 = vunpack.c.l.b16 %v4678_v47  ;;  %v4128_v3 = vsel %vm3872_vm1, %v3744_v59, %v4000_v18  ;;  %v4712_v18 = vld [vmem:[#allocation2 + $0x22] sm:$0xff] }
 0x424   : > { %v4131_v24 = vsel %vm3875_vm4, %v3747_v30, %v4003_v26  ;;  %v4997_v16 = vunpack.c.l.b16 %v4741_v57  ;;  %v3745_v30 = vadd.f32 %v14017_v5, %v3613_v38 }
 0x425   : > { %v4203_v2 = vmax.f32 %v4127_v32, %v4131_v24  ;;  %v3461_v20 = vpop.f32.mrf.mxu2  ;;  %v4933_v8 = vpack.c.b16 %v4902_v13, %v4901_v1  ;;  %v4647_v13 = vld [vmem:[#allocation2 + $0x19] sm:$0xff] }
 0x426   : > { %v3616_v11 = vadd.f32 %v3461_v20, %v2476_v40  ;;  %v1624_v22 = vpop.f32.mrf.mxu0  ;;  %v2477_v33 = vpop.f32.mrf.mxu1  ;;  %v5029_v32 = vpack.c.b16 %v4998_v23, %v4997_v16  ;;  %v6685_v20 = vunpack.c.l.b16 %v6493_v0  ;;  %v4001_v10 = vmul.f32 0.01, %v3745_v30 }
 0x427   : > { %4267 = vst [vmem:[#allocation3 + $0x1a8] sm:$0xff] %v4203_v2  ;;  %v2478_v26 = vadd.f32 %v2477_v33, %v1624_v22  ;;  %vm3873_vm6 = vcmp.ge.f32.partialorder %v3745_v30, 0.0  ;;  %v4680_v23 = vpack.c.bf16 %v13341_v42, %v13341_v42  ;;  %v4744_v0 = vpack.c.bf16 %v4712_v18, %v4712_v18 }
 0x428   : > { %v3748_v12 = vadd.f32 %v14017_v5, %v3616_v11  ;;  %v6717_v51 = vpack.c.b16 %v6686_v46, %v6685_v20  ;;  %v4129_v33 = vsel %vm3873_vm6, %v3745_v30, %v4001_v10  ;;  %v6496_v46 = vpack.c.bf16 %v13463_v21, %v13463_v21 }
 0x429   : > { %v6495_v30 = vpack.c.bf16 %v13444_v17, %v13444_v17  ;;  %v4745_v18 = vpack.c.bf16 %v13404_v35, %v13404_v35 }
 0x42a   : > { %vm3876_vm5 = vcmp.ge.f32.partialorder %v3748_v12, 0.0  ;;  %v4004_v63 = vmul.f32 0.01, %v3748_v12 }
 0x42c   : > { %v4132_v31 = vsel %vm3876_vm5, %v3748_v12, %v4004_v63  ;;  %v4743_v63 = vpack.c.bf16 %v13343_v45, %v13343_v45  ;;  %v6687_v45 = vunpack.c.l.b16 %v6495_v30  ;;  %v5001_v30 = vunpack.c.l.b16 %v4745_v18 }
 0x42d   : > { %v4204_v40 = vmax.f32 %v4128_v3, %v4132_v31  ;;  %v3463_v14 = vpop.f32.mrf.mxu2  ;;  %v4679_v3 = vpack.c.bf16 %v4647_v13, %v4647_v13  ;;  %v4904_v31 = vunpack.c.l.b16 %v4680_v23  ;;  %v6498_v23 = vpack.c.bf16 %v13533_v55, %v13533_v55 }
 0x42e   : > { %v4330_v24 = vld [vmem:[#allocation3 + $0x1a0] ss:$2 sm:$0xff]  ;;  %v4394_v25 = vld [vmem:[#allocation3 + $0x1a1] ss:$2 sm:$0xff]  ;;  %v3617_v60 = vadd.f32 %v3463_v14, %v2478_v26  ;;  %v14259_v2 = vpop.f32.mrf.mxu0  ;;  %v14261_v57 = vpop.f32.mrf.mxu1  ;;  %v4999_v26 = vunpack.c.l.b16 %v4743_v63  ;;  %v6688_v14 = vunpack.c.l.b16 %v6496_v46 }
 0x42f   : > { %v4431_v47 = vmax.f32 %v4330_v24, %v4394_v25  ;;  %4268 = vst [vmem:[#allocation3 + $0x1b0] sm:$0xff] %v4204_v40  ;;  %v5000_v40 = vunpack.c.l.b16 %v4744_v0  ;;  %v14301_v0 = vpop.f32.mrf.mxu3  ;;  %v6690_v35 = vunpack.c.l.b16 %v6498_v23 }
 0x430   : > { %v3749_v59 = vadd.f32 %v14017_v5, %v3617_v60  ;;  %v6718_v10 = vpack.c.b16 %v6688_v14, %v6687_v45 }
 0x431   : > { %6290 = vmatmul.bf16.vlgmr.msrb.gmra.mxu0 %v4933_v8  ;;  %6379 = vmatmul.bf16.vlgmr.msrb.gmra.mxu1 %v5029_v32  ;;  %v4467_v19 = vmul.f32 %v14107_v39, %v4431_v47  ;;  %v4903_v32 = vunpack.c.l.b16 %v4679_v3  ;;  %v5030_v47 = vpack.c.b16 %v5000_v40, %v4999_v26  ;;  %v6497_v3 = vpack.c.bf16 %v13512_v56, %v13512_v56 }
 0x432   : > { %vm3877_vm7 = vcmp.ge.f32.partialorder %v3749_v59, 0.0  ;;  %v4005_v11 = vmul.f32 0.01, %v3749_v59  ;;  %7142 = vmatmul.bf16.vlgmr.msrb.gmra.mxu2 %v6717_v51  ;;  %v4714_v51 = vld [vmem:[#allocation2 + $0x3a] sm:$0xff] }
 0x433   : > { %v4503_v22 = vadd.f32 %v14114_v36, %v4467_v19  ;;  %v14284_v21 = vpack.c.b16 %v4904_v31, %v4903_v32  ;;  %v6689_v45 = vunpack.c.l.b16 %v6497_v3 }
 0x434   : > { %v4133_v52 = vsel %vm3877_vm7, %v3749_v59, %v4005_v11  ;;  %v4649_v11 = vld [vmem:[#allocation2 + $0x31] sm:$0xff] }
 0x435   : > { %v4205_v38 = vmax.f32 %v4129_v33, %v4133_v52  ;;  %v3466_v12 = vpop.f32.mrf.mxu2  ;;  %4575 = vst [vmem:[#allocation2 + $0x151] sm:$0xff] %v4503_v22  ;;  %v4682_v33 = vpack.c.bf16 %v13402_v34, %v13402_v34  ;;  %v4681_v13 = vpack.c.bf16 %v4649_v11, %v4649_v11  ;;  %v2481_v34 = vadd.f32 %v14261_v57, %v14259_v2  ;;  %v12659_v2 = vld [vmem:[%s16352_s5 + $0x118] sm:$0xff] }
 0x436   : > { %v14266_v1 = vpop.f32.mrf.mxu0  ;;  %v14268_v16 = vpop.f32.mrf.mxu1  ;;  %v6719_v57 = vpack.c.b16 %v6690_v35, %v6689_v45  ;;  %5875 = vmatpush.bf16.msrb.mxu3 %v12659_v2 }
 0x437   : > { %4269 = vst [vmem:[#allocation3 + $0x1b8] sm:$0xff] %v4205_v38  ;;  %v4746_v38 = vpack.c.bf16 %v4714_v51, %v4714_v51  ;;  %v4906_v46 = vunpack.c.l.b16 %v4682_v33  ;;  %v4905_v40 = vunpack.c.l.b16 %v4681_v13  ;;  %v14317_v11 = vpop.f32.mrf.mxu3  ;;  %v4716_v33 = vld [vmem:[#allocation2 + $0x52] sm:$0xff] }
 0x439   : > { %v5002_v31 = vunpack.c.l.b16 %v4746_v38  ;;  %v2483_v38 = vadd.f32 %v14268_v16, %v14266_v1 }
 0x43c   : > { %v5135_v63 = vld [vmem:[#allocation2 + $0x150] sm:$0xff] }
 0x43d   : > { %v14278_v8 = vpop.f32.mrf.mxu2  ;;  %v5167_v26 = vpack.c.bf16 %v5135_v63, %v5135_v63  ;;  %v4651_v63 = vld [vmem:[#allocation2 + $0x49] sm:$0xff] }
 0x43e   : > { %v4332_v24 = vld [vmem:[#allocation3 + $0x1b0] ss:$2 sm:$0xff]  ;;  %v4396_v42 = vld [vmem:[#allocation3 + $0x1b1] ss:$2 sm:$0xff]  ;;  %v14280_v25 = vpop.f32.mrf.mxu0  ;;  %v14282_v20 = vpop.f32.mrf.mxu1  ;;  %v4683_v16 = vpack.c.bf16 %v4651_v63, %v4651_v63 }
 0x43f   : > { %v4432_v60 = vmax.f32 %v4332_v24, %v4396_v42  ;;  %v14309_v42 = vpack.c.b16 %v4906_v46, %v4905_v40  ;;  %v5359_v56 = vunpack.c.l.b16 %v5167_v26  ;;  %v4684_v46 = vpack.c.bf16 %v13465_v49, %v13465_v49 }
 0x440   : > { %v6500_v26 = vpack.c.bf16 %v13606_v29, %v13606_v29  ;;  %v3619_v40 = vadd.f32 %v14278_v8, %v2483_v38  ;;  %v6499_v49 = vpack.c.bf16 %v13587_v9, %v13587_v9  ;;  %v2486_v29 = vadd.f32 %v14282_v20, %v14280_v25 }
 0x441   : > { %6295 = vmatmul.bf16.gmra.mxu0 %v14284_v21  ;;  %6384 = vmatmul.bf16.gmra.mxu1 %v5030_v47  ;;  %v4468_v17 = vmul.f32 %v14107_v39, %v4432_v60  ;;  %v3618_v60 = vadd.f32 %v3466_v12, %v2481_v34 }
 0x442   : > { %7147 = vmatmul.bf16.gmra.mxu2 %v6718_v10  ;;  %v5031_v10 = vpack.c.b16 %v5002_v31, %v5001_v30  ;;  %v4747_v30 = vpack.c.bf16 %v13467_v50, %v13467_v50  ;;  %v4748_v31 = vpack.c.bf16 %v4716_v33, %v4716_v33  ;;  %v6692_v50 = vunpack.c.l.b16 %v6500_v26 }
 0x443   : > { %v4504_v59 = vadd.f32 %v14114_v36, %v4468_v17  ;;  %v3750_v12 = vadd.f32 %v14017_v5, %v3618_v60  ;;  %v3751_v60 = vadd.f32 %v14017_v5, %v3619_v40 }
 0x444   : > { %v5004_v45 = vunpack.c.l.b16 %v4748_v31 }
 0x445   : > { %v14289_v19 = vpop.f32.mrf.mxu2  ;;  %4576 = vst [vmem:[#allocation2 + $0x159] sm:$0xff] %v4504_v59  ;;  %v4006_v3 = vmul.f32 0.01, %v3750_v12  ;;  %vm3878_vm8 = vcmp.ge.f32.partialorder %v3750_v12, 0.0  ;;  %vm3879_vm10 = vcmp.ge.f32.partialorder %v3751_v60, 0.0 }
 0x446   : > { %v14291_v22 = vpop.f32.mrf.mxu0  ;;  %v14295_v52 = vpop.f32.mrf.mxu1  ;;  %v3620_v38 = vadd.f32 %v14289_v19, %v2486_v29  ;;  %v6501_v29 = vpack.c.bf16 %v13650_v7, %v13650_v7 }
 0x447   : > { %v2488_v26 = vadd.f32 %v14295_v52, %v14291_v22 }
 0x448   : > { %v6693_v7 = vunpack.c.l.b16 %v6501_v29 }
 0x44c   : > { %v5136_v14 = vld [vmem:[#allocation2 + $0x158] sm:$0xff] }
 0x44d   : > { %v14307_v32 = vpop.f32.mrf.mxu2  ;;  %v5168_v24 = vpack.c.bf16 %v5136_v14, %v5136_v14  ;;  %v4908_v14 = vunpack.c.l.b16 %v4684_v46  ;;  %v14344_v46 = vld [vmem:[%s16395_s2] ss:$0 sm:$0xff] }
 0x44e   : > { %v1637_v55 = vpop.f32.mrf.mxu0  ;;  %v2490_v47 = vpop.f32.mrf.mxu1 }
 0x44f   : > { %v5360_v17 = vunpack.c.l.b16 %v5168_v24  ;;  %v2491_v51 = vadd.f32 %v2490_v47, %v1637_v55  ;;  %v4134_v24 = vsel %vm3878_vm8, %v3750_v12, %v4006_v3  ;;  %v5003_v55 = vunpack.c.l.b16 %v4747_v30 }
 0x450   : > { %v3752_v3 = vadd.f32 %v14344_v46, %v3620_v38 }
 0x451   : > { %6300 = vmatmul.bf16.gmra.mxu0 %v14309_v42  ;;  %6389 = vmatmul.bf16.gmra.mxu1 %v5031_v10  ;;  %v14315_v59 = vpack.c.b16 %v5360_v17, %v5359_v56  ;;  %v4907_v17 = vunpack.c.l.b16 %v4683_v16  ;;  %v5032_v12 = vpack.c.b16 %v5004_v45, %v5003_v55  ;;  %v4653_v16 = vld [vmem:[#allocation2 + $0x61] sm:$0xff]  ;;  %v6502_v55 = vpack.c.bf16 %v13669_v48, %v13669_v48 }
 0x452   : > { %7152 = vmatmul.bf16.gmra.mxu2 %v6719_v57  ;;  %v4008_v45 = vmul.f32 0.01, %v3752_v3  ;;  %vm3880_vm12 = vcmp.ge.f32.partialorder %v3752_v3, 0.0  ;;  %v4685_v52 = vpack.c.bf16 %v4653_v16, %v4653_v16 }
 0x453   : > { %5855 = vmatmul.bf16.gmra.mxu3 %v14315_v59  ;;  %v14336_v9 = vpack.c.b16 %v4908_v14, %v4907_v17  ;;  %v4686_v14 = vpack.c.bf16 %v13535_v4, %v13535_v4 }
 0x455   : > { %v3476_v18 = vpop.f32.mrf.mxu2  ;;  %v4910_v4 = vunpack.c.l.b16 %v4686_v14 }
 0x456   : > { %v3622_v13 = vadd.f32 %v3476_v18, %v2491_v51  ;;  %v1639_v23 = vpop.f32.mrf.mxu0  ;;  %v2492_v34 = vpop.f32.mrf.mxu1  ;;  %v6691_v51 = vunpack.c.l.b16 %v6499_v49  ;;  %v4007_v18 = vmul.f32 0.01, %v3751_v60  ;;  %v4749_v49 = vpack.c.bf16 %v13537_v6, %v13537_v6 }
 0x457   : > { %v2493_v8 = vadd.f32 %v2492_v34, %v1639_v23  ;;  %v4718_v34 = vld [vmem:[#allocation2 + $0x6a] sm:$0xff]  ;;  %v6694_v6 = vunpack.c.l.b16 %v6502_v55  ;;  %v4688_v55 = vpack.c.bf16 %v13608_v58, %v13608_v58 }
 0x458   : > { %v3754_v1 = vadd.f32 %v14017_v5, %v3622_v13  ;;  %v6720_v63 = vpack.c.b16 %v6692_v50, %v6691_v51  ;;  %v4135_v23 = vsel %vm3879_vm10, %v3751_v60, %v4007_v18  ;;  %v3621_v50 = vadd.f32 %v14307_v32, %v2488_v26 }
 0x459   : > { %v4909_v51 = vunpack.c.l.b16 %v4685_v52  ;;  %v4912_v29 = vunpack.c.l.b16 %v4688_v55  ;;  %v16440_v55 = vld [vmem:[#allocation43_spill] sm:$0xff] }
 0x45a   : > { %vm3882_vm9 = vcmp.ge.f32.partialorder %v3754_v1, 0.0  ;;  %v4010_v35 = vmul.f32 0.01, %v3754_v1  ;;  %v3753_v48 = vadd.f32 %v14344_v46, %v3621_v50 }
 0x45c   : > { %v4138_v47 = vsel %vm3882_vm9, %v3754_v1, %v4010_v35  ;;  %vm3881_vm14 = vcmp.ge.f32.partialorder %v3753_v48, 0.0 }
 0x45d   : > { %v4206_v10 = vmax.f32 %v4134_v24, %v4138_v47  ;;  %v3478_v56 = vpop.f32.mrf.mxu2  ;;  %v4750_v24 = vpack.c.bf16 %v4718_v34, %v4718_v34  ;;  %v5005_v47 = vunpack.c.l.b16 %v4749_v49  ;;  %v4655_v49 = vld [vmem:[#allocation2 + $0x79] sm:$0xff] }
 0x45e   : > { %v3623_v2 = vadd.f32 %v3478_v56, %v2493_v8  ;;  %v1642_v57 = vpop.f32.mrf.mxu0  ;;  %v2495_v33 = vpop.f32.mrf.mxu1  ;;  %v4136_v56 = vsel %vm3880_vm12, %v3752_v3, %v4008_v45  ;;  %v4751_v45 = vpack.c.bf16 %v13610_v61, %v13610_v61  ;;  %v4687_v52 = vpack.c.bf16 %v4655_v49, %v4655_v49 }
 0x45f   : > { %4270 = vst [vmem:[#allocation3 + $0x1c0] sm:$0xff] %v4206_v10  ;;  %v2496_v20 = vadd.f32 %v2495_v33, %v1642_v57  ;;  %v5006_v8 = vunpack.c.l.b16 %v4750_v24  ;;  %v14362_v10 = vpop.f32.mrf.mxu3 }
 0x460   : > { %v3755_v13 = vadd.f32 %v14017_v5, %v3623_v2  ;;  %v12658_v5 = vld [vmem:[%s16352_s5 + $0x110] sm:$0xff] }
 0x461   : > { %6305 = vmatmul.bf16.gmra.mxu0 %v14336_v9  ;;  %6394 = vmatmul.bf16.gmra.mxu1 %v5032_v12 }
 0x462   : > { %vm3883_vm11 = vcmp.ge.f32.partialorder %v3755_v13, 0.0  ;;  %v4011_v25 = vmul.f32 0.01, %v3755_v13  ;;  %7157 = vmatmul.bf16.gmra.mxu2 %v6720_v63  ;;  %5876 = vmatpush.bf16.msrb.mxu3 %v12658_v5 }
 0x464   : > { %v4139_v19 = vsel %vm3883_vm11, %v3755_v13, %v4011_v25  ;;  %v14369_v25 = vpack.c.b16 %v4910_v4, %v4909_v51  ;;  %v5007_v4 = vunpack.c.l.b16 %v4751_v45  ;;  %v6505_v45 = vpack.c.bf16 %v16440_v55, %v16440_v55  ;;  %v16442_v55 = vld [vmem:[#allocation39_spill] sm:$0xff] }
 0x465   : > { %v4207_v30 = vmax.f32 %v4135_v23, %v4139_v19  ;;  %v3481_v31 = vpop.f32.mrf.mxu2  ;;  %v4009_v23 = vmul.f32 0.01, %v3753_v48  ;;  %v6721_v19 = vpack.c.b16 %v6694_v6, %v6693_v7  ;;  %v4722_v7 = vld [vmem:[#allocation2 + $0x9a] sm:$0xff] }
 0x466   : > { %v3624_v40 = vadd.f32 %v3481_v31, %v2496_v20  ;;  %v1644_v1 = vpop.f32.mrf.mxu0  ;;  %v2497_v35 = vpop.f32.mrf.mxu1  ;;  %v5033_v20 = vpack.c.b16 %v5006_v8, %v5005_v47 }
 0x467   : > { %4271 = vst [vmem:[#allocation3 + $0x1c8] sm:$0xff] %v4207_v30  ;;  %v2498_v32 = vadd.f32 %v2497_v35, %v1644_v1  ;;  %v4137_v31 = vsel %vm3881_vm14, %v3753_v48, %v4009_v23  ;;  %v14377_v35 = vpop.f32.mrf.mxu3 }
 0x468   : > { %v3756_v22 = vadd.f32 %v14344_v46, %v3624_v40  ;;  %v4720_v40 = vld [vmem:[#allocation2 + $0x82] sm:$0xff] }
 0x469   : > { %v4752_v50 = vpack.c.bf16 %v4720_v40, %v4720_v40  ;;  %v6506_v40 = vpack.c.bf16 %v13802_v41, %v13802_v41 }
 0x46a   : > { %vm3884_vm13 = vcmp.ge.f32.partialorder %v3756_v22, 0.0  ;;  %v4012_v60 = vmul.f32 0.01, %v3756_v22 }
 0x46b   : > { %v5008_v47 = vunpack.c.l.b16 %v4752_v50 }
 0x46c   : > { %v4140_v17 = vsel %vm3884_vm13, %v3756_v22, %v4012_v60  ;;  %v6504_v22 = vpack.c.bf16 %v13732_v53, %v13732_v53  ;;  %v6503_v60 = vpack.c.bf16 %v13713_v15, %v13713_v15 }
 0x46d   : > { %v4208_v2 = vmax.f32 %v4136_v56, %v4140_v17  ;;  %v3483_v57 = vpop.f32.mrf.mxu2  ;;  %v4911_v56 = vunpack.c.l.b16 %v4687_v52  ;;  %v5034_v15 = vpack.c.b16 %v5008_v47, %v5007_v4 }
 0x46e   : > { %v4334_v33 = vld [vmem:[#allocation3 + $0x1c0] ss:$2 sm:$0xff]  ;;  %v4398_v12 = vld [vmem:[#allocation3 + $0x1c1] ss:$2 sm:$0xff]  ;;  %v3625_v18 = vadd.f32 %v3483_v57, %v2498_v32  ;;  %v14365_v38 = vpop.f32.mrf.mxu0  ;;  %v14367_v63 = vpop.f32.mrf.mxu1  ;;  %v6696_v8 = vunpack.c.l.b16 %v6504_v22  ;;  %v6695_v32 = vunpack.c.l.b16 %v6503_v60 }
 0x46f   : > { %v4433_v13 = vmax.f32 %v4334_v33, %v4398_v12  ;;  %4272 = vst [vmem:[#allocation3 + $0x1d0] sm:$0xff] %v4208_v2  ;;  %v14393_v48 = vpop.f32.mrf.mxu3  ;;  %v14399_v57 = vpack.c.b16 %v4912_v29, %v4911_v56  ;;  %v6698_v29 = vunpack.c.l.b16 %v6506_v40 }
 0x470   : > { %v3757_v3 = vadd.f32 %v14344_v46, %v3625_v18  ;;  %v6722_v51 = vpack.c.b16 %v6696_v8, %v6695_v32 }
 0x471   : > { %6310 = vmatmul.bf16.gmra.mxu0 %v14369_v25  ;;  %6399 = vmatmul.bf16.gmra.mxu1 %v5033_v20  ;;  %v4469_v34 = vmul.f32 %v14107_v39, %v4433_v13  ;;  %v4657_v20 = vld [vmem:[#allocation2 + $0x91] sm:$0xff] }
 0x472   : > { %vm3885_vm15 = vcmp.ge.f32.partialorder %v3757_v3, 0.0  ;;  %v4013_v5 = vmul.f32 0.01, %v3757_v3  ;;  %7162 = vmatmul.bf16.gmra.mxu2 %v6721_v19  ;;  %v4690_v19 = vpack.c.bf16 %v13671_v62, %v13671_v62 }
 0x473   : > { %v4505_v30 = vadd.f32 %v14114_v36, %v4469_v34 }
 0x474   : > { %v4141_v26 = vsel %vm3885_vm15, %v3757_v3, %v4013_v5  ;;  %v4754_v5 = vpack.c.bf16 %v4722_v7, %v4722_v7  ;;  %v4914_v49 = vunpack.c.l.b16 %v4690_v19  ;;  %v4724_v7 = vld [vmem:[#allocation2 + $0xb2] sm:$0xff] }
 0x475   : > { %v4209_v1 = vmax.f32 %v4137_v31, %v4141_v26  ;;  %v14375_v16 = vpop.f32.mrf.mxu2  ;;  %4577 = vst [vmem:[#allocation2 + $0x169] sm:$0xff] %v4505_v30  ;;  %v4707_v18 = vpack.c.bf16 %v4505_v30, %v4505_v30  ;;  %v4689_v26 = vpack.c.bf16 %v4657_v20, %v4657_v20 }
 0x476   : > { %v14379_v14 = vpop.f32.mrf.mxu0  ;;  %v14381_v24 = vpop.f32.mrf.mxu1  ;;  %v5010_v22 = vunpack.c.l.b16 %v4754_v5  ;;  %v4659_v5 = vld [vmem:[#allocation2 + $0xa9] sm:$0xff] }
 0x477   : > { %4273 = vst [vmem:[#allocation3 + $0x1d8] sm:$0xff] %v4209_v1  ;;  %v14414_v31 = vunpack.c.l.b16 %v4707_v18  ;;  %v14418_v30 = vpop.f32.mrf.mxu3  ;;  %v4913_v60 = vunpack.c.l.b16 %v4689_v26 }
 0x479   : > { %v14430_v56 = vpack.c.b16 %v4914_v49, %v4913_v60 }
 0x47c   : > { %v5137_v1 = vld [vmem:[#allocation2 + $0x168] sm:$0xff] }
 0x47d   : > { %v14391_v6 = vpop.f32.mrf.mxu2  ;;  %v5169_v52 = vpack.c.bf16 %v5137_v1, %v5137_v1  ;;  %v16441_v1 = vld [vmem:[#allocation38_spill] sm:$0xff] }
 0x47e   : > { %v4336_v58 = vld [vmem:[#allocation3 + $0x1d0] ss:$2 sm:$0xff]  ;;  %v4400_v17 = vld [vmem:[#allocation3 + $0x1d1] ss:$2 sm:$0xff]  ;;  %v14395_v61 = vpop.f32.mrf.mxu0  ;;  %v14397_v53 = vpop.f32.mrf.mxu1  ;;  %v4692_v49 = vpack.c.bf16 %v16441_v1, %v16441_v1 }
 0x47f   : > { %v4434_v2 = vmax.f32 %v4336_v58, %v4400_v17  ;;  %v6697_v58 = vunpack.c.l.b16 %v6505_v45  ;;  %v4755_v45 = vpack.c.bf16 %v16442_v55, %v16442_v55  ;;  %v4726_v1 = vld [vmem:[#allocation2 + $0xca] sm:$0xff] }
 0x481   : > { %6315 = vmatmul.bf16.gmra.mxu0 %v14399_v57  ;;  %6404 = vmatmul.bf16.gmra.mxu1 %v5034_v15  ;;  %v4470_v33 = vmul.f32 %v14107_v39, %v4434_v2  ;;  %v4753_v39 = vpack.c.bf16 %v13673_v54, %v13673_v54  ;;  %v2501_v54 = vadd.f32 %v14367_v63, %v14365_v38  ;;  %v5361_v15 = vunpack.c.l.b16 %v5169_v52  ;;  %v12657_v38 = vld [vmem:[%s16352_s5 + $0x108] sm:$0xff]  ;;  %v14436_v63 = vpop.f32.mrf.mxu3 }
 0x482   : > { %7167 = vmatmul.bf16.gmra.mxu2 %v6722_v51  ;;  %5877 = vmatpush.bf16.msrb.mxu3 %v12657_v38  ;;  %v4691_v52 = vpack.c.bf16 %v4659_v5, %v4659_v5 }
 0x483   : > { %v4506_v12 = vadd.f32 %v14114_v36, %v4470_v33  ;;  %v5009_v50 = vunpack.c.l.b16 %v4753_v39  ;;  %v3626_v17 = vadd.f32 %v14375_v16, %v2501_v54  ;;  %v6723_v33 = vpack.c.b16 %v6698_v29, %v6697_v58 }
 0x484   : > { %v4756_v54 = vpack.c.bf16 %v4724_v7, %v4724_v7  ;;  %v4916_v29 = vunpack.c.l.b16 %v4692_v49  ;;  %v2506_v58 = vadd.f32 %v14397_v53, %v14395_v61  ;;  %v6478_v49 = vld [vmem:[#allocation2 + $0xf8] sm:$0xff] }
 0x485   : > { %v14404_v13 = vpop.f32.mrf.mxu2  ;;  %4578 = vst [vmem:[#allocation2 + $0x171] sm:$0xff] %v4506_v12  ;;  %v4708_v23 = vpack.c.bf16 %v4506_v12, %v4506_v12  ;;  %v5035_v2 = vpack.c.b16 %v5010_v22, %v5009_v50  ;;  %v3758_v16 = vadd.f32 %v14344_v46, %v3626_v17 }
 0x486   : > { %v14406_v3 = vpop.f32.mrf.mxu0  ;;  %v14410_v34 = vpop.f32.mrf.mxu1 }
 0x487   : > { %v14416_v36 = vunpack.c.l.b16 %v4708_v23  ;;  %v2503_v23 = vadd.f32 %v14381_v24, %v14379_v14  ;;  %v4014_v26 = vmul.f32 0.01, %v3758_v16  ;;  %vm3886_vm0 = vcmp.ge.f32.partialorder %v3758_v16, 0.0 }
 0x489   : > { %v3627_v50 = vadd.f32 %v14391_v6, %v2503_v23  ;;  %v14451_v60 = vpop.f32.mrf.mxu3  ;;  %v4142_v24 = vsel %vm3886_vm0, %v3758_v16, %v4014_v26 }
 0x48c   : > { %v5138_v4 = vld [vmem:[#allocation2 + $0x170] sm:$0xff] }
 0x48d   : > { %v14428_v47 = vpop.f32.mrf.mxu2  ;;  %v5170_v41 = vpack.c.bf16 %v5138_v4, %v5138_v4  ;;  %v5011_v4 = vunpack.c.l.b16 %v4755_v45 }
 0x48e   : > { %v1657_v8 = vpop.f32.mrf.mxu0  ;;  %v2510_v32 = vpop.f32.mrf.mxu1 }
 0x48f   : > { %v5362_v51 = vunpack.c.l.b16 %v5170_v41  ;;  %v2511_v18 = vadd.f32 %v2510_v32, %v1657_v8  ;;  %v5012_v41 = vunpack.c.l.b16 %v4756_v54  ;;  %v3759_v8 = vadd.f32 %v14344_v46, %v3627_v50 }
 0x490   : > { %v2508_v54 = vadd.f32 %v14410_v34, %v14406_v3 }
 0x491   : > { %6320 = vmatmul.bf16.gmra.mxu0 %v14430_v56  ;;  %6409 = vmatmul.bf16.gmra.mxu1 %v5035_v2  ;;  %v14439_v12 = vpack.c.b16 %v5362_v51, %v5361_v15  ;;  %v4915_v15 = vunpack.c.l.b16 %v4691_v52  ;;  %v14458_v16 = vpack.c.b16 %v5012_v41, %v5011_v4  ;;  %v4015_v7 = vmul.f32 0.01, %v3759_v8  ;;  %v14464_v61 = vpop.f32.mrf.mxu3  ;;  %v6477_v4 = vld [vmem:[#allocation2 + $0xf0] sm:$0xff] }
 0x492   : > { %7172 = vmatmul.bf16.gmra.mxu2 %v6723_v33  ;;  %vm3887_vm3 = vcmp.ge.f32.partialorder %v3759_v8, 0.0  ;;  %v6510_v41 = vpack.c.bf16 %v6478_v49, %v6478_v49 }
 0x493   : > { %5860 = vmatmul.bf16.gmra.mxu3 %v14439_v12  ;;  %v4143_v5 = vsel %vm3887_vm3, %v3759_v8, %v4015_v7 }
 0x495   : > { %v3496_v20 = vpop.f32.mrf.mxu2 }
 0x496   : > { %v3630_v19 = vadd.f32 %v3496_v20, %v2511_v18  ;;  %v1659_v39 = vpop.f32.mrf.mxu0  ;;  %v2512_v40 = vpop.f32.mrf.mxu1  ;;  %v14456_v18 = vpack.c.b16 %v4916_v29, %v4915_v15  ;;  %v3628_v20 = vadd.f32 %v14404_v13, %v2506_v58  ;;  %v12656_v13 = vld [vmem:[%s16352_s5 + $0x100] sm:$0xff]  ;;  %v4758_v29 = vpack.c.bf16 %v4726_v1, %v4726_v1 }
 0x497   : > { %v2513_v32 = vadd.f32 %v2512_v40, %v1659_v39  ;;  %v16443_v39 = vpack.c.b16 %v13892_v43, %v13889_v37  ;;  %5878 = vmatpush.bf16.msrb.mxu3 %v12656_v13  ;;  %v4661_v37 = vld [vmem:[#allocation2 + $0xc1] sm:$0xff]  ;;  %v16444_v43 = vld [vmem:[#allocation45_spill] sm:$0xff]  ;;  %v3629_v58 = vadd.f32 %v14428_v47, %v2508_v54 }
 0x498   : > { %v3762_v22 = vadd.f32 %v14344_v46, %v3630_v19  ;;  %v3760_v26 = vadd.f32 %v14344_v46, %v3628_v20  ;;  %v4694_v52 = vpack.c.bf16 %v16444_v43, %v16444_v43  ;;  %v4693_v34 = vpack.c.bf16 %v4661_v37, %v4661_v37 }
 0x499   : > { %v3761_v20 = vadd.f32 %v14344_v46, %v3629_v58  ;;  %v6480_v58 = vld [vmem:[#allocation2 + $0x110] sm:$0xff] }
 0x49a   : > { %vm3890_vm2 = vcmp.ge.f32.partialorder %v3762_v22, 0.0  ;;  %v4018_v14 = vmul.f32 0.01, %v3762_v22  ;;  %v4016_v8 = vmul.f32 0.01, %v3760_v26  ;;  %vm3888_vm1 = vcmp.ge.f32.partialorder %v3760_v26, 0.0 }
 0x49b   : > { %vm3889_vm6 = vcmp.ge.f32.partialorder %v3761_v20, 0.0 }
 0x49c   : > { %v4146_v17 = vsel %vm3890_vm2, %v3762_v22, %v4018_v14  ;;  %v16445_v14 = vld [vmem:[#allocation46_spill] sm:$0xff]  ;;  %v4144_v7 = vsel %vm3888_vm1, %v3760_v26, %v4016_v8  ;;  %v4017_v26 = vmul.f32 0.01, %v3761_v20 }
 0x49d   : > { %v4210_v2 = vmax.f32 %v4142_v24, %v4146_v17  ;;  %v3498_v6 = vpop.f32.mrf.mxu2  ;;  %v4757_v24 = vpack.c.bf16 %v16445_v14, %v16445_v14  ;;  %v12910_v14 = vld [vmem:[%s16397_s4] ss:$0 sm:$0xff] }
 0x49e   : > { %v3631_v51 = vadd.f32 %v3498_v6, %v2513_v32  ;;  %v1662_v38 = vpop.f32.mrf.mxu0  ;;  %v2515_v33 = vpop.f32.mrf.mxu1  ;;  %v4918_v6 = vunpack.c.l.b16 %v4694_v52 }
 0x49f   : > { %4274 = vst [vmem:[#allocation3 + $0x1e0] sm:$0xff] %v4210_v2  ;;  %v2516_v19 = vadd.f32 %v2515_v33, %v1662_v38  ;;  %v6509_v2 = vpack.c.bf16 %v6477_v4, %v6477_v4  ;;  %v5013_v15 = vunpack.c.l.b16 %v4757_v24  ;;  %v6702_v38 = vunpack.c.l.b16 %v6510_v41  ;;  %v14481_v33 = vpop.f32.mrf.mxu3  ;;  %v4728_v41 = vld [vmem:[#allocation2 + $0xe2] sm:$0xff] }
 0x4a0   : > { %v3763_v23 = vadd.f32 %v14344_v46, %v3631_v51  ;;  %v5014_v51 = vunpack.c.l.b16 %v4758_v29  ;;  %v4145_v29 = vsel %vm3889_vm6, %v3761_v20, %v4017_v26  ;;  %v4666_v26 = vld [vmem:[#allocation2 + $0xf9] sm:$0xff] }
 0x4a1   : > { %6325 = vmatmul.bf16.gmra.mxu0 %v14456_v18  ;;  %6414 = vmatmul.bf16.gmra.mxu1 %v14458_v16  ;;  %v6701_v49 = vunpack.c.l.b16 %v6509_v2  ;;  %v6479_v2 = vld [vmem:[#allocation2 + $0x108] sm:$0xff] }
 0x4a2   : > { %vm3891_vm4 = vcmp.ge.f32.partialorder %v3763_v23, 0.0  ;;  %v4019_v53 = vmul.f32 0.01, %v3763_v23  ;;  %7177 = vmatmul.bf16.gmra.mxu2 %v16443_v39  ;;  %v4917_v39 = vunpack.c.l.b16 %v4693_v34  ;;  %v14488_v54 = vpack.c.b16 %v5014_v51, %v5013_v15 }
 0x4a3   : > { %v6725_v37 = vpack.c.b16 %v6702_v38, %v6701_v49  ;;  %v6511_v15 = vpack.c.bf16 %v6479_v2, %v6479_v2 }
 0x4a4   : > { %v4147_v40 = vsel %vm3891_vm4, %v3763_v23, %v4019_v53 }
 0x4a5   : > { %v4211_v55 = vmax.f32 %v4143_v5, %v4147_v40  ;;  %v3501_v45 = vpop.f32.mrf.mxu2 }
 0x4a6   : > { %v3632_v50 = vadd.f32 %v3501_v45, %v2516_v19  ;;  %v1664_v22 = vpop.f32.mrf.mxu0  ;;  %v2517_v3 = vpop.f32.mrf.mxu1  ;;  %v14486_v45 = vpack.c.b16 %v4918_v6, %v4917_v39  ;;  %v6512_v6 = vpack.c.bf16 %v6480_v58, %v6480_v58 }
 0x4a7   : > { %4275 = vst [vmem:[#allocation3 + $0x1e8] sm:$0xff] %v4211_v55  ;;  %v2518_v53 = vadd.f32 %v2517_v3, %v1664_v22  ;;  %v12909_v22 = vld [vmem:[%s16396_s3] ss:$0 sm:$0xff]  ;;  %v16448_v3 = vld [vmem:[#allocation50_spill] sm:$0xff] }
 0x4a8   : > { %v3764_v17 = vadd.f32 %v14344_v46, %v3632_v50  ;;  %v4759_v34 = vpack.c.bf16 %v16448_v3, %v16448_v3 }
 0x4aa   : > { %vm3892_vm5 = vcmp.ge.f32.partialorder %v3764_v17, 0.0  ;;  %v4020_v32 = vmul.f32 0.01, %v3764_v17  ;;  %v5015_v51 = vunpack.c.l.b16 %v4759_v34 }
 0x4ac   : > { %v4148_v23 = vsel %vm3892_vm5, %v3764_v17, %v4020_v32  ;;  %v4760_v32 = vpack.c.bf16 %v4728_v41, %v4728_v41 }
 0x4ad   : > { %v4212_v47 = vmax.f32 %v4144_v7, %v4148_v23  ;;  %v3503_v19 = vpop.f32.mrf.mxu2  ;;  %v6704_v7 = vunpack.c.l.b16 %v6512_v6 }
 0x4ae   : > { %v4338_v13 = vld [vmem:[#allocation3 + $0x1e0] ss:$2 sm:$0xff]  ;;  %v4402_v5 = vld [vmem:[#allocation3 + $0x1e1] ss:$2 sm:$0xff]  ;;  %v3633_v40 = vadd.f32 %v3503_v19, %v2518_v53  ;;  %v14484_v1 = vpop.f32.mrf.mxu0  ;;  %v5016_v38 = vunpack.c.l.b16 %v4760_v32  ;;  %v6703_v19 = vunpack.c.l.b16 %v6511_v15 }
 0x4af   : > { %16446 = vst [vmem:[#allocation43_spill] sm:$0xff] %v14484_v1  ;;  %v4435_v55 = vmax.f32 %v4338_v13, %v4402_v5 }
 0x4b0   : > { %4276 = vst [vmem:[#allocation3 + $0x1f0] sm:$0xff] %v4212_v47  ;;  %v3765_v50 = vadd.f32 %v14344_v46, %v3633_v40  ;;  %v14499_v46 = vpop.f32.mrf.mxu3  ;;  %v14509_v13 = vpack.c.b16 %v5016_v38, %v5015_v51  ;;  %v6726_v5 = vpack.c.b16 %v6704_v7, %v6703_v19 }
 0x4b1   : > { %6330 = vmatmul.bf16.gmra.mxu0 %v14486_v45  ;;  %6419 = vmatmul.bf16.gmra.mxu1 %v14488_v54  ;;  %v4471_v43 = vmul.f32 %v12909_v22, %v4435_v55  ;;  %v12671_v55 = vld [vmem:[%s16352_s5 + $0x178] sm:$0xff] }
 0x4b2   : > { %vm3893_vm7 = vcmp.ge.f32.partialorder %v3765_v50, 0.0  ;;  %v4021_v52 = vmul.f32 0.01, %v3765_v50  ;;  %7182 = vmatmul.bf16.gmra.mxu2 %v6725_v37  ;;  %v4730_v37 = vld [vmem:[#allocation2 + $0xfa] sm:$0xff]  ;;  %5960 = vmatpush.bf16.msra.mxu3 %v12671_v55 }
 0x4b3   : > { %v4507_v24 = vadd.f32 %v12910_v14, %v4471_v43  ;;  %v6482_v43 = vld [vmem:[#allocation2 + $0x128] sm:$0xff] }
 0x4b4   : > { %v4149_v4 = vsel %vm3893_vm7, %v3765_v50, %v4021_v52  ;;  %v4729_v50 = vld [vmem:[#allocation2 + $0xf2] sm:$0xff] }
 0x4b5   : > { %v4213_v8 = vmax.f32 %v4145_v29, %v4149_v4  ;;  %4579 = vst [vmem:[#allocation2 + $0x181] sm:$0xff] %v4507_v24  ;;  %v4665_v29 = vld [vmem:[#allocation2 + $0xf1] sm:$0xff]  ;;  %v4698_v4 = vpack.c.bf16 %v4666_v26, %v4666_v26  ;;  %v4761_v41 = vpack.c.bf16 %v4729_v50, %v4729_v50 }
 0x4b6   : > { %v14501_v17 = vpop.f32.mrf.mxu0  ;;  %v4697_v3 = vpack.c.bf16 %v4665_v29, %v4665_v29  ;;  %v4732_v29 = vld [vmem:[#allocation2 + $0x112] sm:$0xff] }
 0x4b7   : > { %16447 = vst [vmem:[#allocation38_spill] sm:$0xff] %v14501_v17  ;;  %v4922_v32 = vunpack.c.l.b16 %v4698_v4  ;;  %v5017_v2 = vunpack.c.l.b16 %v4761_v41  ;;  %v6484_v4 = vld [vmem:[#allocation2 + $0x140] sm:$0xff] }
 0x4b8   : > { %4277 = vst [vmem:[#allocation3 + $0x1f8] sm:$0xff] %v4213_v8  ;;  %v14505_v23 = vpop.f32.mrf.mxu3  ;;  %v6481_v8 = vld [vmem:[#allocation2 + $0x120] sm:$0xff]  ;;  %v4921_v7 = vunpack.c.l.b16 %v4697_v3  ;;  %v6483_v3 = vld [vmem:[#allocation2 + $0x138] sm:$0xff] }
 0x4b9   : > { %v6513_v34 = vpack.c.bf16 %v6481_v8, %v6481_v8  ;;  %v6596_v17 = vld [vmem:[#allocation2 + $0x82] sm:$0xff] }
 0x4bb   : > { %v6705_v19 = vunpack.c.l.b16 %v6513_v34 }
 0x4bc   : > { %v5139_v58 = vld [vmem:[#allocation2 + $0x180] sm:$0xff] }
 0x4bd   : > { %v5171_v15 = vpack.c.bf16 %v5139_v58, %v5139_v58  ;;  %v4764_v58 = vpack.c.bf16 %v4732_v29, %v4732_v29 }
 0x4be   : > { %v14507_v47 = vpop.f32.mrf.mxu0 }
 0x4bf   : > { %v4340_v20 = vld [vmem:[#allocation3 + $0x1f0] ss:$2 sm:$0xff]  ;;  %v4404_v53 = vld [vmem:[#allocation3 + $0x1f1] ss:$2 sm:$0xff]  ;;  %16449 = vst [vmem:[#allocation39_spill] sm:$0xff] %v14507_v47 }
 0x4c0   : > { %v4436_v39 = vmax.f32 %v4340_v20, %v4404_v53  ;;  %v14516_v52 = vpop.f32.mrf.mxu3 }
 0x4c1   : > { %6335 = vmatmul.bf16.gmra.mxu0 %v13899_v28  ;;  %6424 = vmatmul.bf16.gmra.mxu1 %v14509_v13 }
 0x4c2   : > { %v4472_v40 = vmul.f32 %v12909_v22, %v4436_v39  ;;  %7187 = vmatmul.bf16.gmra.mxu2 %v6726_v5  ;;  %v4762_v22 = vpack.c.bf16 %v4730_v37, %v4730_v37  ;;  %v14522_v39 = vpack.c.b16 %v4922_v32, %v4921_v7  ;;  %v4668_v37 = vld [vmem:[#allocation2 + $0x111] sm:$0xff]  ;;  %v6516_v32 = vpack.c.bf16 %v6484_v4, %v6484_v4 }
 0x4c3   : > { %v4700_v8 = vpack.c.bf16 %v4668_v37, %v4668_v37  ;;  %v5020_v7 = vunpack.c.l.b16 %v4764_v58  ;;  %v4734_v58 = vld [vmem:[#allocation2 + $0x12a] sm:$0xff] }
 0x4c4   : > { %v4508_v49 = vadd.f32 %v12910_v14, %v4472_v40  ;;  %v6514_v14 = vpack.c.bf16 %v6482_v43, %v6482_v43  ;;  %v5018_v6 = vunpack.c.l.b16 %v4762_v22  ;;  %v5363_v40 = vunpack.c.l.b16 %v5171_v15  ;;  %v4731_v43 = vld [vmem:[#allocation2 + $0x10a] sm:$0xff]  ;;  %v14537_v15 = vpop.f32.mrf.mxu1 }
 0x4c5   : > { %v4667_v22 = vld [vmem:[#allocation2 + $0x109] sm:$0xff]  ;;  %16453 = vst [vmem:[#allocation56_spill] sm:$0xff] %v14537_v15 }
 0x4c6   : > { %4580 = vst [vmem:[#allocation2 + $0x189] sm:$0xff] %v4508_v49  ;;  %v14518_v24 = vpop.f32.mrf.mxu0  ;;  %v6706_v51 = vunpack.c.l.b16 %v6514_v14  ;;  %v14524_v5 = vpack.c.b16 %v5018_v6, %v5017_v2  ;;  %v4763_v14 = vpack.c.bf16 %v4731_v43, %v4731_v43  ;;  %v4699_v2 = vpack.c.bf16 %v4667_v22, %v4667_v22  ;;  %v14545_v43 = vpop.f32.mrf.mxu2  ;;  %v12670_v22 = vld [vmem:[%s16352_s5 + $0x170] sm:$0xff] }
 0x4c7   : > { %16450 = vst [vmem:[#allocation45_spill] sm:$0xff] %v14518_v24  ;;  %v6515_v6 = vpack.c.bf16 %v6483_v3, %v6483_v3  ;;  %5961 = vmatpush.bf16.msra.mxu3 %v12670_v22 }
 0x4c8   : > { %v14526_v55 = vpop.f32.mrf.mxu3  ;;  %v6727_v26 = vpack.c.b16 %v6706_v51, %v6705_v19  ;;  %v4924_v51 = vunpack.c.l.b16 %v4700_v8  ;;  %v4923_v19 = vunpack.c.l.b16 %v4699_v2  ;;  %16455 = vst [vmem:[#allocation58_spill] sm:$0xff] %v14545_v43  ;;  %v4670_v8 = vld [vmem:[#allocation2 + $0x129] sm:$0xff]  ;;  %v4669_v2 = vld [vmem:[#allocation2 + $0x121] sm:$0xff] }
 0x4cc   : > { %v14555_v3 = vpop.f32.mrf.mxu1 }
 0x4cd   : > { %v5140_v38 = vld [vmem:[#allocation2 + $0x188] sm:$0xff]  ;;  %16456 = vst [vmem:[#allocation59_spill] sm:$0xff] %v14555_v3 }
 0x4ce   : > { %v5172_v20 = vpack.c.bf16 %v5140_v38, %v5140_v38  ;;  %v14520_v53 = vpop.f32.mrf.mxu0  ;;  %v5019_v38 = vunpack.c.l.b16 %v4763_v14  ;;  %v4733_v14 = vld [vmem:[#allocation2 + $0x122] sm:$0xff] }
 0x4cf   : > { %16451 = vst [vmem:[#allocation46_spill] sm:$0xff] %v14520_v53 }
 0x4d0   : > { %v5364_v49 = vunpack.c.l.b16 %v5172_v20  ;;  %v14535_v34 = vpop.f32.mrf.mxu3  ;;  %v6708_v20 = vunpack.c.l.b16 %v6516_v32  ;;  %v14543_v37 = vpack.c.b16 %v5020_v7, %v5019_v38  ;;  %v4766_v38 = vpack.c.bf16 %v4734_v58, %v4734_v58 }
 0x4d1   : > { %6340 = vmatmul.bf16.gmra.mxu0 %v14522_v39  ;;  %6429 = vmatmul.bf16.gmra.mxu1 %v14524_v5  ;;  %v4701_v7 = vpack.c.bf16 %v4669_v2, %v4669_v2  ;;  %v4735_v2 = vld [vmem:[#allocation2 + $0x13a] sm:$0xff] }
 0x4d2   : > { %v14530_v50 = vpack.c.b16 %v5364_v49, %v5363_v40  ;;  %7192 = vmatmul.bf16.gmra.mxu2 %v6727_v26  ;;  %v6707_v49 = vunpack.c.l.b16 %v6515_v6  ;;  %v14541_v26 = vpack.c.b16 %v4924_v51, %v4923_v19  ;;  %v4702_v6 = vpack.c.bf16 %v4670_v8, %v4670_v8  ;;  %v12695_v8 = vld [vmem:[%s16352_s5 + $0x238] sm:$0xff] }
 0x4d3   : > { %v4765_v51 = vpack.c.bf16 %v4733_v14, %v4733_v14  ;;  %v4925_v62 = vunpack.c.l.b16 %v4701_v7  ;;  %7312 = vmatpush.bf16.msra.mxu0 %v12695_v8  ;;  %v4767_v7 = vpack.c.bf16 %v4735_v2, %v4735_v2 }
 0x4d4   : > { %5865 = vmatmul.bf16.gmra.mxu3 %v14530_v50  ;;  %v6728_v29 = vpack.c.b16 %v6708_v20, %v6707_v49  ;;  %v4926_v19 = vunpack.c.l.b16 %v4702_v6  ;;  %v4736_v6 = vld [vmem:[#allocation2 + $0x142] sm:$0xff] }
 0x4d5   : > { %v5021_v49 = vunpack.c.l.b16 %v4765_v51  ;;  %v4671_v51 = vld [vmem:[#allocation2 + $0x139] sm:$0xff]  ;;  %v5023_v8 = vunpack.c.l.b16 %v4767_v7 }
 0x4d6   : > { %v14533_v41 = vpop.f32.mrf.mxu0  ;;  %v14567_v22 = vpack.c.b16 %v4926_v19, %v4925_v62  ;;  %v4672_v62 = vld [vmem:[#allocation2 + $0x141] sm:$0xff]  ;;  %v4768_v19 = vpack.c.bf16 %v4736_v6, %v4736_v6  ;;  %v4674_v7 = vld [vmem:[#allocation2 + $0x159] sm:$0xff] }
 0x4d7   : > { %16452 = vst [vmem:[#allocation50_spill] sm:$0xff] %v14533_v41  ;;  %v14563_v41 = vpop.f32.mrf.mxu1 }
 0x4d8   : > { %v14549_v4 = vpop.f32.mrf.mxu3  ;;  %16459 = vst [vmem:[#allocation62_spill] sm:$0xff] %v14563_v41  ;;  %v5024_v24 = vunpack.c.l.b16 %v4768_v19  ;;  %v4737_v19 = vld [vmem:[#allocation2 + $0x152] sm:$0xff] }
 0x4de   : > { %v14539_v40 = vpop.f32.mrf.mxu0 }
 0x4df   : > { %16454 = vst [vmem:[#allocation57_spill] sm:$0xff] %v14539_v40 }
 0x4e0   : > { %v14559_v20 = vpop.f32.mrf.mxu3 }
 0x4e1   : > { %6345 = vmatmul.bf16.gmra.mxu0 %v14541_v26  ;;  %6434 = vmatmul.bf16.gmra.mxu1 %v14543_v37 }
 0x4e2   : > { %7197 = vmatmul.bf16.gmra.mxu2 %v6728_v29  ;;  %v5022_v29 = vunpack.c.l.b16 %v4766_v38  ;;  %v4704_v38 = vpack.c.bf16 %v4672_v62, %v4672_v62 }
 0x4e4   : > { %5879 = vmatmul.bf16.vlgmr.msrb.gmra.mxu3 %v14284_v21  ;;  %v14561_v21 = vpop.f32.mrf.mxu2  ;;  %v4928_v53 = vunpack.c.l.b16 %v4704_v38 }
 0x4e5   : > { %16458 = vst [vmem:[#allocation61_spill] sm:$0xff] %v14561_v21  ;;  %v16492_v21 = vld [vmem:[#allocation30_spill] sm:$0xff] }
 0x4e6   : > { %v14557_v32 = vpop.f32.mrf.mxu0 }
 0x4e7   : > { %16457 = vst [vmem:[#allocation60_spill] sm:$0xff] %v14557_v32  ;;  %v14569_v32 = vpack.c.b16 %v5022_v29, %v5021_v49  ;;  %v4703_v29 = vpack.c.bf16 %v4671_v51, %v4671_v51  ;;  %v12692_v51 = vld [vmem:[%s16352_s5 + $0x220] sm:$0xff] }
 0x4e8   : > { %v14578_v14 = vpop.f32.mrf.mxu3 }
 0x4e9   : > { %v4927_v2 = vunpack.c.l.b16 %v4703_v29  ;;  %v4673_v29 = vld [vmem:[#allocation2 + $0x151] sm:$0xff] }
 0x4eb   : > { %v14596_v3 = vpack.c.b16 %v4928_v53, %v4927_v2  ;;  %v12691_v53 = vld [vmem:[%s16352_s5 + $0x218] sm:$0xff]  ;;  %v4769_v2 = vpack.c.bf16 %v4737_v19, %v4737_v19 }
 0x4ec   : > { %v14580_v58 = vpop.f32.mrf.mxu2 }
 0x4ed   : > { %16461 = vst [vmem:[#allocation64_spill] sm:$0xff] %v14580_v58 }
 0x4ee   : > { %v14565_v40 = vpop.f32.mrf.mxu0 }
 0x4ef   : > { %16460 = vst [vmem:[#allocation63_spill] sm:$0xff] %v14565_v40  ;;  %v12693_v40 = vld [vmem:[%s16352_s5 + $0x228] sm:$0xff] }
 0x4f0   : > { %v14592_v62 = vpop.f32.mrf.mxu3 }
 0x4f1   : > { %6350 = vmatmul.bf16.gmra.mxu0 %v14567_v22  ;;  %6439 = vmatmul.bf16.gmra.mxu1 %v14569_v32 }
 0x4f2   : > { %7202 = vmatmul.bf16.gmra.mxu2 %v14315_v59  ;;  %v14585_v59 = vpop.f32.mrf.mxu1 }
 0x4f3   : > { %16462 = vst [vmem:[#allocation65_spill] sm:$0xff] %v14585_v59  ;;  %v14598_v59 = vpack.c.b16 %v5024_v24, %v5023_v8  ;;  %v12669_v24 = vld [vmem:[%s16352_s5 + $0x168] sm:$0xff]  ;;  %v4706_v8 = vpack.c.bf16 %v4674_v7, %v4674_v7 }
 0x4f4   : > { %5884 = vmatmul.bf16.gmra.mxu3 %v14309_v42  ;;  %v12694_v42 = vld [vmem:[%s16352_s5 + $0x230] sm:$0xff]  ;;  %v14594_v6 = vpop.f32.mrf.mxu2 }
 0x4f5   : > { %7313 = vmatpush.bf16.msra.mxu0 %v12694_v42  ;;  %16464 = vst [vmem:[#allocation67_spill] sm:$0xff] %v14594_v6  ;;  %v4738_v42 = vld [vmem:[#allocation2 + $0x15a] sm:$0xff]  ;;  %5962 = vmatpush.bf16.msra.mxu3 %v12669_v24  ;;  %v4930_v24 = vunpack.c.l.b16 %v4706_v8  ;;  %v5025_v6 = vunpack.c.l.b16 %v4769_v2 }
 0x4f6   : > { %v14587_v49 = vpop.f32.mrf.mxu0 }
 0x4f7   : > { %16463 = vst [vmem:[#allocation66_spill] sm:$0xff] %v14587_v49 }
 0x4f9   : > { %7314 = vmatpush.bf16.msra.mxu0 %v12693_v40 }
 0x4fa   : > { %v14606_v38 = vpop.f32.mrf.mxu1 }
 0x4fb   : > { %16465 = vst [vmem:[#allocation68_spill] sm:$0xff] %v14606_v38  ;;  %v12689_v38 = vld [vmem:[%s16352_s5 + $0x208] sm:$0xff] }
 0x4fc   : > { %v14622_v49 = vpop.f32.mrf.mxu2 }
 0x4fd   : > { %7315 = vmatpush.bf16.msra.mxu0 %v12692_v51  ;;  %v4770_v51 = vpack.c.bf16 %v4738_v42, %v4738_v42  ;;  %16467 = vst [vmem:[#allocation70_spill] sm:$0xff] %v14622_v49 }
 0x4fe   : > { %v14608_v40 = vpop.f32.mrf.mxu0 }
 0x4ff   : > { %16466 = vst [vmem:[#allocation69_spill] sm:$0xff] %v14608_v40  ;;  %v4705_v40 = vpack.c.bf16 %v4673_v29, %v4673_v29  ;;  %v5026_v41 = vunpack.c.l.b16 %v4770_v51  ;;  %v12688_v29 = vld [vmem:[%s16352_s5 + $0x200] sm:$0xff] }
 0x501   : > { %6355 = vmatmul.bf16.gmra.mxu0 %v14596_v3  ;;  %6444 = vmatmul.bf16.gmra.mxu1 %v14598_v59  ;;  %v4929_v7 = vunpack.c.l.b16 %v4705_v40  ;;  %v14635_v49 = vpack.c.b16 %v5026_v41, %v5025_v6  ;;  %v4740_v40 = vld [vmem:[#allocation2 + $0x172] sm:$0xff] }
 0x502   : > { %7207 = vmatmul.bf16.gmra.mxu2 %v14439_v12  ;;  %v14617_v12 = vpop.f32.mrf.mxu3  ;;  %7316 = vmatpush.bf16.msra.mxu0 %v12691_v53  ;;  %v14627_v58 = vpop.f32.mrf.mxu1  ;;  %v4772_v51 = vpack.c.bf16 %v4740_v40, %v4740_v40  ;;  %v6590_v40 = vld [vmem:[#allocation2 + $0x3a] sm:$0xff] }
 0x503   : > { %16468 = vst [vmem:[#allocation71_spill] sm:$0xff] %v14627_v58  ;;  %v14633_v42 = vpack.c.b16 %v4930_v24, %v4929_v7 }
 0x504   : > { %5889 = vmatmul.bf16.gmra.mxu3 %v14336_v9  ;;  %v12690_v9 = vld [vmem:[%s16352_s5 + $0x210] sm:$0xff]  ;;  %v14642_v8 = vpop.f32.mrf.mxu2  ;;  %v5028_v7 = vunpack.c.l.b16 %v4772_v51 }
 0x505   : > { %16470 = vst [vmem:[#allocation73_spill] sm:$0xff] %v14642_v8 }
 0x506   : > { %7317 = vmatpush.bf16.msra.mxu0 %v12690_v9  ;;  %v14629_v53 = vpop.f32.mrf.mxu0 }
 0x507   : > { %16469 = vst [vmem:[#allocation72_spill] sm:$0xff] %v14629_v53 }
 0x50a   : > { %v14631_v19 = vpop.f32.mrf.mxu3  ;;  %7318 = vmatpush.bf16.msra.mxu0 %v12689_v38  ;;  %v4739_v38 = vld [vmem:[#allocation2 + $0x16a] sm:$0xff]  ;;  %v14646_v2 = vpop.f32.mrf.mxu1 }
 0x50b   : > { %16471 = vst [vmem:[#allocation74_spill] sm:$0xff] %v14646_v2  ;;  %v4771_v6 = vpack.c.bf16 %v4739_v38, %v4739_v38  ;;  %v12668_v38 = vld [vmem:[%s16352_s5 + $0x160] sm:$0xff] }
 0x50c   : > { %5963 = vmatpush.bf16.msra.mxu3 %v12668_v38 }
 0x50d   : > { %v5027_v24 = vunpack.c.l.b16 %v4771_v6  ;;  %v16478_v6 = vld [vmem:[#allocation18_spill] sm:$0xff] }
 0x50e   : > { %7319 = vmatpush.bf16.msra.mxu0 %v12688_v29  ;;  %v14648_v41 = vpop.f32.mrf.mxu0  ;;  %v6621_v51 = vpack.c.bf16 %v16478_v6, %v16478_v6 }
 0x50f   : > { %16472 = vst [vmem:[#allocation75_spill] sm:$0xff] %v14648_v41  ;;  %v14652_v53 = vpack.c.b16 %v5028_v7, %v5027_v24  ;;  %v6622_v24 = vpack.c.bf16 %v6590_v40, %v6590_v40  ;;  %v6592_v41 = vld [vmem:[#allocation2 + $0x52] sm:$0xff] }
 0x510   : > { %v6624_v6 = vpack.c.bf16 %v6592_v41, %v6592_v41  ;;  %v16487_v41 = vld [vmem:[#allocation26_spill] sm:$0xff] }
 0x511   : > { %6360 = vmatmul.bf16.gmra.mxu0 %v14633_v42  ;;  %6449 = vmatmul.bf16.gmra.mxu1 %v14635_v49 }
 0x512   : > { %7212 = vmatmul.bf16.gmra.mxu2 %v14530_v50  ;;  %v14650_v9 = vpop.f32.mrf.mxu3  ;;  %v14656_v50 = vpop.f32.mrf.mxu1  ;;  %v6880_v8 = vunpack.c.l.b16 %v6624_v6 }
 0x513   : > { %16473 = vst [vmem:[#allocation76_spill] sm:$0xff] %v14650_v9 }
 0x514   : > { %5894 = vmatmul.bf16.gmra.mxu3 %v14369_v25  ;;  %16475 = vst [vmem:[#allocation78_spill] sm:$0xff] %v14656_v50  ;;  %v16477_v25 = vpack.c.b16 %v14416_v36, %v14414_v31  ;;  %v6877_v31 = vunpack.c.l.b16 %v6621_v51  ;;  %v6878_v36 = vunpack.c.l.b16 %v6622_v24  ;;  %v16483_v50 = vld [vmem:[#allocation22_spill] sm:$0xff] }
 0x515   : > { %v6623_v40 = vpack.c.bf16 %v16483_v50, %v16483_v50  ;;  %v6594_v50 = vld [vmem:[#allocation2 + $0x6a] sm:$0xff] }
 0x516   : > { %v14658_v29 = vpop.f32.mrf.mxu0 }
 0x517   : > { %16476 = vst [vmem:[#allocation79_spill] sm:$0xff] %v14658_v29  ;;  %v6879_v2 = vunpack.c.l.b16 %v6623_v40  ;;  %v6626_v40 = vpack.c.bf16 %v6594_v50, %v6594_v50  ;;  %v6627_v50 = vpack.c.bf16 %v16492_v21, %v16492_v21 }
 0x519   : > { %v14688_v24 = vpack.c.b16 %v6880_v8, %v6879_v2  ;;  %v6882_v2 = vunpack.c.l.b16 %v6626_v40 }
 0x51a   : > { %v14654_v58 = vpop.f32.mrf.mxu3 }
 0x51b   : > { %16474 = vst [vmem:[#allocation77_spill] sm:$0xff] %v14654_v58 }
 0x51e   : > { %v14672_v29 = vpop.f32.mrf.mxu0 }
 0x51f   : > { %16480 = vst [vmem:[#allocation80_spill] sm:$0xff] %v14672_v29 }
 0x521   : > { %6365 = vmatmul.bf16.gmra.mxu0 %v16477_v25  ;;  %6454 = vmatmul.bf16.gmra.mxu1 %v14652_v53  ;;  %v14674_v25 = vpack.c.b16 %v6878_v36, %v6877_v31  ;;  %v6625_v36 = vpack.c.bf16 %v16487_v41, %v16487_v41  ;;  %v6628_v41 = vpack.c.bf16 %v6596_v17, %v6596_v17 }
 0x522   : > { %v14670_v7 = vpop.f32.mrf.mxu3 }
 0x523   : > { %16479 = vst [vmem:[#allocation18_spill] sm:$0xff] %v14670_v7  ;;  %v6881_v8 = vunpack.c.l.b16 %v6625_v36  ;;  %v6884_v36 = vunpack.c.l.b16 %v6628_v41 }
 0x524   : > { %5899 = vmatmul.bf16.gmra.mxu3 %v14399_v57 }
 0x526   : > { %v14680_v38 = vpop.f32.mrf.mxu0 }
 0x527   : > { %16482 = vst [vmem:[#allocation82_spill] sm:$0xff] %v14680_v38  ;;  %v14703_v38 = vpack.c.b16 %v6882_v2, %v6881_v8  ;;  %v6598_v2 = vld [vmem:[#allocation2 + $0x9a] sm:$0xff] }
 0x52a   : > { %v14677_v57 = vpop.f32.mrf.mxu3 }
 0x52b   : > { %16481 = vst [vmem:[#allocation81_spill] sm:$0xff] %v14677_v57 }
 0x52e   : > { %v14686_v51 = vpop.f32.mrf.mxu0 }
 0x52f   : > { %16485 = vst [vmem:[#allocation83_spill] sm:$0xff] %v14686_v51 }
 0x531   : > { %7320 = vmatmul.bf16.vlgmr.msra.gmra.mxu0 %v14674_v25 }
 0x532   : > { %v14684_v29 = vpop.f32.mrf.mxu3 }
 0x533   : > { %16484 = vst [vmem:[#allocation22_spill] sm:$0xff] %v14684_v29 }
 0x534   : > { %5904 = vmatmul.bf16.gmra.mxu3 %v14430_v56  ;;  %v12667_v56 = vld [vmem:[%s16352_s5 + $0x158] sm:$0xff] }
 0x535   : > { %5964 = vmatpush.bf16.msra.mxu3 %v12667_v56 }
 0x536   : > { %v14699_v6 = vpop.f32.mrf.mxu0 }
 0x537   : > { %16488 = vst [vmem:[#allocation26_spill] sm:$0xff] %v14699_v6  ;;  %v6883_v6 = vunpack.c.l.b16 %v6627_v50  ;;  %v16496_v50 = vld [vmem:[#allocation34_spill] sm:$0xff] }
 0x538   : > { %v6629_v41 = vpack.c.bf16 %v16496_v50, %v16496_v50 }
 0x539   : > { %v14717_v8 = vpack.c.b16 %v6884_v36, %v6883_v6 }
 0x53a   : > { %v14695_v31 = vpop.f32.mrf.mxu3  ;;  %v6885_v6 = vunpack.c.l.b16 %v6629_v41 }
 0x53b   : > { %16486 = vst [vmem:[#allocation84_spill] sm:$0xff] %v14695_v31 }
 0x541   : > { %7325 = vmatmul.bf16.gmra.mxu0 %v14688_v24 }
 0x542   : > { %v14701_v51 = vpop.f32.mrf.mxu3 }
 0x543   : > { %16489 = vst [vmem:[#allocation85_spill] sm:$0xff] %v14701_v51 }
 0x544   : > { %5909 = vmatmul.bf16.gmra.mxu3 %v14456_v18  ;;  %v14706_v18 = vpop.f32.mrf.mxu0 }
 0x545   : > { %16490 = vst [vmem:[#allocation86_spill] sm:$0xff] %v14706_v18 }
 0x54c   : > { %v14713_v40 = vpop.f32.mrf.mxu0 }
 0x54d   : > { %16493 = vst [vmem:[#allocation30_spill] sm:$0xff] %v14713_v40  ;;  %v6630_v40 = vpack.c.bf16 %v6598_v2, %v6598_v2 }
 0x54f   : > { %v6886_v36 = vunpack.c.l.b16 %v6630_v40  ;;  %v12665_v40 = vld [vmem:[%s16352_s5 + $0x148] sm:$0xff] }
 0x551   : > { %7330 = vmatmul.bf16.gmra.mxu0 %v14703_v38  ;;  %v14732_v15 = vpack.c.b16 %v6886_v36, %v6885_v6 }
 0x554   : > { %5914 = vmatmul.bf16.gmra.mxu3 %v14486_v45  ;;  %v12666_v45 = vld [vmem:[%s16352_s5 + $0x150] sm:$0xff]  ;;  %v14726_v17 = vpop.f32.mrf.mxu0 }
 0x555   : > { %5965 = vmatpush.bf16.msra.mxu3 %v12666_v45  ;;  %16495 = vst [vmem:[#allocation89_spill] sm:$0xff] %v14726_v17 }
 0x557   : > { %v14709_v56 = vpop.f32.mrf.mxu3 }
 0x558   : > { %16491 = vst [vmem:[#allocation87_spill] sm:$0xff] %v14709_v56 }
 0x559   : > { %5966 = vmatpush.bf16.msra.mxu3 %v12665_v40  ;;  %v12664_v40 = vld [vmem:[%s16352_s5 + $0x140] sm:$0xff] }
 0x55d   : > { %5967 = vmatpush.bf16.msra.mxu3 %v12664_v40 }
 0x55f   : > { %v14715_v47 = vpop.f32.mrf.mxu3 }
 0x560   : > { %16494 = vst [vmem:[#allocation88_spill] sm:$0xff] %v14715_v47 }
 0x561   : > { %7335 = vmatmul.bf16.gmra.mxu0 %v14717_v8 }
 0x564   : > { %5919 = vmatmul.bf16.gmra.mxu3 %v13899_v28  ;;  %v14734_v28 = vpop.f32.mrf.mxu0 }
 0x565   : > { %16497 = vst [vmem:[#allocation34_spill] sm:$0xff] %v14734_v28 }
 0x567   : > { %v14724_v21 = vpop.f32.mrf.mxu3 }
 0x56c   : > { %v14740_v1 = vpop.f32.mrf.mxu0 }
 0x56d   : > { %16498 = vst [vmem:[#allocation90_spill] sm:$0xff] %v14740_v1 }
 0x56f   : > { %v14730_v18 = vpop.f32.mrf.mxu3 }
 0x571   : > { %7340 = vmatmul.bf16.gmra.mxu0 %v14732_v15 }
 0x574   : > { %5924 = vmatmul.bf16.gmra.mxu3 %v14522_v39  ;;  %v14749_v2 = vpop.f32.mrf.mxu0 }
 0x575   : > { %16499 = vst [vmem:[#allocation91_spill] sm:$0xff] %v14749_v2 }
 0x577   : > { %v14738_v45 = vpop.f32.mrf.mxu3 }
 0x57c   : > { %v14755_v41 = vpop.f32.mrf.mxu0 }
 0x57d   : > { %16500 = vst [vmem:[#allocation92_spill] sm:$0xff] %v14755_v41 }
 0x57f   : > { %v14742_v17 = vpop.f32.mrf.mxu3 }
 0x581   : > { %7345 = vmatmul.bf16.gmra.mxu0 %v14458_v16 }
 0x584   : > { %5929 = vmatmul.bf16.gmra.mxu3 %v14541_v26  ;;  %v14761_v26 = vpop.f32.mrf.mxu0 }
 0x585   : > { %16501 = vst [vmem:[#allocation93_spill] sm:$0xff] %v14761_v26  ;;  %v5202_v26 = vld [vmem:[#allocation2 + $0x171] sm:$0xff] }
 0x586   : > { %v5234_v2 = vpack.c.bf16 %v5202_v26, %v5202_v26  ;;  %v5203_v26 = vld [vmem:[#allocation2 + $0x181] sm:$0xff] }
 0x587   : > { %v14751_v50 = vpop.f32.mrf.mxu3  ;;  %v5235_v56 = vpack.c.bf16 %v5203_v26, %v5203_v26 }
 0x588   : > { %v5458_v1 = vunpack.c.l.b16 %v5234_v2 }
 0x58c   : > { %v14766_v36 = vpop.f32.mrf.mxu0 }
 0x58d   : > { %16502 = vst [vmem:[#allocation94_spill] sm:$0xff] %v14766_v36 }
 0x58f   : > { %v14753_v39 = vpop.f32.mrf.mxu3 }
 0x591   : > { %7350 = vmatmul.bf16.gmra.mxu0 %v14488_v54 }
 0x594   : > { %5934 = vmatmul.bf16.gmra.mxu3 %v14567_v22  ;;  %v14774_v22 = vpop.f32.mrf.mxu0 }
 0x595   : > { %16503 = vst [vmem:[#allocation95_spill] sm:$0xff] %v14774_v22 }
 0x597   : > { %v14759_v16 = vpop.f32.mrf.mxu3 }
 0x59c   : > { %v14782_v36 = vpop.f32.mrf.mxu0 }
 0x59d   : > { %16504 = vst [vmem:[#allocation96_spill] sm:$0xff] %v14782_v36  ;;  %v5204_v36 = vld [vmem:[#allocation2 + $0x189] sm:$0xff] }
 0x59f   : > { %v14763_v6 = vpop.f32.mrf.mxu3 }
 0x5a1   : > { %7355 = vmatmul.bf16.gmra.mxu0 %v14509_v13 }
 0x5a4   : > { %5939 = vmatmul.bf16.gmra.mxu3 %v14596_v3  ;;  %v5201_v3 = vld [vmem:[#allocation2 + $0x169] sm:$0xff]  ;;  %v14786_v47 = vpop.f32.mrf.mxu0 }
 0x5a5   : > { %v5233_v28 = vpack.c.bf16 %v5201_v3, %v5201_v3  ;;  %16505 = vst [vmem:[#allocation97_spill] sm:$0xff] %v14786_v47  ;;  %v5236_v3 = vpack.c.bf16 %v5204_v36, %v5204_v36  ;;  %v5459_v47 = vunpack.c.l.b16 %v5235_v56 }
 0x5a7   : > { %v14772_v54 = vpop.f32.mrf.mxu3  ;;  %v5457_v43 = vunpack.c.l.b16 %v5233_v28  ;;  %v5460_v28 = vunpack.c.l.b16 %v5236_v3 }
 0x5a9   : > { %v5475_v22 = vpack.c.b16 %v5458_v1, %v5457_v43  ;;  %v5476_v1 = vpack.c.b16 %v5460_v28, %v5459_v47  ;;  %v12630_v47 = vld [vmem:[%s16352_s5 + $0x30] sm:$0xff] }
 0x5ac   : > { %v14794_v2 = vpop.f32.mrf.mxu0 }
 0x5ad   : > { %16506 = vst [vmem:[#allocation98_spill] sm:$0xff] %v14794_v2 }
 0x5af   : > { %v14776_v41 = vpop.f32.mrf.mxu3 }
 0x5b1   : > { %7360 = vmatmul.bf16.gmra.mxu0 %v14524_v5  ;;  %v12631_v5 = vld [vmem:[%s16352_s5 + $0x38] sm:$0xff] }
 0x5b2   : > { %6193 = vmatpush.bf16.msrb.mxu3 %v12631_v5  ;;  %v16508_v5 = vld [vmem:[#allocation15_spill] sm:$0xff] }
 0x5b3   : > { %v5269_v31 = vpack.c.bf16 %v16508_v5, %v16508_v5  ;;  %v6617_v5 = vld [vmem:[#allocation2 + $0x182] sm:$0xff] }
 0x5b4   : > { %5944 = vmatmul.bf16.gmra.mxu3 %v14633_v42 }
 0x5b5   : > { %v5525_v29 = vunpack.c.l.b16 %v5269_v31 }
 0x5b6   : > { %6194 = vmatpush.bf16.msrb.mxu3 %v12630_v47 }
 0x5b7   : > { %v14780_v13 = vpop.f32.mrf.mxu3 }
 0x5bf   : > { %v14784_v40 = vpop.f32.mrf.mxu3 }
 0x5c1   : > { %7365 = vmatmul.bf16.gmra.mxu0 %v14543_v37  ;;  %v14799_v37 = vpop.f32.mrf.mxu0 }
 0x5c2   : > { %16507 = vst [vmem:[#allocation99_spill] sm:$0xff] %v14799_v37 }
 0x5c4   : > { %5949 = vmatmul.bf16.gmra.mxu3 %v5475_v22  ;;  %v5238_v22 = vld [vmem:[#allocation2 + $0x22] sm:$0xff] }
 0x5c5   : > { %v5270_v36 = vpack.c.bf16 %v5238_v22, %v5238_v22  ;;  %v12629_v22 = vld [vmem:[%s16352_s5 + $0x28] sm:$0xff] }
 0x5c6   : > { %6195 = vmatpush.bf16.msrb.mxu3 %v12629_v22 }
 0x5c7   : > { %v14792_v42 = vpop.f32.mrf.mxu3  ;;  %v5526_v2 = vunpack.c.l.b16 %v5270_v36 }
 0x5c9   : > { %v14807_v3 = vpop.f32.mrf.mxu0 }
 0x5ca   : > { %16509 = vst [vmem:[#allocation15_spill] sm:$0xff] %v14807_v3 }
 0x5cf   : > { %v14796_v51 = vpop.f32.mrf.mxu3 }
 0x5d1   : > { %7370 = vmatmul.bf16.gmra.mxu0 %v14569_v32  ;;  %v5557_v32 = vpack.c.b16 %v5526_v2, %v5525_v29  ;;  %v14815_v28 = vpop.f32.mrf.mxu0 }
 0x5d2   : > { %16510 = vst [vmem:[#allocation100_spill] sm:$0xff] %v14815_v28 }
 0x5d4   : > { %5954 = vmatmul.bf16.gmra.mxu3 %v5476_v1 }
 0x5d7   : > { %v14801_v43 = vpop.f32.mrf.mxu3 }
 0x5d9   : > { %v14820_v31 = vpop.f32.mrf.mxu0 }
 0x5da   : > { %16511 = vst [vmem:[#allocation101_spill] sm:$0xff] %v14820_v31 }
 0x5df   : > { %v14805_v26 = vpop.f32.mrf.mxu3 }
 0x5e1   : > { %7375 = vmatmul.bf16.gmra.mxu0 %v14598_v59  ;;  %v14825_v29 = vpop.f32.mrf.mxu0 }
 0x5e2   : > { %16512 = vst [vmem:[#allocation102_spill] sm:$0xff] %v14825_v29 }
 0x5e4   : > { %5968 = vmatmul.bf16.vlgmr.msra.gmra.mxu3 %v5557_v32  ;;  %v6649_v32 = vpack.c.bf16 %v6617_v5, %v6617_v5  ;;  %v12628_v5 = vld [vmem:[%s16352_s5 + $0x20] sm:$0xff] }
 0x5e5   : > { %6196 = vmatpush.bf16.msrb.mxu3 %v12628_v5  ;;  %v12627_v5 = vld [vmem:[%s16352_s5 + $0x18] sm:$0xff] }
 0x5e6   : > { %v6905_v37 = vunpack.c.l.b16 %v6649_v32  ;;  %v16519_v32 = vld [vmem:[#allocation40_spill] sm:$0xff] }
 0x5e7   : > { %v14813_v56 = vpop.f32.mrf.mxu3 }
 0x5e9   : > { %6197 = vmatpush.bf16.msrb.mxu3 %v12627_v5 }
 0x5ef   : > { %v14817_v1 = vpop.f32.mrf.mxu3 }
 0x5f1   : > { %7380 = vmatmul.bf16.gmra.mxu0 %v14635_v49  ;;  %v6618_v49 = vld [vmem:[#allocation2 + $0x18a] sm:$0xff] }
 0x5f2   : > { %v6650_v47 = vpack.c.bf16 %v6618_v49, %v6618_v49 }
 0x5f4   : > { %5973 = vmatmul.bf16.gmra.mxu3 %v14674_v25  ;;  %v14836_v25 = vpop.f32.mrf.mxu0  ;;  %v6906_v29 = vunpack.c.l.b16 %v6650_v47  ;;  %v5281_v47 = vpack.c.bf16 %v16519_v32, %v16519_v32 }
 0x5f5   : > { %16513 = vst [vmem:[#allocation103_spill] sm:$0xff] %v14836_v25 }
 0x5f6   : > { %v5537_v25 = vunpack.c.l.b16 %v5281_v47 }
 0x5f7   : > { %v14823_v59 = vpop.f32.mrf.mxu3 }
 0x5ff   : > { %v14827_v2 = vpop.f32.mrf.mxu3 }
 0x601   : > { %7385 = vmatmul.bf16.gmra.mxu0 %v14652_v53  ;;  %v14840_v53 = vpack.c.b16 %v6906_v29, %v6905_v37 }
 0x604   : > { %5978 = vmatmul.bf16.gmra.mxu3 %v14688_v24  ;;  %v14842_v24 = vpop.f32.mrf.mxu0 }
 0x605   : > { %16514 = vst [vmem:[#allocation104_spill] sm:$0xff] %v14842_v24 }
 0x607   : > { %v14834_v36 = vpop.f32.mrf.mxu3 }
 0x60f   : > { %v14838_v31 = vpop.f32.mrf.mxu3 }
 0x611   : > { %7390 = vmatmul.bf16.gmra.mxu0 %v14840_v53 }
 0x614   : > { %5983 = vmatmul.bf16.gmra.mxu3 %v14703_v38  ;;  %v5250_v38 = vld [vmem:[#allocation2 + $0xb2] sm:$0xff] }
 0x615   : > { %v5282_v24 = vpack.c.bf16 %v5250_v38, %v5250_v38 }
 0x617   : > { %v14846_v28 = vpop.f32.mrf.mxu3 }
 0x61f   : > { %v14848_v22 = vpop.f32.mrf.mxu3 }
 0x620   : > { %16515 = vst [vmem:[#allocation105_spill] sm:$0xff] %v14848_v22 }
 0x624   : > { %5988 = vmatmul.bf16.gmra.mxu3 %v14717_v8  ;;  %v5538_v8 = vunpack.c.l.b16 %v5282_v24 }
 0x626   : > { %v5563_v57 = vpack.c.b16 %v5538_v8, %v5537_v25  ;;  %v16523_v8 = vld [vmem:[#allocation51_spill] sm:$0xff] }
 0x627   : > { %v14854_v49 = vpop.f32.mrf.mxu3 }
 0x628   : > { %16516 = vst [vmem:[#allocation106_spill] sm:$0xff] %v14854_v49 }
 0x62f   : > { %v14856_v37 = vpop.f32.mrf.mxu3 }
 0x630   : > { %16517 = vst [vmem:[#allocation107_spill] sm:$0xff] %v14856_v37 }
 0x634   : > { %5993 = vmatmul.bf16.gmra.mxu3 %v14732_v15  ;;  %v5252_v15 = vld [vmem:[#allocation2 + $0xca] sm:$0xff] }
 0x635   : > { %v5284_v49 = vpack.c.bf16 %v5252_v15, %v5252_v15  ;;  %v5255_v15 = vld [vmem:[#allocation2 + $0xf2] sm:$0xff] }
 0x637   : > { %v14859_v29 = vpop.f32.mrf.mxu3  ;;  %v5540_v38 = vunpack.c.l.b16 %v5284_v49  ;;  %v5881_v49 = vadd.f32 %v14724_v21, %v14182_v27  ;;  %v5886_v27 = vadd.f32 %v14738_v45, %v14301_v0  ;;  %v12625_v0 = vld [vmem:[%s16352_s5 + $0x8] sm:$0xff]  ;;  %v5891_v45 = vadd.f32 %v14751_v50, %v14362_v10 }
 0x638   : > { %16518 = vst [vmem:[#allocation108_spill] sm:$0xff] %v14859_v29  ;;  %v16522_v29 = vld [vmem:[#allocation47_spill] sm:$0xff]  ;;  %v5896_v10 = vadd.f32 %v14759_v16, %v14393_v48  ;;  %v5901_v16 = vadd.f32 %v14772_v54, %v14436_v63  ;;  %v5906_v63 = vadd.f32 %v14780_v13, %v14464_v61  ;;  %v12687_v61 = vld [vmem:[%s16352_s5 + $0x1f8] sm:$0xff]  ;;  %v5911_v13 = vadd.f32 %v14792_v42, %v14499_v46 }
 0x639   : > { %v5283_v7 = vpack.c.bf16 %v16522_v29, %v16522_v29  ;;  %v12624_v48 = vld [vmem:[%s16352_s5] sm:$0xff] }
 0x63b   : > { %v5539_v32 = vunpack.c.l.b16 %v5283_v7  ;;  %v12626_v7 = vld [vmem:[%s16352_s5 + $0x10] sm:$0xff] }
 0x63c   : > { %6198 = vmatpush.bf16.msrb.mxu3 %v12626_v7  ;;  %v5257_v7 = vld [vmem:[#allocation2 + $0x10a] sm:$0xff] }
 0x63d   : > { %v5564_v24 = vpack.c.b16 %v5540_v38, %v5539_v32  ;;  %v5256_v32 = vld [vmem:[#allocation2 + $0xfa] sm:$0xff] }
 0x63f   : > { %v14863_v3 = vpop.f32.mrf.mxu3 }
 0x640   : > { %16520 = vst [vmem:[#allocation40_spill] sm:$0xff] %v14863_v3  ;;  %v5285_v3 = vpack.c.bf16 %v16523_v8, %v16523_v8  ;;  %6199 = vmatpush.bf16.msrb.mxu3 %v12625_v0 }
 0x642   : > { %v5541_v58 = vunpack.c.l.b16 %v5285_v3  ;;  %v5288_v3 = vpack.c.bf16 %v5256_v32, %v5256_v32 }
 0x644   : > { %5998 = vmatmul.bf16.gmra.mxu3 %v5563_v57  ;;  %v5254_v57 = vld [vmem:[#allocation2 + $0xe2] sm:$0xff] }
 0x645   : > { %v5286_v5 = vpack.c.bf16 %v5254_v57, %v5254_v57  ;;  %v5883_v57 = vadd.f32 %v14730_v18, %v14222_v44  ;;  %v5888_v44 = vadd.f32 %v14742_v17, %v14317_v11  ;;  %6200 = vmatpush.bf16.msrb.mxu3 %v12624_v48 }
 0x647   : > { %v14868_v37 = vpop.f32.mrf.mxu3 }
 0x648   : > { %16521 = vst [vmem:[#allocation109_spill] sm:$0xff] %v14868_v37  ;;  %v5542_v37 = vunpack.c.l.b16 %v5286_v5 }
 0x649   : > { %7223 = vmatpush.bf16.msra.mxu3 %v12687_v61 }
 0x64a   : > { %v5565_v9 = vpack.c.b16 %v5542_v37, %v5541_v58 }
 0x64f   : > { %v14872_v47 = vpop.f32.mrf.mxu3 }
 0x654   : > { %6003 = vmatmul.bf16.gmra.mxu3 %v5564_v24  ;;  %v5287_v24 = vpack.c.bf16 %v5255_v15, %v5255_v15 }
 0x656   : > { %v5543_v58 = vunpack.c.l.b16 %v5287_v24 }
 0x657   : > { %v14874_v25 = vpop.f32.mrf.mxu3 }
 0x65f   : > { %v14878_v22 = vpop.f32.mrf.mxu3 }
 0x660   : > { %16524 = vst [vmem:[#allocation47_spill] sm:$0xff] %v14878_v22  ;;  %v5258_v22 = vld [vmem:[#allocation2 + $0x112] sm:$0xff] }
 0x661   : > { %v5290_v15 = vpack.c.bf16 %v5258_v22, %v5258_v22  ;;  %v5259_v22 = vld [vmem:[#allocation2 + $0x122] sm:$0xff] }
 0x662   : > { %v5291_v11 = vpack.c.bf16 %v5259_v22, %v5259_v22 }
 0x663   : > { %v5546_v32 = vunpack.c.l.b16 %v5290_v15 }
 0x664   : > { %6008 = vmatmul.bf16.gmra.mxu3 %v5565_v9  ;;  %v5544_v9 = vunpack.c.l.b16 %v5288_v3 }
 0x666   : > { %v5566_v5 = vpack.c.b16 %v5544_v9, %v5543_v58  ;;  %v5260_v9 = vld [vmem:[#allocation2 + $0x12a] sm:$0xff] }
 0x667   : > { %v5969_v29 = vpop.f32.mrf.mxu3  ;;  %v5292_v17 = vpack.c.bf16 %v5260_v9, %v5260_v9 }
 0x668   : > { %v14885_v38 = vadd.f32 %v5969_v29, %v5881_v49  ;;  %v5289_v29 = vpack.c.bf16 %v5257_v7, %v5257_v7 }
 0x66a   : > { %v5545_v18 = vunpack.c.l.b16 %v5289_v29 }
 0x66f   : > { %v5971_v37 = vpop.f32.mrf.mxu3 }
 0x670   : > { %v14889_v8 = vadd.f32 %v5971_v37, %v5883_v57  ;;  %v5567_v57 = vpack.c.b16 %v5546_v32, %v5545_v18  ;;  %v5262_v18 = vld [vmem:[#allocation2 + $0x142] sm:$0xff] }
 0x674   : > { %6013 = vmatmul.bf16.gmra.mxu3 %v5566_v5  ;;  %v5893_v5 = vadd.f32 %v14753_v39, %v14377_v35  ;;  %v5898_v35 = vadd.f32 %v14763_v6, %v14418_v30 }
 0x677   : > { %v5974_v21 = vpop.f32.mrf.mxu3 }
 0x678   : > { %v14893_v49 = vadd.f32 %v5974_v21, %v5886_v27  ;;  %v5547_v27 = vunpack.c.l.b16 %v5291_v11  ;;  %v5548_v21 = vunpack.c.l.b16 %v5292_v17  ;;  %v5263_v11 = vld [vmem:[#allocation2 + $0x152] sm:$0xff]  ;;  %v5264_v17 = vld [vmem:[#allocation2 + $0x15a] sm:$0xff] }
 0x679   : > { %v5295_v30 = vpack.c.bf16 %v5263_v11, %v5263_v11  ;;  %v5296_v6 = vpack.c.bf16 %v5264_v17, %v5264_v17  ;;  %v5916_v11 = vadd.f32 %v14801_v43, %v14516_v52  ;;  %v12686_v52 = vld [vmem:[%s16352_s5 + $0x1f0] sm:$0xff]  ;;  %v5921_v43 = vadd.f32 %v14813_v56, %v14535_v34 }
 0x67a   : > { %v5568_v15 = vpack.c.b16 %v5548_v21, %v5547_v27  ;;  %v5903_v27 = vadd.f32 %v14776_v41, %v14451_v60  ;;  %v5908_v60 = vadd.f32 %v14784_v40, %v14481_v33  ;;  %v5913_v33 = vadd.f32 %v14796_v51, %v14505_v23  ;;  %7224 = vmatpush.bf16.msra.mxu3 %v12686_v52 }
 0x67b   : > { %v5551_v21 = vunpack.c.l.b16 %v5295_v30  ;;  %v5918_v23 = vadd.f32 %v14805_v26, %v14526_v55  ;;  %v16526_v26 = vld [vmem:[#allocation14_spill] sm:$0xff]  ;;  %v5926_v34 = vadd.f32 %v14823_v59, %v14559_v20  ;;  %v12685_v20 = vld [vmem:[%s16352_s5 + $0x1e8] sm:$0xff]  ;;  %v5931_v59 = vadd.f32 %v14834_v36, %v14592_v62 }
 0x67c   : > { %v5936_v62 = vadd.f32 %v14846_v28, %v14631_v19  ;;  %v12684_v19 = vld [vmem:[%s16352_s5 + $0x1e0] sm:$0xff]  ;;  %v16535_v28 = vld [vmem:[#allocation77_spill] sm:$0xff] }
 0x67e   : > { %7225 = vmatpush.bf16.msra.mxu3 %v12685_v20  ;;  %v16540_v20 = vld [vmem:[#allocation107_spill] sm:$0xff] }
 0x67f   : > { %v5976_v24 = vpop.f32.mrf.mxu3 }
 0x680   : > { %v14897_v3 = vadd.f32 %v5976_v24, %v5888_v44  ;;  %v5261_v44 = vld [vmem:[#allocation2 + $0x13a] sm:$0xff] }
 0x681   : > { %v5293_v24 = vpack.c.bf16 %v5261_v44, %v5261_v44  ;;  %v5265_v44 = vld [vmem:[#allocation2 + $0x16a] sm:$0xff] }
 0x682   : > { %7226 = vmatpush.bf16.msra.mxu3 %v12684_v19  ;;  %v16547_v19 = vld [vmem:[#allocation84_spill] sm:$0xff] }
 0x683   : > { %v5549_v39 = vunpack.c.l.b16 %v5293_v24 }
 0x684   : > { %6018 = vmatmul.bf16.gmra.mxu3 %v5567_v57  ;;  %v5294_v57 = vpack.c.bf16 %v5262_v18, %v5262_v18  ;;  %v5266_v18 = vld [vmem:[#allocation2 + $0x172] sm:$0xff] }
 0x686   : > { %v5550_v0 = vunpack.c.l.b16 %v5294_v57  ;;  %v5297_v57 = vpack.c.bf16 %v5265_v44, %v5265_v44 }
 0x687   : > { %v5979_v58 = vpop.f32.mrf.mxu3 }
 0x688   : > { %v14904_v37 = vadd.f32 %v5979_v58, %v5891_v45  ;;  %v5569_v22 = vpack.c.b16 %v5550_v0, %v5549_v39  ;;  %v5553_v41 = vunpack.c.l.b16 %v5297_v57 }
 0x68f   : > { %v5981_v7 = vpop.f32.mrf.mxu3 }
 0x690   : > { %v14908_v29 = vadd.f32 %v5981_v7, %v5893_v5  ;;  %v5552_v7 = vunpack.c.l.b16 %v5296_v6  ;;  %v14953_v6 = vld [vmem:[#allocation2 + $0x198] sm:$0xff] }
 0x691   : > { %v4613_v46 = vpack.c.bf16 %v14953_v6, %v14953_v6 }
 0x693   : > { %v4805_v42 = vunpack.c.l.b16 %v4613_v46 }
 0x694   : > { %6023 = vmatmul.bf16.gmra.mxu3 %v5568_v15 }
 0x697   : > { %v5984_v50 = vpop.f32.mrf.mxu3 }
 0x698   : > { %v14912_v32 = vadd.f32 %v5984_v50, %v5896_v10  ;;  %v5570_v50 = vpack.c.b16 %v5552_v7, %v5551_v21  ;;  %v14961_v21 = vpack.c.b16 %v4805_v42, %v4805_v42  ;;  %v5933_v42 = vadd.f32 %v14838_v31, %v14617_v12  ;;  %v16533_v12 = vld [vmem:[#allocation76_spill] sm:$0xff]  ;;  %v16534_v31 = vld [vmem:[#allocation105_spill] sm:$0xff] }
 0x69f   : > { %v5986_v45 = vpop.f32.mrf.mxu3 }
 0x6a0   : > { %v14916_v58 = vadd.f32 %v5986_v45, %v5898_v35  ;;  %v5298_v35 = vpack.c.bf16 %v5266_v18, %v5266_v18 }
 0x6a2   : > { %v5554_v39 = vunpack.c.l.b16 %v5298_v35 }
 0x6a4   : > { %6028 = vmatmul.bf16.gmra.mxu3 %v5569_v22  ;;  %v5571_v22 = vpack.c.b16 %v5554_v39, %v5553_v41  ;;  %v16527_v41 = vld [vmem:[#allocation19_spill] sm:$0xff] }
 0x6a5   : > { %v4618_v39 = vpack.c.bf16 %v16527_v41, %v16527_v41  ;;  %v16536_v41 = vld [vmem:[#allocation106_spill] sm:$0xff] }
 0x6a7   : > { %v5989_v9 = vpop.f32.mrf.mxu3 }
 0x6a8   : > { %v14923_v5 = vadd.f32 %v5989_v9, %v5901_v16 }
 0x6af   : > { %v5991_v15 = vpop.f32.mrf.mxu3 }
 0x6b0   : > { %v14927_v10 = vadd.f32 %v5991_v15, %v5903_v27  ;;  %v16525_v15 = vld [vmem:[#allocation16_spill] sm:$0xff] }
 0x6b1   : > { %v4616_v55 = vpack.c.bf16 %v16525_v15, %v16525_v15 }
 0x6b4   : > { %6033 = vmatmul.bf16.gmra.mxu3 %v5570_v50  ;;  %v4615_v50 = vpack.c.bf16 %v16526_v26, %v16526_v26 }
 0x6b6   : > { %v4807_v57 = vunpack.c.l.b16 %v4615_v50  ;;  %v16532_v50 = vld [vmem:[#allocation25_spill] sm:$0xff] }
 0x6b7   : > { %v5994_v54 = vpop.f32.mrf.mxu3 }
 0x6b8   : > { %v14931_v24 = vadd.f32 %v5994_v54, %v5906_v63  ;;  %v5923_v63 = vadd.f32 %v14817_v1, %v14549_v4  ;;  %v4808_v54 = vunpack.c.l.b16 %v4616_v55  ;;  %v5928_v4 = vadd.f32 %v14827_v2, %v14578_v14  ;;  %v16530_v2 = vld [vmem:[#allocation21_spill] sm:$0xff]  ;;  %v16531_v55 = vld [vmem:[#allocation27_spill] sm:$0xff] }
 0x6b9   : > { %v4810_v1 = vunpack.c.l.b16 %v4618_v39  ;;  %v4619_v46 = vpack.c.bf16 %v16530_v2, %v16530_v2  ;;  %v4622_v26 = vpack.c.bf16 %v16531_v55, %v16531_v55  ;;  %v5941_v39 = vadd.f32 %v16536_v41, %v16535_v28  ;;  %v16544_v55 = vld [vmem:[#allocation33_spill] sm:$0xff] }
 0x6ba   : > { %v4838_v35 = vpack.c.b16 %v4808_v54, %v4807_v57  ;;  %v5938_v54 = vadd.f32 %v16534_v31, %v16533_v12  ;;  %v16548_v28 = vld [vmem:[#allocation109_spill] sm:$0xff] }
 0x6bb   : > { %v5951_v41 = vadd.f32 %v16548_v28, %v16547_v19 }
 0x6bf   : > { %v5996_v0 = vpop.f32.mrf.mxu3 }
 0x6c0   : > { %v14935_v45 = vadd.f32 %v5996_v0, %v5908_v60  ;;  %v16528_v0 = vld [vmem:[#allocation17_spill] sm:$0xff] }
 0x6c4   : > { %6038 = vmatmul.bf16.gmra.mxu3 %v5571_v22  ;;  %v4617_v22 = vpack.c.bf16 %v16528_v0, %v16528_v0 }
 0x6c7   : > { %v5999_v48 = vpop.f32.mrf.mxu3 }
 0x6c8   : > { %v14942_v16 = vadd.f32 %v5999_v48, %v5911_v13  ;;  %v4809_v48 = vunpack.c.l.b16 %v4617_v22 }
 0x6cf   : > { %v6001_v40 = vpop.f32.mrf.mxu3 }
 0x6d0   : > { %v14946_v9 = vadd.f32 %v6001_v40, %v5913_v33  ;;  %v4839_v33 = vpack.c.b16 %v4810_v1, %v4809_v48 }
 0x6d4   : > { %6043 = vmatmul.bf16.gmra.mxu3 %v14840_v53 }
 0x6d7   : > { %v6004_v17 = vpop.f32.mrf.mxu3 }
 0x6d8   : > { %v14951_v30 = vadd.f32 %v6004_v17, %v5916_v11  ;;  %v16529_v17 = vld [vmem:[#allocation23_spill] sm:$0xff] }
 0x6d9   : > { %v4620_v14 = vpack.c.bf16 %v16529_v17, %v16529_v17 }
 0x6df   : > { %v6006_v51 = vpop.f32.mrf.mxu3 }
 0x6e0   : > { %v14959_v27 = vadd.f32 %v6006_v51, %v5918_v23  ;;  %v4812_v23 = vunpack.c.l.b16 %v4620_v14 }
 0x6e4   : > { %6201 = vmatmul.bf16.vlgmr.msrb.gmra.mxu3 %v14961_v21 }
 0x6e7   : > { %v6009_v53 = vpop.f32.mrf.mxu3 }
 0x6e8   : > { %v14969_v7 = vadd.f32 %v6009_v53, %v5921_v43  ;;  %v4811_v43 = vunpack.c.l.b16 %v4619_v46 }
 0x6ea   : > { %v4840_v53 = vpack.c.b16 %v4812_v23, %v4811_v43  ;;  %v16542_v23 = vld [vmem:[#allocation108_spill] sm:$0xff] }
 0x6ef   : > { %v6011_v44 = vpop.f32.mrf.mxu3 }
 0x6f0   : > { %v14977_v18 = vadd.f32 %v6011_v44, %v5923_v63  ;;  %v4621_v63 = vpack.c.bf16 %v16532_v50, %v16532_v50  ;;  %v4814_v44 = vunpack.c.l.b16 %v4622_v26  ;;  %v4625_v26 = vpack.c.bf16 %v16544_v55, %v16544_v55  ;;  %v16545_v50 = vld [vmem:[#allocation22_spill] sm:$0xff]  ;;  %v16554_v55 = vld [vmem:[#allocation44_spill] sm:$0xff] }
 0x6f4   : > { %6206 = vmatmul.bf16.gmra.mxu3 %v4838_v35 }
 0x6f7   : > { %v6014_v56 = vpop.f32.mrf.mxu3 }
 0x6f8   : > { %v14981_v60 = vadd.f32 %v6014_v56, %v5926_v34  ;;  %v4813_v34 = vunpack.c.l.b16 %v4621_v63  ;;  %v16546_v63 = vld [vmem:[#allocation40_spill] sm:$0xff] }
 0x6f9   : > { %v5948_v12 = vadd.f32 %v16546_v63, %v16545_v50  ;;  %v16556_v50 = vld [vmem:[#allocation47_spill] sm:$0xff] }
 0x6fa   : > { %v4841_v56 = vpack.c.b16 %v4814_v44, %v4813_v34 }
 0x6ff   : > { %v6016_v61 = vpop.f32.mrf.mxu3 }
 0x700   : > { %v14989_v13 = vadd.f32 %v6016_v61, %v5928_v4  ;;  %v16537_v4 = vld [vmem:[#allocation31_spill] sm:$0xff]  ;;  %v16538_v61 = vld [vmem:[#allocation29_spill] sm:$0xff] }
 0x701   : > { %v4624_v1 = vpack.c.bf16 %v16537_v4, %v16537_v4  ;;  %v4623_v48 = vpack.c.bf16 %v16538_v61, %v16538_v61  ;;  %v16549_v4 = vld [vmem:[#allocation41_spill] sm:$0xff] }
 0x702   : > { %v16550_v61 = vld [vmem:[#allocation37_spill] sm:$0xff] }
 0x703   : > { %v4815_v2 = vunpack.c.l.b16 %v4623_v48  ;;  %v4627_v48 = vpack.c.bf16 %v16550_v61, %v16550_v61 }
 0x704   : > { %6211 = vmatmul.bf16.gmra.mxu3 %v4839_v33  ;;  %v16539_v33 = vld [vmem:[#allocation18_spill] sm:$0xff] }
 0x707   : > { %v6019_v40 = vpop.f32.mrf.mxu3 }
 0x708   : > { %v14996_v11 = vadd.f32 %v6019_v40, %v5931_v59  ;;  %v5943_v59 = vadd.f32 %v16540_v20, %v16539_v33  ;;  %v4816_v40 = vunpack.c.l.b16 %v4624_v1  ;;  %v4628_v1 = vpack.c.bf16 %v16549_v4, %v16549_v4  ;;  %v16551_v33 = vld [vmem:[#allocation85_spill] sm:$0xff]  ;;  %v16558_v4 = vld [vmem:[#allocation52_spill] sm:$0xff] }
 0x709   : > { %v5953_v20 = vadd.f32 %v14872_v47, %v16551_v33  ;;  %v16555_v47 = vld [vmem:[#allocation88_spill] sm:$0xff] }
 0x70a   : > { %v4842_v46 = vpack.c.b16 %v4816_v40, %v4815_v2  ;;  %v4819_v2 = vunpack.c.l.b16 %v4627_v48  ;;  %v5958_v63 = vadd.f32 %v16556_v50, %v16555_v47  ;;  %v4602_v48 = vld [vmem:[#allocation2 + $0xf8] sm:$0xff] }
 0x70f   : > { %v6021_v51 = vpop.f32.mrf.mxu3 }
 0x710   : > { %v15004_v52 = vadd.f32 %v6021_v51, %v5933_v42  ;;  %v16541_v42 = vld [vmem:[#allocation81_spill] sm:$0xff] }
 0x711   : > { %v5946_v51 = vadd.f32 %v16542_v23, %v16541_v42  ;;  %v16552_v42 = vld [vmem:[#allocation87_spill] sm:$0xff] }
 0x712   : > { %v5956_v23 = vadd.f32 %v14874_v25, %v16552_v42  ;;  %v12682_v25 = vld [vmem:[%s16352_s5 + $0x1d0] sm:$0xff] }
 0x714   : > { %6216 = vmatmul.bf16.gmra.mxu3 %v4840_v53 }
 0x717   : > { %v6024_v36 = vpop.f32.mrf.mxu3 }
 0x718   : > { %v15008_v15 = vadd.f32 %v6024_v36, %v5936_v62  ;;  %v16543_v62 = vld [vmem:[#allocation35_spill] sm:$0xff] }
 0x719   : > { %v4626_v36 = vpack.c.bf16 %v16543_v62, %v16543_v62  ;;  %v16553_v62 = vld [vmem:[#allocation48_spill] sm:$0xff] }
 0x71b   : > { %v4818_v31 = vunpack.c.l.b16 %v4626_v36  ;;  %v4630_v36 = vpack.c.bf16 %v16553_v62, %v16553_v62  ;;  %v4604_v62 = vld [vmem:[#allocation2 + $0x110] sm:$0xff] }
 0x71f   : > { %v6026_v57 = vpop.f32.mrf.mxu3 }
 0x720   : > { %v15016_v35 = vadd.f32 %v6026_v57, %v5938_v54  ;;  %v4817_v57 = vunpack.c.l.b16 %v4625_v26  ;;  %v4629_v26 = vpack.c.bf16 %v16554_v55, %v16554_v55  ;;  %v4636_v55 = vpack.c.bf16 %v4604_v62, %v4604_v62  ;;  %v4610_v62 = vld [vmem:[#allocation2 + $0x158] sm:$0xff] }
 0x722   : > { %v4843_v34 = vpack.c.b16 %v4818_v31, %v4817_v57  ;;  %v4821_v57 = vunpack.c.l.b16 %v4629_v26  ;;  %v4828_v47 = vunpack.c.l.b16 %v4636_v55  ;;  %v4609_v55 = vld [vmem:[#allocation2 + $0x150] sm:$0xff] }
 0x724   : > { %6221 = vmatmul.bf16.gmra.mxu3 %v4841_v56  ;;  %v12683_v56 = vld [vmem:[%s16352_s5 + $0x1d8] sm:$0xff] }
 0x725   : > { %7227 = vmatpush.bf16.msra.mxu3 %v12683_v56 }
 0x727   : > { %v6029_v0 = vpop.f32.mrf.mxu3 }
 0x728   : > { %v15023_v22 = vadd.f32 %v6029_v0, %v5941_v39 }
 0x729   : > { %7228 = vmatpush.bf16.msra.mxu3 %v12682_v25  ;;  %v4605_v25 = vld [vmem:[#allocation2 + $0x120] sm:$0xff] }
 0x72f   : > { %v6031_v17 = vpop.f32.mrf.mxu3 }
 0x730   : > { %v15031_v14 = vadd.f32 %v6031_v17, %v5943_v59  ;;  %v4820_v59 = vunpack.c.l.b16 %v4628_v1 }
 0x734   : > { %6226 = vmatmul.bf16.gmra.mxu3 %v4842_v46  ;;  %v4844_v46 = vpack.c.b16 %v4820_v59, %v4819_v2  ;;  %v4634_v59 = vpack.c.bf16 %v4602_v48, %v4602_v48 }
 0x736   : > { %v4826_v2 = vunpack.c.l.b16 %v4634_v59  ;;  %v4607_v59 = vld [vmem:[#allocation2 + $0x138] sm:$0xff] }
 0x737   : > { %v6034_v43 = vpop.f32.mrf.mxu3 }
 0x738   : > { %v15035_v53 = vadd.f32 %v6034_v43, %v5946_v51 }
 0x73f   : > { %v6036_v54 = vpop.f32.mrf.mxu3 }
 0x740   : > { %v15043_v44 = vadd.f32 %v6036_v54, %v5948_v12  ;;  %v4822_v12 = vunpack.c.l.b16 %v4630_v36  ;;  %v4603_v36 = vld [vmem:[#allocation2 + $0x108] sm:$0xff] }
 0x741   : > { %v4635_v26 = vpack.c.bf16 %v4603_v36, %v4603_v36 }
 0x744   : > { %6231 = vmatmul.bf16.gmra.mxu3 %v4843_v34  ;;  %v4845_v34 = vpack.c.b16 %v4822_v12, %v4821_v57  ;;  %v4606_v57 = vld [vmem:[#allocation2 + $0x128] sm:$0xff] }
 0x747   : > { %v6039_v39 = vpop.f32.mrf.mxu3 }
 0x748   : > { %v15050_v0 = vadd.f32 %v6039_v39, %v5951_v41  ;;  %v16557_v39 = vld [vmem:[#allocation53_spill] sm:$0xff] }
 0x749   : > { %v16559_v1 = vpack.c.b16 %v16557_v39, %v16558_v4 }
 0x74f   : > { %v6041_v40 = vpop.f32.mrf.mxu3 }
 0x750   : > { %v15058_v17 = vadd.f32 %v6041_v40, %v5953_v20  ;;  %v4601_v20 = vld [vmem:[#allocation2 + $0xf0] sm:$0xff] }
 0x751   : > { %v4633_v40 = vpack.c.bf16 %v4601_v20, %v4601_v20  ;;  %v4608_v20 = vld [vmem:[#allocation2 + $0x140] sm:$0xff] }
 0x753   : > { %v4825_v42 = vunpack.c.l.b16 %v4633_v40  ;;  %v4640_v40 = vpack.c.bf16 %v4608_v20, %v4608_v20  ;;  %v6525_v20 = vld [vmem:[#allocation2 + $0x31] sm:$0xff] }
 0x754   : > { %6236 = vmatmul.bf16.gmra.mxu3 %v4844_v46 }
 0x757   : > { %v6044_v51 = vpop.f32.mrf.mxu3 }
 0x758   : > { %v15062_v43 = vadd.f32 %v6044_v51, %v5956_v23  ;;  %v12681_v23 = vld [vmem:[%s16352_s5 + $0x1c8] sm:$0xff] }
 0x759   : > { %7229 = vmatpush.bf16.msra.mxu3 %v12681_v23 }
 0x75f   : > { %v6046_v31 = vpop.f32.mrf.mxu3 }
 0x760   : > { %v15070_v54 = vadd.f32 %v6046_v31, %v5958_v63  ;;  %v4827_v63 = vunpack.c.l.b16 %v4635_v26  ;;  %v4642_v26 = vpack.c.bf16 %v4610_v62, %v4610_v62  ;;  %v6527_v62 = vld [vmem:[#allocation2 + $0x49] sm:$0xff] }
 0x762   : > { %v4848_v12 = vpack.c.b16 %v4828_v47, %v4827_v63  ;;  %v4834_v47 = vunpack.c.l.b16 %v4642_v26  ;;  %v6559_v26 = vpack.c.bf16 %v6527_v62, %v6527_v62  ;;  %v6533_v62 = vld [vmem:[#allocation2 + $0x91] sm:$0xff] }
 0x764   : > { %6241 = vmatmul.bf16.gmra.mxu3 %v4845_v34 }
 0x767   : > { %v6202_v56 = vpop.f32.mrf.mxu3 }
 0x768   : > { %v15076_v19 = vadd.f32 %v6202_v56, %v14885_v38  ;;  %v4638_v56 = vpack.c.bf16 %v4606_v57, %v4606_v57  ;;  %v4612_v57 = vld [vmem:[#allocation2 + $0x170] sm:$0xff] }
 0x76f   : > { %v6204_v28 = vpop.f32.mrf.mxu3 }
 0x770   : > { %v15079_v41 = vadd.f32 %v6204_v28, %v14889_v8  ;;  %v4847_v8 = vpack.c.b16 %v4826_v2, %v4825_v42  ;;  %v4830_v28 = vunpack.c.l.b16 %v4638_v56  ;;  %v4639_v2 = vpack.c.bf16 %v4607_v59, %v4607_v59  ;;  %v4611_v56 = vld [vmem:[#allocation2 + $0x168] sm:$0xff] }
 0x771   : > { %v16560_v59 = vld [vmem:[#allocation20_spill] sm:$0xff] }
 0x774   : > { %6246 = vmatmul.bf16.gmra.mxu3 %v16559_v1 }
 0x777   : > { %v6207_v61 = vpop.f32.mrf.mxu3 }
 0x778   : > { %v15085_v33 = vadd.f32 %v6207_v61, %v14893_v49 }
 0x77f   : > { %v6209_v46 = vpop.f32.mrf.mxu3 }
 0x780   : > { %v15088_v38 = vadd.f32 %v6209_v46, %v14897_v3  ;;  %v4832_v46 = vunpack.c.l.b16 %v4640_v40  ;;  %v6557_v40 = vpack.c.bf16 %v6525_v20, %v6525_v20  ;;  %v6531_v20 = vld [vmem:[#allocation2 + $0x79] sm:$0xff] }
 0x784   : > { %6251 = vmatmul.bf16.gmra.mxu3 %v4847_v8  ;;  %v4831_v8 = vunpack.c.l.b16 %v4639_v2 }
 0x786   : > { %v4850_v23 = vpack.c.b16 %v4832_v46, %v4831_v8  ;;  %v6781_v8 = vunpack.c.l.b16 %v6557_v40 }
 0x787   : > { %v6212_v51 = vpop.f32.mrf.mxu3 }
 0x788   : > { %v15094_v49 = vadd.f32 %v6212_v51, %v14904_v37  ;;  %v4637_v37 = vpack.c.bf16 %v4605_v25, %v4605_v25 }
 0x78a   : > { %v4829_v1 = vunpack.c.l.b16 %v4637_v37  ;;  %v4644_v37 = vpack.c.bf16 %v4612_v57, %v4612_v57  ;;  %v6529_v57 = vld [vmem:[#allocation2 + $0x61] sm:$0xff] }
 0x78c   : > { %v4849_v61 = vpack.c.b16 %v4830_v28, %v4829_v1  ;;  %v4836_v28 = vunpack.c.l.b16 %v4644_v37  ;;  %v6561_v37 = vpack.c.bf16 %v6529_v57, %v6529_v57  ;;  %v6535_v57 = vld [vmem:[#allocation2 + $0xa9] sm:$0xff] }
 0x78f   : > { %v6214_v50 = vpop.f32.mrf.mxu3 }
 0x790   : > { %v15097_v3 = vadd.f32 %v6214_v50, %v14908_v29  ;;  %v12680_v29 = vld [vmem:[%s16352_s5 + $0x1c0] sm:$0xff] }
 0x791   : > { %7230 = vmatpush.bf16.msra.mxu3 %v12680_v29 }
 0x794   : > { %6256 = vmatmul.bf16.gmra.mxu3 %v4848_v12 }
 0x797   : > { %v6217_v31 = vpop.f32.mrf.mxu3 }
 0x798   : > { %v15100_v34 = vadd.f32 %v6217_v31, %v14912_v32 }
 0x79f   : > { %v6219_v39 = vpop.f32.mrf.mxu3 }
 0x7a0   : > { %v15103_v4 = vadd.f32 %v6219_v39, %v14916_v58 }
 0x7a4   : > { %6261 = vmatmul.bf16.gmra.mxu3 %v4849_v61 }
 0x7a7   : > { %v6222_v48 = vpop.f32.mrf.mxu3 }
 0x7a8   : > { %v15109_v32 = vadd.f32 %v6222_v48, %v14923_v5  ;;  %v4641_v5 = vpack.c.bf16 %v4609_v55, %v4609_v55 }
 0x7aa   : > { %v4833_v12 = vunpack.c.l.b16 %v4641_v5 }
 0x7ac   : > { %v4851_v31 = vpack.c.b16 %v4834_v47, %v4833_v12  ;;  %v6783_v12 = vunpack.c.l.b16 %v6559_v26 }
 0x7af   : > { %v6224_v42 = vpop.f32.mrf.mxu3 }
 0x7b0   : > { %v15112_v58 = vadd.f32 %v6224_v42, %v14927_v10 }
 0x7b4   : > { %6266 = vmatmul.bf16.gmra.mxu3 %v4850_v23 }
 0x7b7   : > { %v6227_v51 = vpop.f32.mrf.mxu3 }
 0x7b8   : > { %v15115_v36 = vadd.f32 %v6227_v51, %v14931_v24  ;;  %v4643_v24 = vpack.c.bf16 %v4611_v56, %v4611_v56 }
 0x7ba   : > { %v4835_v61 = vunpack.c.l.b16 %v4643_v24 }
 0x7bc   : > { %v4852_v29 = vpack.c.b16 %v4836_v28, %v4835_v61  ;;  %v6785_v61 = vunpack.c.l.b16 %v6561_v37 }
 0x7bf   : > { %v6229_v50 = vpop.f32.mrf.mxu3 }
 0x7c0   : > { %v15118_v63 = vadd.f32 %v6229_v50, %v14935_v45 }
 0x7c4   : > { %6271 = vmatmul.bf16.gmra.mxu3 %v4851_v31 }
 0x7c7   : > { %v6232_v10 = vpop.f32.mrf.mxu3 }
 0x7c8   : > { %v15121_v25 = vadd.f32 %v6232_v10, %v14942_v16  ;;  %v6558_v16 = vpack.c.bf16 %v16560_v59, %v16560_v59 }
 0x7ca   : > { %v6782_v2 = vunpack.c.l.b16 %v6558_v16  ;;  %v6563_v16 = vpack.c.bf16 %v6531_v20, %v6531_v20  ;;  %v6537_v20 = vld [vmem:[#allocation2 + $0xc1] sm:$0xff] }
 0x7cf   : > { %v6234_v39 = vpop.f32.mrf.mxu3 }
 0x7d0   : > { %v15124_v1 = vadd.f32 %v6234_v39, %v14946_v9  ;;  %v6813_v9 = vpack.c.b16 %v6782_v2, %v6781_v8  ;;  %v6787_v8 = vunpack.c.l.b16 %v6563_v16  ;;  %v12735_v16 = vld [vmem:[%s16356_s9 + $0x138] sm:$0xff] }
 0x7d1   : > { %8167 = vmatpush.bf16.msra.mxu2 %v12735_v16 }
 0x7d4   : > { %6276 = vmatmul.bf16.gmra.mxu3 %v4852_v29 }
 0x7d7   : > { %v6237_v45 = vpop.f32.mrf.mxu3 }
 0x7d8   : > { %v15127_v48 = vadd.f32 %v6237_v45, %v14951_v30  ;;  %v16561_v30 = vld [vmem:[#allocation24_spill] sm:$0xff] }
 0x7d9   : > { %v6560_v55 = vpack.c.bf16 %v16561_v30, %v16561_v30 }
 0x7db   : > { %v6784_v5 = vunpack.c.l.b16 %v6560_v55  ;;  %v6565_v55 = vpack.c.bf16 %v6533_v62, %v6533_v62  ;;  %v12727_v62 = vld [vmem:[%s16356_s9 + $0xf8] sm:$0xff] }
 0x7dc   : > { %8138 = vmatpush.bf16.msra.mxu1 %v12727_v62 }
 0x7df   : > { %v6239_v46 = vpop.f32.mrf.mxu3 }
 0x7e0   : > { %v15132_v42 = vadd.f32 %v6239_v46, %v14959_v27  ;;  %v6814_v27 = vpack.c.b16 %v6784_v5, %v6783_v12  ;;  %v6789_v12 = vunpack.c.l.b16 %v6565_v55 }
 0x7e4   : > { %7231 = vmatmul.bf16.vlgmr.msra.gmra.mxu3 %v6813_v9 }
 0x7e7   : > { %v6242_v23 = vpop.f32.mrf.mxu3 }
 0x7e8   : > { %v15135_v51 = vadd.f32 %v6242_v23, %v14969_v7  ;;  %v16562_v7 = vld [vmem:[#allocation28_spill] sm:$0xff] }
 0x7e9   : > { %v6562_v56 = vpack.c.bf16 %v16562_v7, %v16562_v7 }
 0x7eb   : > { %v6786_v24 = vunpack.c.l.b16 %v6562_v56  ;;  %v6567_v56 = vpack.c.bf16 %v6535_v57, %v6535_v57  ;;  %v6542_v57 = vld [vmem:[#allocation2 + $0xf9] sm:$0xff] }
 0x7ef   : > { %v6244_v47 = vpop.f32.mrf.mxu3 }
 0x7f0   : > { %v15140_v50 = vadd.f32 %v6244_v47, %v14977_v18  ;;  %v6815_v18 = vpack.c.b16 %v6786_v24, %v6785_v61  ;;  %v6791_v61 = vunpack.c.l.b16 %v6567_v56 }
 0x7f4   : > { %7236 = vmatmul.bf16.gmra.mxu3 %v6814_v27 }
 0x7f7   : > { %v6247_v31 = vpop.f32.mrf.mxu3 }
 0x7f8   : > { %v15143_v10 = vadd.f32 %v6247_v31, %v14981_v60  ;;  %v16563_v60 = vld [vmem:[#allocation32_spill] sm:$0xff] }
 0x7f9   : > { %v6564_v59 = vpack.c.bf16 %v16563_v60, %v16563_v60 }
 0x7fb   : > { %v6788_v40 = vunpack.c.l.b16 %v6564_v59  ;;  %v6569_v59 = vpack.c.bf16 %v6537_v20, %v6537_v20 }
 0x7ff   : > { %v6249_v28 = vpop.f32.mrf.mxu3 }
 0x800   : > { %v15148_v39 = vadd.f32 %v6249_v28, %v14989_v13  ;;  %v6816_v13 = vpack.c.b16 %v6788_v40, %v6787_v8  ;;  %v6793_v8 = vunpack.c.l.b16 %v6569_v59  ;;  %v12742_v59 = vld [vmem:[%s16356_s9 + $0x170] sm:$0xff] }
 0x804   : > { %7241 = vmatmul.bf16.gmra.mxu3 %v6815_v18 }
 0x807   : > { %v6252_v29 = vpop.f32.mrf.mxu3 }
 0x808   : > { %v15151_v45 = vadd.f32 %v6252_v29, %v14996_v11  ;;  %v16566_v11 = vld [vmem:[#allocation36_spill] sm:$0xff] }
 0x809   : > { %v6566_v30 = vpack.c.bf16 %v16566_v11, %v16566_v11 }
 0x80b   : > { %v6790_v26 = vunpack.c.l.b16 %v6566_v30 }
 0x80f   : > { %v6254_v2 = vpop.f32.mrf.mxu3 }
 0x810   : > { %v15156_v46 = vadd.f32 %v6254_v2, %v15004_v52  ;;  %v6817_v52 = vpack.c.b16 %v6790_v26, %v6789_v12  ;;  %v16577_v12 = vld [vmem:[#allocation54_spill] sm:$0xff] }
 0x812   : > { %16564 = vst [vmem:[#allocation51_spill] sm:$0xff] %v15156_v46 }
 0x814   : > { %7246 = vmatmul.bf16.gmra.mxu3 %v6816_v13 }
 0x817   : > { %v6257_v9 = vpop.f32.mrf.mxu3 }
 0x818   : > { %v15159_v23 = vadd.f32 %v6257_v9, %v15008_v15  ;;  %v16569_v15 = vld [vmem:[#allocation42_spill] sm:$0xff]  ;;  %v15188_v9 = vpop.f32.mrf.mxu2 }
 0x819   : > { %v6568_v7 = vpack.c.bf16 %v16569_v15, %v16569_v15  ;;  %v15204_v15 = vpop.f32.mrf.mxu1 }
 0x81a   : > { %16565 = vst [vmem:[#allocation16_spill] sm:$0xff] %v15159_v23 }
 0x81b   : > { %v6792_v37 = vunpack.c.l.b16 %v6568_v7 }
 0x81f   : > { %v6259_v5 = vpop.f32.mrf.mxu3 }
 0x820   : > { %v15164_v47 = vadd.f32 %v6259_v5, %v15016_v35  ;;  %v6818_v35 = vpack.c.b16 %v6792_v37, %v6791_v61  ;;  %v15196_v55 = vpop.f32.mrf.mxu2  ;;  %v16576_v5 = vld [vmem:[#allocation55_spill] sm:$0xff]  ;;  %v6574_v37 = vpack.c.bf16 %v6542_v57, %v6542_v57  ;;  %7217 = vmatmul.bf16.gmra.mxu2 %v14961_v21 }
 0x821   : > { %v15214_v20 = vpop.f32.mrf.mxu1  ;;  %v12724_v21 = vld [vmem:[%s16356_s9 + $0xe0] sm:$0xff] }
 0x822   : > { %16567 = vst [vmem:[#allocation14_spill] sm:$0xff] %v15164_v47  ;;  %v6798_v61 = vunpack.c.l.b16 %v6574_v37 }
 0x824   : > { %7251 = vmatmul.bf16.gmra.mxu3 %v6817_v52  ;;  %v16578_v52 = vpack.c.b16 %v16576_v5, %v16577_v12 }
 0x827   : > { %v6262_v27 = vpop.f32.mrf.mxu3 }
 0x828   : > { %v15167_v31 = vadd.f32 %v6262_v27, %v15023_v22  ;;  %v16572_v22 = vld [vmem:[#allocation49_spill] sm:$0xff]  ;;  %v15206_v7 = vpop.f32.mrf.mxu2 }
 0x829   : > { %v6570_v60 = vpack.c.bf16 %v16572_v22, %v16572_v22 }
 0x82a   : > { %16568 = vst [vmem:[#allocation19_spill] sm:$0xff] %v15167_v31 }
 0x82b   : > { %v6794_v40 = vunpack.c.l.b16 %v6570_v60 }
 0x82d   : > { %v6819_v13 = vpack.c.b16 %v6794_v40, %v6793_v8  ;;  %v6543_v40 = vld [vmem:[#allocation2 + $0x109] sm:$0xff]  ;;  %v15226_v8 = vpop.f32.mrf.mxu1 }
 0x82e   : > { %v6575_v62 = vpack.c.bf16 %v6543_v40, %v6543_v40  ;;  %v16586_v40 = vld [vmem:[#allocation61_spill] sm:$0xff] }
 0x82f   : > { %v6264_v24 = vpop.f32.mrf.mxu3 }
 0x830   : > { %v15172_v28 = vadd.f32 %v6264_v24, %v15031_v14  ;;  %v12743_v14 = vld [vmem:[%s16356_s9 + $0x178] sm:$0xff]  ;;  %v15216_v22 = vpop.f32.mrf.mxu2  ;;  %v6799_v57 = vunpack.c.l.b16 %v6575_v62  ;;  %v6546_v62 = vld [vmem:[#allocation2 + $0x129] sm:$0xff] }
 0x831   : > { %8196 = vmatpush.bf16.msrb.mxu3 %v12743_v14  ;;  %v6544_v14 = vld [vmem:[#allocation2 + $0x111] sm:$0xff] }
 0x832   : > { %16570 = vst [vmem:[#allocation17_spill] sm:$0xff] %v15172_v28 }
 0x834   : > { %7256 = vmatmul.bf16.gmra.mxu3 %v6818_v35 }
 0x835   : > { %8197 = vmatpush.bf16.msrb.mxu3 %v12742_v59  ;;  %v16585_v59 = vld [vmem:[#allocation39_spill] sm:$0xff] }
 0x837   : > { %v6267_v18 = vpop.f32.mrf.mxu3 }
 0x838   : > { %v15175_v29 = vadd.f32 %v6267_v18, %v15035_v53 }
 0x83a   : > { %16571 = vst [vmem:[#allocation23_spill] sm:$0xff] %v15175_v29 }
 0x83f   : > { %v6269_v2 = vpop.f32.mrf.mxu3 }
 0x840   : > { %v15186_v53 = vadd.f32 %v6269_v2, %v15043_v44  ;;  %v6576_v2 = vpack.c.bf16 %v6544_v14, %v6544_v14 }
 0x842   : > { %16573 = vst [vmem:[#allocation21_spill] sm:$0xff] %v15186_v53  ;;  %v6800_v5 = vunpack.c.l.b16 %v6576_v2 }
 0x844   : > { %7261 = vmatmul.bf16.gmra.mxu3 %v6819_v13  ;;  %v15228_v13 = vpop.f32.mrf.mxu2 }
 0x847   : > { %v6272_v11 = vpop.f32.mrf.mxu3 }
 0x848   : > { %v15194_v30 = vadd.f32 %v6272_v11, %v15050_v0  ;;  %v6541_v0 = vld [vmem:[#allocation2 + $0xf1] sm:$0xff] }
 0x849   : > { %v6573_v24 = vpack.c.bf16 %v6541_v0, %v6541_v0  ;;  %v16581_v11 = vld [vmem:[#allocation58_spill] sm:$0xff]  ;;  %v16583_v0 = vld [vmem:[#allocation15_spill] sm:$0xff] }
 0x84a   : > { %16574 = vst [vmem:[#allocation27_spill] sm:$0xff] %v15194_v30 }
 0x84b   : > { %v6797_v18 = vunpack.c.l.b16 %v6573_v24  ;;  %v6822_v24 = vpack.c.b16 %v6800_v5, %v6799_v57  ;;  %v6545_v57 = vld [vmem:[#allocation2 + $0x121] sm:$0xff] }
 0x84d   : > { %v6821_v60 = vpack.c.b16 %v6798_v61, %v6797_v18 }
 0x84f   : > { %v6274_v26 = vpop.f32.mrf.mxu3 }
 0x850   : > { %v15199_v44 = vadd.f32 %v6274_v26, %v15058_v17 }
 0x852   : > { %16575 = vst [vmem:[#allocation25_spill] sm:$0xff] %v15199_v44  ;;  %v16592_v44 = vld [vmem:[#allocation59_spill] sm:$0xff] }
 0x854   : > { %7266 = vmatmul.bf16.gmra.mxu3 %v16578_v52  ;;  %v16582_v52 = vld [vmem:[#allocation43_spill] sm:$0xff] }
 0x857   : > { %v6277_v27 = vpop.f32.mrf.mxu3 }
 0x858   : > { %v15209_v56 = vadd.f32 %v6277_v27, %v15062_v43  ;;  %v12734_v43 = vld [vmem:[%s16356_s9 + $0x130] sm:$0xff]  ;;  %v6292_v27 = vadd.f32 %v16582_v52, %v15076_v19  ;;  %v15246_v19 = vld [vmem:[%s16353_s6] ss:$0 sm:$0xff]  ;;  %v16588_v52 = vld [vmem:[#allocation64_spill] sm:$0xff] }
 0x859   : > { %8168 = vmatpush.bf16.msra.mxu2 %v12734_v43  ;;  %v15239_v43 = vpop.f32.mrf.mxu2 }
 0x85a   : > { %16579 = vst [vmem:[#allocation76_spill] sm:$0xff] %v15209_v56 }
 0x85f   : > { %v6279_v35 = vpop.f32.mrf.mxu3 }
 0x860   : > { %v15212_v17 = vadd.f32 %v6279_v35, %v15070_v54  ;;  %v15224_v54 = vpop.f32.mrf.mxu0  ;;  %v16584_v35 = vld [vmem:[#allocation56_spill] sm:$0xff] }
 0x861   : > { %v6381_v18 = vadd.f32 %v16584_v35, %v6292_v27 }
 0x862   : > { %16580 = vst [vmem:[#allocation105_spill] sm:$0xff] %v15212_v17 }
 0x864   : > { %7271 = vmatmul.bf16.gmra.mxu3 %v6821_v60  ;;  %v15237_v60 = vpop.f32.mrf.mxu1 }
 0x867   : > { %v7232_v16 = vpop.f32.mrf.mxu3 }
 0x868   : > { %v7233_v26 = vadd.f32 %v7232_v16, %v16581_v11  ;;  %v15234_v61 = vpop.f32.mrf.mxu0  ;;  %v6297_v16 = vadd.f32 %v16585_v59, %v15085_v33  ;;  %v16591_v59 = vld [vmem:[#allocation101_spill] sm:$0xff] }
 0x86a   : > { %v7322_v37 = vadd.f32 %v16583_v0, %v7233_v26  ;;  %v16587_v26 = vld [vmem:[#allocation38_spill] sm:$0xff]  ;;  %v6578_v0 = vpack.c.bf16 %v6546_v62, %v6546_v62  ;;  %v16593_v62 = vld [vmem:[#allocation45_spill] sm:$0xff] }
 0x86b   : > { %v6294_v5 = vadd.f32 %v16587_v26, %v15079_v41 }
 0x86c   : > { %v7401_v14 = vadd.f32 %v7322_v37, %v6381_v18  ;;  %v16590_v37 = vld [vmem:[#allocation100_spill] sm:$0xff] }
 0x86d   : > { %v6383_v56 = vadd.f32 %v16592_v44, %v6294_v5 }
 0x86e   : > { %v7437_v33 = vadd.f32 %v15246_v19, %v7401_v14 }
 0x86f   : > { %v7234_v12 = vpop.f32.mrf.mxu3 }
 0x870   : > { %v7235_v2 = vadd.f32 %v7234_v12, %v16586_v40  ;;  %v12726_v12 = vld [vmem:[%s16356_s9 + $0xf0] sm:$0xff]  ;;  %v6577_v40 = vpack.c.bf16 %v6545_v57, %v6545_v57  ;;  %v15260_v26 = vpop.f32.mrf.mxu0  ;;  %v7501_v14 = vmul.f32 0.01, %v7437_v33  ;;  %vm7469_vm8 = vcmp.ge.f32.partialorder %v7437_v33, 0.0  ;;  %v15267_v57 = vpop.f32.mrf.mxu2 }
 0x871   : > { %8139 = vmatpush.bf16.msra.mxu1 %v12726_v12 }
 0x872   : > { %v7324_v18 = vadd.f32 %v16590_v37, %v7235_v2  ;;  %v15265_v37 = vpop.f32.mrf.mxu1  ;;  %v7533_v12 = vsel %vm7469_vm8, %v7437_v33, %v7501_v14 }
 0x874   : > { %7276 = vmatmul.bf16.gmra.mxu3 %v6822_v24  ;;  %v16589_v24 = vld [vmem:[#allocation62_spill] sm:$0xff] }
 0x875   : > { %v6386_v35 = vadd.f32 %v16589_v24, %v6297_v16  ;;  %v6802_v16 = vunpack.c.l.b16 %v6578_v0  ;;  %v6801_v24 = vunpack.c.l.b16 %v6577_v40  ;;  %v12733_v40 = vld [vmem:[%s16356_s9 + $0x128] sm:$0xff] }
 0x876   : > { %8169 = vmatpush.bf16.msra.mxu2 %v12733_v40 }
 0x877   : > { %v7237_v11 = vpop.f32.mrf.mxu3 }
 0x878   : > { %v7238_v27 = vadd.f32 %v7237_v11, %v16588_v52  ;;  %v6299_v11 = vadd.f32 %v16593_v62, %v15088_v38  ;;  %v7402_v52 = vadd.f32 %v7324_v18, %v6383_v56  ;;  %v6823_v38 = vpack.c.b16 %v6802_v16, %v6801_v24  ;;  %v16596_v18 = vld [vmem:[#allocation102_spill] sm:$0xff]  ;;  %v15280_v16 = vpop.f32.mrf.mxu0 }
 0x879   : > { %v6547_v24 = vld [vmem:[#allocation2 + $0x139] sm:$0xff] }
 0x87a   : > { %v7327_v17 = vadd.f32 %v16591_v59, %v7238_v27  ;;  %v7438_v0 = vadd.f32 %v15246_v19, %v7402_v52  ;;  %v6548_v52 = vld [vmem:[#allocation2 + $0x141] sm:$0xff] }
 0x87c   : > { %v7403_v41 = vadd.f32 %v7327_v17, %v6386_v35  ;;  %v16594_v17 = vld [vmem:[#allocation67_spill] sm:$0xff]  ;;  %v16595_v35 = vld [vmem:[#allocation65_spill] sm:$0xff]  ;;  %vm7470_vm10 = vcmp.ge.f32.partialorder %v7438_v0, 0.0 }
 0x87d   : > { %v6388_v59 = vadd.f32 %v16595_v35, %v6299_v11  ;;  %v7502_v11 = vmul.f32 0.01, %v7438_v0  ;;  %v15288_v35 = vpop.f32.mrf.mxu2 }
 0x87e   : > { %v7439_v2 = vadd.f32 %v15246_v19, %v7403_v41 }
 0x87f   : > { %v7239_v27 = vpop.f32.mrf.mxu3 }
 0x880   : > { %vm7471_vm9 = vcmp.ge.f32.partialorder %v7439_v2, 0.0  ;;  %v7503_v44 = vmul.f32 0.01, %v7439_v2  ;;  %v7240_v5 = vadd.f32 %v7239_v27, %v16594_v17  ;;  %v12741_v27 = vld [vmem:[%s16356_s9 + $0x168] sm:$0xff]  ;;  %v15295_v28 = vpop.f32.mrf.mxu0 }
 0x881   : > { %8198 = vmatpush.bf16.msrb.mxu3 %v12741_v27  ;;  %v15284_v17 = vld [vmem:[#allocation2 + $0x2] sm:$0xff]  ;;  %v16599_v27 = vld [vmem:[#allocation46_spill] sm:$0xff] }
 0x882   : > { %v7535_v56 = vsel %vm7471_vm9, %v7439_v2, %v7503_v44  ;;  %v7329_v41 = vadd.f32 %v16596_v18, %v7240_v5  ;;  %v15282_v44 = vld [vmem:[#allocation2 + $0x1] sm:$0xff]  ;;  %v15286_v5 = vpop.f32.mrf.mxu1  ;;  %v16598_v18 = vld [vmem:[#allocation70_spill] sm:$0xff] }
 0x883   : > { %v7565_v62 = vmax.f32 %v7533_v12, %v7535_v56  ;;  %16597 = vst [vmem:[#allocation77_spill] sm:$0xff] %v15282_v44  ;;  %v6579_v56 = vpack.c.bf16 %v6547_v24, %v6547_v24  ;;  %v6302_v44 = vadd.f32 %v16599_v27, %v15094_v49  ;;  %v16601_v49 = vld [vmem:[#allocation68_spill] sm:$0xff] }
 0x884   : > { %v7404_v30 = vadd.f32 %v7329_v41, %v6388_v59  ;;  %7281 = vmatmul.bf16.gmra.mxu3 %v6823_v38  ;;  %v7534_v59 = vsel %vm7470_vm10, %v7438_v0, %v7502_v11  ;;  %v6580_v38 = vpack.c.bf16 %v6548_v52, %v6548_v52  ;;  %8960 = vst [vmem:[#allocation2] sm:$0xff] %v14953_v6  ;;  %v16600_v0 = vld [vmem:[#allocation103_spill] sm:$0xff] }
 0x885   : > { %7581 = vst [vmem:[#allocation3] sm:$0xff] %v7565_v62  ;;  %v6803_v53 = vunpack.c.l.b16 %v6579_v56  ;;  %v15301_v52 = vld [vmem:[%s16354_s7] ss:$0 sm:$0xff]  ;;  %v15308_v24 = vpop.f32.mrf.mxu2  ;;  %v16602_v56 = vld [vmem:[#allocation57_spill] sm:$0xff] }
 0x886   : > { %v7440_v33 = vadd.f32 %v15246_v19, %v7404_v30  ;;  %8961 = vst [vmem:[#allocation2 + $0x8] sm:$0x3] %v14953_v6  ;;  %v6804_v62 = vunpack.c.l.b16 %v6580_v38 }
 0x887   : > { %v7242_v14 = vpop.f32.mrf.mxu3 }
 0x888   : > { %vm7472_vm11 = vcmp.ge.f32.partialorder %v7440_v33, 0.0  ;;  %v7504_v2 = vmul.f32 0.01, %v7440_v33  ;;  %v7243_v41 = vadd.f32 %v7242_v14, %v16598_v18  ;;  %v12732_v14 = vld [vmem:[%s16356_s9 + $0x120] sm:$0xff]  ;;  %v6307_v18 = vadd.f32 %v16602_v56, %v15100_v34 }
 0x889   : > { %8170 = vmatpush.bf16.msra.mxu2 %v12732_v14  ;;  %v16604_v14 = vld [vmem:[#allocation50_spill] sm:$0xff] }
 0x88a   : > { %v7536_v30 = vsel %vm7472_vm11, %v7440_v33, %v7504_v2  ;;  %v7332_v11 = vadd.f32 %v16600_v0, %v7243_v41  ;;  %v6824_v33 = vpack.c.b16 %v6804_v62, %v6803_v53  ;;  %v15306_v2 = vpop.f32.mrf.mxu1  ;;  %v15314_v53 = vld [vmem:[%s16355_s8] ss:$0 sm:$0xff]  ;;  %v16603_v62 = vld [vmem:[#allocation73_spill] sm:$0xff] }
 0x88b   : > { %v7566_v12 = vmax.f32 %v7534_v59, %v7536_v30  ;;  %v6391_v59 = vadd.f32 %v16601_v49, %v6302_v44  ;;  %v6550_v0 = vld [vmem:[#allocation2 + $0x159] sm:$0xff] }
 0x88c   : > { %v12731_v49 = vld [vmem:[%s16356_s9 + $0x118] sm:$0xff] }
 0x88d   : > { %7582 = vst [vmem:[#allocation3 + $0x8] sm:$0xff] %v7566_v12  ;;  %v7405_v41 = vadd.f32 %v7332_v11, %v6391_v59  ;;  %v6549_v11 = vld [vmem:[#allocation2 + $0x151] sm:$0xff]  ;;  %v6582_v59 = vpack.c.bf16 %v6550_v0, %v6550_v0  ;;  %8171 = vmatpush.bf16.msra.mxu2 %v12731_v49  ;;  %v15351_v49 = vpop.f32.mrf.mxu2 }
 0x88f   : > { %v7244_v40 = vpop.f32.mrf.mxu3  ;;  %v7441_v56 = vadd.f32 %v15246_v19, %v7405_v41 }
 0x890   : > { %v7245_v27 = vadd.f32 %v7244_v40, %v16603_v62  ;;  %v16606_v62 = vld [vmem:[#allocation104_spill] sm:$0xff] }
 0x891   : > { %vm7473_vm12 = vcmp.ge.f32.partialorder %v7441_v56, 0.0 }
 0x892   : > { %v7334_v31 = vadd.f32 %v16606_v62, %v7245_v27  ;;  %v16608_v27 = vld [vmem:[#allocation60_spill] sm:$0xff] }
 0x894   : > { %v7597_v30 = vld [vmem:[#allocation3] ss:$2 sm:$0xff]  ;;  %v7612_v38 = vld [vmem:[#allocation3 + $0x1] ss:$2 sm:$0xff]  ;;  %7286 = vmatmul.bf16.gmra.mxu3 %v6824_v33  ;;  %v12725_v33 = vld [vmem:[%s16356_s9 + $0xe8] sm:$0xff] }
 0x895   : > { %v7620_v12 = vmax.f32 %v7597_v30, %v7612_v38  ;;  %v6304_v30 = vadd.f32 %v16604_v14, %v15097_v3  ;;  %8140 = vmatpush.bf16.msra.mxu1 %v12725_v33  ;;  %v16605_v38 = vld [vmem:[#allocation74_spill] sm:$0xff]  ;;  %v15337_v3 = vpop.f32.mrf.mxu0  ;;  %v15349_v33 = vpop.f32.mrf.mxu1  ;;  %v7505_v14 = vmul.f32 0.01, %v7441_v56 }
 0x897   : > { %v7632_v29 = vmul.f32 %v15301_v52, %v7620_v12  ;;  %v7247_v44 = vpop.f32.mrf.mxu3  ;;  %v6396_v12 = vadd.f32 %v16605_v38, %v6307_v18  ;;  %v16607_v18 = vld [vmem:[#allocation71_spill] sm:$0xff] }
 0x898   : > { %v7248_v34 = vadd.f32 %v7247_v44, %v15188_v9  ;;  %v6581_v9 = vpack.c.bf16 %v6549_v11, %v6549_v11  ;;  %v6393_v0 = vadd.f32 %v16607_v18, %v6304_v30  ;;  %v6309_v44 = vadd.f32 %v16608_v27, %v15103_v4  ;;  %v12729_v4 = vld [vmem:[%s16356_s9 + $0x108] sm:$0xff] }
 0x899   : > { %v15331_v40 = vadd.f32 %v15314_v53, %v7632_v29  ;;  %v12730_v29 = vld [vmem:[%s16356_s9 + $0x110] sm:$0xff]  ;;  %8141 = vmatpush.bf16.msra.mxu1 %v12724_v21  ;;  %v7721_v30 = vpack.c.bf16 %v15284_v17, %v15284_v17 }
 0x89a   : > { %v7337_v47 = vadd.f32 %v15224_v54, %v7248_v34  ;;  %v6806_v54 = vunpack.c.l.b16 %v6582_v59  ;;  %8172 = vmatpush.bf16.msra.mxu2 %v12730_v29  ;;  %v7406_v34 = vadd.f32 %v7334_v31, %v6393_v0  ;;  %v6805_v62 = vunpack.c.l.b16 %v6581_v9  ;;  %v12722_v17 = vld [vmem:[%s16356_s9 + $0xd0] sm:$0xff] }
 0x89b   : > { %7673 = vst [vmem:[#allocation2 + $0x19] sm:$0xff] %v15331_v40  ;;  %v7537_v9 = vsel %vm7473_vm12, %v7441_v56, %v7505_v14 }
 0x89c   : > { %v7407_v41 = vadd.f32 %v7337_v47, %v6396_v12  ;;  %v12723_v47 = vld [vmem:[%s16356_s9 + $0xd8] sm:$0xff]  ;;  %v6825_v29 = vpack.c.b16 %v6806_v54, %v6805_v62  ;;  %v7442_v18 = vadd.f32 %v15246_v19, %v7406_v34  ;;  %v15377_v54 = vunpack.c.l.b16 %v7721_v30  ;;  %v12740_v34 = vld [vmem:[%s16356_s9 + $0x160] sm:$0xff]  ;;  %v15395_v30 = vpop.f32.mrf.mxu2 }
 0x89d   : > { %v16609_v12 = vld [vmem:[#allocation78_spill] sm:$0xff]  ;;  %8142 = vmatpush.bf16.msra.mxu1 %v12723_v47  ;;  %v15380_v14 = vpop.f32.mrf.mxu0  ;;  %8199 = vmatpush.bf16.msrb.mxu3 %v12740_v34  ;;  %v16611_v34 = vld [vmem:[#allocation63_spill] sm:$0xff] }
 0x89e   : > { %v7443_v11 = vadd.f32 %v15246_v19, %v7407_v41  ;;  %v6398_v21 = vadd.f32 %v16609_v12, %v6309_v44  ;;  %8173 = vmatpush.bf16.msra.mxu2 %v12729_v4  ;;  %16610 = vst [vmem:[#allocation106_spill] sm:$0xff] %v15377_v54  ;;  %vm7474_vm14 = vcmp.ge.f32.partialorder %v7442_v18, 0.0  ;;  %v6552_v47 = vld [vmem:[#allocation2 + $0x171] sm:$0xff]  ;;  %v15393_v4 = vpop.f32.mrf.mxu1 }
 0x89f   : > { %v7249_v38 = vpop.f32.mrf.mxu3 }
 0x8a0   : > { %vm7475_vm13 = vcmp.ge.f32.partialorder %v7443_v11, 0.0  ;;  %v7507_v59 = vmul.f32 0.01, %v7443_v11  ;;  %v7250_v31 = vadd.f32 %v7249_v38, %v15196_v55  ;;  %v12728_v55 = vld [vmem:[%s16356_s9 + $0x100] sm:$0xff] }
 0x8a1   : > { %8143 = vmatpush.bf16.msra.mxu1 %v12722_v17 }
 0x8a2   : > { %v7539_v0 = vsel %vm7475_vm13, %v7443_v11, %v7507_v59  ;;  %v7339_v41 = vadd.f32 %v15234_v61, %v7250_v31  ;;  %v15366_v27 = vld [vmem:[#allocation2 + $0x18] sm:$0xff]  ;;  %8174 = vmatpush.bf16.msra.mxu2 %v12728_v55  ;;  %v7506_v11 = vmul.f32 0.01, %v7442_v18  ;;  %v6551_v31 = vld [vmem:[#allocation2 + $0x169] sm:$0xff] }
 0x8a3   : > { %v7857_v46 = vld [vmem:[#allocation2 + $0x1a] sm:$0xff]  ;;  %v7567_v23 = vmax.f32 %v7537_v9, %v7539_v0  ;;  %8965 = vst [vmem:[#allocation2 + $0x18] sm:$0x1] %v14953_v6 }
 0x8a4   : > { %v7865_v44 = vpack.c.bf16 %v7857_v46, %v7857_v46  ;;  %v15375_v56 = vld [vmem:[#allocation2 + $0x19] sm:$0xff]  ;;  %v7408_v61 = vadd.f32 %v7339_v41, %v6398_v21  ;;  %7291 = vmatmul.bf16.gmra.mxu3 %v6825_v29  ;;  %v7538_v12 = vsel %vm7474_vm14, %v7442_v18, %v7506_v11  ;;  %v6584_v29 = vpack.c.bf16 %v6552_v47, %v6552_v47 }
 0x8a5   : > { %8969 = vst [vmem:[#allocation2 + $0x1d] sm:$0x1f] %v14953_v6  ;;  %v12721_v6 = vld [vmem:[%s16356_s9 + $0xc8] sm:$0xff]  ;;  %v12720_v0 = vld [vmem:[%s16356_s9 + $0xc0] sm:$0xff]  ;;  %v6583_v41 = vpack.c.bf16 %v6551_v31, %v6551_v31 }
 0x8a6   : > { %7583 = vst [vmem:[#allocation3 + $0x20] sm:$0xff] %v7567_v23  ;;  %v15385_v46 = vunpack.c.l.b16 %v7865_v44  ;;  %v7444_v38 = vadd.f32 %v15246_v19, %v7408_v61  ;;  %8144 = vmatpush.bf16.msra.mxu1 %v12721_v6  ;;  %v6808_v55 = vunpack.c.l.b16 %v6584_v29  ;;  %v15401_v44 = vpop.f32.mrf.mxu0  ;;  %v6312_v6 = vadd.f32 %v16611_v34, %v15109_v32  ;;  %v15405_v11 = vpop.f32.mrf.mxu1  ;;  %v6620_v32 = vld [vmem:[#allocation2 + $0x1a2] sm:$0xff] }
 0x8a7   : > { %v7252_v62 = vpop.f32.mrf.mxu3  ;;  %v6807_v18 = vunpack.c.l.b16 %v6583_v41  ;;  %v6652_v54 = vpack.c.bf16 %v6620_v32, %v6620_v32 }
 0x8a8   : > { %vm7476_vm15 = vcmp.ge.f32.partialorder %v7444_v38, 0.0  ;;  %v7508_v59 = vmul.f32 0.01, %v7444_v38  ;;  %v7253_v17 = vadd.f32 %v7252_v62, %v15206_v7  ;;  %v6401_v31 = vadd.f32 %v15204_v15, %v6312_v6  ;;  %v16612_v7 = vld [vmem:[#allocation69_spill] sm:$0xff]  ;;  %v16613_v15 = vld [vmem:[#allocation66_spill] sm:$0xff] }
 0x8a9   : > { %v6317_v62 = vadd.f32 %v16612_v7, %v15115_v36 }
 0x8aa   : > { %v7540_v21 = vsel %vm7476_vm15, %v7444_v38, %v7508_v59  ;;  %8145 = vmatpush.bf16.msra.mxu1 %v12720_v0  ;;  %v15407_v38 = vpop.f32.mrf.mxu2  ;;  %v7342_v47 = vadd.f32 %v15260_v26, %v7253_v17  ;;  %v6826_v59 = vpack.c.b16 %v6808_v55, %v6807_v18  ;;  %v6619_v0 = vld [vmem:[#allocation2 + $0x19a] sm:$0xff]  ;;  %v6314_v55 = vadd.f32 %v16613_v15, %v15112_v58  ;;  %v12738_v15 = vld [vmem:[%s16356_s9 + $0x150] sm:$0xff] }
 0x8ab   : > { %v7568_v9 = vmax.f32 %v7538_v12, %v7540_v21  ;;  %v6651_v23 = vpack.c.bf16 %v6619_v0, %v6619_v0  ;;  %v6553_v18 = vld [vmem:[#allocation2 + $0x181] sm:$0xff] }
 0x8ac   : > { %v7409_v41 = vadd.f32 %v7342_v47, %v6401_v31  ;;  %v7849_v47 = vpack.c.bf16 %v15331_v40, %v15331_v40  ;;  %v6406_v31 = vadd.f32 %v15226_v8, %v6317_v62  ;;  %v6403_v8 = vadd.f32 %v15214_v20, %v6314_v55 }
 0x8ad   : > { %7584 = vst [vmem:[#allocation3 + $0x28] sm:$0xff] %v7568_v9  ;;  %v6554_v9 = vld [vmem:[#allocation2 + $0x189] sm:$0xff] }
 0x8ae   : > { %v15418_v36 = vpop.f32.mrf.mxu0  ;;  %v15430_v32 = vpop.f32.mrf.mxu1  ;;  %v7898_v62 = vunpack.c.l.b16 %v7849_v47  ;;  %v7833_v47 = vpack.c.bf16 %v15366_v27, %v15366_v27  ;;  %v6555_v27 = vld [vmem:[#allocation2 + $0x199] sm:$0xff] }
 0x8af   : > { %v7254_v61 = vpop.f32.mrf.mxu3 }
 0x8b0   : > { %v7255_v34 = vadd.f32 %v7254_v61, %v15216_v22  ;;  %v6907_v22 = vunpack.c.l.b16 %v6651_v23  ;;  %v6908_v61 = vunpack.c.l.b16 %v6652_v54 }
 0x8b2   : > { %v7344_v7 = vadd.f32 %v15280_v16, %v7255_v34  ;;  %v6924_v0 = vpack.c.b16 %v6908_v61, %v6907_v22  ;;  %v15432_v40 = vpop.f32.mrf.mxu2  ;;  %v16614_v16 = vld [vmem:[#allocation72_spill] sm:$0xff] }
 0x8b3   : > { %v6319_v23 = vadd.f32 %v16614_v16, %v15118_v63 }
 0x8b4   : > { %v7599_v12 = vld [vmem:[#allocation3 + $0x20] ss:$2 sm:$0xff]  ;;  %v7613_v21 = vld [vmem:[#allocation3 + $0x21] ss:$2 sm:$0xff]  ;;  %7296 = vmatmul.bf16.gmra.mxu3 %v6826_v59  ;;  %v6586_v59 = vpack.c.bf16 %v6554_v9, %v6554_v9  ;;  %7395 = vmatmul.bf16.gmra.mxu0 %v6924_v0 }
 0x8b5   : > { %v7621_v29 = vmax.f32 %v7599_v12, %v7613_v21  ;;  %v7445_v21 = vadd.f32 %v15246_v19, %v7409_v41 }
 0x8b7   : > { %v7633_v26 = vmul.f32 %v15301_v52, %v7621_v29  ;;  %v7257_v17 = vpop.f32.mrf.mxu3  ;;  %v6585_v29 = vpack.c.bf16 %v6553_v18, %v6553_v18  ;;  %v7509_v34 = vmul.f32 0.01, %v7445_v21  ;;  %vm7477_vm0 = vcmp.ge.f32.partialorder %v7445_v21, 0.0 }
 0x8b8   : > { %v7258_v6 = vadd.f32 %v7257_v17, %v15228_v13  ;;  %v12739_v13 = vld [vmem:[%s16356_s9 + $0x158] sm:$0xff] }
 0x8b9   : > { %v7645_v12 = vadd.f32 %v15314_v53, %v7633_v26  ;;  %8200 = vmatpush.bf16.msrb.mxu3 %v12739_v13  ;;  %v7410_v26 = vadd.f32 %v7344_v7, %v6403_v8  ;;  %v6809_v20 = vunpack.c.l.b16 %v6585_v29  ;;  %v7541_v22 = vsel %vm7477_vm0, %v7445_v21, %v7509_v34  ;;  %v12737_v13 = vld [vmem:[%s16356_s9 + $0x148] sm:$0xff]  ;;  %v15454_v8 = vld [vmem:[#allocation2 + $0x198] sm:$0xff] }
 0x8ba   : > { %v7347_v58 = vadd.f32 %v15295_v28, %v7258_v6  ;;  %v6810_v28 = vunpack.c.l.b16 %v6586_v59  ;;  %v6408_v59 = vadd.f32 %v15237_v60, %v6319_v23  ;;  %v6556_v21 = vld [vmem:[#allocation2 + $0x1a1] sm:$0xff] }
 0x8bb   : > { %7674 = vst [vmem:[#allocation2 + $0x31] sm:$0xff] %v7645_v12  ;;  %v7850_v9 = vpack.c.bf16 %v7645_v12, %v7645_v12  ;;  %v7446_v61 = vadd.f32 %v15246_v19, %v7410_v26 }
 0x8bc   : > { %v7411_v54 = vadd.f32 %v7347_v58, %v6406_v31  ;;  %v6827_v12 = vpack.c.b16 %v6810_v28, %v6809_v20 }
 0x8bd   : > { %v7901_v41 = vunpack.c.l.b16 %v7850_v9  ;;  %8201 = vmatpush.bf16.msrb.mxu3 %v12738_v15  ;;  %v7510_v34 = vmul.f32 0.01, %v7446_v61  ;;  %vm7478_vm3 = vcmp.ge.f32.partialorder %v7446_v61, 0.0 }
 0x8be   : > { %v7447_v17 = vadd.f32 %v15246_v19, %v7411_v54 }
 0x8bf   : > { %v7259_v6 = vpop.f32.mrf.mxu3  ;;  %v7971_v55 = vpack.c.b16 %v7901_v41, %v7898_v62  ;;  %v15465_v62 = vpop.f32.mrf.mxu1 }
 0x8c0   : > { %vm7479_vm2 = vcmp.ge.f32.partialorder %v7447_v17, 0.0  ;;  %v7511_v18 = vmul.f32 0.01, %v7447_v17  ;;  %v7260_v63 = vadd.f32 %v7259_v6, %v15239_v43  ;;  %v15450_v43 = vpop.f32.mrf.mxu0  ;;  %v15467_v41 = vpop.f32.mrf.mxu2 }
 0x8c1   : > { %8175 = vmatmul.bf16.vlgmr.msra.gmra.mxu2 %v7971_v55  ;;  %8202 = vmatpush.bf16.msrb.mxu3 %v12737_v13  ;;  %v6587_v55 = vpack.c.bf16 %v6555_v27, %v6555_v27 }
 0x8c2   : > { %v7543_v31 = vsel %vm7479_vm2, %v7447_v17, %v7511_v18  ;;  %v7349_v7 = vadd.f32 %v15337_v3, %v7260_v63  ;;  %v7826_v58 = vld [vmem:[#allocation2 + $0x30] sm:$0xff]  ;;  %v15457_v3 = vunpack.c.l.b16 %v7833_v47  ;;  %v12736_v17 = vld [vmem:[%s16356_s9 + $0x140] sm:$0xff]  ;;  %v6588_v18 = vpack.c.bf16 %v6556_v21, %v6556_v21 }
 0x8c3   : > { %v7569_v29 = vmax.f32 %v7541_v22, %v7543_v31  ;;  %v7834_v60 = vpack.c.bf16 %v7826_v58, %v7826_v58  ;;  %v15452_v9 = vld [vmem:[#allocation2 + $0x30] sm:$0xff]  ;;  %v7542_v63 = vsel %vm7478_vm3, %v7446_v61, %v7510_v34  ;;  %v6811_v47 = vunpack.c.l.b16 %v6587_v55 }
 0x8c4   : > { %v7412_v0 = vadd.f32 %v7349_v7, %v6408_v59  ;;  %7301 = vmatmul.bf16.gmra.mxu3 %v6827_v12  ;;  %8966 = vst [vmem:[#allocation2 + $0x30] sm:$0x1] %v15454_v8  ;;  %v7858_v16 = vld [vmem:[#allocation2 + $0x32] sm:$0xff]  ;;  %v6812_v22 = vunpack.c.l.b16 %v6588_v18 }
 0x8c5   : > { %7585 = vst [vmem:[#allocation3 + $0x40] sm:$0xff] %v7569_v29  ;;  %v15459_v54 = vunpack.c.l.b16 %v7834_v60  ;;  %v15461_v23 = vld [vmem:[#allocation2 + $0x31] sm:$0xff]  ;;  %8203 = vmatpush.bf16.msrb.mxu3 %v12736_v17  ;;  %v16615_v60 = vld [vmem:[#allocation75_spill] sm:$0xff] }
 0x8c6   : > { %v15463_v28 = vld [vmem:[#allocation2 + $0x32] sm:$0xff]  ;;  %v7448_v26 = vadd.f32 %v15246_v19, %v7412_v0  ;;  %v6322_v0 = vadd.f32 %v16615_v60, %v15121_v25  ;;  %v6828_v27 = vpack.c.b16 %v6812_v22, %v6811_v47 }
 0x8c7   : > { %8970 = vst [vmem:[#allocation2 + $0x35] sm:$0x1f] %v15454_v8  ;;  %v7262_v15 = vpop.f32.mrf.mxu3  ;;  %v7970_v6 = vpack.c.b16 %v15459_v54, %v15457_v3  ;;  %v15479_v13 = vpop.f32.mrf.mxu1  ;;  %v16618_v60 = vld [vmem:[#allocation82_spill] sm:$0xff] }
 0x8c8   : > { %vm7480_vm4 = vcmp.ge.f32.partialorder %v7448_v26, 0.0  ;;  %v7512_v20 = vmul.f32 0.01, %v7448_v26  ;;  %v15476_v31 = vpop.f32.mrf.mxu0  ;;  %v7263_v7 = vadd.f32 %v7262_v15, %v15267_v57  ;;  %v15481_v29 = vpop.f32.mrf.mxu2  ;;  %v6411_v21 = vadd.f32 %v15265_v37, %v6322_v0 }
 0x8c9   : > { %8146 = vmatmul.bf16.vlgmr.msra.gmra.mxu1 %v7970_v6  ;;  %v16616_v6 = vld [vmem:[#allocation80_spill] sm:$0xff] }
 0x8ca   : > { %v7544_v59 = vsel %vm7480_vm4, %v7448_v26, %v7512_v20  ;;  %v7352_v61 = vadd.f32 %v15380_v14, %v7263_v7  ;;  %v6327_v57 = vadd.f32 %v16616_v6, %v15127_v48 }
 0x8cb   : > { %v7570_v12 = vmax.f32 %v7542_v63, %v7544_v59  ;;  %v16617_v63 = vld [vmem:[#allocation79_spill] sm:$0xff] }
 0x8cc   : > { %v7413_v15 = vadd.f32 %v7352_v61, %v6411_v21  ;;  %v6324_v14 = vadd.f32 %v16617_v63, %v15124_v1 }
 0x8cd   : > { %7586 = vst [vmem:[#allocation3 + $0x48] sm:$0xff] %v7570_v12  ;;  %v7866_v12 = vpack.c.bf16 %v7858_v16, %v7858_v16  ;;  %v6329_v16 = vadd.f32 %v16618_v60, %v15132_v42 }
 0x8ce   : > { %v7449_v22 = vadd.f32 %v15246_v19, %v7413_v15  ;;  %v6413_v1 = vadd.f32 %v15286_v5, %v6324_v14 }
 0x8cf   : > { %v7264_v58 = vpop.f32.mrf.mxu3  ;;  %v15499_v47 = vpop.f32.mrf.mxu1  ;;  %v15511_v0 = vunpack.c.l.b16 %v7866_v12 }
 0x8d0   : > { %v7265_v20 = vadd.f32 %v7264_v58, %v15288_v35  ;;  %v15490_v55 = vpop.f32.mrf.mxu0  ;;  %v15501_v48 = vpop.f32.mrf.mxu2  ;;  %v6416_v35 = vadd.f32 %v15306_v2, %v6327_v57  ;;  %vm7481_vm1 = vcmp.ge.f32.partialorder %v7449_v22, 0.0 }
 0x8d1   : > { %v7972_v5 = vpack.c.b16 %v15511_v0, %v15385_v46 }
 0x8d2   : > { %v7354_v7 = vadd.f32 %v15401_v44, %v7265_v20 }
 0x8d4   : > { %v7601_v34 = vld [vmem:[#allocation3 + $0x40] ss:$2 sm:$0xff]  ;;  %v7614_v26 = vld [vmem:[#allocation3 + $0x41] ss:$2 sm:$0xff]  ;;  %7306 = vmatmul.bf16.gmra.mxu3 %v6828_v27  ;;  %v7513_v27 = vmul.f32 0.01, %v7449_v22  ;;  %v7414_v61 = vadd.f32 %v7354_v7, %v6413_v1 }
 0x8d5   : > { %v7622_v17 = vmax.f32 %v7601_v34, %v7614_v26  ;;  %v6418_v26 = vadd.f32 %v15349_v33, %v6329_v16 }
 0x8d6   : > { %v7450_v42 = vadd.f32 %v15246_v19, %v7414_v61 }
 0x8d7   : > { %v7634_v18 = vmul.f32 %v15301_v52, %v7622_v17  ;;  %v7267_v25 = vpop.f32.mrf.mxu3  ;;  %v7545_v17 = vsel %vm7481_vm1, %v7449_v22, %v7513_v27 }
 0x8d8   : > { %v7268_v37 = vadd.f32 %v7267_v25, %v15308_v24  ;;  %v7366_v34 = vpop.f32.mrf.mxu0  ;;  %v7514_v7 = vmul.f32 0.01, %v7450_v42  ;;  %vm7482_vm6 = vcmp.ge.f32.partialorder %v7450_v42, 0.0 }
 0x8d9   : > { %v15497_v59 = vadd.f32 %v15314_v53, %v7634_v18 }
 0x8da   : > { %v7357_v58 = vadd.f32 %v15418_v36, %v7268_v37  ;;  %v15524_v37 = vpop.f32.mrf.mxu2  ;;  %v7546_v27 = vsel %vm7482_vm6, %v7450_v42, %v7514_v7 }
 0x8db   : > { %7675 = vst [vmem:[#allocation2 + $0x49] sm:$0xff] %v15497_v59 }
 0x8dc   : > { %v7415_v24 = vadd.f32 %v7357_v58, %v6416_v35 }
 0x8de   : > { %v7451_v2 = vadd.f32 %v15246_v19, %v7415_v24 }
 0x8df   : > { %v7269_v21 = vpop.f32.mrf.mxu3 }
 0x8e0   : > { %vm7483_vm5 = vcmp.ge.f32.partialorder %v7451_v2, 0.0  ;;  %v7515_v44 = vmul.f32 0.01, %v7451_v2  ;;  %v7270_v36 = vadd.f32 %v7269_v21, %v15351_v49  ;;  %v15522_v49 = vpop.f32.mrf.mxu1 }
 0x8e2   : > { %v7547_v6 = vsel %vm7483_vm5, %v7451_v2, %v7515_v44  ;;  %v7359_v57 = vadd.f32 %v15450_v43, %v7270_v36  ;;  %v7827_v15 = vld [vmem:[#allocation2 + $0x48] sm:$0xff]  ;;  %v7368_v2 = vpop.f32.mrf.mxu0  ;;  %v15543_v36 = vpop.f32.mrf.mxu2 }
 0x8e3   : > { %v7859_v20 = vld [vmem:[#allocation2 + $0x4a] sm:$0xff]  ;;  %v7571_v18 = vmax.f32 %v7545_v17, %v7547_v6  ;;  %v7835_v25 = vpack.c.bf16 %v7827_v15, %v7827_v15  ;;  %v16619_v17 = vld [vmem:[#allocation83_spill] sm:$0xff] }
 0x8e4   : > { %v7867_v63 = vpack.c.bf16 %v7859_v20, %v7859_v20  ;;  %v15520_v14 = vld [vmem:[#allocation2 + $0x48] sm:$0xff]  ;;  %v7416_v33 = vadd.f32 %v7359_v57, %v6418_v26  ;;  %8204 = vmatmul.bf16.vlgmr.msrb.gmra.mxu3 %v7972_v5  ;;  %v6332_v6 = vadd.f32 %v16619_v17, %v15135_v51 }
 0x8e5   : > { %8967 = vst [vmem:[#allocation2 + $0x48] sm:$0x1] %v15454_v8  ;;  %v15527_v12 = vunpack.c.l.b16 %v7835_v25  ;;  %v15531_v43 = vld [vmem:[#allocation2 + $0x49] sm:$0xff] }
 0x8e6   : > { %7587 = vst [vmem:[#allocation3 + $0x60] sm:$0xff] %v7571_v18  ;;  %v15529_v35 = vunpack.c.l.b16 %v7867_v63  ;;  %v15533_v22 = vld [vmem:[#allocation2 + $0x4a] sm:$0xff]  ;;  %v7452_v58 = vadd.f32 %v15246_v19, %v7416_v33  ;;  %v6421_v15 = vadd.f32 %v15393_v4, %v6332_v6  ;;  %v16620_v63 = vld [vmem:[#allocation86_spill] sm:$0xff] }
 0x8e7   : > { %8971 = vst [vmem:[#allocation2 + $0x4d] sm:$0x1f] %v15454_v8  ;;  %v7272_v1 = vpop.f32.mrf.mxu3  ;;  %v8228_v24 = vpack.c.b16 %v15527_v12, %v15459_v54  ;;  %v6337_v33 = vadd.f32 %v16620_v63, %v15143_v10  ;;  %v16621_v4 = vld [vmem:[#allocation26_spill] sm:$0xff]  ;;  %v7851_v10 = vpack.c.bf16 %v15497_v59, %v15497_v59  ;;  %v12752_v54 = vld [vmem:[%s16356_s9 + $0x1c0] sm:$0xff] }
 0x8e8   : > { %v8230_v60 = vpack.c.b16 %v15529_v35, %v15511_v0  ;;  %vm7484_vm7 = vcmp.ge.f32.partialorder %v7452_v58, 0.0  ;;  %v7516_v16 = vmul.f32 0.01, %v7452_v58  ;;  %v15541_v44 = vpop.f32.mrf.mxu1  ;;  %v7273_v26 = vadd.f32 %v7272_v1, %v15395_v30  ;;  %v12760_v0 = vld [vmem:[%s16356_s9 + $0x200] sm:$0xff] }
 0x8ea   : > { %v7548_v61 = vsel %vm7484_vm7, %v7452_v58, %v7516_v16  ;;  %v7362_v57 = vadd.f32 %v15476_v31, %v7273_v26  ;;  %v15550_v18 = vpop.f32.mrf.mxu0  ;;  %v15558_v51 = vpop.f32.mrf.mxu2  ;;  %v6334_v31 = vadd.f32 %v16621_v4, %v15140_v50  ;;  %v16622_v50 = vld [vmem:[#allocation30_spill] sm:$0xff] }
 0x8eb   : > { %v7572_v21 = vmax.f32 %v7546_v27, %v7548_v61 }
 0x8ec   : > { %v7417_v7 = vadd.f32 %v7362_v57, %v6421_v15  ;;  %v6423_v6 = vadd.f32 %v15405_v11, %v6334_v31  ;;  %v7904_v15 = vunpack.c.l.b16 %v7851_v10 }
 0x8ed   : > { %7588 = vst [vmem:[#allocation3 + $0x68] sm:$0xff] %v7572_v21  ;;  %v6426_v21 = vadd.f32 %v15430_v32, %v6337_v33 }
 0x8ef   : > { %v7274_v5 = vpop.f32.mrf.mxu3 }
 0x8f0   : > { %v7275_v58 = vadd.f32 %v7274_v5, %v15407_v38  ;;  %v15556_v16 = vpop.f32.mrf.mxu1  ;;  %v7453_v38 = vadd.f32 %v15246_v19, %v7417_v7 }
 0x8f2   : > { %v7364_v26 = vadd.f32 %v15490_v55, %v7275_v58  ;;  %vm7485_vm8 = vcmp.ge.f32.partialorder %v7453_v38, 0.0  ;;  %v15582_v7 = vpop.f32.mrf.mxu2 }
 0x8f4   : > { %v7603_v20 = vld [vmem:[#allocation3 + $0x60] ss:$2 sm:$0xff]  ;;  %v7615_v42 = vld [vmem:[#allocation3 + $0x61] ss:$2 sm:$0xff]  ;;  %v7418_v59 = vadd.f32 %v7364_v26, %v6423_v6 }
 0x8f5   : > { %v7623_v25 = vmax.f32 %v7603_v20, %v7615_v42  ;;  %v7517_v42 = vmul.f32 0.01, %v7453_v38 }
 0x8f7   : > { %v7635_v30 = vmul.f32 %v15301_v52, %v7623_v25  ;;  %v7277_v1 = vpop.f32.mrf.mxu3  ;;  %v15575_v25 = vpop.f32.mrf.mxu0  ;;  %v7549_v58 = vsel %vm7485_vm8, %v7453_v38, %v7517_v42 }
 0x8f8   : > { %v7278_v27 = vadd.f32 %v7277_v1, %v15432_v40  ;;  %v6339_v40 = vadd.f32 %v16622_v50, %v15148_v39  ;;  %v15580_v39 = vpop.f32.mrf.mxu1 }
 0x8f9   : > { %v7647_v61 = vadd.f32 %v15314_v53, %v7635_v30  ;;  %v7454_v30 = vadd.f32 %v15246_v19, %v7418_v59 }
 0x8fa   : > { %v7367_v5 = vadd.f32 %v7366_v34, %v7278_v27  ;;  %v6428_v33 = vadd.f32 %v15465_v62, %v6339_v40 }
 0x8fb   : > { %7676 = vst [vmem:[#allocation2 + $0x61] sm:$0xff] %v7647_v61  ;;  %v7852_v17 = vpack.c.bf16 %v7647_v61, %v7647_v61  ;;  %vm7486_vm10 = vcmp.ge.f32.partialorder %v7454_v30, 0.0 }
 0x8fc   : > { %v7419_v57 = vadd.f32 %v7367_v5, %v6426_v21 }
 0x8fd   : > { %v15572_v20 = vunpack.c.l.b16 %v7852_v17  ;;  %v7518_v17 = vmul.f32 0.01, %v7454_v30 }
 0x8fe   : > { %v7455_v32 = vadd.f32 %v15246_v19, %v7419_v57 }
 0x8ff   : > { %v7279_v55 = vpop.f32.mrf.mxu3  ;;  %v7974_v34 = vpack.c.b16 %v15572_v20, %v7904_v15  ;;  %v7376_v42 = vpop.f32.mrf.mxu0  ;;  %v7550_v59 = vsel %vm7486_vm10, %v7454_v30, %v7518_v17  ;;  %v16624_v17 = vld [vmem:[#allocation16_spill] sm:$0xff] }
 0x900   : > { %vm7487_vm9 = vcmp.ge.f32.partialorder %v7455_v32, 0.0  ;;  %v7519_v63 = vmul.f32 0.01, %v7455_v32  ;;  %v7280_v11 = vadd.f32 %v7279_v55, %v15467_v41 }
 0x901   : > { %8180 = vmatmul.bf16.gmra.mxu2 %v7974_v34  ;;  %v15602_v34 = vpop.f32.mrf.mxu1 }
 0x902   : > { %v7551_v1 = vsel %vm7487_vm9, %v7455_v32, %v7519_v63  ;;  %v7369_v4 = vadd.f32 %v7368_v2, %v7280_v11  ;;  %v7828_v31 = vld [vmem:[#allocation2 + $0x60] sm:$0xff]  ;;  %v15604_v63 = vpop.f32.mrf.mxu2 }
 0x903   : > { %v7860_v27 = vld [vmem:[#allocation2 + $0x62] sm:$0xff]  ;;  %v7573_v10 = vmax.f32 %v7549_v58, %v7551_v1  ;;  %v7836_v21 = vpack.c.bf16 %v7828_v31, %v7828_v31  ;;  %v16623_v58 = vld [vmem:[#allocation89_spill] sm:$0xff] }
 0x904   : > { %v15585_v61 = vld [vmem:[#allocation2 + $0x60] sm:$0xff]  ;;  %v7868_v26 = vpack.c.bf16 %v7860_v27, %v7860_v27  ;;  %v7420_v5 = vadd.f32 %v7369_v4, %v6428_v33  ;;  %v6342_v1 = vadd.f32 %v16623_v58, %v15151_v45 }
 0x905   : > { %8968 = vst [vmem:[#allocation2 + $0x60] sm:$0x1] %v15454_v8  ;;  %v15588_v62 = vld [vmem:[#allocation2 + $0x61] sm:$0xff]  ;;  %v15593_v38 = vunpack.c.l.b16 %v7836_v21 }
 0x906   : > { %v15590_v41 = vld [vmem:[#allocation2 + $0x62] sm:$0xff]  ;;  %7589 = vst [vmem:[#allocation3 + $0x80] sm:$0xff] %v7573_v10  ;;  %v15595_v2 = vunpack.c.l.b16 %v7868_v26  ;;  %v7456_v6 = vadd.f32 %v15246_v19, %v7420_v5  ;;  %v6431_v27 = vadd.f32 %v15479_v13, %v6342_v1 }
 0x907   : > { %8972 = vst [vmem:[#allocation2 + $0x65] sm:$0x1f] %v15454_v8  ;;  %v7282_v57 = vpop.f32.mrf.mxu3  ;;  %v7973_v50 = vpack.c.b16 %v15593_v38, %v15527_v12  ;;  %v7378_v31 = vpop.f32.mrf.mxu0  ;;  %v12744_v12 = vld [vmem:[%s16356_s9 + $0x180] sm:$0xff] }
 0x908   : > { %v7975_v40 = vpack.c.b16 %v15595_v2, %v15529_v35  ;;  %vm7488_vm11 = vcmp.ge.f32.partialorder %v7456_v6, 0.0  ;;  %v7520_v15 = vmul.f32 0.01, %v7456_v6  ;;  %v7283_v11 = vadd.f32 %v7282_v57, %v15481_v29 }
 0x909   : > { %8151 = vmatmul.bf16.gmra.mxu1 %v7973_v50  ;;  %v15611_v26 = vpop.f32.mrf.mxu1 }
 0x90a   : > { %8209 = vmatmul.bf16.gmra.mxu3 %v7975_v40  ;;  %v7552_v32 = vsel %vm7488_vm11, %v7456_v6, %v7520_v15  ;;  %v7372_v4 = vadd.f32 %v15550_v18, %v7283_v11  ;;  %v15613_v5 = vpop.f32.mrf.mxu2  ;;  %v16625_v6 = vld [vmem:[#allocation90_spill] sm:$0xff]  ;;  %v16626_v18 = vld [vmem:[#allocation51_spill] sm:$0xff] }
 0x90b   : > { %v7574_v55 = vmax.f32 %v7550_v59, %v7552_v32  ;;  %v6347_v50 = vadd.f32 %v16625_v6, %v16624_v17  ;;  %v16627_v15 = vld [vmem:[#allocation34_spill] sm:$0xff] }
 0x90c   : > { %v7421_v29 = vadd.f32 %v7372_v4, %v6431_v27  ;;  %v6344_v59 = vadd.f32 %v16627_v15, %v16626_v18 }
 0x90d   : > { %7590 = vst [vmem:[#allocation3 + $0x88] sm:$0xff] %v7574_v55  ;;  %v6436_v55 = vadd.f32 %v15522_v49, %v6347_v50 }
 0x90e   : > { %v7457_v11 = vadd.f32 %v15246_v19, %v7421_v29 }
 0x90f   : > { %v7284_v33 = vpop.f32.mrf.mxu3  ;;  %v7381_v27 = vpop.f32.mrf.mxu0 }
 0x910   : > { %v7285_v57 = vadd.f32 %v7284_v33, %v15501_v48  ;;  %v6433_v48 = vadd.f32 %v15499_v47, %v6344_v59  ;;  %vm7489_vm12 = vcmp.ge.f32.partialorder %v7457_v11, 0.0 }
 0x912   : > { %v7374_v58 = vadd.f32 %v15575_v25, %v7285_v57  ;;  %v15636_v29 = vpop.f32.mrf.mxu2 }
 0x914   : > { %v7605_v10 = vld [vmem:[#allocation3 + $0x80] ss:$2 sm:$0xff]  ;;  %v7616_v30 = vld [vmem:[#allocation3 + $0x81] ss:$2 sm:$0xff]  ;;  %v7422_v6 = vadd.f32 %v7374_v58, %v6433_v48 }
 0x915   : > { %v7624_v21 = vmax.f32 %v7605_v10, %v7616_v30  ;;  %v16628_v10 = vld [vmem:[#allocation14_spill] sm:$0xff]  ;;  %v16629_v30 = vld [vmem:[#allocation91_spill] sm:$0xff] }
 0x916   : > { %v7458_v18 = vadd.f32 %v15246_v19, %v7422_v6 }
 0x917   : > { %v7636_v45 = vmul.f32 %v15301_v52, %v7624_v21  ;;  %v7287_v40 = vpop.f32.mrf.mxu3  ;;  %v6349_v21 = vadd.f32 %v16629_v30, %v16628_v10 }
 0x918   : > { %v7288_v13 = vadd.f32 %v7287_v40, %v15524_v37  ;;  %v7521_v37 = vmul.f32 0.01, %v7457_v11  ;;  %vm7490_vm14 = vcmp.ge.f32.partialorder %v7458_v18, 0.0 }
 0x919   : > { %v7648_v32 = vadd.f32 %v15314_v53, %v7636_v45  ;;  %v6438_v45 = vadd.f32 %v15541_v44, %v6349_v21 }
 0x91a   : > { %v7377_v1 = vadd.f32 %v7376_v42, %v7288_v13  ;;  %v15634_v42 = vpop.f32.mrf.mxu1  ;;  %v7553_v40 = vsel %vm7489_vm12, %v7457_v11, %v7521_v37 }
 0x91b   : > { %7677 = vst [vmem:[#allocation2 + $0x79] sm:$0xff] %v7648_v32  ;;  %v7853_v4 = vpack.c.bf16 %v7648_v32, %v7648_v32 }
 0x91c   : > { %v7423_v33 = vadd.f32 %v7377_v1, %v6436_v55 }
 0x91d   : > { %v15629_v17 = vunpack.c.l.b16 %v7853_v4 }
 0x91e   : > { %v7459_v49 = vadd.f32 %v15246_v19, %v7423_v33  ;;  %v7522_v19 = vmul.f32 0.01, %v7458_v18  ;;  %v7383_v33 = vpop.f32.mrf.mxu0 }
 0x91f   : > { %v7289_v50 = vpop.f32.mrf.mxu3  ;;  %v8232_v25 = vpack.c.b16 %v15629_v17, %v15572_v20 }
 0x920   : > { %vm7491_vm13 = vcmp.ge.f32.partialorder %v7459_v49, 0.0  ;;  %v7523_v47 = vmul.f32 0.01, %v7459_v49  ;;  %v7290_v57 = vadd.f32 %v7289_v50, %v15543_v36  ;;  %v7554_v50 = vsel %vm7490_vm14, %v7458_v18, %v7522_v19  ;;  %v16632_v19 = vld [vmem:[#allocation23_spill] sm:$0xff] }
 0x922   : > { %v7555_v15 = vsel %vm7491_vm13, %v7459_v49, %v7523_v47  ;;  %v7379_v59 = vadd.f32 %v7378_v31, %v7290_v57  ;;  %v7829_v13 = vld [vmem:[#allocation2 + $0x78] sm:$0xff]  ;;  %v15652_v31 = vld [vmem:[%s16353_s6] ss:$0 sm:$0xff]  ;;  %v15659_v6 = vpop.f32.mrf.mxu1  ;;  %v15661_v49 = vpop.f32.mrf.mxu2 }
 0x923   : > { %v7861_v32 = vld [vmem:[#allocation2 + $0x7a] sm:$0xff]  ;;  %v7575_v58 = vmax.f32 %v7553_v40, %v7555_v15  ;;  %v7837_v1 = vpack.c.bf16 %v7829_v13, %v7829_v13 }
 0x924   : > { %v15641_v55 = vld [vmem:[#allocation2 + $0x79] sm:$0xff]  ;;  %v7869_v4 = vpack.c.bf16 %v7861_v32, %v7861_v32  ;;  %v7424_v48 = vadd.f32 %v7379_v59, %v6438_v45  ;;  %v16631_v59 = vld [vmem:[#allocation92_spill] sm:$0xff] }
 0x925   : > { %8963 = vst [vmem:[#allocation2 + $0x78] sm:$0xff] %v15454_v8  ;;  %v15645_v36 = vunpack.c.l.b16 %v7837_v1  ;;  %v16630_v15 = vld [vmem:[#allocation19_spill] sm:$0xff] }
 0x926   : > { %8964 = vst [vmem:[#allocation2 + $0x80] sm:$0x3] %v15454_v8  ;;  %v15647_v44 = vunpack.c.l.b16 %v7869_v4  ;;  %v7460_v11 = vadd.f32 %v15652_v31, %v7424_v48  ;;  %v6352_v13 = vadd.f32 %v16631_v59, %v16630_v15  ;;  %v7386_v32 = vpop.f32.mrf.mxu0 }
 0x927   : > { %7591 = vst [vmem:[#allocation3 + $0xa0] sm:$0xff] %v7575_v58  ;;  %v7292_v10 = vpop.f32.mrf.mxu3  ;;  %v16649_v35 = vpack.c.b16 %v15645_v36, %v15593_v38  ;;  %v12823_v38 = vld [vmem:[%s16360_s13 + $0x1b8] sm:$0xff] }
 0x928   : > { %vm7492_vm15 = vcmp.ge.f32.partialorder %v7460_v11, 0.0  ;;  %v7524_v37 = vmul.f32 0.01, %v7460_v11  ;;  %v7293_v45 = vadd.f32 %v7292_v10, %v15558_v51  ;;  %v6441_v48 = vadd.f32 %v15556_v16, %v6352_v13  ;;  %9849 = vmatpush.bf16.msrb.mxu0 %v12823_v38 }
 0x92a   : > { %v7556_v47 = vsel %vm7492_vm15, %v7460_v11, %v7524_v37  ;;  %v7382_v58 = vadd.f32 %v7381_v27, %v7293_v45  ;;  %v15666_v1 = vpop.f32.mrf.mxu2  ;;  %v15668_v4 = vpop.f32.mrf.mxu1  ;;  %v16633_v11 = vld [vmem:[#allocation94_spill] sm:$0xff]  ;;  %v16635_v27 = vld [vmem:[#allocation93_spill] sm:$0xff] }
 0x92b   : > { %v7576_v57 = vmax.f32 %v7554_v50, %v7556_v47  ;;  %v6357_v37 = vadd.f32 %v16633_v11, %v16632_v19 }
 0x92c   : > { %v7425_v50 = vadd.f32 %v7382_v58, %v6441_v48  ;;  %v16636_v48 = vld [vmem:[#allocation21_spill] sm:$0xff] }
 0x92d   : > { %7592 = vst [vmem:[#allocation3 + $0xa8] sm:$0xff] %v7576_v57  ;;  %v16634_v57 = vld [vmem:[#allocation17_spill] sm:$0xff]  ;;  %v6446_v16 = vadd.f32 %v15602_v34, %v6357_v37 }
 0x92e   : > { %v6354_v45 = vadd.f32 %v16635_v27, %v16634_v57  ;;  %v7388_v19 = vpop.f32.mrf.mxu0 }
 0x92f   : > { %v7294_v40 = vpop.f32.mrf.mxu3 }
 0x930   : > { %v7295_v51 = vadd.f32 %v7294_v40, %v15582_v7  ;;  %v6443_v7 = vadd.f32 %v15580_v39, %v6354_v45 }
 0x932   : > { %v15682_v40 = vpop.f32.mrf.mxu2 }
 0x934   : > { %v7607_v21 = vld [vmem:[#allocation3 + $0xa0] ss:$2 sm:$0xff]  ;;  %v7617_v30 = vld [vmem:[#allocation3 + $0xa1] ss:$2 sm:$0xff] }
 0x935   : > { %v7625_v18 = vmax.f32 %v7607_v21, %v7617_v30  ;;  %v7461_v30 = vadd.f32 %v15652_v31, %v7425_v50  ;;  %v7384_v21 = vadd.f32 %v7383_v33, %v7295_v51 }
 0x937   : > { %v7637_v10 = vmul.f32 %v15301_v52, %v7625_v18  ;;  %v7297_v47 = vpop.f32.mrf.mxu3  ;;  %v16637_v18 = vld [vmem:[#allocation95_spill] sm:$0xff]  ;;  %v7525_v34 = vmul.f32 0.01, %v7461_v30  ;;  %v7426_v37 = vadd.f32 %v7384_v21, %v6443_v7  ;;  %vm7493_vm0 = vcmp.ge.f32.partialorder %v7461_v30, 0.0  ;;  %v7391_v7 = vpop.f32.mrf.mxu0 }
 0x938   : > { %v7298_v15 = vadd.f32 %v7297_v47, %v15604_v63  ;;  %v6359_v11 = vadd.f32 %v16637_v18, %v16636_v48 }
 0x939   : > { %v7649_v59 = vadd.f32 %v15314_v53, %v7637_v10  ;;  %v15688_v53 = vpop.f32.mrf.mxu1  ;;  %v7557_v47 = vsel %vm7493_vm0, %v7461_v30, %v7525_v34  ;;  %v7462_v57 = vadd.f32 %v15652_v31, %v7426_v37 }
 0x93a   : > { %v7387_v13 = vadd.f32 %v7386_v32, %v7298_v15  ;;  %v6448_v10 = vadd.f32 %v15611_v26, %v6359_v11  ;;  %v12711_v26 = vld [vmem:[%s16356_s9 + $0x78] sm:$0xff] }
 0x93b   : > { %7678 = vst [vmem:[#allocation2 + $0x91] sm:$0xff] %v7649_v59  ;;  %v7854_v58 = vpack.c.bf16 %v7649_v59, %v7649_v59  ;;  %v7526_v30 = vmul.f32 0.01, %v7462_v57  ;;  %vm7494_vm3 = vcmp.ge.f32.partialorder %v7462_v57, 0.0  ;;  %8422 = vmatpush.bf16.msrb.mxu2 %v12711_v26 }
 0x93c   : > { %v7427_v52 = vadd.f32 %v7387_v13, %v6446_v16 }
 0x93d   : > { %v15686_v63 = vunpack.c.l.b16 %v7854_v58 }
 0x93e   : > { %v7463_v33 = vadd.f32 %v15652_v31, %v7427_v52 }
 0x93f   : > { %v7299_v32 = vpop.f32.mrf.mxu3  ;;  %v7977_v50 = vpack.c.b16 %v15686_v63, %v15629_v17 }
 0x940   : > { %vm7495_vm2 = vcmp.ge.f32.partialorder %v7463_v33, 0.0  ;;  %v7527_v39 = vmul.f32 0.01, %v7463_v33  ;;  %v7300_v51 = vadd.f32 %v7299_v32, %v15613_v5  ;;  %v12719_v5 = vld [vmem:[%s16356_s9 + $0xb8] sm:$0xff] }
 0x941   : > { %8185 = vmatmul.bf16.gmra.mxu2 %v7977_v50  ;;  %8451 = vmatpush.bf16.msra.mxu3 %v12719_v5 }
 0x942   : > { %v7559_v27 = vsel %vm7495_vm2, %v7463_v33, %v7527_v39  ;;  %v7389_v45 = vadd.f32 %v7388_v19, %v7300_v51  ;;  %v7830_v15 = vld [vmem:[#allocation2 + $0x90] sm:$0xff]  ;;  %v7558_v39 = vsel %vm7494_vm3, %v7462_v57, %v7526_v30 }
 0x943   : > { %v7862_v59 = vld [vmem:[#allocation2 + $0x92] sm:$0xff]  ;;  %v7577_v16 = vmax.f32 %v7557_v47, %v7559_v27  ;;  %v7838_v21 = vpack.c.bf16 %v7830_v15, %v7830_v15  ;;  %v7393_v27 = vpop.f32.mrf.mxu0  ;;  %v16638_v15 = vld [vmem:[#allocation27_spill] sm:$0xff] }
 0x944   : > { %v7870_v13 = vpack.c.bf16 %v7862_v59, %v7862_v59  ;;  %v7428_v58 = vadd.f32 %v7389_v45, %v6448_v10  ;;  %v8176_v11 = vpop.f32.mrf.mxu2  ;;  %v16639_v59 = vld [vmem:[#allocation96_spill] sm:$0xff] }
 0x945   : > { %7593 = vst [vmem:[#allocation3 + $0xc0] sm:$0xff] %v7577_v16  ;;  %v15696_v52 = vunpack.c.l.b16 %v7838_v21  ;;  %v6362_v16 = vadd.f32 %v16639_v59, %v16638_v15  ;;  %v12703_v59 = vld [vmem:[%s16356_s9 + $0x38] sm:$0xff] }
 0x946   : > { %v15698_v48 = vunpack.c.l.b16 %v7870_v13  ;;  %v7464_v19 = vadd.f32 %v15652_v31, %v7428_v58  ;;  %v8147_v18 = vpop.f32.mrf.mxu1  ;;  %8393 = vmatpush.bf16.msrb.mxu1 %v12703_v59 }
 0x947   : > { %v7302_v34 = vpop.f32.mrf.mxu3  ;;  %v7976_v37 = vpack.c.b16 %v15696_v52, %v15645_v36  ;;  %v15711_v32 = vadd.f32 %v8176_v11, %v8147_v18  ;;  %v6451_v13 = vadd.f32 %v15634_v42, %v6362_v16  ;;  %v16640_v18 = vld [vmem:[#allocation76_spill] sm:$0xff]  ;;  %v16641_v11 = vld [vmem:[#allocation98_spill] sm:$0xff]  ;;  %v16643_v42 = vld [vmem:[#allocation97_spill] sm:$0xff] }
 0x948   : > { %v7978_v33 = vpack.c.b16 %v15698_v48, %v15647_v44  ;;  %vm7496_vm4 = vcmp.ge.f32.partialorder %v7464_v19, 0.0  ;;  %v7528_v50 = vmul.f32 0.01, %v7464_v19  ;;  %v7303_v47 = vadd.f32 %v7302_v34, %v15636_v29  ;;  %v15723_v29 = vld [vmem:[%s16354_s7] ss:$0 sm:$0xff]  ;;  %v12718_v16 = vld [vmem:[%s16356_s9 + $0xb0] sm:$0xff] }
 0x949   : > { %8156 = vmatmul.bf16.gmra.mxu1 %v7976_v37  ;;  %v6367_v37 = vadd.f32 %v16641_v11, %v16640_v18  ;;  %v12709_v18 = vld [vmem:[%s16356_s9 + $0x68] sm:$0xff]  ;;  %8452 = vmatpush.bf16.msra.mxu3 %v12718_v16 }
 0x94a   : > { %8214 = vmatmul.bf16.gmra.mxu3 %v7978_v33  ;;  %v7560_v51 = vsel %vm7496_vm4, %v7464_v19, %v7528_v50  ;;  %v7392_v21 = vadd.f32 %v7391_v7, %v7303_v47  ;;  %v16642_v33 = vld [vmem:[#allocation25_spill] sm:$0xff] }
 0x94b   : > { %v7578_v10 = vmax.f32 %v7558_v39, %v7560_v51  ;;  %v7396_v34 = vpop.f32.mrf.mxu0  ;;  %v6364_v50 = vadd.f32 %v16643_v42, %v16642_v33  ;;  %v15732_v51 = vld [vmem:[%s16355_s8] ss:$0 sm:$0xff] }
 0x94c   : > { %v7429_v57 = vadd.f32 %v7392_v21, %v6451_v13 }
 0x94d   : > { %7594 = vst [vmem:[#allocation3 + $0xc8] sm:$0xff] %v7578_v10  ;;  %v6456_v10 = vadd.f32 %v15668_v4, %v6367_v37  ;;  %v6453_v4 = vadd.f32 %v15659_v6, %v6364_v50 }
 0x94e   : > { %v7465_v47 = vadd.f32 %v15652_v31, %v7429_v57 }
 0x94f   : > { %v7304_v45 = vpop.f32.mrf.mxu3 }
 0x950   : > { %v7305_v30 = vadd.f32 %v7304_v45, %v15661_v49  ;;  %v7529_v37 = vmul.f32 0.01, %v7465_v47  ;;  %vm7497_vm1 = vcmp.ge.f32.partialorder %v7465_v47, 0.0 }
 0x952   : > { %v7394_v45 = vadd.f32 %v7393_v27, %v7305_v30  ;;  %v16645_v27 = vld [vmem:[#allocation99_spill] sm:$0xff]  ;;  %v12717_v30 = vld [vmem:[%s16356_s9 + $0xa8] sm:$0xff] }
 0x953   : > { %v7398_v50 = vpop.f32.mrf.mxu0  ;;  %8453 = vmatpush.bf16.msra.mxu3 %v12717_v30 }
 0x954   : > { %v7609_v58 = vld [vmem:[#allocation3 + $0xc0] ss:$2 sm:$0xff]  ;;  %v7618_v26 = vld [vmem:[#allocation3 + $0xc1] ss:$2 sm:$0xff]  ;;  %v7430_v57 = vadd.f32 %v7394_v45, %v6453_v4 }
 0x955   : > { %v7626_v5 = vmax.f32 %v7609_v58, %v7618_v26  ;;  %v16644_v58 = vld [vmem:[#allocation105_spill] sm:$0xff] }
 0x956   : > { %v6369_v26 = vadd.f32 %v16645_v27, %v16644_v58  ;;  %v7466_v45 = vadd.f32 %v15652_v31, %v7430_v57  ;;  %v12707_v58 = vld [vmem:[%s16356_s9 + $0x58] sm:$0xff] }
 0x957   : > { %v7638_v19 = vmul.f32 %v15723_v29, %v7626_v5  ;;  %v7307_v7 = vpop.f32.mrf.mxu3  ;;  %v12702_v5 = vld [vmem:[%s16356_s9 + $0x30] sm:$0xff] }
 0x958   : > { %v7308_v39 = vadd.f32 %v7307_v7, %v15666_v1  ;;  %v12710_v1 = vld [vmem:[%s16356_s9 + $0x70] sm:$0xff]  ;;  %v6458_v42 = vadd.f32 %v15688_v53, %v6369_v26  ;;  %8394 = vmatpush.bf16.msrb.mxu1 %v12702_v5  ;;  %vm7498_vm6 = vcmp.ge.f32.partialorder %v7466_v45, 0.0  ;;  %v7530_v5 = vmul.f32 0.01, %v7466_v45 }
 0x959   : > { %v7650_v49 = vadd.f32 %v15732_v51, %v7638_v19  ;;  %8423 = vmatpush.bf16.msrb.mxu2 %v12710_v1 }
 0x95a   : > { %v7397_v15 = vadd.f32 %v7396_v34, %v7308_v39  ;;  %v12701_v39 = vld [vmem:[%s16356_s9 + $0x28] sm:$0xff] }
 0x95b   : > { %7679 = vst [vmem:[#allocation2 + $0xa9] sm:$0xff] %v7650_v49  ;;  %v7855_v21 = vpack.c.bf16 %v7650_v49, %v7650_v49  ;;  %v12708_v49 = vld [vmem:[%s16356_s9 + $0x60] sm:$0xff] }
 0x95c   : > { %v7431_v13 = vadd.f32 %v7397_v15, %v6456_v10  ;;  %v7561_v10 = vsel %vm7497_vm1, %v7465_v47, %v7529_v37  ;;  %8395 = vmatpush.bf16.msrb.mxu1 %v12701_v39  ;;  %v12700_v47 = vld [vmem:[%s16356_s9 + $0x20] sm:$0xff]  ;;  %v12715_v37 = vld [vmem:[%s16356_s9 + $0x98] sm:$0xff]  ;;  %v12705_v39 = vld [vmem:[%s16356_s9 + $0x48] sm:$0xff] }
 0x95d   : > { %v15755_v11 = vunpack.c.l.b16 %v7855_v21  ;;  %8424 = vmatpush.bf16.msrb.mxu2 %v12709_v18 }
 0x95e   : > { %v7467_v6 = vadd.f32 %v15652_v31, %v7431_v13 }
 0x95f   : > { %v7309_v19 = vpop.f32.mrf.mxu3  ;;  %v8235_v34 = vpack.c.b16 %v15755_v11, %v15686_v63  ;;  %v8489_v63 = vpack.c.bf16 %v15520_v14, %v15520_v14  ;;  %v8506_v14 = vpack.c.bf16 %v15588_v62, %v15588_v62 }
 0x960   : > { %vm7499_vm5 = vcmp.ge.f32.partialorder %v7467_v6, 0.0  ;;  %v7531_v7 = vmul.f32 0.01, %v7467_v6  ;;  %v7310_v33 = vadd.f32 %v7309_v19, %v15682_v40  ;;  %v12716_v40 = vld [vmem:[%s16356_s9 + $0xa0] sm:$0xff]  ;;  %8396 = vmatpush.bf16.msrb.mxu1 %v12700_v47  ;;  %v12751_v47 = vld [vmem:[%s16356_s9 + $0x1b8] sm:$0xff] }
 0x961   : > { %8425 = vmatpush.bf16.msrb.mxu2 %v12708_v49  ;;  %8454 = vmatpush.bf16.msra.mxu3 %v12716_v40  ;;  %v12713_v49 = vld [vmem:[%s16356_s9 + $0x88] sm:$0xff] }
 0x962   : > { %v7563_v15 = vsel %vm7499_vm5, %v7467_v6, %v7531_v7  ;;  %v7399_v59 = vadd.f32 %v7398_v50, %v7310_v33  ;;  %v7831_v53 = vld [vmem:[#allocation2 + $0xa8] sm:$0xff]  ;;  %v7562_v33 = vsel %vm7498_vm6, %v7466_v45, %v7530_v5  ;;  %v12704_v45 = vld [vmem:[%s16356_s9 + $0x40] sm:$0xff]  ;;  %v12750_v5 = vld [vmem:[%s16356_s9 + $0x1b0] sm:$0xff] }
 0x963   : > { %v7863_v1 = vld [vmem:[#allocation2 + $0xaa] sm:$0xff]  ;;  %v7579_v16 = vmax.f32 %v7561_v10, %v7563_v15  ;;  %v7839_v21 = vpack.c.bf16 %v7831_v53, %v7831_v53  ;;  %v12712_v15 = vld [vmem:[%s16356_s9 + $0x80] sm:$0xff] }
 0x964   : > { %v7871_v4 = vpack.c.bf16 %v7863_v1, %v7863_v1  ;;  %v7432_v13 = vadd.f32 %v7399_v59, %v6458_v42  ;;  %v12697_v10 = vld [vmem:[%s16356_s9 + $0x8] sm:$0xff]  ;;  %v12696_v1 = vld [vmem:[%s16356_s9] sm:$0xff] }
 0x965   : > { %7595 = vst [vmem:[#allocation3 + $0xe0] sm:$0xff] %v7579_v16  ;;  %v15781_v27 = vunpack.c.l.b16 %v7839_v21  ;;  %8426 = vmatpush.bf16.msrb.mxu2 %v12707_v58  ;;  %8455 = vmatpush.bf16.msra.mxu3 %v12715_v37  ;;  %v15852_v37 = vpop.f32.mrf.mxu1 }
 0x966   : > { %v15783_v26 = vunpack.c.l.b16 %v7871_v4  ;;  %v7468_v18 = vadd.f32 %v15652_v31, %v7432_v13  ;;  %v12699_v31 = vld [vmem:[%s16356_s9 + $0x18] sm:$0xff] }
 0x967   : > { %v8205_v57 = vpop.f32.mrf.mxu3  ;;  %v15791_v6 = vpack.c.b16 %v15781_v27, %v15696_v52  ;;  %v12706_v52 = vld [vmem:[%s16356_s9 + $0x50] sm:$0xff]  ;;  %8397 = vmatpush.bf16.msrb.mxu1 %v12699_v31  ;;  %v12759_v4 = vld [vmem:[%s16356_s9 + $0x1f8] sm:$0xff] }
 0x968   : > { %v15795_v30 = vpack.c.b16 %v15783_v26, %v15698_v48  ;;  %vm7500_vm7 = vcmp.ge.f32.partialorder %v7468_v18, 0.0  ;;  %v7532_v19 = vmul.f32 0.01, %v7468_v18  ;;  %v15798_v7 = vadd.f32 %v8205_v57, %v15711_v32  ;;  %v12714_v48 = vld [vmem:[%s16356_s9 + $0x90] sm:$0xff]  ;;  %v12767_v13 = vld [vmem:[%s16356_s9 + $0x238] sm:$0xff]  ;;  %v15854_v57 = vpop.f32.mrf.mxu2 }
 0x969   : > { %8427 = vmatpush.bf16.msrb.mxu2 %v12706_v52  ;;  %v12698_v32 = vld [vmem:[%s16356_s9 + $0x10] sm:$0xff]  ;;  %8456 = vmatpush.bf16.msra.mxu3 %v12714_v48 }
 0x96a   : > { %v7564_v42 = vsel %vm7500_vm7, %v7468_v18, %v7532_v19 }
 0x96b   : > { %v7580_v50 = vmax.f32 %v7562_v33, %v7564_v42  ;;  %8398 = vmatpush.bf16.msrb.mxu1 %v12698_v32 }
 0x96d   : > { %7596 = vst [vmem:[#allocation3 + $0xe8] sm:$0xff] %v7580_v50  ;;  %8428 = vmatpush.bf16.msrb.mxu2 %v12705_v39  ;;  %8457 = vmatpush.bf16.msra.mxu3 %v12713_v49 }
 0x96f   : > { %8399 = vmatpush.bf16.msrb.mxu1 %v12697_v10  ;;  %v15858_v48 = vpop.f32.mrf.mxu3  ;;  %v16646_v10 = vld [vmem:[#allocation77_spill] sm:$0xff] }
 0x971   : > { %8429 = vmatpush.bf16.msrb.mxu2 %v12704_v45  ;;  %8458 = vmatpush.bf16.msra.mxu3 %v12712_v15  ;;  %v7705_v45 = vpack.c.bf16 %v16646_v10, %v16646_v10 }
 0x973   : > { %8400 = vmatpush.bf16.msrb.mxu1 %v12696_v1  ;;  %v12757_v1 = vld [vmem:[%s16356_s9 + $0x1e8] sm:$0xff] }
 0x974   : > { %v7611_v59 = vld [vmem:[#allocation3 + $0xe0] ss:$2 sm:$0xff]  ;;  %v7619_v40 = vld [vmem:[#allocation3 + $0xe1] ss:$2 sm:$0xff] }
 0x975   : > { %v7627_v53 = vmax.f32 %v7611_v59, %v7619_v40  ;;  %8822 = vmatpush.bf16.msra.mxu2 %v12759_v4  ;;  %8851 = vmatpush.bf16.msrb.mxu3 %v12767_v13  ;;  %v12764_v4 = vld [vmem:[%s16356_s9 + $0x220] sm:$0xff] }
 0x977   : > { %v7639_v16 = vmul.f32 %v15723_v29, %v7627_v53  ;;  %v12758_v29 = vld [vmem:[%s16356_s9 + $0x1f0] sm:$0xff]  ;;  %8793 = vmatpush.bf16.msra.mxu1 %v12751_v47  ;;  %v7706_v53 = vpack.c.bf16 %v15375_v56, %v15375_v56  ;;  %v12756_v56 = vld [vmem:[%s16356_s9 + $0x1e0] sm:$0xff] }
 0x978   : > { %v12748_v47 = vld [vmem:[%s16356_s9 + $0x1a0] sm:$0xff] }
 0x979   : > { %v7651_v21 = vadd.f32 %v15732_v51, %v7639_v16  ;;  %v12766_v51 = vld [vmem:[%s16356_s9 + $0x230] sm:$0xff]  ;;  %8823 = vmatpush.bf16.msra.mxu2 %v12758_v29  ;;  %v12765_v16 = vld [vmem:[%s16356_s9 + $0x228] sm:$0xff]  ;;  %v7689_v29 = vpack.c.bf16 %v15454_v8, %v15454_v8  ;;  %v7707_v8 = vpack.c.bf16 %v15461_v23, %v15461_v23 }
 0x97a   : > { %8852 = vmatpush.bf16.msrb.mxu3 %v12766_v51  ;;  %v12762_v23 = vld [vmem:[%s16356_s9 + $0x210] sm:$0xff] }
 0x97b   : > { %7680 = vst [vmem:[#allocation2 + $0xc1] sm:$0xff] %v7651_v21  ;;  %v7856_v58 = vpack.c.bf16 %v7651_v21, %v7651_v21  ;;  %8794 = vmatpush.bf16.msra.mxu1 %v12750_v5  ;;  %v7754_v21 = vunpack.c.l.b16 %v7705_v45  ;;  %v15894_v5 = vunpack.c.l.b16 %v7689_v29  ;;  %v12746_v45 = vld [vmem:[%s16356_s9 + $0x190] sm:$0xff] }
 0x97d   : > { %v15850_v18 = vunpack.c.l.b16 %v7856_v58  ;;  %8824 = vmatpush.bf16.msra.mxu2 %v12757_v1 }
 0x97e   : > { %8853 = vmatpush.bf16.msrb.mxu3 %v12765_v16 }
 0x97f   : > { %v7980_v19 = vpack.c.b16 %v15850_v18, %v15755_v11 }
 0x981   : > { %8190 = vmatmul.bf16.gmra.mxu2 %v7980_v19  ;;  %v8225_v19 = vpack.c.b16 %v15457_v3, %v15894_v5  ;;  %v12747_v3 = vld [vmem:[%s16356_s9 + $0x198] sm:$0xff] }
 0x982   : > { %v7832_v31 = vld [vmem:[#allocation2 + $0xc0] sm:$0xff]  ;;  %8825 = vmatpush.bf16.msra.mxu2 %v12756_v56  ;;  %8854 = vmatpush.bf16.msrb.mxu3 %v12764_v4 }
 0x983   : > { %v7864_v52 = vld [vmem:[#allocation2 + $0xc2] sm:$0xff]  ;;  %v7840_v33 = vpack.c.bf16 %v7832_v31, %v7832_v31  ;;  %v7708_v31 = vpack.c.bf16 %v15531_v43, %v15531_v43 }
 0x984   : > { %v7872_v42 = vpack.c.bf16 %v7864_v52, %v7864_v52  ;;  %v8181_v49 = vpop.f32.mrf.mxu2  ;;  %v16647_v52 = vld [vmem:[#allocation106_spill] sm:$0xff] }
 0x985   : > { %v15860_v50 = vunpack.c.l.b16 %v7840_v33  ;;  %v16648_v33 = vpack.c.b16 %v15385_v46, %v16647_v52  ;;  %v7763_v43 = vunpack.c.l.b16 %v7708_v31  ;;  %v12754_v46 = vld [vmem:[%s16356_s9 + $0x1d0] sm:$0xff]  ;;  %v8522_v31 = vpack.c.bf16 %v15590_v41, %v15590_v41  ;;  %v8503_v41 = vld [vmem:[#allocation2 + $0xd9] sm:$0xff] }
 0x986   : > { %v15862_v32 = vunpack.c.l.b16 %v7872_v42  ;;  %v8152_v39 = vpop.f32.mrf.mxu1  ;;  %v12755_v42 = vld [vmem:[%s16356_s9 + $0x1d8] sm:$0xff] }
 0x987   : > { %v7979_v15 = vpack.c.b16 %v15860_v50, %v15781_v27  ;;  %v8182_v40 = vadd.f32 %v8181_v49, %v8152_v39  ;;  %v12749_v27 = vld [vmem:[%s16356_s9 + $0x1a8] sm:$0xff]  ;;  %v12763_v39 = vld [vmem:[%s16356_s9 + $0x218] sm:$0xff]  ;;  %8826 = vmatpush.bf16.msra.mxu2 %v12755_v42  ;;  %v7760_v49 = vunpack.c.l.b16 %v7707_v8 }
 0x988   : > { %v7981_v59 = vpack.c.b16 %v15862_v32, %v15783_v26  ;;  %v7757_v26 = vunpack.c.l.b16 %v7706_v53  ;;  %8795 = vmatpush.bf16.msra.mxu1 %v12749_v27  ;;  %8855 = vmatpush.bf16.msrb.mxu3 %v12763_v39  ;;  %v8488_v27 = vpack.c.bf16 %v15452_v9, %v15452_v9  ;;  %v8559_v9 = vunpack.c.l.b16 %v8506_v14  ;;  %v8500_v8 = vld [vmem:[#allocation2 + $0x91] sm:$0xff] }
 0x989   : > { %8161 = vmatmul.bf16.gmra.mxu1 %v7979_v15  ;;  %v8229_v10 = vpack.c.b16 %v7763_v43, %v7760_v49  ;;  %v12753_v15 = vld [vmem:[%s16356_s9 + $0x1c8] sm:$0xff]  ;;  %v8508_v62 = vpack.c.bf16 %v8500_v8, %v8500_v8  ;;  %v8511_v43 = vpack.c.bf16 %v8503_v41, %v8503_v41 }
 0x98a   : > { %8219 = vmatmul.bf16.gmra.mxu3 %v7981_v59  ;;  %v8226_v51 = vpack.c.b16 %v7757_v26, %v7754_v21  ;;  %v12761_v59 = vld [vmem:[%s16356_s9 + $0x208] sm:$0xff]  ;;  %v8520_v21 = vpack.c.bf16 %v15463_v28, %v15463_v28  ;;  %v8555_v26 = vunpack.c.l.b16 %v8489_v63  ;;  %v8552_v4 = vunpack.c.l.b16 %v8488_v27 }
 0x98b   : > { %8827 = vmatpush.bf16.msra.mxu2 %v12754_v46  ;;  %v8490_v28 = vpack.c.bf16 %v15585_v61, %v15585_v61  ;;  %v8565_v39 = vunpack.c.l.b16 %v8508_v62  ;;  %v8519_v46 = vld [vmem:[#allocation2 + $0xda] sm:$0xff] }
 0x98c   : > { %8796 = vmatpush.bf16.msra.mxu1 %v12748_v47  ;;  %8856 = vmatpush.bf16.msrb.mxu3 %v12762_v23  ;;  %v15958_v53 = vpop.f32.mrf.mxu2  ;;  %v8625_v47 = vpack.c.b16 %v8555_v26, %v8552_v4 }
 0x98d   : > { %v8210_v13 = vpop.f32.mrf.mxu3  ;;  %v8558_v52 = vunpack.c.l.b16 %v8490_v28  ;;  %v8632_v61 = vpack.c.b16 %v15755_v11, %v8565_v39 }
 0x98e   : > { %v15890_v58 = vadd.f32 %v8210_v13, %v8182_v40  ;;  %v12745_v40 = vld [vmem:[%s16356_s9 + $0x188] sm:$0xff]  ;;  %v8554_v13 = vunpack.c.l.b16 %v8520_v21 }
 0x98f   : > { %8828 = vmatpush.bf16.msra.mxu2 %v12753_v15 }
 0x990   : > { %8797 = vmatpush.bf16.msra.mxu1 %v12747_v3  ;;  %8857 = vmatpush.bf16.msrb.mxu3 %v12761_v59  ;;  %v12822_v3 = vld [vmem:[%s16360_s13 + $0x1b0] sm:$0xff] }
 0x991   : > { %8430 = vmatmul.bf16.vlgmr.msrb.gmra.mxu2 %v8226_v51  ;;  %v8507_v51 = vpack.c.bf16 %v15641_v55, %v15641_v55  ;;  %v8628_v55 = vpack.c.b16 %v15645_v36, %v8558_v52  ;;  %9850 = vmatpush.bf16.msrb.mxu0 %v12822_v3  ;;  %v8574_v36 = vunpack.c.l.b16 %v8511_v43 }
 0x993   : > { %8829 = vmatpush.bf16.msra.mxu2 %v12752_v54  ;;  %v8635_v49 = vpack.c.b16 %v8574_v36, %v15850_v18  ;;  %v12821_v18 = vld [vmem:[%s16360_s13 + $0x1a8] sm:$0xff] }
 0x994   : > { %8798 = vmatpush.bf16.msra.mxu1 %v12746_v45  ;;  %8858 = vmatpush.bf16.msrb.mxu3 %v12760_v0 }
 0x995   : > { %v15963_v20 = vpop.f32.mrf.mxu3  ;;  %9851 = vmatpush.bf16.msrb.mxu0 %v12821_v18  ;;  %v12807_v18 = vld [vmem:[%s16360_s13 + $0x138] sm:$0xff] }
 0x997   : > { %9345 = vmatpush.bf16.msrb.mxu2 %v12807_v18 }
 0x998   : > { %8799 = vmatpush.bf16.msra.mxu1 %v12745_v40  ;;  %v8634_v40 = vpack.c.b16 %v15894_v5, %v15860_v50 }
 0x999   : > { %8401 = vmatmul.bf16.vlgmr.msrb.gmra.mxu1 %v8225_v19 }
 0x99a   : > { %8459 = vmatmul.bf16.vlgmr.msra.gmra.mxu3 %v16648_v33  ;;  %v8560_v33 = vunpack.c.l.b16 %v8522_v31 }
 0x99c   : > { %8800 = vmatpush.bf16.msra.mxu1 %v12744_v12  ;;  %v8630_v42 = vpack.c.b16 %v15647_v44, %v8560_v33 }
 0x9a1   : > { %8435 = vmatmul.bf16.gmra.mxu2 %v8229_v10 }
 0x9a9   : > { %8406 = vmatmul.bf16.gmra.mxu1 %v8228_v24  ;;  %v16650_v24 = vpack.c.b16 %v15647_v44, %v15595_v2 }
 0x9aa   : > { %8464 = vmatmul.bf16.gmra.mxu3 %v8230_v60  ;;  %v15956_v60 = vpop.f32.mrf.mxu1 }
 0x9b1   : > { %8440 = vmatmul.bf16.gmra.mxu2 %v8232_v25 }
 0x9b9   : > { %8411 = vmatmul.bf16.gmra.mxu1 %v16649_v35 }
 0x9ba   : > { %8469 = vmatmul.bf16.gmra.mxu3 %v16650_v24 }
 0x9c1   : > { %8445 = vmatmul.bf16.gmra.mxu2 %v8235_v34  ;;  %v8521_v34 = vpack.c.bf16 %v15533_v22, %v15533_v22  ;;  %v8562_v22 = vunpack.c.l.b16 %v8507_v51 }
 0x9c3   : > { %v8557_v56 = vunpack.c.l.b16 %v8521_v34  ;;  %v8629_v19 = vpack.c.b16 %v8562_v22, %v8559_v9 }
 0x9c4   : > { %v8186_v25 = vpop.f32.mrf.mxu2 }
 0x9c5   : > { %v8627_v29 = vpack.c.b16 %v8557_v56, %v8554_v13 }
 0x9c6   : > { %v8157_v17 = vpop.f32.mrf.mxu1 }
 0x9c7   : > { %v8187_v1 = vadd.f32 %v8186_v25, %v8157_v17 }
 0x9c9   : > { %8416 = vmatmul.bf16.gmra.mxu1 %v15791_v6 }
 0x9ca   : > { %8474 = vmatmul.bf16.gmra.mxu3 %v15795_v30 }
 0x9cc   : > { %v8188_v44 = vpop.f32.mrf.mxu2 }
 0x9cd   : > { %v8215_v2 = vpop.f32.mrf.mxu3 }
 0x9ce   : > { %v15970_v16 = vadd.f32 %v8215_v2, %v8187_v1  ;;  %v8159_v23 = vpop.f32.mrf.mxu1 }
 0x9cf   : > { %v8189_v9 = vadd.f32 %v8188_v44, %v8159_v23 }
 0x9d1   : > { %8830 = vmatmul.bf16.vlgmr.msra.gmra.mxu2 %v8229_v10  ;;  %v8527_v10 = vpack.c.bf16 %v8519_v46, %v8519_v46 }
 0x9d3   : > { %v8575_v45 = vunpack.c.l.b16 %v8527_v10 }
 0x9d5   : > { %v8217_v15 = vpop.f32.mrf.mxu3  ;;  %v8636_v54 = vpack.c.b16 %v8575_v45, %v15862_v32 }
 0x9d6   : > { %v8218_v31 = vadd.f32 %v8217_v15, %v8189_v9  ;;  %v8184_v9 = vadd.f32 %v15958_v53, %v15956_v60  ;;  %v12796_v60 = vld [vmem:[%s16360_s13 + $0xe0] sm:$0xff] }
 0x9d7   : > { %v12812_v53 = vld [vmem:[%s16360_s13 + $0x160] sm:$0xff] }
 0x9d9   : > { %8801 = vmatmul.bf16.vlgmr.msra.gmra.mxu1 %v8625_v47 }
 0x9da   : > { %8859 = vmatmul.bf16.vlgmr.msrb.gmra.mxu3 %v8627_v29 }
 0x9e1   : > { %8835 = vmatmul.bf16.gmra.mxu2 %v8629_v19 }
 0x9e9   : > { %8806 = vmatmul.bf16.gmra.mxu1 %v8628_v55 }
 0x9ea   : > { %8864 = vmatmul.bf16.gmra.mxu3 %v8630_v42 }
 0x9f1   : > { %8840 = vmatmul.bf16.gmra.mxu2 %v8632_v61 }
 0x9f9   : > { %8811 = vmatmul.bf16.gmra.mxu1 %v15791_v6 }
 0x9fa   : > { %8869 = vmatmul.bf16.gmra.mxu3 %v15795_v30 }
 0xa01   : > { %8845 = vmatmul.bf16.gmra.mxu2 %v8635_v49 }
 0xa04   : > { %v8191_v59 = vpop.f32.mrf.mxu2 }
 0xa06   : > { %v8162_v11 = vpop.f32.mrf.mxu1 }
 0xa07   : > { %v8192_v6 = vadd.f32 %v8191_v59, %v8162_v11 }
 0xa09   : > { %8816 = vmatmul.bf16.gmra.mxu1 %v8634_v40  ;;  %v8179_v40 = vadd.f32 %v15854_v57, %v15852_v37 }
 0xa0a   : > { %8874 = vmatmul.bf16.gmra.mxu3 %v8636_v54 }
 0xa0c   : > { %v8193_v0 = vpop.f32.mrf.mxu2 }
 0xa0d   : > { %v8220_v30 = vpop.f32.mrf.mxu3 }
 0xa0e   : > { %v8221_v12 = vadd.f32 %v8220_v30, %v8192_v6  ;;  %v8164_v35 = vpop.f32.mrf.mxu1 }
 0xa0f   : > { %v8194_v43 = vadd.f32 %v8193_v0, %v8164_v35  ;;  %v8208_v0 = vadd.f32 %v15858_v48, %v8179_v40  ;;  %v16042_v48 = vld [vmem:[%s16357_s10] ss:$0 sm:$0xff] }
 0xa14   : > { %v8431_v17 = vpop.f32.mrf.mxu2 }
 0xa15   : > { %v8222_v24 = vpop.f32.mrf.mxu3 }
 0xa16   : > { %v8402_v25 = vpop.f32.mrf.mxu1  ;;  %v8223_v46 = vadd.f32 %v8222_v24, %v8194_v43  ;;  %v12799_v24 = vld [vmem:[%s16360_s13 + $0xf8] sm:$0xff] }
 0xa17   : > { %v8403_v1 = vadd.f32 %v8402_v25, %v15798_v7  ;;  %v12820_v7 = vld [vmem:[%s16360_s13 + $0x1a0] sm:$0xff]  ;;  %9326 = vmatpush.bf16.msrb.mxu1 %v12799_v24  ;;  %v12815_v25 = vld [vmem:[%s16360_s13 + $0x178] sm:$0xff] }
 0xa18   : > { %9852 = vmatpush.bf16.msrb.mxu0 %v12820_v7  ;;  %9364 = vmatpush.bf16.msra.mxu3 %v12815_v25  ;;  %v12809_v25 = vld [vmem:[%s16360_s13 + $0x148] sm:$0xff] }
 0xa19   : > { %v8432_v50 = vadd.f32 %v8431_v17, %v8403_v1  ;;  %v12819_v17 = vld [vmem:[%s16360_s13 + $0x198] sm:$0xff] }
 0xa1c   : > { %v8433_v32 = vpop.f32.mrf.mxu2  ;;  %9853 = vmatpush.bf16.msrb.mxu0 %v12819_v17 }
 0xa1d   : > { %v8460_v5 = vpop.f32.mrf.mxu3 }
 0xa1e   : > { %v8461_v38 = vadd.f32 %v8460_v5, %v8432_v50  ;;  %v8404_v2 = vpop.f32.mrf.mxu1 }
 0xa1f   : > { %v8405_v37 = vadd.f32 %v8404_v2, %v8208_v0 }
 0xa21   : > { %v8434_v1 = vadd.f32 %v8433_v32, %v8405_v37  ;;  %v12814_v32 = vld [vmem:[%s16360_s13 + $0x170] sm:$0xff]  ;;  %v12793_v37 = vld [vmem:[%s16360_s13 + $0xc8] sm:$0xff] }
 0xa22   : > { %9365 = vmatpush.bf16.msra.mxu3 %v12814_v32  ;;  %v12818_v32 = vld [vmem:[%s16360_s13 + $0x190] sm:$0xff] }
 0xa23   : > { %9854 = vmatpush.bf16.msrb.mxu0 %v12818_v32 }
 0xa24   : > { %v8436_v34 = vpop.f32.mrf.mxu2 }
 0xa25   : > { %v16004_v63 = vpop.f32.mrf.mxu3 }
 0xa26   : > { %v8407_v27 = vpop.f32.mrf.mxu1  ;;  %v8463_v2 = vadd.f32 %v16004_v63, %v8434_v1 }
 0xa27   : > { %v8408_v21 = vadd.f32 %v8407_v27, %v15890_v58 }
 0xa29   : > { %v8437_v26 = vadd.f32 %v8436_v34, %v8408_v21 }
 0xa2c   : > { %v16007_v4 = vpop.f32.mrf.mxu2 }
 0xa2d   : > { %v8465_v56 = vpop.f32.mrf.mxu3 }
 0xa2e   : > { %v16009_v13 = vadd.f32 %v8465_v56, %v8437_v26  ;;  %v16011_v47 = vpop.f32.mrf.mxu1  ;;  %v12806_v26 = vld [vmem:[%s16360_s13 + $0x130] sm:$0xff] }
 0xa2f   : > { %v12798_v56 = vld [vmem:[%s16360_s13 + $0xf0] sm:$0xff]  ;;  %9346 = vmatpush.bf16.msrb.mxu2 %v12806_v26 }
 0xa30   : > { %9327 = vmatpush.bf16.msrb.mxu1 %v12798_v56 }
 0xa34   : > { %v8441_v51 = vpop.f32.mrf.mxu2 }
 0xa35   : > { %v16016_v29 = vpop.f32.mrf.mxu3 }
 0xa36   : > { %v8412_v14 = vpop.f32.mrf.mxu1 }
 0xa37   : > { %v8413_v22 = vadd.f32 %v8412_v14, %v15970_v16  ;;  %v12805_v14 = vld [vmem:[%s16360_s13 + $0x128] sm:$0xff] }
 0xa38   : > { %9347 = vmatpush.bf16.msrb.mxu2 %v12805_v14 }
 0xa39   : > { %v8442_v58 = vadd.f32 %v8441_v51, %v8413_v22  ;;  %v12797_v22 = vld [vmem:[%s16360_s13 + $0xe8] sm:$0xff] }
 0xa3a   : > { %9328 = vmatpush.bf16.msrb.mxu1 %v12797_v22 }
 0xa3c   : > { %v8443_v28 = vpop.f32.mrf.mxu2 }
 0xa3d   : > { %v8470_v19 = vpop.f32.mrf.mxu3 }
 0xa3e   : > { %v16019_v52 = vadd.f32 %v8470_v19, %v8442_v58  ;;  %v8414_v33 = vpop.f32.mrf.mxu1  ;;  %v12813_v58 = vld [vmem:[%s16360_s13 + $0x168] sm:$0xff]  ;;  %9329 = vmatpush.bf16.msrb.mxu1 %v12796_v60 }
 0xa3f   : > { %v8415_v8 = vadd.f32 %v8414_v33, %v8218_v31  ;;  %9366 = vmatpush.bf16.msra.mxu3 %v12813_v58 }
 0xa41   : > { %v8444_v55 = vadd.f32 %v8443_v28, %v8415_v8  ;;  %v8213_v8 = vadd.f32 %v15963_v20, %v8184_v9 }
 0xa43   : > { %v8410_v20 = vadd.f32 %v16011_v47, %v8213_v8  ;;  %9367 = vmatpush.bf16.msra.mxu3 %v12812_v53 }
 0xa44   : > { %v8446_v62 = vpop.f32.mrf.mxu2 }
 0xa45   : > { %v8472_v42 = vpop.f32.mrf.mxu3  ;;  %v8439_v47 = vadd.f32 %v16007_v4, %v8410_v20  ;;  %v12794_v4 = vld [vmem:[%s16360_s13 + $0xd0] sm:$0xff] }
 0xa46   : > { %v16021_v39 = vadd.f32 %v8472_v42, %v8444_v55  ;;  %v8417_v3 = vpop.f32.mrf.mxu1 }
 0xa47   : > { %v8418_v61 = vadd.f32 %v8417_v3, %v8221_v12 }
 0xa49   : > { %v8447_v41 = vadd.f32 %v8446_v62, %v8418_v61 }
 0xa4c   : > { %v8448_v16 = vpop.f32.mrf.mxu2 }
 0xa4d   : > { %v8475_v36 = vpop.f32.mrf.mxu3 }
 0xa4e   : > { %v16023_v44 = vadd.f32 %v8475_v36, %v8447_v41  ;;  %v8419_v23 = vpop.f32.mrf.mxu1  ;;  %v12804_v41 = vld [vmem:[%s16360_s13 + $0x120] sm:$0xff]  ;;  %v12803_v36 = vld [vmem:[%s16360_s13 + $0x118] sm:$0xff] }
 0xa4f   : > { %v8420_v49 = vadd.f32 %v8419_v23, %v8223_v46  ;;  %9348 = vmatpush.bf16.msrb.mxu2 %v12804_v41  ;;  %v12811_v46 = vld [vmem:[%s16360_s13 + $0x158] sm:$0xff] }
 0xa50   : > { %9368 = vmatpush.bf16.msra.mxu3 %v12811_v46  ;;  %v12816_v46 = vld [vmem:[%s16360_s13 + $0x180] sm:$0xff] }
 0xa51   : > { %v8449_v10 = vadd.f32 %v8448_v16, %v8420_v49  ;;  %v12795_v16 = vld [vmem:[%s16360_s13 + $0xd8] sm:$0xff] }
 0xa52   : > { %9330 = vmatpush.bf16.msrb.mxu1 %v12795_v16 }
 0xa53   : > { %9349 = vmatpush.bf16.msrb.mxu2 %v12803_v36 }
 0xa54   : > { %v8831_v15 = vpop.f32.mrf.mxu2 }
 0xa55   : > { %v8477_v45 = vpop.f32.mrf.mxu3 }
 0xa56   : > { %v16025_v59 = vadd.f32 %v8477_v45, %v8449_v10  ;;  %v8802_v11 = vpop.f32.mrf.mxu1  ;;  %v16096_v45 = vld [vmem:[%s16358_s11] ss:$0 sm:$0xff]  ;;  %9331 = vmatpush.bf16.msrb.mxu1 %v12794_v4 }
 0xa57   : > { %v8832_v54 = vadd.f32 %v8831_v15, %v8802_v11 }
 0xa5a   : > { %9332 = vmatpush.bf16.msrb.mxu1 %v12793_v37  ;;  %v12789_v37 = vld [vmem:[%s16360_s13 + $0xa8] sm:$0xff] }
 0xa5c   : > { %v8833_v30 = vpop.f32.mrf.mxu2 }
 0xa5d   : > { %v8860_v6 = vpop.f32.mrf.mxu3 }
 0xa5e   : > { %v8861_v12 = vadd.f32 %v8860_v6, %v8832_v54  ;;  %v8804_v35 = vpop.f32.mrf.mxu1  ;;  %v12802_v54 = vld [vmem:[%s16360_s13 + $0x110] sm:$0xff] }
 0xa5f   : > { %v8834_v50 = vadd.f32 %v8833_v30, %v8804_v35  ;;  %v16111_v35 = vld [vmem:[%s16359_s12] ss:$0 sm:$0xff]  ;;  %9350 = vmatpush.bf16.msrb.mxu2 %v12802_v54  ;;  %v12774_v54 = vld [vmem:[%s16360_s13 + $0x30] sm:$0xff] }
 0xa60   : > { %v8880_v57 = vadd.f32 %v8861_v12, %v8461_v38 }
 0xa62   : > { %v8892_v27 = vadd.f32 %v16042_v48, %v8880_v57  ;;  %v12801_v57 = vld [vmem:[%s16360_s13 + $0x108] sm:$0xff] }
 0xa63   : > { %9351 = vmatpush.bf16.msrb.mxu2 %v12801_v57 }
 0xa64   : > { %v8836_v34 = vpop.f32.mrf.mxu2  ;;  %v8908_v63 = vmul.f32 0.01, %v8892_v27  ;;  %vm8900_vm8 = vcmp.ge.f32.partialorder %v8892_v27, 0.0 }
 0xa65   : > { %v8862_v5 = vpop.f32.mrf.mxu3 }
 0xa66   : > { %v8863_v38 = vadd.f32 %v8862_v5, %v8834_v50  ;;  %v8807_v21 = vpop.f32.mrf.mxu1  ;;  %v8916_v55 = vsel %vm8900_vm8, %v8892_v27, %v8908_v63  ;;  %v12800_v63 = vld [vmem:[%s16360_s13 + $0x100] sm:$0xff] }
 0xa67   : > { %v8837_v28 = vadd.f32 %v8836_v34, %v8807_v21  ;;  %9352 = vmatpush.bf16.msrb.mxu2 %v12800_v63 }
 0xa68   : > { %v8881_v7 = vadd.f32 %v8863_v38, %v8463_v2 }
 0xa6a   : > { %v8893_v51 = vadd.f32 %v16042_v48, %v8881_v7  ;;  %v12792_v7 = vld [vmem:[%s16360_s13 + $0xc0] sm:$0xff] }
 0xa6b   : > { %9333 = vmatpush.bf16.msrb.mxu1 %v12792_v7 }
 0xa6c   : > { %vm8901_vm9 = vcmp.ge.f32.partialorder %v8893_v51, 0.0  ;;  %v8909_v19 = vmul.f32 0.01, %v8893_v51  ;;  %v8838_v33 = vpop.f32.mrf.mxu2 }
 0xa6d   : > { %v8865_v31 = vpop.f32.mrf.mxu3 }
 0xa6e   : > { %v8917_v42 = vsel %vm8901_vm9, %v8893_v51, %v8909_v19  ;;  %v8866_v62 = vadd.f32 %v8865_v31, %v8837_v28  ;;  %v8809_v61 = vpop.f32.mrf.mxu1  ;;  %v12808_v51 = vld [vmem:[%s16360_s13 + $0x140] sm:$0xff] }
 0xa6f   : > { %v8924_v3 = vmax.f32 %v8916_v55, %v8917_v42  ;;  %v8839_v23 = vadd.f32 %v8838_v33, %v8809_v61 }
 0xa70   : > { %v8882_v43 = vadd.f32 %v8866_v62, %v16009_v13  ;;  %v8468_v13 = vadd.f32 %v16016_v29, %v8439_v47  ;;  %v12810_v29 = vld [vmem:[%s16360_s13 + $0x150] sm:$0xff]  ;;  %v12783_v47 = vld [vmem:[%s16360_s13 + $0x78] sm:$0xff] }
 0xa71   : > { %8928 = vst [vmem:[#allocation3] sm:$0xff] %v8924_v3  ;;  %9369 = vmatpush.bf16.msra.mxu3 %v12810_v29  ;;  %9558 = vmatpush.bf16.msra.mxu2 %v12783_v47  ;;  %v12790_v29 = vld [vmem:[%s16360_s13 + $0xb0] sm:$0xff]  ;;  %v12785_v47 = vld [vmem:[%s16360_s13 + $0x88] sm:$0xff] }
 0xa72   : > { %v8894_v15 = vadd.f32 %v16042_v48, %v8882_v43 }
 0xa74   : > { %v8841_v10 = vpop.f32.mrf.mxu2  ;;  %v8910_v18 = vmul.f32 0.01, %v8894_v15  ;;  %vm8902_vm10 = vcmp.ge.f32.partialorder %v8894_v15, 0.0 }
 0xa75   : > { %v8867_v49 = vpop.f32.mrf.mxu3  ;;  %9370 = vmatpush.bf16.msra.mxu3 %v12809_v25 }
 0xa76   : > { %v8868_v11 = vadd.f32 %v8867_v49, %v8839_v23  ;;  %v8812_v40 = vpop.f32.mrf.mxu1  ;;  %v8918_v2 = vsel %vm8902_vm10, %v8894_v15, %v8910_v18  ;;  %v12775_v23 = vld [vmem:[%s16360_s13 + $0x38] sm:$0xff] }
 0xa77   : > { %v8842_v50 = vadd.f32 %v8841_v10, %v8812_v40  ;;  %v12791_v10 = vld [vmem:[%s16360_s13 + $0xb8] sm:$0xff]  ;;  %v12782_v40 = vld [vmem:[%s16360_s13 + $0x70] sm:$0xff]  ;;  %9539 = vmatpush.bf16.msra.mxu1 %v12775_v23 }
 0xa78   : > { %v8932_v6 = vld [vmem:[#allocation3] ss:$2 sm:$0xf]  ;;  %v8936_v30 = vld [vmem:[#allocation3 + $0x1] ss:$2 sm:$0xf]  ;;  %v8883_v0 = vadd.f32 %v8868_v11, %v8468_v13  ;;  %9559 = vmatpush.bf16.msra.mxu2 %v12782_v40 }
 0xa79   : > { %v8940_v12 = vmax.f32 %v8932_v6, %v8936_v30  ;;  %9371 = vmatpush.bf16.msra.mxu3 %v12808_v51 }
 0xa7a   : > { %v8895_v24 = vadd.f32 %v16042_v48, %v8883_v0 }
 0xa7b   : > { %v8948_v17 = vmul.f32 %v16096_v45, %v8940_v12  ;;  %9540 = vmatpush.bf16.msra.mxu1 %v12774_v54  ;;  %v12784_v54 = vld [vmem:[%s16360_s13 + $0x80] sm:$0xff] }
 0xa7c   : > { %vm8903_vm11 = vcmp.ge.f32.partialorder %v8895_v24, 0.0  ;;  %v8911_v1 = vmul.f32 0.01, %v8895_v24  ;;  %v8843_v56 = vpop.f32.mrf.mxu2 }
 0xa7d   : > { %v8956_v5 = vadd.f32 %v16111_v35, %v8948_v17  ;;  %v8870_v34 = vpop.f32.mrf.mxu3  ;;  %9577 = vmatpush.bf16.msrb.mxu3 %v12791_v10  ;;  %v12773_v17 = vld [vmem:[%s16360_s13 + $0x28] sm:$0xff] }
 0xa7e   : > { %v8919_v27 = vsel %vm8903_vm11, %v8895_v24, %v8911_v1  ;;  %v8871_v38 = vadd.f32 %v8870_v34, %v8842_v50  ;;  %v8814_v26 = vpop.f32.mrf.mxu1 }
 0xa7f   : > { %8973 = vst [vmem:[#allocation2 + $0x19] sm:$0xf] %v8956_v5  ;;  %v8925_v21 = vmax.f32 %v8918_v2, %v8919_v27  ;;  %v8844_v22 = vadd.f32 %v8843_v56, %v8814_v26  ;;  %9541 = vmatpush.bf16.msra.mxu1 %v12773_v17  ;;  %v12837_v17 = vld [vmem:[%s16360_s13 + $0x228] sm:$0xff] }
 0xa80   : > { %v8884_v14 = vadd.f32 %v8871_v38, %v16019_v52  ;;  %v12817_v52 = vld [vmem:[%s16360_s13 + $0x188] sm:$0xff] }
 0xa81   : > { %8929 = vst [vmem:[#allocation3 + $0x20] sm:$0xff] %v8925_v21  ;;  %9855 = vmatpush.bf16.msrb.mxu0 %v12817_v52  ;;  %9578 = vmatpush.bf16.msrb.mxu3 %v12790_v29 }
 0xa82   : > { %v8896_v9 = vadd.f32 %v16042_v48, %v8884_v14 }
 0xa84   : > { %v8846_v42 = vpop.f32.mrf.mxu2  ;;  %v8912_v62 = vmul.f32 0.01, %v8896_v9  ;;  %vm8904_vm12 = vcmp.ge.f32.partialorder %v8896_v9, 0.0 }
 0xa85   : > { %v8872_v58 = vpop.f32.mrf.mxu3  ;;  %9856 = vmatpush.bf16.msrb.mxu0 %v12816_v46  ;;  %9579 = vmatpush.bf16.msrb.mxu3 %v12789_v37  ;;  %v12769_v46 = vld [vmem:[%s16360_s13 + $0x8] sm:$0xff] }
 0xa86   : > { %v8873_v19 = vadd.f32 %v8872_v58, %v8844_v22  ;;  %v8817_v28 = vpop.f32.mrf.mxu1  ;;  %v9073_v49 = vld [vmem:[#allocation2 + $0x18] sm:$0xff]  ;;  %v12829_v37 = vld [vmem:[%s16360_s13 + $0x1e8] sm:$0xff] }
 0xa87   : > { %v8847_v60 = vadd.f32 %v8846_v42, %v8817_v28  ;;  %v9081_v15 = vld [vmem:[#allocation2 + $0x19] sm:$0xff]  ;;  %v9077_v0 = vpack.c.bf16 %v9073_v49, %v9073_v49 }
 0xa88   : > { %v8933_v31 = vld [vmem:[#allocation3 + $0x20] ss:$2 sm:$0xf]  ;;  %v8937_v33 = vld [vmem:[#allocation3 + $0x21] ss:$2 sm:$0xf]  ;;  %v8885_v8 = vadd.f32 %v8873_v19, %v16021_v39  ;;  %v8920_v39 = vsel %vm8904_vm12, %v8896_v9, %v8912_v62  ;;  %v9085_v12 = vpack.c.bf16 %v9081_v15, %v9081_v15 }
 0xa89   : > { %v8941_v55 = vmax.f32 %v8933_v31, %v8937_v33  ;;  %v9089_v11 = vld [vmem:[#allocation2 + $0x1a] sm:$0xff]  ;;  %v16179_v56 = vunpack.c.l.b16 %v9077_v0 }
 0xa8a   : > { %v8897_v3 = vadd.f32 %v16042_v48, %v8885_v8  ;;  %v9093_v18 = vpack.c.bf16 %v9089_v11, %v9089_v11  ;;  %v16181_v32 = vunpack.c.l.b16 %v9085_v12  ;;  %v12788_v8 = vld [vmem:[%s16360_s13 + $0xa0] sm:$0xff] }
 0xa8b   : > { %v8949_v61 = vmul.f32 %v16096_v45, %v8941_v55  ;;  %9580 = vmatpush.bf16.msrb.mxu3 %v12788_v8  ;;  %v12776_v15 = vld [vmem:[%s16360_s13 + $0x40] sm:$0xff] }
 0xa8c   : > { %vm8905_vm13 = vcmp.ge.f32.partialorder %v8897_v3, 0.0  ;;  %v8913_v41 = vmul.f32 0.01, %v8897_v3  ;;  %v8848_v6 = vpop.f32.mrf.mxu2  ;;  %v16183_v7 = vunpack.c.l.b16 %v9093_v18  ;;  %v8985_v8 = vld [vmem:[#allocation2 + $0x1] sm:$0xff] }
 0xa8d   : > { %v8957_v53 = vadd.f32 %v16111_v35, %v8949_v61  ;;  %v8875_v20 = vpop.f32.mrf.mxu3  ;;  %v12779_v61 = vld [vmem:[%s16360_s13 + $0x58] sm:$0xff] }
 0xa8e   : > { %v8921_v43 = vsel %vm8905_vm13, %v8897_v3, %v8913_v41  ;;  %v8876_v36 = vadd.f32 %v8875_v20, %v8847_v60  ;;  %v8819_v13 = vpop.f32.mrf.mxu1  ;;  %v12771_v41 = vld [vmem:[%s16360_s13 + $0x18] sm:$0xff]  ;;  %v12770_v20 = vld [vmem:[%s16360_s13 + $0x10] sm:$0xff] }
 0xa8f   : > { %8974 = vst [vmem:[#allocation2 + $0x31] sm:$0xf] %v8957_v53  ;;  %v8926_v16 = vmax.f32 %v8920_v39, %v8921_v43  ;;  %v8849_v30 = vadd.f32 %v8848_v6, %v8819_v13  ;;  %v12787_v60 = vld [vmem:[%s16360_s13 + $0x98] sm:$0xff]  ;;  %v12778_v53 = vld [vmem:[%s16360_s13 + $0x50] sm:$0xff] }
 0xa90   : > { %v8886_v4 = vadd.f32 %v8876_v36, %v16023_v44  ;;  %v12781_v44 = vld [vmem:[%s16360_s13 + $0x68] sm:$0xff]  ;;  %9581 = vmatpush.bf16.msrb.mxu3 %v12787_v60  ;;  %v12786_v39 = vld [vmem:[%s16360_s13 + $0x90] sm:$0xff]  ;;  %v12831_v6 = vld [vmem:[%s16360_s13 + $0x1f8] sm:$0xff] }
 0xa91   : > { %8930 = vst [vmem:[#allocation3 + $0x40] sm:$0xff] %v8926_v16  ;;  %9560 = vmatpush.bf16.msra.mxu2 %v12781_v44  ;;  %v12777_v36 = vld [vmem:[%s16360_s13 + $0x48] sm:$0xff] }
 0xa92   : > { %v8898_v57 = vadd.f32 %v16042_v48, %v8886_v4  ;;  %v12768_v4 = vld [vmem:[%s16360_s13] sm:$0xff] }
 0xa94   : > { %vm8906_vm14 = vcmp.ge.f32.partialorder %v8898_v57, 0.0  ;;  %v8914_v58 = vmul.f32 0.01, %v8898_v57  ;;  %9582 = vmatpush.bf16.msrb.mxu3 %v12786_v39  ;;  %v12824_v39 = vld [vmem:[%s16360_s13 + $0x1c0] sm:$0xff] }
 0xa95   : > { %v8877_v24 = vpop.f32.mrf.mxu3 }
 0xa96   : > { %v8878_v25 = vadd.f32 %v8877_v24, %v8849_v30  ;;  %v9074_v1 = vld [vmem:[#allocation2 + $0x30] sm:$0xff]  ;;  %v8922_v62 = vsel %vm8906_vm14, %v8898_v57, %v8914_v58  ;;  %v12916_v24 = vld [vmem:[#allocation2 + $0x198] sm:$0xff] }
 0xa97   : > { %v9082_v50 = vld [vmem:[#allocation2 + $0x31] sm:$0xff]  ;;  %v9078_v34 = vpack.c.bf16 %v9074_v1, %v9074_v1  ;;  %v9603_v44 = vpack.c.bf16 %v12916_v24, %v12916_v24 }
 0xa98   : > { %v9090_v5 = vld [vmem:[#allocation2 + $0x32] sm:$0xff]  ;;  %v9086_v2 = vpack.c.bf16 %v9082_v50, %v9082_v50  ;;  %v8887_v26 = vadd.f32 %v8878_v25, %v16025_v59  ;;  %v12780_v59 = vld [vmem:[%s16360_s13 + $0x60] sm:$0xff]  ;;  %9583 = vmatpush.bf16.msrb.mxu3 %v12785_v47 }
 0xa99   : > { %v9094_v27 = vpack.c.bf16 %v9090_v5, %v9090_v5  ;;  %v8934_v38 = vld [vmem:[#allocation3 + $0x40] ss:$2 sm:$0xf]  ;;  %v8938_v21 = vld [vmem:[#allocation3 + $0x41] ss:$2 sm:$0xf]  ;;  %v9112_v51 = vunpack.c.l.b16 %v9078_v34  ;;  %9561 = vmatpush.bf16.msra.mxu2 %v12780_v59 }
 0xa9a   : > { %v8942_v63 = vmax.f32 %v8934_v38, %v8938_v21  ;;  %v16185_v14 = vunpack.c.l.b16 %v9086_v2  ;;  %v8899_v9 = vadd.f32 %v16042_v48, %v8887_v26  ;;  %v12772_v48 = vld [vmem:[%s16360_s13 + $0x20] sm:$0xff]  ;;  %v12830_v30 = vld [vmem:[%s16360_s13 + $0x1f0] sm:$0xff]  ;;  %v9641_v38 = vunpack.c.l.b16 %v9603_v44 }
 0xa9b   : > { %v16187_v22 = vunpack.c.l.b16 %v9094_v27  ;;  %v9170_v28 = vpack.c.b16 %v9112_v51, %v16179_v56  ;;  %9542 = vmatpush.bf16.msra.mxu1 %v12772_v48  ;;  %v12836_v21 = vld [vmem:[%s16360_s13 + $0x220] sm:$0xff]  ;;  %v12827_v48 = vld [vmem:[%s16360_s13 + $0x1d8] sm:$0xff] }
 0xa9c   : > { %v8950_v19 = vmul.f32 %v16096_v45, %v8942_v63  ;;  %v9171_v31 = vpack.c.b16 %v16185_v14, %v16181_v32  ;;  %vm8907_vm15 = vcmp.ge.f32.partialorder %v8899_v9, 0.0  ;;  %v8915_v55 = vmul.f32 0.01, %v8899_v9  ;;  %9584 = vmatpush.bf16.msrb.mxu3 %v12784_v54  ;;  %v12828_v26 = vld [vmem:[%s16360_s13 + $0x1e0] sm:$0xff] }
 0xa9d   : > { %v9172_v33 = vpack.c.b16 %v16187_v22, %v16183_v7  ;;  %9334 = vmatmul.bf16.vlgmr.msrb.gmra.mxu1 %v9170_v28  ;;  %9562 = vmatpush.bf16.msra.mxu2 %v12779_v61 }
 0xa9e   : > { %v8958_v42 = vadd.f32 %v16111_v35, %v8950_v19  ;;  %9353 = vmatmul.bf16.vlgmr.msrb.gmra.mxu2 %v9171_v31  ;;  %v8923_v3 = vsel %vm8907_vm15, %v8899_v9, %v8915_v55  ;;  %v12834_v55 = vld [vmem:[%s16360_s13 + $0x210] sm:$0xff] }
 0xa9f   : > { %9372 = vmatmul.bf16.vlgmr.msra.gmra.mxu3 %v9172_v33  ;;  %v8927_v52 = vmax.f32 %v8922_v62, %v8923_v3  ;;  %9543 = vmatpush.bf16.msra.mxu1 %v12771_v41  ;;  %v12835_v33 = vld [vmem:[%s16360_s13 + $0x218] sm:$0xff]  ;;  %v8993_v62 = vld [vmem:[#allocation2 + $0x2] sm:$0xff]  ;;  %v8989_v3 = vpack.c.bf16 %v8985_v8, %v8985_v8 }
 0xaa0   : > { %8975 = vst [vmem:[#allocation2 + $0x49] sm:$0xf] %v8958_v42  ;;  %v12826_v42 = vld [vmem:[%s16360_s13 + $0x1d0] sm:$0xff]  ;;  %v8997_v61 = vpack.c.bf16 %v8993_v62, %v8993_v62  ;;  %v12825_v41 = vld [vmem:[%s16360_s13 + $0x1c8] sm:$0xff] }
 0xaa1   : > { %8931 = vst [vmem:[#allocation3 + $0x60] sm:$0xff] %v8927_v52  ;;  %9563 = vmatpush.bf16.msra.mxu2 %v12778_v53  ;;  %v12833_v52 = vld [vmem:[%s16360_s13 + $0x208] sm:$0xff]  ;;  %v9014_v60 = vunpack.c.l.b16 %v8989_v3 }
 0xaa2   : > { %v9015_v53 = vunpack.c.l.b16 %v8997_v61 }
 0xaa3   : > { %9544 = vmatpush.bf16.msra.mxu1 %v12770_v20  ;;  %v12832_v20 = vld [vmem:[%s16360_s13 + $0x200] sm:$0xff] }
 0xaa5   : > { %9564 = vmatpush.bf16.msra.mxu2 %v12777_v36  ;;  %v9384_v36 = vpack.c.b16 %v16181_v32, %v9014_v60 }
 0xaa7   : > { %v9597_v43 = vld [vmem:[#allocation2 + $0x48] sm:$0xff]  ;;  %9545 = vmatpush.bf16.msra.mxu1 %v12769_v46 }
 0xaa8   : > { %v9601_v16 = vpack.c.bf16 %v9597_v43, %v9597_v43  ;;  %v8935_v23 = vld [vmem:[#allocation3 + $0x60] ss:$2 sm:$0xf]  ;;  %v8939_v49 = vld [vmem:[#allocation3 + $0x61] ss:$2 sm:$0xf]  ;;  %v9383_v43 = vpack.c.b16 %v16179_v56, %v9641_v38 }
 0xaa9   : > { %v8943_v10 = vmax.f32 %v8935_v23, %v8939_v49  ;;  %9565 = vmatpush.bf16.msra.mxu2 %v12776_v15  ;;  %v9083_v0 = vld [vmem:[#allocation2 + $0x49] sm:$0xff]  ;;  %v9607_v56 = vld [vmem:[#allocation2 + $0x79] sm:$0xff] }
 0xaaa   : > { %v9635_v13 = vunpack.c.l.b16 %v9601_v16  ;;  %v9091_v12 = vld [vmem:[#allocation2 + $0x4a] sm:$0xff]  ;;  %v9087_v18 = vpack.c.bf16 %v9083_v0, %v9083_v0  ;;  %v9385_v16 = vpack.c.b16 %v16183_v7, %v9015_v53  ;;  %v9615_v23 = vld [vmem:[#allocation2 + $0x7a] sm:$0xff]  ;;  %v9611_v32 = vpack.c.bf16 %v9607_v56, %v9607_v56 }
 0xaab   : > { %v8951_v11 = vmul.f32 %v16096_v45, %v8943_v10  ;;  %v12839_v45 = vld [vmem:[%s16360_s13 + $0x238] sm:$0xff]  ;;  %9546 = vmatpush.bf16.msra.mxu1 %v12768_v4  ;;  %v9095_v57 = vpack.c.bf16 %v9091_v12, %v9091_v12  ;;  %v9619_v49 = vpack.c.bf16 %v9615_v23, %v9615_v23 }
 0xaac   : > { %v16238_v40 = vpack.c.b16 %v9635_v13, %v9112_v51  ;;  %v9116_v27 = vunpack.c.l.b16 %v9087_v18  ;;  %v9642_v7 = vunpack.c.l.b16 %v9611_v32 }
 0xaad   : > { %v8959_v29 = vadd.f32 %v16111_v35, %v8951_v11  ;;  %9887 = vmatpush.bf16.msrb.mxu2 %v12839_v45  ;;  %v12838_v35 = vld [vmem:[%s16360_s13 + $0x230] sm:$0xff]  ;;  %v9117_v58 = vunpack.c.l.b16 %v9095_v57  ;;  %v9643_v10 = vunpack.c.l.b16 %v9619_v49 }
 0xaae   : > { %9857 = vmatmul.bf16.vlgmr.msrb.gmra.mxu0 %v16238_v40  ;;  %v9387_v46 = vpack.c.b16 %v9116_v27, %v16185_v14 }
 0xaaf   : > { %8976 = vst [vmem:[#allocation2 + $0x61] sm:$0xf] %v8959_v29  ;;  %9868 = vmatpush.bf16.msrb.mxu1 %v12831_v6  ;;  %v9388_v47 = vpack.c.b16 %v9117_v58, %v16187_v22 }
 0xab1   : > { %9888 = vmatpush.bf16.msrb.mxu2 %v12838_v35 }
 0xab3   : > { %9869 = vmatpush.bf16.msrb.mxu1 %v12830_v30 }
 0xab5   : > { %9889 = vmatpush.bf16.msrb.mxu2 %v12837_v17 }
 0xab6   : > { %v9076_v25 = vld [vmem:[#allocation2 + $0x60] sm:$0xff] }
 0xab7   : > { %v9084_v1 = vld [vmem:[#allocation2 + $0x61] sm:$0xff]  ;;  %v9080_v5 = vpack.c.bf16 %v9076_v25, %v9076_v25  ;;  %9870 = vmatpush.bf16.msrb.mxu1 %v12829_v37 }
 0xab8   : > { %v9092_v50 = vld [vmem:[#allocation2 + $0x62] sm:$0xff]  ;;  %v9088_v34 = vpack.c.bf16 %v9084_v1, %v9084_v1 }
 0xab9   : > { %v9096_v2 = vpack.c.bf16 %v9092_v50, %v9092_v50  ;;  %v9118_v63 = vunpack.c.l.b16 %v9080_v5  ;;  %9890 = vmatpush.bf16.msrb.mxu2 %v12836_v21 }
 0xaba   : > { %v9119_v51 = vunpack.c.l.b16 %v9088_v34 }
 0xabb   : > { %v9120_v9 = vunpack.c.l.b16 %v9096_v2  ;;  %v9173_v59 = vpack.c.b16 %v9118_v63, %v9635_v13  ;;  %v9696_v31 = vpack.c.b16 %v9641_v38, %v9118_v63  ;;  %9871 = vmatpush.bf16.msrb.mxu1 %v12828_v26 }
 0xabc   : > { %v9174_v19 = vpack.c.b16 %v9119_v51, %v9116_v27  ;;  %v9697_v13 = vpack.c.b16 %v9642_v7, %v9119_v51 }
 0xabd   : > { %v9175_v28 = vpack.c.b16 %v9120_v9, %v9117_v58  ;;  %9339 = vmatmul.bf16.gmra.mxu1 %v9173_v59  ;;  %9891 = vmatpush.bf16.msrb.mxu2 %v12835_v33  ;;  %v9698_v15 = vpack.c.b16 %v9643_v10, %v9120_v9 }
 0xabe   : > { %9358 = vmatmul.bf16.gmra.mxu2 %v9174_v19  ;;  %9862 = vmatmul.bf16.gmra.mxu0 %v9696_v31 }
 0xabf   : > { %9377 = vmatmul.bf16.gmra.mxu3 %v9175_v28  ;;  %9872 = vmatpush.bf16.msrb.mxu1 %v12827_v48 }
 0xac1   : > { %9892 = vmatpush.bf16.msrb.mxu2 %v12834_v55  ;;  %v12893_v55 = vld [vmem:[%s16361_s14] ss:$0 sm:$0xff] }
 0xac3   : > { %9873 = vmatpush.bf16.msrb.mxu1 %v12826_v42 }
 0xac5   : > { %9893 = vmatpush.bf16.msrb.mxu2 %v12833_v52 }
 0xac7   : > { %9874 = vmatpush.bf16.msrb.mxu1 %v12825_v41 }
 0xac9   : > { %9894 = vmatpush.bf16.msrb.mxu2 %v12832_v20 }
 0xacb   : > { %9875 = vmatpush.bf16.msrb.mxu1 %v12824_v39 }
 0xacd   : > { %9547 = vmatmul.bf16.vlgmr.msra.gmra.mxu1 %v9383_v43 }
 0xace   : > { %9566 = vmatmul.bf16.vlgmr.msra.gmra.mxu2 %v9384_v36 }
 0xacf   : > { %9585 = vmatmul.bf16.vlgmr.msrb.gmra.mxu3 %v9385_v16 }
 0xadd   : > { %9552 = vmatmul.bf16.gmra.mxu1 %v16238_v40 }
 0xade   : > { %9571 = vmatmul.bf16.gmra.mxu2 %v9387_v46 }
 0xadf   : > { %9590 = vmatmul.bf16.gmra.mxu3 %v9388_v47 }
 0xaed   : > { %9876 = vmatmul.bf16.vlgmr.msrb.gmra.mxu1 %v9387_v46 }
 0xaee   : > { %9895 = vmatmul.bf16.vlgmr.msrb.gmra.mxu2 %v9388_v47 }
 0xafd   : > { %9881 = vmatmul.bf16.gmra.mxu1 %v9697_v13 }
 0xafe   : > { %9900 = vmatmul.bf16.gmra.mxu2 %v9698_v15 }
 0xb1a   : > { %v9335_v11 = vpop.f32.mrf.mxu1 }
 0xb21   : > { %v9354_v14 = vpop.f32.mrf.mxu2 }
 0xb22   : > { %v9355_v4 = vadd.f32 %v9354_v14, %v9335_v11  ;;  %v9337_v22 = vpop.f32.mrf.mxu1  ;;  %v9373_v35 = vpop.f32.mrf.mxu3 }
 0xb24   : > { %v9374_v27 = vadd.f32 %v9373_v35, %v9355_v4 }
 0xb29   : > { %v9356_v54 = vpop.f32.mrf.mxu2 }
 0xb2a   : > { %v9375_v12 = vpop.f32.mrf.mxu3  ;;  %v9357_v38 = vadd.f32 %v9356_v54, %v9337_v22 }
 0xb2b   : > { %v9858_v50 = vpop.f32.mrf.mxu0 }
 0xb2c   : > { %v9376_v58 = vadd.f32 %v9375_v12, %v9357_v38  ;;  %v12894_v12 = vld [vmem:[%s16362_s15] ss:$0 sm:$0xff] }
 0xb33   : > { %v9860_v59 = vpop.f32.mrf.mxu0 }
 0xb3a   : > { %v9340_v40 = vpop.f32.mrf.mxu1 }
 0xb3b   : > { %v9863_v20 = vpop.f32.mrf.mxu0 }
 0xb41   : > { %v9359_v29 = vpop.f32.mrf.mxu2 }
 0xb42   : > { %v9360_v45 = vadd.f32 %v9359_v29, %v9340_v40  ;;  %v9342_v6 = vpop.f32.mrf.mxu1  ;;  %v9378_v44 = vpop.f32.mrf.mxu3 }
 0xb43   : > { %v9865_v40 = vpop.f32.mrf.mxu0 }
 0xb44   : > { %v9379_v60 = vadd.f32 %v9378_v44, %v9360_v45 }
 0xb49   : > { %v9361_v30 = vpop.f32.mrf.mxu2 }
 0xb4a   : > { %v9548_v0 = vpop.f32.mrf.mxu1  ;;  %v9380_v57 = vpop.f32.mrf.mxu3  ;;  %v9362_v39 = vadd.f32 %v9361_v30, %v9342_v6 }
 0xb4b   : > { %v9549_v21 = vadd.f32 %v9548_v0, %v9374_v27 }
 0xb4c   : > { %v9381_v49 = vadd.f32 %v9380_v57, %v9362_v39 }
 0xb51   : > { %v9567_v18 = vpop.f32.mrf.mxu2 }
 0xb52   : > { %v9550_v24 = vpop.f32.mrf.mxu1  ;;  %v9586_v34 = vpop.f32.mrf.mxu3  ;;  %v9568_v26 = vadd.f32 %v9567_v18, %v9549_v21 }
 0xb53   : > { %v9551_v31 = vadd.f32 %v9550_v24, %v9376_v58 }
 0xb54   : > { %v9587_v28 = vadd.f32 %v9586_v34, %v9568_v26 }
 0xb59   : > { %v9569_v17 = vpop.f32.mrf.mxu2 }
 0xb5a   : > { %v9553_v37 = vpop.f32.mrf.mxu1  ;;  %v9588_v33 = vpop.f32.mrf.mxu3  ;;  %v9570_v48 = vadd.f32 %v9569_v17, %v9551_v31 }
 0xb5b   : > { %v9554_v43 = vadd.f32 %v9553_v37, %v9379_v60  ;;  %v12895_v37 = vld [vmem:[%s16363_s16] ss:$0 sm:$0xff] }
 0xb5c   : > { %v9589_v3 = vadd.f32 %v9588_v33, %v9570_v48 }
 0xb61   : > { %v9572_v25 = vpop.f32.mrf.mxu2 }
 0xb62   : > { %v9555_v1 = vpop.f32.mrf.mxu1  ;;  %v9591_v46 = vpop.f32.mrf.mxu3  ;;  %v9573_v47 = vadd.f32 %v9572_v25, %v9554_v43 }
 0xb63   : > { %v9556_v14 = vadd.f32 %v9555_v1, %v9381_v49 }
 0xb64   : > { %v9592_v11 = vadd.f32 %v9591_v46, %v9573_v47 }
 0xb69   : > { %v9574_v5 = vpop.f32.mrf.mxu2 }
 0xb6a   : > { %v9877_v2 = vpop.f32.mrf.mxu1  ;;  %v9575_v22 = vadd.f32 %v9574_v5, %v9556_v14  ;;  %v9593_v45 = vpop.f32.mrf.mxu3 }
 0xb6b   : > { %v9878_v63 = vadd.f32 %v9877_v2, %v9858_v50 }
 0xb6c   : > { %v9594_v35 = vadd.f32 %v9593_v45, %v9575_v22 }
 0xb71   : > { %v9896_v51 = vpop.f32.mrf.mxu2 }
 0xb72   : > { %v9897_v9 = vadd.f32 %v9896_v51, %v9878_v63  ;;  %v9879_v19 = vpop.f32.mrf.mxu1 }
 0xb73   : > { %v9880_v42 = vadd.f32 %v9879_v19, %v9860_v59 }
 0xb74   : > { %v9906_v8 = vadd.f32 %v9897_v9, %v9587_v28 }
 0xb76   : > { %v9914_v61 = vadd.f32 %v12893_v55, %v9906_v8 }
 0xb78   : > { %v9922_v36 = vmul.f32 0.01, %v9914_v61  ;;  %vm9918_vm0 = vcmp.ge.f32.partialorder %v9914_v61, 0.0 }
 0xb79   : > { %v9898_v62 = vpop.f32.mrf.mxu2 }
 0xb7a   : > { %v9899_v52 = vadd.f32 %v9898_v62, %v9880_v42  ;;  %v9882_v41 = vpop.f32.mrf.mxu1  ;;  %v9926_v7 = vsel %vm9918_vm0, %v9914_v61, %v9922_v36 }
 0xb7b   : > { %v9883_v23 = vadd.f32 %v9882_v41, %v9863_v20 }
 0xb7c   : > { %v9907_v53 = vadd.f32 %v9899_v52, %v9589_v3 }
 0xb7e   : > { %v9915_v16 = vadd.f32 %v12893_v55, %v9907_v53 }
 0xb80   : > { %vm9919_vm2 = vcmp.ge.f32.partialorder %v9915_v16, 0.0  ;;  %v9923_v56 = vmul.f32 0.01, %v9915_v16 }
 0xb81   : > { %v9901_v32 = vpop.f32.mrf.mxu2 }
 0xb82   : > { %v9927_v10 = vsel %vm9919_vm2, %v9915_v16, %v9923_v56  ;;  %v9902_v13 = vadd.f32 %v9901_v32, %v9883_v23  ;;  %v9884_v4 = vpop.f32.mrf.mxu1 }
 0xb83   : > { %v9930_v15 = vmax.f32 %v9926_v7, %v9927_v10  ;;  %v9885_v29 = vadd.f32 %v9884_v4, %v9865_v40 }
 0xb84   : > { %v9908_v54 = vadd.f32 %v9902_v13, %v9592_v11 }
 0xb85   : > { %9932 = vst [vmem:[#allocation3] sm:$0xff] %v9930_v15 }
 0xb86   : > { %v9916_v30 = vadd.f32 %v12893_v55, %v9908_v54 }
 0xb88   : > { %v9924_v57 = vmul.f32 0.01, %v9916_v30  ;;  %vm9920_vm3 = vcmp.ge.f32.partialorder %v9916_v30, 0.0 }
 0xb89   : > { %v9903_v6 = vpop.f32.mrf.mxu2 }
 0xb8a   : > { %v9904_v0 = vadd.f32 %v9903_v6, %v9885_v29  ;;  %v9928_v34 = vsel %vm9920_vm3, %v9916_v30, %v9924_v57 }
 0xb8c   : > { %v9909_v18 = vadd.f32 %v9904_v0, %v9594_v35  ;;  %v9934_v24 = vld [vmem:[#allocation3] ss:$2 sm:$0x3]  ;;  %v9936_v44 = vld [vmem:[#allocation3 + $0x1] ss:$2 sm:$0x3] }
 0xb8d   : > { %v9938_v17 = vmax.f32 %v9934_v24, %v9936_v44 }
 0xb8e   : > { %v9917_v25 = vadd.f32 %v12893_v55, %v9909_v18 }
 0xb8f   : > { %v9944_v1 = vmul.f32 %v12894_v12, %v9938_v17 }
 0xb90   : > { %vm9921_vm4 = vcmp.ge.f32.partialorder %v9917_v25, 0.0  ;;  %v9925_v50 = vmul.f32 0.01, %v9917_v25 }
 0xb91   : > { %v9950_v5 = vadd.f32 %v12895_v37, %v9944_v1 }
 0xb92   : > { %v9929_v2 = vsel %vm9921_vm4, %v9917_v25, %v9925_v50 }
 0xb93   : > { %v9931_v27 = vmax.f32 %v9928_v34, %v9929_v2  ;;  %9952 = vst [vmem:[%s541_s20] sm:$0x3] %v9950_v5 }
 0xb95   : > { %9933 = vst [vmem:[#allocation3 + $0x20] sm:$0xff] %v9931_v27 }
 0xb9c   : > { %v9935_v38 = vld [vmem:[#allocation3 + $0x20] ss:$2 sm:$0x3]  ;;  %v9937_v21 = vld [vmem:[#allocation3 + $0x21] ss:$2 sm:$0x3] }
 0xb9d   : > { %v9939_v26 = vmax.f32 %v9935_v38, %v9937_v21 }
 0xb9f   : > { %v9945_v63 = vmul.f32 %v12894_v12, %v9939_v26 }
 0xba1   : > { %v9951_v51 = vadd.f32 %v12895_v37, %v9945_v63 }
 0xba3   : > { %9953 = vst [vmem:[%s541_s20 + $0x2] sm:$0x3] %v9951_v51 }
 0xba4   : > { %12944 = shalt.err (!%p12941_p3)
}
 0xba5   : > { %s12982_s19 = smov 32   ;;  %s12983_s20 = smov 2  }
 0xba6   : > { %12842 = dma.vmem_to_hbm [thread:$0]  (%p13112_p5), %s9968_s18, 64, %s9970_s24, %s9955_s26, %s12982_s19, %s12982_s19, %s12983_s20  }
 0xba7 PF: > { %s16652_s2 = sld [smem:[#allocation9_spill]] }
 0xba8   : > { %s16653_s3 = sld [smem:[#allocation7_spill]] }
 0xbad   : > { %p12848_p4 = scmp.ge.s32.totalorder %s16652_s2, 2 }
 0xbae   : > { %s9984_s0 = sand.u32 1, %s16653_s3  }
 0xbaf   : > { %p12845_p7 = pnand %p12848_p4, %p13116_p6  ;;  %s9985_s21 = scalar_lea.sflag [#allocation5], %s9984_s0 }
 0xbb1   : > { %p12846_p8 = pneg %p12845_p7 }
 0xbb3   : > { %12962 = dma.done.wait (%p12846_p8), %s9985_s21, 64  }
 0xbb4   : > { %12964 = vsyncadd (%p12846_p8), %s9985_s21, 4294967232  ;;  %s16655_s27 = sld [smem:[#allocation10_spill]]  ;;  %s16658_s24 = smov %s12971_s25 }
 0xbb5   : > { %s16656_s28 = sld [smem:[#allocation8_spill]] }
 0xbb6   : > { %s16657_s26 = sld [smem:[#allocation11_spill]] }
 0xbba   : > { %p27_p9 = scmp.ge.s32.totalorder %s16655_s27, 4  }
 0xbbb   : > { %s16659_s25 = smov %s16656_s28 }
 0xbbc   :  { %29 = sbr.rel (!%p27_p9) target bundleno = 9 (0x9), region = 208 }
 0xbc1   :  { %9991 = vsyncpa [#allocation5], 1 }
 0xbc2   :  { %9993 = vsyncpa [#allocation5 + $0x1], 1 }

</bundles_post_ra>
